<compile_context>
chip_gen: v6e
topology: v6e:2x2x1
jax: 0.10.0
libtpu: 0.0.40
codegen_flags: <defaults>
</compile_context>

<pallas_src>
import jax
import jax.numpy as jnp
from jax import lax
from jax.experimental import pallas as pl
from jax.experimental.pallas import tpu as pltpu

EPS = 2e-5
KH = KW = 3
LANE = 128


def _iblock_kernel(x_ref, s1_ref, b1_ref, w1_ref, s2_ref, b2_ref, a_ref,
                   w2_ref, b3_ref, o_ref, pbuf):
    """One batch item, whole image.

    x_ref : (H, W, C)        f32   input (true channel count)
    s1/b1 : (1, C)           f32   bn1 scale / shift
    w1    : (9, Cpad, Ppad)  bf16  conv1 taps (HWIO flattened, zero padded)
    s2/b2 : (1, Ppad)        f32   bn2 scale / shift (zero padded)
    alpha : (1, Ppad)        f32   PReLU slope (zero padded)
    w2    : (9, Ppad, Ppad)  bf16  conv2 taps, bn3 scale folded into out cols
    b3    : (1, Ppad)        f32   bn3 shift (zero padded)
    o_ref : (H, W, P)              output (true channel count)
    pbuf  : ((H+3)*(W+2), Cpad) bf16  flattened zero-halo padded image scratch
    """
    H, W, C = x_ref.shape
    P = o_ref.shape[-1]
    Cpad = pbuf.shape[-1]
    Wp = W + 2
    M = H * Wp                      # matmul rows: one per padded-width pixel
    ROWS = pbuf.shape[0]            # (H + 3) * Wp

    # Zero the whole padded-image scratch: halo rows/columns and padded lanes.
    # The interior is overwritten below; this costs ROWS*Cpad*2 bytes of vst
    # (tiny next to the conv traffic) and guarantees every tap-slice read is
    # finite (no NaN garbage times zero-padded weights).
    pbuf[...] = jnp.zeros((ROWS, Cpad), jnp.bfloat16)

    # ---- bn1 (explicit scale + shift) and conv1-input interior rows ----
    s1 = s1_ref[0]
    b1 = b1_ref[0]
    for y in range(H):
        r = (x_ref[y].astype(jnp.float32) * s1 + b1).astype(jnp.bfloat16)
        # interior pixel (y, x) -> flat padded position (y+1)*Wp + (x+1);
        # padded lanes [C, Cpad) stay zero from the memset above.
        pbuf[(y + 1) * Wp + 1:(y + 1) * Wp + 1 + W, :C] = r

    def conv3x3(w_ref):
        # 9 back-to-back MXU dots over contiguous row-slices of the flattened
        # padded image, chained into one f32 accumulator value.  Result row m
        # is output pixel (m // Wp, m % Wp); columns >= W are row-wrap junk.
        acc = None
        for dy in range(KH):
            for dx in range(KW):
                s = dy * Wp + dx
                d = jnp.dot(pbuf[s:s + M, :], w_ref[dy * KW + dx],
                            preferred_element_type=jnp.float32)
                acc = d if acc is None else acc + d
        return acc                                           # (M, Ppad) f32

    # ---- conv1 -> bn2 -> PReLU ----
    t = conv3x3(w1_ref)
    t = t * s2_ref[0] + b2_ref[0]
    t = jnp.where(t >= 0.0, t, a_ref[0] * t)

    # Mask the wrapped columns (x in {W, W+1}) so the single bulk store below
    # also writes zeros into conv2's left/right halo columns.
    col = lax.broadcasted_iota(jnp.int32, (M, 1), 0) % Wp
    t = jnp.where(col < W, t, 0.0)

    # ---- conv2 input: ONE bulk store.  Offset Wp+1 maps conv1-output pixel
    #      (y, x) to padded position (y+1, x+1); masked columns land exactly
    #      on the halo columns with value 0. ----
    pbuf[Wp + 1:Wp + 1 + M, :] = t.astype(jnp.bfloat16)

    # ---- conv2 -> bn3 (scale already folded into w2) -> residual add ----
    t = conv3x3(w2_ref) + b3_ref[0]
    for y in range(H):
        row = t[y * Wp:y * Wp + W, :P] + x_ref[y].astype(jnp.float32)
        o_ref[y] = row.astype(o_ref.dtype)


# ---------------- BN folding / padding helpers ----------------
def fold_bn(gamma, beta, mean, var, eps=EPS):
    scale = gamma / jnp.sqrt(var + eps)
    shift = beta - mean * scale
    return scale, shift


def _pad_vec(v, n):
    return jnp.pad(v, (0, n - v.shape[0])).reshape(1, n)


def _prepare_params(params, Cpad, Ppad):
    """Fold bn3 scale into w2, pad weights/vectors lane-dense (weights bf16)."""
    s1, b1 = fold_bn(*params["bn1"])
    s2, b2 = fold_bn(*params["bn2"])
    s3, b3 = fold_bn(*params["bn3"])
    C = s1.shape[0]
    P = s2.shape[0]

    w1 = jnp.pad(params["w1"], ((0, 0), (0, 0), (0, Cpad - C), (0, Ppad - P)))
    w2 = params["w2"] * s3[None, None, None, :]       # exact fold of bn3 scale
    w2 = jnp.pad(w2, ((0, 0), (0, 0), (0, Ppad - P), (0, Ppad - P)))

    return dict(
        s1=s1.reshape(1, C),
        b1=b1.reshape(1, C),
        w1=w1.reshape(KH * KW, Cpad, Ppad).astype(jnp.bfloat16),
        s2=_pad_vec(s2, Ppad),
        b2=_pad_vec(b2, Ppad),
        alpha=_pad_vec(params["alpha"], Ppad),
        w2=w2.reshape(KH * KW, Ppad, Ppad).astype(jnp.bfloat16),
        b3=_pad_vec(b3, Ppad),
    )


# ---------------- NHWC core wrapper (no extra HBM passes) ----------------
def ibasic_block_pallas_nhwc(x, params):
    """x: (N, H, W, C) float32, NHWC.  Returns (N, H, W, C)."""
    N, H, W, C = x.shape
    P = params["w1"].shape[-1]
    assert P == C, "residual add requires planes == inplanes (downsample=None)"

    Cpad = pl.cdiv(C, LANE) * LANE
    Ppad = Cpad
    kp = _prepare_params(params, Cpad, Ppad)

    Wp = W + 2
    M = H * Wp
    rows = (H + 3) * Wp

    # VMEM working set: double-buffered in/out blocks, weights (x2 buffers),
    # the padded-image scratch and the f32 matmul/elementwise temporaries.
    working = (2 * H * W * (C + P) * 4
               + 2 * KH * KW * (Cpad * Ppad + Ppad * Ppad) * 2
               + rows * Cpad * 2
               + 3 * M * Ppad * 4
               + (1 << 20))
    try:
        cap = int(getattr(pltpu.get_tpu_info(), "vmem_capacity_bytes",
                          64 * 1024 * 1024))
    except Exception:
        cap = 64 * 1024 * 1024
    vmem_limit = int(min(int(cap * 0.85),
                         max(16 * 1024 * 1024, int(working * 1.2))))

    flops = 4 * N * KH * KW * M * Cpad * Ppad         # two convs (MACs * 2)
    bytes_accessed = int(x.size * 4 + N * H * W * P * 4
                         + kp["w1"].size * 2 + kp["w2"].size * 2)

    img_map = lambda n: (n, 0, 0, 0)
    w_map = lambda n: (0, 0, 0)
    vec_map = lambda n: (0, 0)

    return pl.pallas_call(
        _iblock_kernel,
        out_shape=jax.ShapeDtypeStruct((N, H, W, P), x.dtype),
        grid_spec=pltpu.PrefetchScalarGridSpec(
            num_scalar_prefetch=0,
            grid=(N,),
            in_specs=[
                pl.BlockSpec((None, H, W, C), img_map),            # x
                pl.BlockSpec((1, C), vec_map),                     # s1
                pl.BlockSpec((1, C), vec_map),                     # b1
                pl.BlockSpec((KH * KW, Cpad, Ppad), w_map),        # w1 (bf16)
                pl.BlockSpec((1, Ppad), vec_map),                  # s2
                pl.BlockSpec((1, Ppad), vec_map),                  # b2
                pl.BlockSpec((1, Ppad), vec_map),                  # alpha
                pl.BlockSpec((KH * KW, Ppad, Ppad), w_map),        # w2 (bf16)
                pl.BlockSpec((1, Ppad), vec_map),                  # b3
            ],
            out_specs=pl.BlockSpec((None, H, W, P), img_map),
            scratch_shapes=[pltpu.VMEM((rows, Cpad), jnp.bfloat16)],
        ),
        compiler_params=pltpu.CompilerParams(
            dimension_semantics=("parallel",),
            vmem_limit_bytes=vmem_limit,
        ),
        cost_estimate=pl.CostEstimate(flops=flops, transcendentals=0,
                                      bytes_accessed=bytes_accessed),
    )(x, kp["s1"], kp["b1"], kp["w1"], kp["s2"], kp["b2"], kp["alpha"],
      kp["w2"], kp["b3"])


def ibasic_block_pallas(x_nchw, params):
    """NCHW compatibility adapter (matches the PyTorch module's layout).

    The Pallas kernel itself is NHWC end-to-end with true channel counts at
    the HBM boundary; keep activations NHWC in a real model to skip these two
    transposes entirely.
    """
    x = jnp.transpose(x_nchw, (0, 2, 3, 1))
    out = ibasic_block_pallas_nhwc(x, params)
    return jnp.transpose(out, (0, 3, 1, 2))


# ---------------- parameter construction (deterministic, synthetic) ---------
def make_params(inplanes, planes, key):
    k1, k2 = jax.random.split(key)
    c = jnp.arange(inplanes, dtype=jnp.float32)
    p = jnp.arange(planes, dtype=jnp.float32)

    # (gamma, beta, running_mean, running_var) per BN — eval-mode statistics.
    bn1 = (1.0 + 0.01 * c, 0.02 * c, 0.05 * c, 1.0 + 0.03 * c)
    bn2 = (1.0 - 0.01 * p, -0.02 * p, 0.04 * p, 1.0 + 0.02 * p)
    bn3 = (1.0 + 0.02 * p, 0.01 * p, -0.03 * p, 1.0 + 0.01 * p)

    # conv weights in HWIO layout (kh, kw, in, out), no bias (per conv3x3).
    w1 = 0.1 * jax.random.normal(k1, (KH, KW, inplanes, planes), jnp.float32)
    w2 = 0.1 * jax.random.normal(k2, (KH, KW, planes, planes), jnp.float32)

    alpha = 0.25 + 0.01 * p  # PReLU per-channel slope

    return dict(bn1=bn1, bn2=bn2, bn3=bn3, w1=w1, w2=w2, alpha=alpha)


# ---------------- pure-JAX f32 reference for validation ----------------
def ibasic_block_ref_nhwc(x, params):
    dn = ("NHWC", "HWIO", "NHWC")
    s1, b1 = fold_bn(*params["bn1"])
    s2, b2 = fold_bn(*params["bn2"])
    s3, b3 = fold_bn(*params["bn3"])
    out = x * s1 + b1
    out = lax.conv_general_dilated(out, params["w1"], (1, 1), "SAME",
                                   dimension_numbers=dn)
    out = out * s2 + b2
    out = jnp.where(out >= 0, out, params["alpha"] * out)
    out = lax.conv_general_dilated(out, params["w2"], (1, 1), "SAME",
                                   dimension_numbers=dn)
    out = out * s3 + b3
    return out + x


def ibasic_block_ref(x_nchw, params):
    x = jnp.transpose(x_nchw, (0, 2, 3, 1))
    out = ibasic_block_ref_nhwc(x, params)
    return jnp.transpose(out, (0, 3, 1, 2))


if __name__ == "__main__":
    key = jax.random.PRNGKey(0)
    # Two cases: the small square case, plus a non-square case with W+2 not a
    # multiple of 8 to exercise the tap / halo indexing more thoroughly.
    for (N, C, H, W) in [(2, 8, 16, 16), (1, 16, 20, 24)]:
        key, kx, kp = jax.random.split(key, 3)
        x = jax.random.normal(kx, (N, C, H, W), jnp.float32)
        params = make_params(C, C, kp)

        out = jax.block_until_ready(ibasic_block_pallas(x, params))
        ref = jax.block_until_ready(ibasic_block_ref(x, params))

        assert out.shape == (N, C, H, W)
        err = float(jnp.max(jnp.abs(out - ref)))
        # Kernel uses bf16 MXU inputs (f32 accumulation); reference is f32.
        assert jnp.allclose(out, ref, atol=5e-2, rtol=5e-2), (
            f"mismatch vs reference at {(N, C, H, W)}: max abs err {err}")

    print("KERNEL_OK")
</pallas_src>

<mosaic_0001>
module attributes {stable_mosaic.version = 11 : i64} {
  func.func @_iblock_kernel(%arg0: i32, %arg1: memref<1x16x16x8xf32, #tpu.memory_space<vmem>>, %arg2: memref<1x8xf32, #tpu.memory_space<vmem>>, %arg3: memref<1x8xf32, #tpu.memory_space<vmem>>, %arg4: memref<9x128x128xbf16, #tpu.memory_space<vmem>>, %arg5: memref<1x128xf32, #tpu.memory_space<vmem>>, %arg6: memref<1x128xf32, #tpu.memory_space<vmem>>, %arg7: memref<1x128xf32, #tpu.memory_space<vmem>>, %arg8: memref<9x128x128xbf16, #tpu.memory_space<vmem>>, %arg9: memref<1x128xf32, #tpu.memory_space<vmem>>, %arg10: memref<1x16x16x8xf32, #tpu.memory_space<vmem>>, %arg11: memref<342x128xbf16, #tpu.memory_space<vmem>>) attributes {dimension_semantics = [#tpu.dimension_semantics<parallel>], iteration_bounds = array<i64: 2>, scalar_prefetch = 0 : i64, scratch_operands = 1 : i64, tpu.core_type = #tpu.core_type<tc>, window_params = [{transform_indices = @transform_0, window_bounds = array<i64: 1, 16, 16, 8>}, {pipeline_mode = #tpu.pipeline_mode<synchronous>, transform_indices = @transform_1, window_bounds = array<i64: 1, 8>}, {pipeline_mode = #tpu.pipeline_mode<synchronous>, transform_indices = @transform_2, window_bounds = array<i64: 1, 8>}, {pipeline_mode = #tpu.pipeline_mode<synchronous>, transform_indices = @transform_3, window_bounds = array<i64: 9, 128, 128>}, {pipeline_mode = #tpu.pipeline_mode<synchronous>, transform_indices = @transform_4, window_bounds = array<i64: 1, 128>}, {pipeline_mode = #tpu.pipeline_mode<synchronous>, transform_indices = @transform_5, window_bounds = array<i64: 1, 128>}, {pipeline_mode = #tpu.pipeline_mode<synchronous>, transform_indices = @transform_6, window_bounds = array<i64: 1, 128>}, {pipeline_mode = #tpu.pipeline_mode<synchronous>, transform_indices = @transform_7, window_bounds = array<i64: 9, 128, 128>}, {pipeline_mode = #tpu.pipeline_mode<synchronous>, transform_indices = @transform_8, window_bounds = array<i64: 1, 128>}, {transform_indices = @transform_9, window_bounds = array<i64: 1, 16, 16, 8>}]} {
    %cst = arith.constant 0.000000e+00 : bf16
    %0 = vector.broadcast %cst : bf16 to vector<342x128xbf16>
    %c0 = arith.constant 0 : index
    %c0_0 = arith.constant 0 : index
    %1 = vector.load %arg11[%c0, %c0_0] : memref<342x128xbf16, #tpu.memory_space<vmem>>, vector<342x128xbf16>
    tpu.vector_store %arg11[%c0, %c0_0], %0 {strides = array<i32>} : memref<342x128xbf16, #tpu.memory_space<vmem>>, vector<342x128xbf16>,
    %c0_1 = arith.constant 0 : index
    %c0_2 = arith.constant 0 : index
    %2 = vector.load %arg2[%c0_1, %c0_2] : memref<1x8xf32, #tpu.memory_space<vmem>>, vector<1x8xf32>
    %3 = vector.shape_cast %2 : vector<1x8xf32> to vector<8xf32>
    %c0_3 = arith.constant 0 : index
    %c0_4 = arith.constant 0 : index
    %4 = vector.load %arg3[%c0_3, %c0_4] : memref<1x8xf32, #tpu.memory_space<vmem>>, vector<1x8xf32>
    %5 = vector.shape_cast %4 : vector<1x8xf32> to vector<8xf32>
    %c0_5 = arith.constant 0 : index
    %c0_6 = arith.constant 0 : index
    %c0_7 = arith.constant 0 : index
    %c0_8 = arith.constant 0 : index
    %6 = vector.load %arg1[%c0_5, %c0_6, %c0_7, %c0_8] : memref<1x16x16x8xf32, #tpu.memory_space<vmem>>, vector<1x1x16x8xf32>
    %7 = vector.shape_cast %6 : vector<1x1x16x8xf32> to vector<16x8xf32>
    %8 = vector.shape_cast %3 : vector<8xf32> to vector<1x8xf32>
    %9 = vector.broadcast %8 : vector<1x8xf32> to vector<16x8xf32>
    %10 = arith.mulf %7, %9 : vector<16x8xf32>
    %11 = vector.shape_cast %5 : vector<8xf32> to vector<1x8xf32>
    %12 = vector.broadcast %11 : vector<1x8xf32> to vector<16x8xf32>
    %13 = arith.addf %10, %12 : vector<16x8xf32>
    %14 = arith.truncf %13 : vector<16x8xf32> to vector<16x8xbf16>
    %c19 = arith.constant 19 : index
    %c0_9 = arith.constant 0 : index
    %15 = vector.load %arg11[%c19, %c0_9] : memref<342x128xbf16, #tpu.memory_space<vmem>>, vector<16x8xbf16>
    tpu.vector_store %arg11[%c19, %c0_9], %14 {strides = array<i32>} : memref<342x128xbf16, #tpu.memory_space<vmem>>, vector<16x8xbf16>,
    %c0_10 = arith.constant 0 : index
    %c1 = arith.constant 1 : index
    %c0_11 = arith.constant 0 : index
    %c0_12 = arith.constant 0 : index
    %16 = vector.load %arg1[%c0_10, %c1, %c0_11, %c0_12] : memref<1x16x16x8xf32, #tpu.memory_space<vmem>>, vector<1x1x16x8xf32>
    %17 = vector.shape_cast %16 : vector<1x1x16x8xf32> to vector<16x8xf32>
    %18 = vector.shape_cast %3 : vector<8xf32> to vector<1x8xf32>
    %19 = vector.broadcast %18 : vector<1x8xf32> to vector<16x8xf32>
    %20 = arith.mulf %17, %19 : vector<16x8xf32>
    %21 = vector.shape_cast %5 : vector<8xf32> to vector<1x8xf32>
    %22 = vector.broadcast %21 : vector<1x8xf32> to vector<16x8xf32>
    %23 = arith.addf %20, %22 : vector<16x8xf32>
    %24 = arith.truncf %23 : vector<16x8xf32> to vector<16x8xbf16>
    %c37 = arith.constant 37 : index
    %c0_13 = arith.constant 0 : index
    %25 = vector.load %arg11[%c37, %c0_13] : memref<342x128xbf16, #tpu.memory_space<vmem>>, vector<16x8xbf16>
    tpu.vector_store %arg11[%c37, %c0_13], %24 {strides = array<i32>} : memref<342x128xbf16, #tpu.memory_space<vmem>>, vector<16x8xbf16>,
    %c0_14 = arith.constant 0 : index
    %c2 = arith.constant 2 : index
    %c0_15 = arith.constant 0 : index
    %c0_16 = arith.constant 0 : index
    %26 = vector.load %arg1[%c0_14, %c2, %c0_15, %c0_16] : memref<1x16x16x8xf32, #tpu.memory_space<vmem>>, vector<1x1x16x8xf32>
    %27 = vector.shape_cast %26 : vector<1x1x16x8xf32> to vector<16x8xf32>
    %28 = vector.shape_cast %3 : vector<8xf32> to vector<1x8xf32>
    %29 = vector.broadcast %28 : vector<1x8xf32> to vector<16x8xf32>
    %30 = arith.mulf %27, %29 : vector<16x8xf32>
    %31 = vector.shape_cast %5 : vector<8xf32> to vector<1x8xf32>
    %32 = vector.broadcast %31 : vector<1x8xf32> to vector<16x8xf32>
    %33 = arith.addf %30, %32 : vector<16x8xf32>
    %34 = arith.truncf %33 : vector<16x8xf32> to vector<16x8xbf16>
    %c55 = arith.constant 55 : index
    %c0_17 = arith.constant 0 : index
    %35 = vector.load %arg11[%c55, %c0_17] : memref<342x128xbf16, #tpu.memory_space<vmem>>, vector<16x8xbf16>
    tpu.vector_store %arg11[%c55, %c0_17], %34 {strides = array<i32>} : memref<342x128xbf16, #tpu.memory_space<vmem>>, vector<16x8xbf16>,
    %c0_18 = arith.constant 0 : index
    %c3 = arith.constant 3 : index
    %c0_19 = arith.constant 0 : index
    %c0_20 = arith.constant 0 : index
    %36 = vector.load %arg1[%c0_18, %c3, %c0_19, %c0_20] : memref<1x16x16x8xf32, #tpu.memory_space<vmem>>, vector<1x1x16x8xf32>
    %37 = vector.shape_cast %36 : vector<1x1x16x8xf32> to vector<16x8xf32>
    %38 = vector.shape_cast %3 : vector<8xf32> to vector<1x8xf32>
    %39 = vector.broadcast %38 : vector<1x8xf32> to vector<16x8xf32>
    %40 = arith.mulf %37, %39 : vector<16x8xf32>
    %41 = vector.shape_cast %5 : vector<8xf32> to vector<1x8xf32>
    %42 = vector.broadcast %41 : vector<1x8xf32> to vector<16x8xf32>
    %43 = arith.addf %40, %42 : vector<16x8xf32>
    %44 = arith.truncf %43 : vector<16x8xf32> to vector<16x8xbf16>
    %c73 = arith.constant 73 : index
    %c0_21 = arith.constant 0 : index
    %45 = vector.load %arg11[%c73, %c0_21] : memref<342x128xbf16, #tpu.memory_space<vmem>>, vector<16x8xbf16>
    tpu.vector_store %arg11[%c73, %c0_21], %44 {strides = array<i32>} : memref<342x128xbf16, #tpu.memory_space<vmem>>, vector<16x8xbf16>,
    %c0_22 = arith.constant 0 : index
    %c4 = arith.constant 4 : index
    %c0_23 = arith.constant 0 : index
    %c0_24 = arith.constant 0 : index
    %46 = vector.load %arg1[%c0_22, %c4, %c0_23, %c0_24] : memref<1x16x16x8xf32, #tpu.memory_space<vmem>>, vector<1x1x16x8xf32>
    %47 = vector.shape_cast %46 : vector<1x1x16x8xf32> to vector<16x8xf32>
    %48 = vector.shape_cast %3 : vector<8xf32> to vector<1x8xf32>
    %49 = vector.broadcast %48 : vector<1x8xf32> to vector<16x8xf32>
    %50 = arith.mulf %47, %49 : vector<16x8xf32>
    %51 = vector.shape_cast %5 : vector<8xf32> to vector<1x8xf32>
    %52 = vector.broadcast %51 : vector<1x8xf32> to vector<16x8xf32>
    %53 = arith.addf %50, %52 : vector<16x8xf32>
    %54 = arith.truncf %53 : vector<16x8xf32> to vector<16x8xbf16>
    %c91 = arith.constant 91 : index
    %c0_25 = arith.constant 0 : index
    %55 = vector.load %arg11[%c91, %c0_25] : memref<342x128xbf16, #tpu.memory_space<vmem>>, vector<16x8xbf16>
    tpu.vector_store %arg11[%c91, %c0_25], %54 {strides = array<i32>} : memref<342x128xbf16, #tpu.memory_space<vmem>>, vector<16x8xbf16>,
    %c0_26 = arith.constant 0 : index
    %c5 = arith.constant 5 : index
    %c0_27 = arith.constant 0 : index
    %c0_28 = arith.constant 0 : index
    %56 = vector.load %arg1[%c0_26, %c5, %c0_27, %c0_28] : memref<1x16x16x8xf32, #tpu.memory_space<vmem>>, vector<1x1x16x8xf32>
    %57 = vector.shape_cast %56 : vector<1x1x16x8xf32> to vector<16x8xf32>
    %58 = vector.shape_cast %3 : vector<8xf32> to vector<1x8xf32>
    %59 = vector.broadcast %58 : vector<1x8xf32> to vector<16x8xf32>
    %60 = arith.mulf %57, %59 : vector<16x8xf32>
    %61 = vector.shape_cast %5 : vector<8xf32> to vector<1x8xf32>
    %62 = vector.broadcast %61 : vector<1x8xf32> to vector<16x8xf32>
    %63 = arith.addf %60, %62 : vector<16x8xf32>
    %64 = arith.truncf %63 : vector<16x8xf32> to vector<16x8xbf16>
    %c109 = arith.constant 109 : index
    %c0_29 = arith.constant 0 : index
    %65 = vector.load %arg11[%c109, %c0_29] : memref<342x128xbf16, #tpu.memory_space<vmem>>, vector<16x8xbf16>
    tpu.vector_store %arg11[%c109, %c0_29], %64 {strides = array<i32>} : memref<342x128xbf16, #tpu.memory_space<vmem>>, vector<16x8xbf16>,
    %c0_30 = arith.constant 0 : index
    %c6 = arith.constant 6 : index
    %c0_31 = arith.constant 0 : index
    %c0_32 = arith.constant 0 : index
    %66 = vector.load %arg1[%c0_30, %c6, %c0_31, %c0_32] : memref<1x16x16x8xf32, #tpu.memory_space<vmem>>, vector<1x1x16x8xf32>
    %67 = vector.shape_cast %66 : vector<1x1x16x8xf32> to vector<16x8xf32>
    %68 = vector.shape_cast %3 : vector<8xf32> to vector<1x8xf32>
    %69 = vector.broadcast %68 : vector<1x8xf32> to vector<16x8xf32>
    %70 = arith.mulf %67, %69 : vector<16x8xf32>
    %71 = vector.shape_cast %5 : vector<8xf32> to vector<1x8xf32>
    %72 = vector.broadcast %71 : vector<1x8xf32> to vector<16x8xf32>
    %73 = arith.addf %70, %72 : vector<16x8xf32>
    %74 = arith.truncf %73 : vector<16x8xf32> to vector<16x8xbf16>
    %c127 = arith.constant 127 : index
    %c0_33 = arith.constant 0 : index
    %75 = vector.load %arg11[%c127, %c0_33] : memref<342x128xbf16, #tpu.memory_space<vmem>>, vector<16x8xbf16>
    tpu.vector_store %arg11[%c127, %c0_33], %74 {strides = array<i32>} : memref<342x128xbf16, #tpu.memory_space<vmem>>, vector<16x8xbf16>,
    %c0_34 = arith.constant 0 : index
    %c7 = arith.constant 7 : index
    %c0_35 = arith.constant 0 : index
    %c0_36 = arith.constant 0 : index
    %76 = vector.load %arg1[%c0_34, %c7, %c0_35, %c0_36] : memref<1x16x16x8xf32, #tpu.memory_space<vmem>>, vector<1x1x16x8xf32>
    %77 = vector.shape_cast %76 : vector<1x1x16x8xf32> to vector<16x8xf32>
    %78 = vector.shape_cast %3 : vector<8xf32> to vector<1x8xf32>
    %79 = vector.broadcast %78 : vector<1x8xf32> to vector<16x8xf32>
    %80 = arith.mulf %77, %79 : vector<16x8xf32>
    %81 = vector.shape_cast %5 : vector<8xf32> to vector<1x8xf32>
    %82 = vector.broadcast %81 : vector<1x8xf32> to vector<16x8xf32>
    %83 = arith.addf %80, %82 : vector<16x8xf32>
    %84 = arith.truncf %83 : vector<16x8xf32> to vector<16x8xbf16>
    %c145 = arith.constant 145 : index
    %c0_37 = arith.constant 0 : index
    %85 = vector.load %arg11[%c145, %c0_37] : memref<342x128xbf16, #tpu.memory_space<vmem>>, vector<16x8xbf16>
    tpu.vector_store %arg11[%c145, %c0_37], %84 {strides = array<i32>} : memref<342x128xbf16, #tpu.memory_space<vmem>>, vector<16x8xbf16>,
    %c0_38 = arith.constant 0 : index
    %c8 = arith.constant 8 : index
    %c0_39 = arith.constant 0 : index
    %c0_40 = arith.constant 0 : index
    %86 = vector.load %arg1[%c0_38, %c8, %c0_39, %c0_40] : memref<1x16x16x8xf32, #tpu.memory_space<vmem>>, vector<1x1x16x8xf32>
    %87 = vector.shape_cast %86 : vector<1x1x16x8xf32> to vector<16x8xf32>
    %88 = vector.shape_cast %3 : vector<8xf32> to vector<1x8xf32>
    %89 = vector.broadcast %88 : vector<1x8xf32> to vector<16x8xf32>
    %90 = arith.mulf %87, %89 : vector<16x8xf32>
    %91 = vector.shape_cast %5 : vector<8xf32> to vector<1x8xf32>
    %92 = vector.broadcast %91 : vector<1x8xf32> to vector<16x8xf32>
    %93 = arith.addf %90, %92 : vector<16x8xf32>
    %94 = arith.truncf %93 : vector<16x8xf32> to vector<16x8xbf16>
    %c163 = arith.constant 163 : index
    %c0_41 = arith.constant 0 : index
    %95 = vector.load %arg11[%c163, %c0_41] : memref<342x128xbf16, #tpu.memory_space<vmem>>, vector<16x8xbf16>
    tpu.vector_store %arg11[%c163, %c0_41], %94 {strides = array<i32>} : memref<342x128xbf16, #tpu.memory_space<vmem>>, vector<16x8xbf16>,
    %c0_42 = arith.constant 0 : index
    %c9 = arith.constant 9 : index
    %c0_43 = arith.constant 0 : index
    %c0_44 = arith.constant 0 : index
    %96 = vector.load %arg1[%c0_42, %c9, %c0_43, %c0_44] : memref<1x16x16x8xf32, #tpu.memory_space<vmem>>, vector<1x1x16x8xf32>
    %97 = vector.shape_cast %96 : vector<1x1x16x8xf32> to vector<16x8xf32>
    %98 = vector.shape_cast %3 : vector<8xf32> to vector<1x8xf32>
    %99 = vector.broadcast %98 : vector<1x8xf32> to vector<16x8xf32>
    %100 = arith.mulf %97, %99 : vector<16x8xf32>
    %101 = vector.shape_cast %5 : vector<8xf32> to vector<1x8xf32>
    %102 = vector.broadcast %101 : vector<1x8xf32> to vector<16x8xf32>
    %103 = arith.addf %100, %102 : vector<16x8xf32>
    %104 = arith.truncf %103 : vector<16x8xf32> to vector<16x8xbf16>
    %c181 = arith.constant 181 : index
    %c0_45 = arith.constant 0 : index
    %105 = vector.load %arg11[%c181, %c0_45] : memref<342x128xbf16, #tpu.memory_space<vmem>>, vector<16x8xbf16>
    tpu.vector_store %arg11[%c181, %c0_45], %104 {strides = array<i32>} : memref<342x128xbf16, #tpu.memory_space<vmem>>, vector<16x8xbf16>,
    %c0_46 = arith.constant 0 : index
    %c10 = arith.constant 10 : index
    %c0_47 = arith.constant 0 : index
    %c0_48 = arith.constant 0 : index
    %106 = vector.load %arg1[%c0_46, %c10, %c0_47, %c0_48] : memref<1x16x16x8xf32, #tpu.memory_space<vmem>>, vector<1x1x16x8xf32>
    %107 = vector.shape_cast %106 : vector<1x1x16x8xf32> to vector<16x8xf32>
    %108 = vector.shape_cast %3 : vector<8xf32> to vector<1x8xf32>
    %109 = vector.broadcast %108 : vector<1x8xf32> to vector<16x8xf32>
    %110 = arith.mulf %107, %109 : vector<16x8xf32>
    %111 = vector.shape_cast %5 : vector<8xf32> to vector<1x8xf32>
    %112 = vector.broadcast %111 : vector<1x8xf32> to vector<16x8xf32>
    %113 = arith.addf %110, %112 : vector<16x8xf32>
    %114 = arith.truncf %113 : vector<16x8xf32> to vector<16x8xbf16>
    %c199 = arith.constant 199 : index
    %c0_49 = arith.constant 0 : index
    %115 = vector.load %arg11[%c199, %c0_49] : memref<342x128xbf16, #tpu.memory_space<vmem>>, vector<16x8xbf16>
    tpu.vector_store %arg11[%c199, %c0_49], %114 {strides = array<i32>} : memref<342x128xbf16, #tpu.memory_space<vmem>>, vector<16x8xbf16>,
    %c0_50 = arith.constant 0 : index
    %c11 = arith.constant 11 : index
    %c0_51 = arith.constant 0 : index
    %c0_52 = arith.constant 0 : index
    %116 = vector.load %arg1[%c0_50, %c11, %c0_51, %c0_52] : memref<1x16x16x8xf32, #tpu.memory_space<vmem>>, vector<1x1x16x8xf32>
    %117 = vector.shape_cast %116 : vector<1x1x16x8xf32> to vector<16x8xf32>
    %118 = vector.shape_cast %3 : vector<8xf32> to vector<1x8xf32>
    %119 = vector.broadcast %118 : vector<1x8xf32> to vector<16x8xf32>
    %120 = arith.mulf %117, %119 : vector<16x8xf32>
    %121 = vector.shape_cast %5 : vector<8xf32> to vector<1x8xf32>
    %122 = vector.broadcast %121 : vector<1x8xf32> to vector<16x8xf32>
    %123 = arith.addf %120, %122 : vector<16x8xf32>
    %124 = arith.truncf %123 : vector<16x8xf32> to vector<16x8xbf16>
    %c217 = arith.constant 217 : index
    %c0_53 = arith.constant 0 : index
    %125 = vector.load %arg11[%c217, %c0_53] : memref<342x128xbf16, #tpu.memory_space<vmem>>, vector<16x8xbf16>
    tpu.vector_store %arg11[%c217, %c0_53], %124 {strides = array<i32>} : memref<342x128xbf16, #tpu.memory_space<vmem>>, vector<16x8xbf16>,
    %c0_54 = arith.constant 0 : index
    %c12 = arith.constant 12 : index
    %c0_55 = arith.constant 0 : index
    %c0_56 = arith.constant 0 : index
    %126 = vector.load %arg1[%c0_54, %c12, %c0_55, %c0_56] : memref<1x16x16x8xf32, #tpu.memory_space<vmem>>, vector<1x1x16x8xf32>
    %127 = vector.shape_cast %126 : vector<1x1x16x8xf32> to vector<16x8xf32>
    %128 = vector.shape_cast %3 : vector<8xf32> to vector<1x8xf32>
    %129 = vector.broadcast %128 : vector<1x8xf32> to vector<16x8xf32>
    %130 = arith.mulf %127, %129 : vector<16x8xf32>
    %131 = vector.shape_cast %5 : vector<8xf32> to vector<1x8xf32>
    %132 = vector.broadcast %131 : vector<1x8xf32> to vector<16x8xf32>
    %133 = arith.addf %130, %132 : vector<16x8xf32>
    %134 = arith.truncf %133 : vector<16x8xf32> to vector<16x8xbf16>
    %c235 = arith.constant 235 : index
    %c0_57 = arith.constant 0 : index
    %135 = vector.load %arg11[%c235, %c0_57] : memref<342x128xbf16, #tpu.memory_space<vmem>>, vector<16x8xbf16>
    tpu.vector_store %arg11[%c235, %c0_57], %134 {strides = array<i32>} : memref<342x128xbf16, #tpu.memory_space<vmem>>, vector<16x8xbf16>,
    %c0_58 = arith.constant 0 : index
    %c13 = arith.constant 13 : index
    %c0_59 = arith.constant 0 : index
    %c0_60 = arith.constant 0 : index
    %136 = vector.load %arg1[%c0_58, %c13, %c0_59, %c0_60] : memref<1x16x16x8xf32, #tpu.memory_space<vmem>>, vector<1x1x16x8xf32>
    %137 = vector.shape_cast %136 : vector<1x1x16x8xf32> to vector<16x8xf32>
    %138 = vector.shape_cast %3 : vector<8xf32> to vector<1x8xf32>
    %139 = vector.broadcast %138 : vector<1x8xf32> to vector<16x8xf32>
    %140 = arith.mulf %137, %139 : vector<16x8xf32>
    %141 = vector.shape_cast %5 : vector<8xf32> to vector<1x8xf32>
    %142 = vector.broadcast %141 : vector<1x8xf32> to vector<16x8xf32>
    %143 = arith.addf %140, %142 : vector<16x8xf32>
    %144 = arith.truncf %143 : vector<16x8xf32> to vector<16x8xbf16>
    %c253 = arith.constant 253 : index
    %c0_61 = arith.constant 0 : index
    %145 = vector.load %arg11[%c253, %c0_61] : memref<342x128xbf16, #tpu.memory_space<vmem>>, vector<16x8xbf16>
    tpu.vector_store %arg11[%c253, %c0_61], %144 {strides = array<i32>} : memref<342x128xbf16, #tpu.memory_space<vmem>>, vector<16x8xbf16>,
    %c0_62 = arith.constant 0 : index
    %c14 = arith.constant 14 : index
    %c0_63 = arith.constant 0 : index
    %c0_64 = arith.constant 0 : index
    %146 = vector.load %arg1[%c0_62, %c14, %c0_63, %c0_64] : memref<1x16x16x8xf32, #tpu.memory_space<vmem>>, vector<1x1x16x8xf32>
    %147 = vector.shape_cast %146 : vector<1x1x16x8xf32> to vector<16x8xf32>
    %148 = vector.shape_cast %3 : vector<8xf32> to vector<1x8xf32>
    %149 = vector.broadcast %148 : vector<1x8xf32> to vector<16x8xf32>
    %150 = arith.mulf %147, %149 : vector<16x8xf32>
    %151 = vector.shape_cast %5 : vector<8xf32> to vector<1x8xf32>
    %152 = vector.broadcast %151 : vector<1x8xf32> to vector<16x8xf32>
    %153 = arith.addf %150, %152 : vector<16x8xf32>
    %154 = arith.truncf %153 : vector<16x8xf32> to vector<16x8xbf16>
    %c271 = arith.constant 271 : index
    %c0_65 = arith.constant 0 : index
    %155 = vector.load %arg11[%c271, %c0_65] : memref<342x128xbf16, #tpu.memory_space<vmem>>, vector<16x8xbf16>
    tpu.vector_store %arg11[%c271, %c0_65], %154 {strides = array<i32>} : memref<342x128xbf16, #tpu.memory_space<vmem>>, vector<16x8xbf16>,
    %c0_66 = arith.constant 0 : index
    %c15 = arith.constant 15 : index
    %c0_67 = arith.constant 0 : index
    %c0_68 = arith.constant 0 : index
    %156 = vector.load %arg1[%c0_66, %c15, %c0_67, %c0_68] : memref<1x16x16x8xf32, #tpu.memory_space<vmem>>, vector<1x1x16x8xf32>
    %157 = vector.shape_cast %156 : vector<1x1x16x8xf32> to vector<16x8xf32>
    %158 = vector.shape_cast %3 : vector<8xf32> to vector<1x8xf32>
    %159 = vector.broadcast %158 : vector<1x8xf32> to vector<16x8xf32>
    %160 = arith.mulf %157, %159 : vector<16x8xf32>
    %161 = vector.shape_cast %5 : vector<8xf32> to vector<1x8xf32>
    %162 = vector.broadcast %161 : vector<1x8xf32> to vector<16x8xf32>
    %163 = arith.addf %160, %162 : vector<16x8xf32>
    %164 = arith.truncf %163 : vector<16x8xf32> to vector<16x8xbf16>
    %c289 = arith.constant 289 : index
    %c0_69 = arith.constant 0 : index
    %165 = vector.load %arg11[%c289, %c0_69] : memref<342x128xbf16, #tpu.memory_space<vmem>>, vector<16x8xbf16>
    tpu.vector_store %arg11[%c289, %c0_69], %164 {strides = array<i32>} : memref<342x128xbf16, #tpu.memory_space<vmem>>, vector<16x8xbf16>,
    %c0_70 = arith.constant 0 : index
    %c0_71 = arith.constant 0 : index
    %166 = vector.load %arg11[%c0_70, %c0_71] : memref<342x128xbf16, #tpu.memory_space<vmem>>, vector<288x128xbf16>
    %c0_72 = arith.constant 0 : index
    %c0_73 = arith.constant 0 : index
    %c0_74 = arith.constant 0 : index
    %167 = vector.load %arg4[%c0_72, %c0_73, %c0_74] : memref<9x128x128xbf16, #tpu.memory_space<vmem>>, vector<1x128x128xbf16>
    %168 = vector.shape_cast %167 : vector<1x128x128xbf16> to vector<128x128xbf16>
    %cst_75 = arith.constant dense<0.000000e+00> : vector<288x128xf32>
    %169 = tpu.matmul %166, %168, %cst_75 {dimension_numbers = #tpu.dot_dimension_numbers<[1], [0], [0], [1], [0, 0, 1, 1], [], []>} : vector<288x128xbf16>, vector<128x128xbf16>, vector<288x128xf32> -> vector<288x128xf32>
    %c1_76 = arith.constant 1 : index
    %c0_77 = arith.constant 0 : index
    %170 = vector.load %arg11[%c1_76, %c0_77] : memref<342x128xbf16, #tpu.memory_space<vmem>>, vector<288x128xbf16>
    %c1_78 = arith.constant 1 : index
    %c0_79 = arith.constant 0 : index
    %c0_80 = arith.constant 0 : index
    %171 = vector.load %arg4[%c1_78, %c0_79, %c0_80] : memref<9x128x128xbf16, #tpu.memory_space<vmem>>, vector<1x128x128xbf16>
    %172 = vector.shape_cast %171 : vector<1x128x128xbf16> to vector<128x128xbf16>
    %cst_81 = arith.constant dense<0.000000e+00> : vector<288x128xf32>
    %173 = tpu.matmul %170, %172, %cst_81 {dimension_numbers = #tpu.dot_dimension_numbers<[1], [0], [0], [1], [0, 0, 1, 1], [], []>} : vector<288x128xbf16>, vector<128x128xbf16>, vector<288x128xf32> -> vector<288x128xf32>
    %174 = arith.addf %169, %173 : vector<288x128xf32>
    %c2_82 = arith.constant 2 : index
    %c0_83 = arith.constant 0 : index
    %175 = vector.load %arg11[%c2_82, %c0_83] : memref<342x128xbf16, #tpu.memory_space<vmem>>, vector<288x128xbf16>
    %c2_84 = arith.constant 2 : index
    %c0_85 = arith.constant 0 : index
    %c0_86 = arith.constant 0 : index
    %176 = vector.load %arg4[%c2_84, %c0_85, %c0_86] : memref<9x128x128xbf16, #tpu.memory_space<vmem>>, vector<1x128x128xbf16>
    %177 = vector.shape_cast %176 : vector<1x128x128xbf16> to vector<128x128xbf16>
    %cst_87 = arith.constant dense<0.000000e+00> : vector<288x128xf32>
    %178 = tpu.matmul %175, %177, %cst_87 {dimension_numbers = #tpu.dot_dimension_numbers<[1], [0], [0], [1], [0, 0, 1, 1], [], []>} : vector<288x128xbf16>, vector<128x128xbf16>, vector<288x128xf32> -> vector<288x128xf32>
    %179 = arith.addf %174, %178 : vector<288x128xf32>
    %c18 = arith.constant 18 : index
    %c0_88 = arith.constant 0 : index
    %180 = vector.load %arg11[%c18, %c0_88] : memref<342x128xbf16, #tpu.memory_space<vmem>>, vector<288x128xbf16>
    %c3_89 = arith.constant 3 : index
    %c0_90 = arith.constant 0 : index
    %c0_91 = arith.constant 0 : index
    %181 = vector.load %arg4[%c3_89, %c0_90, %c0_91] : memref<9x128x128xbf16, #tpu.memory_space<vmem>>, vector<1x128x128xbf16>
    %182 = vector.shape_cast %181 : vector<1x128x128xbf16> to vector<128x128xbf16>
    %cst_92 = arith.constant dense<0.000000e+00> : vector<288x128xf32>
    %183 = tpu.matmul %180, %182, %cst_92 {dimension_numbers = #tpu.dot_dimension_numbers<[1], [0], [0], [1], [0, 0, 1, 1], [], []>} : vector<288x128xbf16>, vector<128x128xbf16>, vector<288x128xf32> -> vector<288x128xf32>
    %184 = arith.addf %179, %183 : vector<288x128xf32>
    %c19_93 = arith.constant 19 : index
    %c0_94 = arith.constant 0 : index
    %185 = vector.load %arg11[%c19_93, %c0_94] : memref<342x128xbf16, #tpu.memory_space<vmem>>, vector<288x128xbf16>
    %c4_95 = arith.constant 4 : index
    %c0_96 = arith.constant 0 : index
    %c0_97 = arith.constant 0 : index
    %186 = vector.load %arg4[%c4_95, %c0_96, %c0_97] : memref<9x128x128xbf16, #tpu.memory_space<vmem>>, vector<1x128x128xbf16>
    %187 = vector.shape_cast %186 : vector<1x128x128xbf16> to vector<128x128xbf16>
    %cst_98 = arith.constant dense<0.000000e+00> : vector<288x128xf32>
    %188 = tpu.matmul %185, %187, %cst_98 {dimension_numbers = #tpu.dot_dimension_numbers<[1], [0], [0], [1], [0, 0, 1, 1], [], []>} : vector<288x128xbf16>, vector<128x128xbf16>, vector<288x128xf32> -> vector<288x128xf32>
    %189 = arith.addf %184, %188 : vector<288x128xf32>
    %c20 = arith.constant 20 : index
    %c0_99 = arith.constant 0 : index
    %190 = vector.load %arg11[%c20, %c0_99] : memref<342x128xbf16, #tpu.memory_space<vmem>>, vector<288x128xbf16>
    %c5_100 = arith.constant 5 : index
    %c0_101 = arith.constant 0 : index
    %c0_102 = arith.constant 0 : index
    %191 = vector.load %arg4[%c5_100, %c0_101, %c0_102] : memref<9x128x128xbf16, #tpu.memory_space<vmem>>, vector<1x128x128xbf16>
    %192 = vector.shape_cast %191 : vector<1x128x128xbf16> to vector<128x128xbf16>
    %cst_103 = arith.constant dense<0.000000e+00> : vector<288x128xf32>
    %193 = tpu.matmul %190, %192, %cst_103 {dimension_numbers = #tpu.dot_dimension_numbers<[1], [0], [0], [1], [0, 0, 1, 1], [], []>} : vector<288x128xbf16>, vector<128x128xbf16>, vector<288x128xf32> -> vector<288x128xf32>
    %194 = arith.addf %189, %193 : vector<288x128xf32>
    %c36 = arith.constant 36 : index
    %c0_104 = arith.constant 0 : index
    %195 = vector.load %arg11[%c36, %c0_104] : memref<342x128xbf16, #tpu.memory_space<vmem>>, vector<288x128xbf16>
    %c6_105 = arith.constant 6 : index
    %c0_106 = arith.constant 0 : index
    %c0_107 = arith.constant 0 : index
    %196 = vector.load %arg4[%c6_105, %c0_106, %c0_107] : memref<9x128x128xbf16, #tpu.memory_space<vmem>>, vector<1x128x128xbf16>
    %197 = vector.shape_cast %196 : vector<1x128x128xbf16> to vector<128x128xbf16>
    %cst_108 = arith.constant dense<0.000000e+00> : vector<288x128xf32>
    %198 = tpu.matmul %195, %197, %cst_108 {dimension_numbers = #tpu.dot_dimension_numbers<[1], [0], [0], [1], [0, 0, 1, 1], [], []>} : vector<288x128xbf16>, vector<128x128xbf16>, vector<288x128xf32> -> vector<288x128xf32>
    %199 = arith.addf %194, %198 : vector<288x128xf32>
    %c37_109 = arith.constant 37 : index
    %c0_110 = arith.constant 0 : index
    %200 = vector.load %arg11[%c37_109, %c0_110] : memref<342x128xbf16, #tpu.memory_space<vmem>>, vector<288x128xbf16>
    %c7_111 = arith.constant 7 : index
    %c0_112 = arith.constant 0 : index
    %c0_113 = arith.constant 0 : index
    %201 = vector.load %arg4[%c7_111, %c0_112, %c0_113] : memref<9x128x128xbf16, #tpu.memory_space<vmem>>, vector<1x128x128xbf16>
    %202 = vector.shape_cast %201 : vector<1x128x128xbf16> to vector<128x128xbf16>
    %cst_114 = arith.constant dense<0.000000e+00> : vector<288x128xf32>
    %203 = tpu.matmul %200, %202, %cst_114 {dimension_numbers = #tpu.dot_dimension_numbers<[1], [0], [0], [1], [0, 0, 1, 1], [], []>} : vector<288x128xbf16>, vector<128x128xbf16>, vector<288x128xf32> -> vector<288x128xf32>
    %204 = arith.addf %199, %203 : vector<288x128xf32>
    %c38 = arith.constant 38 : index
    %c0_115 = arith.constant 0 : index
    %205 = vector.load %arg11[%c38, %c0_115] : memref<342x128xbf16, #tpu.memory_space<vmem>>, vector<288x128xbf16>
    %c8_116 = arith.constant 8 : index
    %c0_117 = arith.constant 0 : index
    %c0_118 = arith.constant 0 : index
    %206 = vector.load %arg4[%c8_116, %c0_117, %c0_118] : memref<9x128x128xbf16, #tpu.memory_space<vmem>>, vector<1x128x128xbf16>
    %207 = vector.shape_cast %206 : vector<1x128x128xbf16> to vector<128x128xbf16>
    %cst_119 = arith.constant dense<0.000000e+00> : vector<288x128xf32>
    %208 = tpu.matmul %205, %207, %cst_119 {dimension_numbers = #tpu.dot_dimension_numbers<[1], [0], [0], [1], [0, 0, 1, 1], [], []>} : vector<288x128xbf16>, vector<128x128xbf16>, vector<288x128xf32> -> vector<288x128xf32>
    %209 = arith.addf %204, %208 : vector<288x128xf32>
    %c0_120 = arith.constant 0 : index
    %c0_121 = arith.constant 0 : index
    %210 = vector.load %arg5[%c0_120, %c0_121] : memref<1x128xf32, #tpu.memory_space<vmem>>, vector<1x128xf32>
    %211 = vector.shape_cast %210 : vector<1x128xf32> to vector<128xf32>
    %212 = vector.shape_cast %211 : vector<128xf32> to vector<1x128xf32>
    %213 = vector.broadcast %212 : vector<1x128xf32> to vector<288x128xf32>
    %214 = arith.mulf %209, %213 : vector<288x128xf32>
    %c0_122 = arith.constant 0 : index
    %c0_123 = arith.constant 0 : index
    %215 = vector.load %arg6[%c0_122, %c0_123] : memref<1x128xf32, #tpu.memory_space<vmem>>, vector<1x128xf32>
    %216 = vector.shape_cast %215 : vector<1x128xf32> to vector<128xf32>
    %217 = vector.shape_cast %216 : vector<128xf32> to vector<1x128xf32>
    %218 = vector.broadcast %217 : vector<1x128xf32> to vector<288x128xf32>
    %219 = arith.addf %214, %218 : vector<288x128xf32>
    %cst_124 = arith.constant 0.000000e+00 : f32
    %220 = vector.broadcast %cst_124 : f32 to vector<288x128xf32>
    %221 = arith.cmpf oge, %219, %220 : vector<288x128xf32>
    %c0_125 = arith.constant 0 : index
    %c0_126 = arith.constant 0 : index
    %222 = vector.load %arg7[%c0_125, %c0_126] : memref<1x128xf32, #tpu.memory_space<vmem>>, vector<1x128xf32>
    %223 = vector.shape_cast %222 : vector<1x128xf32> to vector<128xf32>
    %224 = vector.shape_cast %223 : vector<128xf32> to vector<1x128xf32>
    %225 = vector.broadcast %224 : vector<1x128xf32> to vector<288x128xf32>
    %226 = arith.mulf %225, %219 : vector<288x128xf32>
    %227 = arith.select %221, %219, %226 : vector<288x128xi1>, vector<288x128xf32>
    %228 = tpu.iota {dimensions = array<i32: 0>} : vector<288x1xi32>
    %c18_i32 = arith.constant 18 : i32
    %c0_i32 = arith.constant 0 : i32
    %229 = arith.cmpi eq, %c18_i32, %c0_i32 : i32
    %c1_i32 = arith.constant 1 : i32
    %230 = arith.select %229, %c1_i32, %c18_i32 : i32
    %231 = vector.broadcast %230 : i32 to vector<288x1xi32>
    %232 = arith.remsi %228, %231 : vector<288x1xi32>
    %c0_i32_127 = arith.constant 0 : i32
    %233 = vector.broadcast %c0_i32_127 : i32 to vector<288x1xi32>
    %234 = arith.cmpi ne, %232, %233 : vector<288x1xi32>
    %c0_i32_128 = arith.constant 0 : i32
    %235 = vector.broadcast %c0_i32_128 : i32 to vector<288x1xi32>
    %236 = arith.cmpi slt, %232, %235 : vector<288x1xi32>
    %c0_i32_129 = arith.constant 0 : i32
    %237 = arith.cmpi slt, %230, %c0_i32_129 : i32
    %238 = vector.broadcast %237 : i1 to vector<288x1xi1>
    %239 = vector.broadcast %238 : vector<288x1xi1> to vector<288x1xi1>
    %240 = arith.xori %236, %239 : vector<288x1xi1>
    %241 = arith.andi %240, %234 : vector<288x1xi1>
    %242 = vector.broadcast %230 : i32 to vector<288x1xi32>
    %243 = arith.addi %232, %242 : vector<288x1xi32>
    %244 = arith.select %241, %243, %232 : vector<288x1xi1>, vector<288x1xi32>
    %c16_i32 = arith.constant 16 : i32
    %245 = vector.broadcast %c16_i32 : i32 to vector<288x1xi32>
    %246 = arith.cmpi slt, %244, %245 : vector<288x1xi32>
    %cst_130 = arith.constant 0.000000e+00 : f32
    %247 = vector.shape_cast %246 : vector<288x1xi1> to vector<288x1xi1>
    %248 = vector.broadcast %247 : vector<288x1xi1> to vector<288x128xi1>
    %249 = vector.broadcast %cst_130 : f32 to vector<288x128xf32>
    %250 = arith.select %248, %227, %249 : vector<288x128xi1>, vector<288x128xf32>
    %251 = arith.truncf %250 : vector<288x128xf32> to vector<288x128xbf16>
    %c19_131 = arith.constant 19 : index
    %c0_132 = arith.constant 0 : index
    %252 = vector.load %arg11[%c19_131, %c0_132] : memref<342x128xbf16, #tpu.memory_space<vmem>>, vector<288x128xbf16>
    tpu.vector_store %arg11[%c19_131, %c0_132], %251 {strides = array<i32>} : memref<342x128xbf16, #tpu.memory_space<vmem>>, vector<288x128xbf16>,
    %c0_133 = arith.constant 0 : index
    %c0_134 = arith.constant 0 : index
    %253 = vector.load %arg11[%c0_133, %c0_134] : memref<342x128xbf16, #tpu.memory_space<vmem>>, vector<288x128xbf16>
    %c0_135 = arith.constant 0 : index
    %c0_136 = arith.constant 0 : index
    %c0_137 = arith.constant 0 : index
    %254 = vector.load %arg8[%c0_135, %c0_136, %c0_137] : memref<9x128x128xbf16, #tpu.memory_space<vmem>>, vector<1x128x128xbf16>
    %255 = vector.shape_cast %254 : vector<1x128x128xbf16> to vector<128x128xbf16>
    %cst_138 = arith.constant dense<0.000000e+00> : vector<288x128xf32>
    %256 = tpu.matmul %253, %255, %cst_138 {dimension_numbers = #tpu.dot_dimension_numbers<[1], [0], [0], [1], [0, 0, 1, 1], [], []>} : vector<288x128xbf16>, vector<128x128xbf16>, vector<288x128xf32> -> vector<288x128xf32>
    %c1_139 = arith.constant 1 : index
    %c0_140 = arith.constant 0 : index
    %257 = vector.load %arg11[%c1_139, %c0_140] : memref<342x128xbf16, #tpu.memory_space<vmem>>, vector<288x128xbf16>
    %c1_141 = arith.constant 1 : index
    %c0_142 = arith.constant 0 : index
    %c0_143 = arith.constant 0 : index
    %258 = vector.load %arg8[%c1_141, %c0_142, %c0_143] : memref<9x128x128xbf16, #tpu.memory_space<vmem>>, vector<1x128x128xbf16>
    %259 = vector.shape_cast %258 : vector<1x128x128xbf16> to vector<128x128xbf16>
    %cst_144 = arith.constant dense<0.000000e+00> : vector<288x128xf32>
    %260 = tpu.matmul %257, %259, %cst_144 {dimension_numbers = #tpu.dot_dimension_numbers<[1], [0], [0], [1], [0, 0, 1, 1], [], []>} : vector<288x128xbf16>, vector<128x128xbf16>, vector<288x128xf32> -> vector<288x128xf32>
    %261 = arith.addf %256, %260 : vector<288x128xf32>
    %c2_145 = arith.constant 2 : index
    %c0_146 = arith.constant 0 : index
    %262 = vector.load %arg11[%c2_145, %c0_146] : memref<342x128xbf16, #tpu.memory_space<vmem>>, vector<288x128xbf16>
    %c2_147 = arith.constant 2 : index
    %c0_148 = arith.constant 0 : index
    %c0_149 = arith.constant 0 : index
    %263 = vector.load %arg8[%c2_147, %c0_148, %c0_149] : memref<9x128x128xbf16, #tpu.memory_space<vmem>>, vector<1x128x128xbf16>
    %264 = vector.shape_cast %263 : vector<1x128x128xbf16> to vector<128x128xbf16>
    %cst_150 = arith.constant dense<0.000000e+00> : vector<288x128xf32>
    %265 = tpu.matmul %262, %264, %cst_150 {dimension_numbers = #tpu.dot_dimension_numbers<[1], [0], [0], [1], [0, 0, 1, 1], [], []>} : vector<288x128xbf16>, vector<128x128xbf16>, vector<288x128xf32> -> vector<288x128xf32>
    %266 = arith.addf %261, %265 : vector<288x128xf32>
    %c18_151 = arith.constant 18 : index
    %c0_152 = arith.constant 0 : index
    %267 = vector.load %arg11[%c18_151, %c0_152] : memref<342x128xbf16, #tpu.memory_space<vmem>>, vector<288x128xbf16>
    %c3_153 = arith.constant 3 : index
    %c0_154 = arith.constant 0 : index
    %c0_155 = arith.constant 0 : index
    %268 = vector.load %arg8[%c3_153, %c0_154, %c0_155] : memref<9x128x128xbf16, #tpu.memory_space<vmem>>, vector<1x128x128xbf16>
    %269 = vector.shape_cast %268 : vector<1x128x128xbf16> to vector<128x128xbf16>
    %cst_156 = arith.constant dense<0.000000e+00> : vector<288x128xf32>
    %270 = tpu.matmul %267, %269, %cst_156 {dimension_numbers = #tpu.dot_dimension_numbers<[1], [0], [0], [1], [0, 0, 1, 1], [], []>} : vector<288x128xbf16>, vector<128x128xbf16>, vector<288x128xf32> -> vector<288x128xf32>
    %271 = arith.addf %266, %270 : vector<288x128xf32>
    %c19_157 = arith.constant 19 : index
    %c0_158 = arith.constant 0 : index
    %272 = vector.load %arg11[%c19_157, %c0_158] : memref<342x128xbf16, #tpu.memory_space<vmem>>, vector<288x128xbf16>
    %c4_159 = arith.constant 4 : index
    %c0_160 = arith.constant 0 : index
    %c0_161 = arith.constant 0 : index
    %273 = vector.load %arg8[%c4_159, %c0_160, %c0_161] : memref<9x128x128xbf16, #tpu.memory_space<vmem>>, vector<1x128x128xbf16>
    %274 = vector.shape_cast %273 : vector<1x128x128xbf16> to vector<128x128xbf16>
    %cst_162 = arith.constant dense<0.000000e+00> : vector<288x128xf32>
    %275 = tpu.matmul %272, %274, %cst_162 {dimension_numbers = #tpu.dot_dimension_numbers<[1], [0], [0], [1], [0, 0, 1, 1], [], []>} : vector<288x128xbf16>, vector<128x128xbf16>, vector<288x128xf32> -> vector<288x128xf32>
    %276 = arith.addf %271, %275 : vector<288x128xf32>
    %c20_163 = arith.constant 20 : index
    %c0_164 = arith.constant 0 : index
    %277 = vector.load %arg11[%c20_163, %c0_164] : memref<342x128xbf16, #tpu.memory_space<vmem>>, vector<288x128xbf16>
    %c5_165 = arith.constant 5 : index
    %c0_166 = arith.constant 0 : index
    %c0_167 = arith.constant 0 : index
    %278 = vector.load %arg8[%c5_165, %c0_166, %c0_167] : memref<9x128x128xbf16, #tpu.memory_space<vmem>>, vector<1x128x128xbf16>
    %279 = vector.shape_cast %278 : vector<1x128x128xbf16> to vector<128x128xbf16>
    %cst_168 = arith.constant dense<0.000000e+00> : vector<288x128xf32>
    %280 = tpu.matmul %277, %279, %cst_168 {dimension_numbers = #tpu.dot_dimension_numbers<[1], [0], [0], [1], [0, 0, 1, 1], [], []>} : vector<288x128xbf16>, vector<128x128xbf16>, vector<288x128xf32> -> vector<288x128xf32>
    %281 = arith.addf %276, %280 : vector<288x128xf32>
    %c36_169 = arith.constant 36 : index
    %c0_170 = arith.constant 0 : index
    %282 = vector.load %arg11[%c36_169, %c0_170] : memref<342x128xbf16, #tpu.memory_space<vmem>>, vector<288x128xbf16>
    %c6_171 = arith.constant 6 : index
    %c0_172 = arith.constant 0 : index
    %c0_173 = arith.constant 0 : index
    %283 = vector.load %arg8[%c6_171, %c0_172, %c0_173] : memref<9x128x128xbf16, #tpu.memory_space<vmem>>, vector<1x128x128xbf16>
    %284 = vector.shape_cast %283 : vector<1x128x128xbf16> to vector<128x128xbf16>
    %cst_174 = arith.constant dense<0.000000e+00> : vector<288x128xf32>
    %285 = tpu.matmul %282, %284, %cst_174 {dimension_numbers = #tpu.dot_dimension_numbers<[1], [0], [0], [1], [0, 0, 1, 1], [], []>} : vector<288x128xbf16>, vector<128x128xbf16>, vector<288x128xf32> -> vector<288x128xf32>
    %286 = arith.addf %281, %285 : vector<288x128xf32>
    %c37_175 = arith.constant 37 : index
    %c0_176 = arith.constant 0 : index
    %287 = vector.load %arg11[%c37_175, %c0_176] : memref<342x128xbf16, #tpu.memory_space<vmem>>, vector<288x128xbf16>
    %c7_177 = arith.constant 7 : index
    %c0_178 = arith.constant 0 : index
    %c0_179 = arith.constant 0 : index
    %288 = vector.load %arg8[%c7_177, %c0_178, %c0_179] : memref<9x128x128xbf16, #tpu.memory_space<vmem>>, vector<1x128x128xbf16>
    %289 = vector.shape_cast %288 : vector<1x128x128xbf16> to vector<128x128xbf16>
    %cst_180 = arith.constant dense<0.000000e+00> : vector<288x128xf32>
    %290 = tpu.matmul %287, %289, %cst_180 {dimension_numbers = #tpu.dot_dimension_numbers<[1], [0], [0], [1], [0, 0, 1, 1], [], []>} : vector<288x128xbf16>, vector<128x128xbf16>, vector<288x128xf32> -> vector<288x128xf32>
    %291 = arith.addf %286, %290 : vector<288x128xf32>
    %c38_181 = arith.constant 38 : index
    %c0_182 = arith.constant 0 : index
    %292 = vector.load %arg11[%c38_181, %c0_182] : memref<342x128xbf16, #tpu.memory_space<vmem>>, vector<288x128xbf16>
    %c8_183 = arith.constant 8 : index
    %c0_184 = arith.constant 0 : index
    %c0_185 = arith.constant 0 : index
    %293 = vector.load %arg8[%c8_183, %c0_184, %c0_185] : memref<9x128x128xbf16, #tpu.memory_space<vmem>>, vector<1x128x128xbf16>
    %294 = vector.shape_cast %293 : vector<1x128x128xbf16> to vector<128x128xbf16>
    %cst_186 = arith.constant dense<0.000000e+00> : vector<288x128xf32>
    %295 = tpu.matmul %292, %294, %cst_186 {dimension_numbers = #tpu.dot_dimension_numbers<[1], [0], [0], [1], [0, 0, 1, 1], [], []>} : vector<288x128xbf16>, vector<128x128xbf16>, vector<288x128xf32> -> vector<288x128xf32>
    %296 = arith.addf %291, %295 : vector<288x128xf32>
    %c0_187 = arith.constant 0 : index
    %c0_188 = arith.constant 0 : index
    %297 = vector.load %arg9[%c0_187, %c0_188] : memref<1x128xf32, #tpu.memory_space<vmem>>, vector<1x128xf32>
    %298 = vector.shape_cast %297 : vector<1x128xf32> to vector<128xf32>
    %299 = vector.shape_cast %298 : vector<128xf32> to vector<1x128xf32>
    %300 = vector.broadcast %299 : vector<1x128xf32> to vector<288x128xf32>
    %301 = arith.addf %296, %300 : vector<288x128xf32>
    %302 = vector.extract_strided_slice %301 {offsets = [0, 0], sizes = [16, 8], strides = [1, 1]} : vector<288x128xf32> to vector<16x8xf32>
    %c0_189 = arith.constant 0 : index
    %c0_190 = arith.constant 0 : index
    %c0_191 = arith.constant 0 : index
    %c0_192 = arith.constant 0 : index
    %303 = vector.load %arg1[%c0_189, %c0_190, %c0_191, %c0_192] : memref<1x16x16x8xf32, #tpu.memory_space<vmem>>, vector<1x1x16x8xf32>
    %304 = vector.shape_cast %303 : vector<1x1x16x8xf32> to vector<16x8xf32>
    %305 = arith.addf %302, %304 : vector<16x8xf32>
    %c0_193 = arith.constant 0 : index
    %c0_194 = arith.constant 0 : index
    %c0_195 = arith.constant 0 : index
    %c0_196 = arith.constant 0 : index
    %306 = vector.load %arg10[%c0_193, %c0_194, %c0_195, %c0_196] : memref<1x16x16x8xf32, #tpu.memory_space<vmem>>, vector<1x1x16x8xf32>
    %307 = vector.shape_cast %306 : vector<1x1x16x8xf32> to vector<16x8xf32>
    %308 = vector.shape_cast %305 : vector<16x8xf32> to vector<1x1x16x8xf32>
    tpu.vector_store %arg10[%c0_193, %c0_194, %c0_195, %c0_196], %308 {strides = array<i32>} : memref<1x16x16x8xf32, #tpu.memory_space<vmem>>, vector<1x1x16x8xf32>,
    %309 = vector.extract_strided_slice %301 {offsets = [18, 0], sizes = [16, 8], strides = [1, 1]} : vector<288x128xf32> to vector<16x8xf32>
    %c0_197 = arith.constant 0 : index
    %c1_198 = arith.constant 1 : index
    %c0_199 = arith.constant 0 : index
    %c0_200 = arith.constant 0 : index
    %310 = vector.load %arg1[%c0_197, %c1_198, %c0_199, %c0_200] : memref<1x16x16x8xf32, #tpu.memory_space<vmem>>, vector<1x1x16x8xf32>
    %311 = vector.shape_cast %310 : vector<1x1x16x8xf32> to vector<16x8xf32>
    %312 = arith.addf %309, %311 : vector<16x8xf32>
    %c0_201 = arith.constant 0 : index
    %c1_202 = arith.constant 1 : index
    %c0_203 = arith.constant 0 : index
    %c0_204 = arith.constant 0 : index
    %313 = vector.load %arg10[%c0_201, %c1_202, %c0_203, %c0_204] : memref<1x16x16x8xf32, #tpu.memory_space<vmem>>, vector<1x1x16x8xf32>
    %314 = vector.shape_cast %313 : vector<1x1x16x8xf32> to vector<16x8xf32>
    %315 = vector.shape_cast %312 : vector<16x8xf32> to vector<1x1x16x8xf32>
    tpu.vector_store %arg10[%c0_201, %c1_202, %c0_203, %c0_204], %315 {strides = array<i32>} : memref<1x16x16x8xf32, #tpu.memory_space<vmem>>, vector<1x1x16x8xf32>,
    %316 = vector.extract_strided_slice %301 {offsets = [36, 0], sizes = [16, 8], strides = [1, 1]} : vector<288x128xf32> to vector<16x8xf32>
    %c0_205 = arith.constant 0 : index
    %c2_206 = arith.constant 2 : index
    %c0_207 = arith.constant 0 : index
    %c0_208 = arith.constant 0 : index
    %317 = vector.load %arg1[%c0_205, %c2_206, %c0_207, %c0_208] : memref<1x16x16x8xf32, #tpu.memory_space<vmem>>, vector<1x1x16x8xf32>
    %318 = vector.shape_cast %317 : vector<1x1x16x8xf32> to vector<16x8xf32>
    %319 = arith.addf %316, %318 : vector<16x8xf32>
    %c0_209 = arith.constant 0 : index
    %c2_210 = arith.constant 2 : index
    %c0_211 = arith.constant 0 : index
    %c0_212 = arith.constant 0 : index
    %320 = vector.load %arg10[%c0_209, %c2_210, %c0_211, %c0_212] : memref<1x16x16x8xf32, #tpu.memory_space<vmem>>, vector<1x1x16x8xf32>
    %321 = vector.shape_cast %320 : vector<1x1x16x8xf32> to vector<16x8xf32>
    %322 = vector.shape_cast %319 : vector<16x8xf32> to vector<1x1x16x8xf32>
    tpu.vector_store %arg10[%c0_209, %c2_210, %c0_211, %c0_212], %322 {strides = array<i32>} : memref<1x16x16x8xf32, #tpu.memory_space<vmem>>, vector<1x1x16x8xf32>,
    %323 = vector.extract_strided_slice %301 {offsets = [54, 0], sizes = [16, 8], strides = [1, 1]} : vector<288x128xf32> to vector<16x8xf32>
    %c0_213 = arith.constant 0 : index
    %c3_214 = arith.constant 3 : index
    %c0_215 = arith.constant 0 : index
    %c0_216 = arith.constant 0 : index
    %324 = vector.load %arg1[%c0_213, %c3_214, %c0_215, %c0_216] : memref<1x16x16x8xf32, #tpu.memory_space<vmem>>, vector<1x1x16x8xf32>
    %325 = vector.shape_cast %324 : vector<1x1x16x8xf32> to vector<16x8xf32>
    %326 = arith.addf %323, %325 : vector<16x8xf32>
    %c0_217 = arith.constant 0 : index
    %c3_218 = arith.constant 3 : index
    %c0_219 = arith.constant 0 : index
    %c0_220 = arith.constant 0 : index
    %327 = vector.load %arg10[%c0_217, %c3_218, %c0_219, %c0_220] : memref<1x16x16x8xf32, #tpu.memory_space<vmem>>, vector<1x1x16x8xf32>
    %328 = vector.shape_cast %327 : vector<1x1x16x8xf32> to vector<16x8xf32>
    %329 = vector.shape_cast %326 : vector<16x8xf32> to vector<1x1x16x8xf32>
    tpu.vector_store %arg10[%c0_217, %c3_218, %c0_219, %c0_220], %329 {strides = array<i32>} : memref<1x16x16x8xf32, #tpu.memory_space<vmem>>, vector<1x1x16x8xf32>,
    %330 = vector.extract_strided_slice %301 {offsets = [72, 0], sizes = [16, 8], strides = [1, 1]} : vector<288x128xf32> to vector<16x8xf32>
    %c0_221 = arith.constant 0 : index
    %c4_222 = arith.constant 4 : index
    %c0_223 = arith.constant 0 : index
    %c0_224 = arith.constant 0 : index
    %331 = vector.load %arg1[%c0_221, %c4_222, %c0_223, %c0_224] : memref<1x16x16x8xf32, #tpu.memory_space<vmem>>, vector<1x1x16x8xf32>
    %332 = vector.shape_cast %331 : vector<1x1x16x8xf32> to vector<16x8xf32>
    %333 = arith.addf %330, %332 : vector<16x8xf32>
    %c0_225 = arith.constant 0 : index
    %c4_226 = arith.constant 4 : index
    %c0_227 = arith.constant 0 : index
    %c0_228 = arith.constant 0 : index
    %334 = vector.load %arg10[%c0_225, %c4_226, %c0_227, %c0_228] : memref<1x16x16x8xf32, #tpu.memory_space<vmem>>, vector<1x1x16x8xf32>
    %335 = vector.shape_cast %334 : vector<1x1x16x8xf32> to vector<16x8xf32>
    %336 = vector.shape_cast %333 : vector<16x8xf32> to vector<1x1x16x8xf32>
    tpu.vector_store %arg10[%c0_225, %c4_226, %c0_227, %c0_228], %336 {strides = array<i32>} : memref<1x16x16x8xf32, #tpu.memory_space<vmem>>, vector<1x1x16x8xf32>,
    %337 = vector.extract_strided_slice %301 {offsets = [90, 0], sizes = [16, 8], strides = [1, 1]} : vector<288x128xf32> to vector<16x8xf32>
    %c0_229 = arith.constant 0 : index
    %c5_230 = arith.constant 5 : index
    %c0_231 = arith.constant 0 : index
    %c0_232 = arith.constant 0 : index
    %338 = vector.load %arg1[%c0_229, %c5_230, %c0_231, %c0_232] : memref<1x16x16x8xf32, #tpu.memory_space<vmem>>, vector<1x1x16x8xf32>
    %339 = vector.shape_cast %338 : vector<1x1x16x8xf32> to vector<16x8xf32>
    %340 = arith.addf %337, %339 : vector<16x8xf32>
    %c0_233 = arith.constant 0 : index
    %c5_234 = arith.constant 5 : index
    %c0_235 = arith.constant 0 : index
    %c0_236 = arith.constant 0 : index
    %341 = vector.load %arg10[%c0_233, %c5_234, %c0_235, %c0_236] : memref<1x16x16x8xf32, #tpu.memory_space<vmem>>, vector<1x1x16x8xf32>
    %342 = vector.shape_cast %341 : vector<1x1x16x8xf32> to vector<16x8xf32>
    %343 = vector.shape_cast %340 : vector<16x8xf32> to vector<1x1x16x8xf32>
    tpu.vector_store %arg10[%c0_233, %c5_234, %c0_235, %c0_236], %343 {strides = array<i32>} : memref<1x16x16x8xf32, #tpu.memory_space<vmem>>, vector<1x1x16x8xf32>,
    %344 = vector.extract_strided_slice %301 {offsets = [108, 0], sizes = [16, 8], strides = [1, 1]} : vector<288x128xf32> to vector<16x8xf32>
    %c0_237 = arith.constant 0 : index
    %c6_238 = arith.constant 6 : index
    %c0_239 = arith.constant 0 : index
    %c0_240 = arith.constant 0 : index
    %345 = vector.load %arg1[%c0_237, %c6_238, %c0_239, %c0_240] : memref<1x16x16x8xf32, #tpu.memory_space<vmem>>, vector<1x1x16x8xf32>
    %346 = vector.shape_cast %345 : vector<1x1x16x8xf32> to vector<16x8xf32>
    %347 = arith.addf %344, %346 : vector<16x8xf32>
    %c0_241 = arith.constant 0 : index
    %c6_242 = arith.constant 6 : index
    %c0_243 = arith.constant 0 : index
    %c0_244 = arith.constant 0 : index
    %348 = vector.load %arg10[%c0_241, %c6_242, %c0_243, %c0_244] : memref<1x16x16x8xf32, #tpu.memory_space<vmem>>, vector<1x1x16x8xf32>
    %349 = vector.shape_cast %348 : vector<1x1x16x8xf32> to vector<16x8xf32>
    %350 = vector.shape_cast %347 : vector<16x8xf32> to vector<1x1x16x8xf32>
    tpu.vector_store %arg10[%c0_241, %c6_242, %c0_243, %c0_244], %350 {strides = array<i32>} : memref<1x16x16x8xf32, #tpu.memory_space<vmem>>, vector<1x1x16x8xf32>,
    %351 = vector.extract_strided_slice %301 {offsets = [126, 0], sizes = [16, 8], strides = [1, 1]} : vector<288x128xf32> to vector<16x8xf32>
    %c0_245 = arith.constant 0 : index
    %c7_246 = arith.constant 7 : index
    %c0_247 = arith.constant 0 : index
    %c0_248 = arith.constant 0 : index
    %352 = vector.load %arg1[%c0_245, %c7_246, %c0_247, %c0_248] : memref<1x16x16x8xf32, #tpu.memory_space<vmem>>, vector<1x1x16x8xf32>
    %353 = vector.shape_cast %352 : vector<1x1x16x8xf32> to vector<16x8xf32>
    %354 = arith.addf %351, %353 : vector<16x8xf32>
    %c0_249 = arith.constant 0 : index
    %c7_250 = arith.constant 7 : index
    %c0_251 = arith.constant 0 : index
    %c0_252 = arith.constant 0 : index
    %355 = vector.load %arg10[%c0_249, %c7_250, %c0_251, %c0_252] : memref<1x16x16x8xf32, #tpu.memory_space<vmem>>, vector<1x1x16x8xf32>
    %356 = vector.shape_cast %355 : vector<1x1x16x8xf32> to vector<16x8xf32>
    %357 = vector.shape_cast %354 : vector<16x8xf32> to vector<1x1x16x8xf32>
    tpu.vector_store %arg10[%c0_249, %c7_250, %c0_251, %c0_252], %357 {strides = array<i32>} : memref<1x16x16x8xf32, #tpu.memory_space<vmem>>, vector<1x1x16x8xf32>,
    %358 = vector.extract_strided_slice %301 {offsets = [144, 0], sizes = [16, 8], strides = [1, 1]} : vector<288x128xf32> to vector<16x8xf32>
    %c0_253 = arith.constant 0 : index
    %c8_254 = arith.constant 8 : index
    %c0_255 = arith.constant 0 : index
    %c0_256 = arith.constant 0 : index
    %359 = vector.load %arg1[%c0_253, %c8_254, %c0_255, %c0_256] : memref<1x16x16x8xf32, #tpu.memory_space<vmem>>, vector<1x1x16x8xf32>
    %360 = vector.shape_cast %359 : vector<1x1x16x8xf32> to vector<16x8xf32>
    %361 = arith.addf %358, %360 : vector<16x8xf32>
    %c0_257 = arith.constant 0 : index
    %c8_258 = arith.constant 8 : index
    %c0_259 = arith.constant 0 : index
    %c0_260 = arith.constant 0 : index
    %362 = vector.load %arg10[%c0_257, %c8_258, %c0_259, %c0_260] : memref<1x16x16x8xf32, #tpu.memory_space<vmem>>, vector<1x1x16x8xf32>
    %363 = vector.shape_cast %362 : vector<1x1x16x8xf32> to vector<16x8xf32>
    %364 = vector.shape_cast %361 : vector<16x8xf32> to vector<1x1x16x8xf32>
    tpu.vector_store %arg10[%c0_257, %c8_258, %c0_259, %c0_260], %364 {strides = array<i32>} : memref<1x16x16x8xf32, #tpu.memory_space<vmem>>, vector<1x1x16x8xf32>,
    %365 = vector.extract_strided_slice %301 {offsets = [162, 0], sizes = [16, 8], strides = [1, 1]} : vector<288x128xf32> to vector<16x8xf32>
    %c0_261 = arith.constant 0 : index
    %c9_262 = arith.constant 9 : index
    %c0_263 = arith.constant 0 : index
    %c0_264 = arith.constant 0 : index
    %366 = vector.load %arg1[%c0_261, %c9_262, %c0_263, %c0_264] : memref<1x16x16x8xf32, #tpu.memory_space<vmem>>, vector<1x1x16x8xf32>
    %367 = vector.shape_cast %366 : vector<1x1x16x8xf32> to vector<16x8xf32>
    %368 = arith.addf %365, %367 : vector<16x8xf32>
    %c0_265 = arith.constant 0 : index
    %c9_266 = arith.constant 9 : index
    %c0_267 = arith.constant 0 : index
    %c0_268 = arith.constant 0 : index
    %369 = vector.load %arg10[%c0_265, %c9_266, %c0_267, %c0_268] : memref<1x16x16x8xf32, #tpu.memory_space<vmem>>, vector<1x1x16x8xf32>
    %370 = vector.shape_cast %369 : vector<1x1x16x8xf32> to vector<16x8xf32>
    %371 = vector.shape_cast %368 : vector<16x8xf32> to vector<1x1x16x8xf32>
    tpu.vector_store %arg10[%c0_265, %c9_266, %c0_267, %c0_268], %371 {strides = array<i32>} : memref<1x16x16x8xf32, #tpu.memory_space<vmem>>, vector<1x1x16x8xf32>,
    %372 = vector.extract_strided_slice %301 {offsets = [180, 0], sizes = [16, 8], strides = [1, 1]} : vector<288x128xf32> to vector<16x8xf32>
    %c0_269 = arith.constant 0 : index
    %c10_270 = arith.constant 10 : index
    %c0_271 = arith.constant 0 : index
    %c0_272 = arith.constant 0 : index
    %373 = vector.load %arg1[%c0_269, %c10_270, %c0_271, %c0_272] : memref<1x16x16x8xf32, #tpu.memory_space<vmem>>, vector<1x1x16x8xf32>
    %374 = vector.shape_cast %373 : vector<1x1x16x8xf32> to vector<16x8xf32>
    %375 = arith.addf %372, %374 : vector<16x8xf32>
    %c0_273 = arith.constant 0 : index
    %c10_274 = arith.constant 10 : index
    %c0_275 = arith.constant 0 : index
    %c0_276 = arith.constant 0 : index
    %376 = vector.load %arg10[%c0_273, %c10_274, %c0_275, %c0_276] : memref<1x16x16x8xf32, #tpu.memory_space<vmem>>, vector<1x1x16x8xf32>
    %377 = vector.shape_cast %376 : vector<1x1x16x8xf32> to vector<16x8xf32>
    %378 = vector.shape_cast %375 : vector<16x8xf32> to vector<1x1x16x8xf32>
    tpu.vector_store %arg10[%c0_273, %c10_274, %c0_275, %c0_276], %378 {strides = array<i32>} : memref<1x16x16x8xf32, #tpu.memory_space<vmem>>, vector<1x1x16x8xf32>,
    %379 = vector.extract_strided_slice %301 {offsets = [198, 0], sizes = [16, 8], strides = [1, 1]} : vector<288x128xf32> to vector<16x8xf32>
    %c0_277 = arith.constant 0 : index
    %c11_278 = arith.constant 11 : index
    %c0_279 = arith.constant 0 : index
    %c0_280 = arith.constant 0 : index
    %380 = vector.load %arg1[%c0_277, %c11_278, %c0_279, %c0_280] : memref<1x16x16x8xf32, #tpu.memory_space<vmem>>, vector<1x1x16x8xf32>
    %381 = vector.shape_cast %380 : vector<1x1x16x8xf32> to vector<16x8xf32>
    %382 = arith.addf %379, %381 : vector<16x8xf32>
    %c0_281 = arith.constant 0 : index
    %c11_282 = arith.constant 11 : index
    %c0_283 = arith.constant 0 : index
    %c0_284 = arith.constant 0 : index
    %383 = vector.load %arg10[%c0_281, %c11_282, %c0_283, %c0_284] : memref<1x16x16x8xf32, #tpu.memory_space<vmem>>, vector<1x1x16x8xf32>
    %384 = vector.shape_cast %383 : vector<1x1x16x8xf32> to vector<16x8xf32>
    %385 = vector.shape_cast %382 : vector<16x8xf32> to vector<1x1x16x8xf32>
    tpu.vector_store %arg10[%c0_281, %c11_282, %c0_283, %c0_284], %385 {strides = array<i32>} : memref<1x16x16x8xf32, #tpu.memory_space<vmem>>, vector<1x1x16x8xf32>,
    %386 = vector.extract_strided_slice %301 {offsets = [216, 0], sizes = [16, 8], strides = [1, 1]} : vector<288x128xf32> to vector<16x8xf32>
    %c0_285 = arith.constant 0 : index
    %c12_286 = arith.constant 12 : index
    %c0_287 = arith.constant 0 : index
    %c0_288 = arith.constant 0 : index
    %387 = vector.load %arg1[%c0_285, %c12_286, %c0_287, %c0_288] : memref<1x16x16x8xf32, #tpu.memory_space<vmem>>, vector<1x1x16x8xf32>
    %388 = vector.shape_cast %387 : vector<1x1x16x8xf32> to vector<16x8xf32>
    %389 = arith.addf %386, %388 : vector<16x8xf32>
    %c0_289 = arith.constant 0 : index
    %c12_290 = arith.constant 12 : index
    %c0_291 = arith.constant 0 : index
    %c0_292 = arith.constant 0 : index
    %390 = vector.load %arg10[%c0_289, %c12_290, %c0_291, %c0_292] : memref<1x16x16x8xf32, #tpu.memory_space<vmem>>, vector<1x1x16x8xf32>
    %391 = vector.shape_cast %390 : vector<1x1x16x8xf32> to vector<16x8xf32>
    %392 = vector.shape_cast %389 : vector<16x8xf32> to vector<1x1x16x8xf32>
    tpu.vector_store %arg10[%c0_289, %c12_290, %c0_291, %c0_292], %392 {strides = array<i32>} : memref<1x16x16x8xf32, #tpu.memory_space<vmem>>, vector<1x1x16x8xf32>,
    %393 = vector.extract_strided_slice %301 {offsets = [234, 0], sizes = [16, 8], strides = [1, 1]} : vector<288x128xf32> to vector<16x8xf32>
    %c0_293 = arith.constant 0 : index
    %c13_294 = arith.constant 13 : index
    %c0_295 = arith.constant 0 : index
    %c0_296 = arith.constant 0 : index
    %394 = vector.load %arg1[%c0_293, %c13_294, %c0_295, %c0_296] : memref<1x16x16x8xf32, #tpu.memory_space<vmem>>, vector<1x1x16x8xf32>
    %395 = vector.shape_cast %394 : vector<1x1x16x8xf32> to vector<16x8xf32>
    %396 = arith.addf %393, %395 : vector<16x8xf32>
    %c0_297 = arith.constant 0 : index
    %c13_298 = arith.constant 13 : index
    %c0_299 = arith.constant 0 : index
    %c0_300 = arith.constant 0 : index
    %397 = vector.load %arg10[%c0_297, %c13_298, %c0_299, %c0_300] : memref<1x16x16x8xf32, #tpu.memory_space<vmem>>, vector<1x1x16x8xf32>
    %398 = vector.shape_cast %397 : vector<1x1x16x8xf32> to vector<16x8xf32>
    %399 = vector.shape_cast %396 : vector<16x8xf32> to vector<1x1x16x8xf32>
    tpu.vector_store %arg10[%c0_297, %c13_298, %c0_299, %c0_300], %399 {strides = array<i32>} : memref<1x16x16x8xf32, #tpu.memory_space<vmem>>, vector<1x1x16x8xf32>,
    %400 = vector.extract_strided_slice %301 {offsets = [252, 0], sizes = [16, 8], strides = [1, 1]} : vector<288x128xf32> to vector<16x8xf32>
    %c0_301 = arith.constant 0 : index
    %c14_302 = arith.constant 14 : index
    %c0_303 = arith.constant 0 : index
    %c0_304 = arith.constant 0 : index
    %401 = vector.load %arg1[%c0_301, %c14_302, %c0_303, %c0_304] : memref<1x16x16x8xf32, #tpu.memory_space<vmem>>, vector<1x1x16x8xf32>
    %402 = vector.shape_cast %401 : vector<1x1x16x8xf32> to vector<16x8xf32>
    %403 = arith.addf %400, %402 : vector<16x8xf32>
    %c0_305 = arith.constant 0 : index
    %c14_306 = arith.constant 14 : index
    %c0_307 = arith.constant 0 : index
    %c0_308 = arith.constant 0 : index
    %404 = vector.load %arg10[%c0_305, %c14_306, %c0_307, %c0_308] : memref<1x16x16x8xf32, #tpu.memory_space<vmem>>, vector<1x1x16x8xf32>
    %405 = vector.shape_cast %404 : vector<1x1x16x8xf32> to vector<16x8xf32>
    %406 = vector.shape_cast %403 : vector<16x8xf32> to vector<1x1x16x8xf32>
    tpu.vector_store %arg10[%c0_305, %c14_306, %c0_307, %c0_308], %406 {strides = array<i32>} : memref<1x16x16x8xf32, #tpu.memory_space<vmem>>, vector<1x1x16x8xf32>,
    %407 = vector.extract_strided_slice %301 {offsets = [270, 0], sizes = [16, 8], strides = [1, 1]} : vector<288x128xf32> to vector<16x8xf32>
    %c0_309 = arith.constant 0 : index
    %c15_310 = arith.constant 15 : index
    %c0_311 = arith.constant 0 : index
    %c0_312 = arith.constant 0 : index
    %408 = vector.load %arg1[%c0_309, %c15_310, %c0_311, %c0_312] : memref<1x16x16x8xf32, #tpu.memory_space<vmem>>, vector<1x1x16x8xf32>
    %409 = vector.shape_cast %408 : vector<1x1x16x8xf32> to vector<16x8xf32>
    %410 = arith.addf %407, %409 : vector<16x8xf32>
    %c0_313 = arith.constant 0 : index
    %c15_314 = arith.constant 15 : index
    %c0_315 = arith.constant 0 : index
    %c0_316 = arith.constant 0 : index
    %411 = vector.load %arg10[%c0_313, %c15_314, %c0_315, %c0_316] : memref<1x16x16x8xf32, #tpu.memory_space<vmem>>, vector<1x1x16x8xf32>
    %412 = vector.shape_cast %411 : vector<1x1x16x8xf32> to vector<16x8xf32>
    %413 = vector.shape_cast %410 : vector<16x8xf32> to vector<1x1x16x8xf32>
    tpu.vector_store %arg10[%c0_313, %c15_314, %c0_315, %c0_316], %413 {strides = array<i32>} : memref<1x16x16x8xf32, #tpu.memory_space<vmem>>, vector<1x1x16x8xf32>,
    return
  }
  func.func @transform_0(%arg0: i32) -> (i32, i32, i32, i32) {
    %c0_i32 = arith.constant 0 : i32
    %c0_i32_0 = arith.constant 0 : i32
    %c0_i32_1 = arith.constant 0 : i32
    %c0_i32_2 = arith.constant 0 : i32
    return %arg0, %c0_i32, %c0_i32_0, %c0_i32_1 : i32, i32, i32, i32
  }
  func.func @transform_1(%arg0: i32) -> (i32, i32) {
    %c0_i32 = arith.constant 0 : i32
    %c0_i32_0 = arith.constant 0 : i32
    %c0_i32_1 = arith.constant 0 : i32
    return %c0_i32, %c0_i32_0 : i32, i32
  }
  func.func @transform_2(%arg0: i32) -> (i32, i32) {
    %c0_i32 = arith.constant 0 : i32
    %c0_i32_0 = arith.constant 0 : i32
    %c0_i32_1 = arith.constant 0 : i32
    return %c0_i32, %c0_i32_0 : i32, i32
  }
  func.func @transform_3(%arg0: i32) -> (i32, i32, i32) {
    %c0_i32 = arith.constant 0 : i32
    %c0_i32_0 = arith.constant 0 : i32
    %c0_i32_1 = arith.constant 0 : i32
    %c0_i32_2 = arith.constant 0 : i32
    return %c0_i32, %c0_i32_0, %c0_i32_1 : i32, i32, i32
  }
  func.func @transform_4(%arg0: i32) -> (i32, i32) {
    %c0_i32 = arith.constant 0 : i32
    %c0_i32_0 = arith.constant 0 : i32
    %c0_i32_1 = arith.constant 0 : i32
    return %c0_i32, %c0_i32_0 : i32, i32
  }
  func.func @transform_5(%arg0: i32) -> (i32, i32) {
    %c0_i32 = arith.constant 0 : i32
    %c0_i32_0 = arith.constant 0 : i32
    %c0_i32_1 = arith.constant 0 : i32
    return %c0_i32, %c0_i32_0 : i32, i32
  }
  func.func @transform_6(%arg0: i32) -> (i32, i32) {
    %c0_i32 = arith.constant 0 : i32
    %c0_i32_0 = arith.constant 0 : i32
    %c0_i32_1 = arith.constant 0 : i32
    return %c0_i32, %c0_i32_0 : i32, i32
  }
  func.func @transform_7(%arg0: i32) -> (i32, i32, i32) {
    %c0_i32 = arith.constant 0 : i32
    %c0_i32_0 = arith.constant 0 : i32
    %c0_i32_1 = arith.constant 0 : i32
    %c0_i32_2 = arith.constant 0 : i32
    return %c0_i32, %c0_i32_0, %c0_i32_1 : i32, i32, i32
  }
  func.func @transform_8(%arg0: i32) -> (i32, i32) {
    %c0_i32 = arith.constant 0 : i32
    %c0_i32_0 = arith.constant 0 : i32
    %c0_i32_1 = arith.constant 0 : i32
    return %c0_i32, %c0_i32_0 : i32, i32
  }
  func.func @transform_9(%arg0: i32) -> (i32, i32, i32, i32) {
    %c0_i32 = arith.constant 0 : i32
    %c0_i32_0 = arith.constant 0 : i32
    %c0_i32_1 = arith.constant 0 : i32
    %c0_i32_2 = arith.constant 0 : i32
    return %arg0, %c0_i32, %c0_i32_0, %c0_i32_1 : i32, i32, i32, i32
  }
}

</mosaic_0001>

<bundles_post_ra>
// kernel: tpu_custom_call.1
= control target key start
LH: loop header
LB: loop body
LE: loop exit
PB: predicated region body
PF: predicated region fallthrough
CT: control target
= control target key end

     0   :  { %14 = vsyncpa [#allocation4], 0  ;;  %s12849_s30 = smov 0   ;;  %s17794_s0 = inlined_call_operand.vmem [shape: f32[2,16,16,8], index: 0, kind: input, shape index: {}]   ;;  %s17795_s1 = inlined_call_operand.vmem [shape: f32[1,8], index: 1, kind: input, shape index: {}]   ;;  %s17796_s2 = inlined_call_operand.vmem [shape: f32[1,8], index: 2, kind: input, shape index: {}]   ;;  %s17797_s3 = inlined_call_operand.vmem [shape: bf16[9,128,128], index: 3, kind: input, shape index: {}]   ;;  %s17798_s4 = inlined_call_operand.vmem [shape: f32[1,128], index: 4, kind: input, shape index: {}]   ;;  %s17799_s5 = inlined_call_operand.vmem [shape: f32[1,128], index: 5, kind: input, shape index: {}]   ;;  %s17800_s6 = inlined_call_operand.vmem [shape: f32[1,128], index: 6, kind: input, shape index: {}]   ;;  %s17801_s7 = inlined_call_operand.hbm [shape: bf16[9,128,128], index: 7, kind: input, shape index: {}]   ;;  %s17802_s8 = inlined_call_operand.vmem [shape: f32[1,128], index: 8, kind: input, shape index: {}]   ;;  %s17803_s9 = inlined_call_operand.vmem [shape: f32[2,16,16,8], index: 9, kind: output, shape index: {}]  }
   0x1 LB: > { %s12855_s10 = sadd.s32 4294967295, %s12793_s30   ;;  %p10313_p0 = scmp.ge.s32.totalorder %s12793_s30, 1  ;;  %s12793_s30 = sphi %s12849_s30, %s20_s30  }
   0x2   : > { %p245_p1 = scmp.lt.s32.totalorder %s12793_s30, 3  ;;  %s12795_s11 = smov [#allocation3]  }
   0x3   : > { %s275_s12 = sshll.u32 %s12795_s11, 4  ;;  %p12450_p3 = scmp.eq.s32.totalorder %s12855_s10, 0  ;;  %s276_s12 = int_to_ptr.vmem [resolvable:$true] %s275_s12 }
   0x4   : > { %p12859_p2 = pnand %p10313_p0, %p245_p1  ;;  %s12768_s14 = scalar_lea.vmem %s276_s12, 9216 }
   0x5   : > { %p12769_p7 = scmp.ne.s32.totalorder %s276_s12, %s12768_s14  ;;  %p12776_p10 = scmp.lt.s32.totalorder %s276_s12, %s276_s12 }
   0x6   : > { %p12446_p4 = pneg %p12859_p2  ;;  %p12777_p11 = scmp.lt.s32.totalorder %s12768_s14, %s12768_s14 }
   0x8   : > { %p12447_p5 = pnand %p12450_p3, %p12446_p4  ;;  %p12778_p12 = por %p12777_p11, %p12776_p10 }
   0xa   : > { %p12759_p6 = pneg %p12447_p5 }
   0xc   : > { %p12771_p8 = pnand %p12769_p7, %p12759_p6 }
   0xe   : > { %p12772_p9 = pneg %p12771_p8 }
  0x10   : > { %p12779_p13 = pnand %p12778_p12, %p12772_p9 }
  0x12   : > { %12782 = shalt.err (!%p12779_p13)
}
  0x13   : > { %s12796_s15 = smov 64   ;;  %s12797_s16 = smov 4  }
  0x14   : > { %12449 = dma.hbm_to_vmem [thread:$0]  (!%p12447_p5), %s17801_s7, 9216, %s276_s12, [#allocation4], %s12796_s15, %s12796_s15, %s12797_s16  }
  0x15   : > { %302 = sbr.rel (%p12859_p2) target bundleno = 1298 (0x512), region = 56 }
  0x1a   : > { %12788 = dma.done.wait (%p12450_p3), [#allocation4], 9216  }
  0x1b   : > { %12790 = vsyncadd (%p12450_p3), [#allocation4], 4294958080  ;;  %v12798_v0 = vmov 0   ;;  %v12464_v1 = vld [vmem:[%s17797_s3 + $0x78] sm:$0xff]   ;;  %v12466_v3 = vld [vmem:[%s17797_s3 + $0x70] sm:$0xff]   ;;  %p338_p0 = scmp.lt.s32.totalorder %s12855_s10, 1 }
  0x1c   : > { %349 = vst [vmem:[#allocation2] sm:$0xf] %v12798_v0  ;;  %350 = vst [vmem:[#allocation2 + $0x4] sm:$0xf] %v12798_v0  ;;  %v12465_v2 = vld [vmem:[%s17797_s3 + $0x38] sm:$0xff]   ;;  %11434 = vmatprep.subr.bf16.mxu0 %v12464_v1  ;;  %v12467_v4 = vld [vmem:[%s17797_s3 + $0x30] sm:$0xff]  }
  0x1d   : > { %351 = vst [vmem:[#allocation2 + $0x8] sm:$0xf] %v12798_v0  ;;  %352 = vst [vmem:[#allocation2 + $0xc] sm:$0xf] %v12798_v0  ;;  %11486 = vmatprep.subr.bf16.mxu1 %v12465_v2  ;;  %11435 = vmatpush3.bf16.msra.mxu0 %v12464_v1  ;;  %v12468_v5 = vld [vmem:[%s17797_s3 + $0x68] sm:$0xff]   ;;  %s18722_s10 = smov (!%p338_p0, %s12855_s10), 1 }
  0x1e   : > { %353 = vst [vmem:[#allocation2 + $0x10] sm:$0xf] %v12798_v0  ;;  %354 = vst [vmem:[#allocation2 + $0x14] sm:$0xf] %v12798_v0  ;;  %11487 = vmatpush3.bf16.msra.mxu1 %v12465_v2  ;;  %11436 = vmatprep.subr.bf16.mxu0 %v12466_v3  ;;  %v12469_v6 = vld [vmem:[%s17797_s3 + $0x28] sm:$0xff]   ;;  %v12470_v7 = vld [vmem:[%s17797_s3 + $0x60] sm:$0xff]  }
  0x1f   : > { %355 = vst [vmem:[#allocation2 + $0x18] sm:$0xf] %v12798_v0  ;;  %356 = vst [vmem:[#allocation2 + $0x1c] sm:$0xf] %v12798_v0  ;;  %11488 = vmatprep.subr.bf16.mxu1 %v12467_v4  ;;  %v12471_v8 = vld [vmem:[%s17797_s3 + $0x20] sm:$0xff]   ;;  %s10896_s16 = sshll.u32 %s18722_s10, 8 }
  0x20   : > { %357 = vst [vmem:[#allocation2 + $0x20] sm:$0xf] %v12798_v0  ;;  %358 = vst [vmem:[#allocation2 + $0x24] sm:$0xf] %v12798_v0  ;;  %v12472_v9 = vld [vmem:[%s17797_s3 + $0x58] sm:$0xff]   ;;  %s12917_s23 = scalar_lea.vmem %s17794_s0, %s10896_s16  ;;  %v12474_v11 = vld [vmem:[%s17797_s3 + $0x50] sm:$0xff]   ;;  %s17538_s18 = scalar_lea.vmem %s17803_s9, %s10896_s16 }
  0x21   : > { %359 = vst [vmem:[#allocation2 + $0x28] sm:$0xf] %v12798_v0  ;;  %360 = vst [vmem:[#allocation2 + $0x2c] sm:$0xf] %v12798_v0  ;;  %11437 = vmatpush3.bf16.msra.mxu0 %v12466_v3  ;;  %v12473_v10 = vld [vmem:[%s17797_s3 + $0x18] sm:$0xff]   ;;  %v394_v14 = vld [vmem:[%s12917_s23] sm:$0xff] }
  0x22   : > { %361 = vst [vmem:[#allocation2 + $0x30] sm:$0xf] %v12798_v0  ;;  %362 = vst [vmem:[#allocation2 + $0x34] sm:$0xf] %v12798_v0  ;;  %11489 = vmatpush3.bf16.msra.mxu1 %v12467_v4  ;;  %11438 = vmatprep.subr.bf16.mxu0 %v12468_v5  ;;  %v12925_v12 = vld [vmem:[%s17795_s1] ss:$0 sm:$0xff] }
  0x23   : > { %363 = vst [vmem:[#allocation2 + $0x38] sm:$0xf] %v12798_v0  ;;  %364 = vst [vmem:[#allocation2 + $0x3c] sm:$0xf] %v12798_v0  ;;  %11490 = vmatprep.subr.bf16.mxu1 %v12469_v6  ;;  %v12930_v13 = vld [vmem:[%s17796_s2] ss:$0 sm:$0xff]  ;;  %v402_v17 = vmul.f32 %v12925_v12, %v394_v14 }
  0x24   : > { %365 = vst [vmem:[#allocation2 + $0x40] sm:$0xf] %v12798_v0  ;;  %366 = vst [vmem:[#allocation2 + $0x44] sm:$0xf] %v12798_v0  ;;  %vm17805_vm0 = vsmask.f32 1280 }
  0x25   : > { %367 = vst [vmem:[#allocation2 + $0x48] sm:$0xf] %v12798_v0  ;;  %368 = vst [vmem:[#allocation2 + $0x4c] sm:$0xf] %v12798_v0  ;;  %11439 = vmatpush3.bf16.msra.mxu0 %v12468_v5  ;;  %vm419_vm1 = vsmask.f32 5392  ;;  %v410_v22 = vadd.f32 %v12930_v13, %v402_v17 }
  0x26   : > { %369 = vst [vmem:[#allocation2 + $0x50] sm:$0xf] %v12798_v0  ;;  %370 = vst [vmem:[#allocation2 + $0x54] sm:$0xf] %v12798_v0  ;;  %11491 = vmatpush3.bf16.msra.mxu1 %v12469_v6  ;;  %11440 = vmatprep.subr.bf16.mxu0 %v12470_v7  ;;  %v12475_v15 = vld [vmem:[%s17797_s3 + $0x10] sm:$0xff]   ;;  %v395_v16 = vld [vmem:[%s12917_s23 + $0x8] sm:$0xff] }
  0x27   : > { %371 = vst [vmem:[#allocation2 + $0x58] sm:$0xf] %v12798_v0  ;;  %372 = vst [vmem:[#allocation2 + $0x5c] sm:$0xf] %v12798_v0  ;;  %11492 = vmatprep.subr.bf16.mxu1 %v12471_v8  ;;  %vm17806_vm2 = vsmask.f32 7942  ;;  %v403_v19 = vmul.f32 %v12925_v12, %v395_v16  ;;  %v10898_v30 = vpack.c.bf16 %v410_v22, %v410_v22 }
  0x28   : > { %373 = vst [vmem:[#allocation2 + $0x60] sm:$0xf] %v12798_v0  ;;  %374 = vst [vmem:[#allocation2 + $0x64] sm:$0xf] %v12798_v0  ;;  %v1101_v18 = vld [vmem:[#allocation2] sm:$0xf] }
  0x29   : > { %375 = vst [vmem:[#allocation2 + $0x68] sm:$0xf] %v12798_v0  ;;  %376 = vst [vmem:[#allocation2 + $0x6c] sm:$0xf] %v12798_v0  ;;  %11441 = vmatpush3.bf16.msra.mxu0 %v12470_v7  ;;  %vm443_vm3 = vcmask 60417   ;;  %vm17804_vm4 = vcmask 58368   ;;  %v411_v27 = vadd.f32 %v12930_v13, %v403_v19 }
  0x2a   : > { %377 = vst [vmem:[#allocation2 + $0x70] sm:$0xf] %v12798_v0  ;;  %378 = vst [vmem:[#allocation2 + $0x74] sm:$0xf] %v12798_v0  ;;  %11493 = vmatpush3.bf16.msra.mxu1 %v12471_v8  ;;  %11442 = vmatprep.subr.bf16.mxu0 %v12472_v9  ;;  %v1102_v20 = vld [vmem:[#allocation2 + $0x4] sm:$0xf] }
  0x2b   : > { %379 = vst [vmem:[#allocation2 + $0x78] sm:$0xf] %v12798_v0  ;;  %380 = vst [vmem:[#allocation2 + $0x7c] sm:$0xf] %v12798_v0  ;;  %11494 = vmatprep.subr.bf16.mxu1 %v12473_v10  ;;  %v10326_v21 = vld [vmem:[%s12917_s23 + $0x10] sm:$0xff]  ;;  %vm494_vm5 = vcmask 60418   ;;  %v10402_v23 = vcombine.low %v1101_v18, %v1102_v20  ;;  %v10899_v36 = vpack.c.bf16 %v411_v27, %v411_v27 }
  0x2c   : > { %381 = vst [vmem:[#allocation2 + $0x80] sm:$0xf] %v12798_v0  ;;  %382 = vst [vmem:[#allocation2 + $0x84] sm:$0xf] %v12798_v0  ;;  %v10327_v24 = vld [vmem:[%s12917_s23 + $0x18] sm:$0xff]  ;;  %v459_v25 = vmul.f32 %v10326_v21, %v12925_v12  ;;  %v12476_v26 = vld [vmem:[%s17797_s3 + $0x48] sm:$0xff]  }
  0x2d   : > { %383 = vst [vmem:[#allocation2 + $0x88] sm:$0xf] %v12798_v0  ;;  %384 = vst [vmem:[#allocation2 + $0x8c] sm:$0xf] %v12798_v0  ;;  %11443 = vmatpush3.bf16.msra.mxu0 %v12472_v9  ;;  %vm469_vm6 = vsmask.f32 2304  ;;  %v460_v28 = vmul.f32 %v10327_v24, %v12925_v12  ;;  %11502 = vmatprep.mubr.bf16.mxu1 %v10402_v23 }
  0x2e   : > { %385 = vst [vmem:[#allocation2 + $0x90] sm:$0xf] %v12798_v0  ;;  %386 = vst [vmem:[#allocation2 + $0x94] sm:$0xf] %v12798_v0  ;;  %vm470_vm7 = vsmask.f32 6416  ;;  %11495 = vmatpush3.bf16.msra.mxu1 %v12473_v10  ;;  %11444 = vmatprep.subr.bf16.mxu0 %v12474_v11  ;;  %v461_v33 = vadd.f32 %v12930_v13, %v459_v25 }
  0x2f   : > { %387 = vst [vmem:[#allocation2 + $0x98] sm:$0xf] %v12798_v0  ;;  %388 = vst [vmem:[#allocation2 + $0x9c] sm:$0xf] %v12798_v0  ;;  %vm495_vm8 = vsmask.f32 7946  ;;  %11496 = vmatprep.subr.bf16.mxu1 %v12475_v15  ;;  %v462_v37 = vadd.f32 %v12930_v13, %v460_v28 }
  0x30   : > { %389 = vst [vmem:[#allocation2 + $0xa0] sm:$0xf] %v12798_v0  ;;  %vm544_vm9 = vcmask 60419   ;;  %vm545_vm10 = vsmask.f32 7950  ;;  %v12477_v29 = vld [vmem:[%s17797_s3 + $0x8] sm:$0xff]   ;;  %v10900_v44 = vpack.c.bf16 %v461_v33, %v461_v33  ;;  %vm12968_vm15 = vmand %vm443_vm3, %vm17806_vm2 }
  0x31   : > { %vm17823_vm11 = vcmask 60416   ;;  %v1266_v31 = vshrl.u32 %v10402_v23, 16  ;;  %v1268_v32 = vshll.u32 %v10402_v23, 16  ;;  %vm501_vm12 = vcmask 59392   ;;  %v10330_v34 = vld [vmem:[%s12917_s23 + $0x20] sm:$0xff]  ;;  %v10331_v35 = vld [vmem:[%s12917_s23 + $0x28] sm:$0xff]  ;;  %11445 = vmatpush3.bf16.msra.mxu0 %v12474_v11  ;;  %vm12974_vm13 = vmor %vm17805_vm0, %vm419_vm1 }
  0x32   : > { %v509_v38 = vmul.f32 %v10330_v34, %v12925_v12  ;;  %v510_v39 = vmul.f32 %v10331_v35, %v12925_v12  ;;  %v12478_v40 = vld [vmem:[%s17797_s3 + $0x40] sm:$0xff]   ;;  %v422_v41 = vshrl.u32 %v10898_v30, 16  ;;  %v425_v42 = vshll.u32 %v10898_v30, 16  ;;  %11497 = vmatpush3.bf16.msra.mxu1 %v12475_v15  ;;  %11446 = vmatprep.subr.bf16.mxu0 %v12476_v26  ;;  %v446_v57 = vld [vmem:[#allocation2 + $0x8] sm:$0xe]  ;;  %vm12981_vm3 = vmand %vm17804_vm4, %vm17805_vm0 }
  0x33   : > { %v1270_v43 = vrot.slane %v1268_v32, 1  ;;  %v431_v45 = vshrl.u32 %v10899_v36, 16  ;;  %v434_v46 = vshll.u32 %v10899_v36, 16  ;;  %v10901_v47 = vpack.c.bf16 %v462_v37, %v462_v37  ;;  %11498 = vmatprep.subr.bf16.mxu1 %v12477_v29  ;;  %v12479_v49 = vld [vmem:[%s17797_s3] sm:$0xff]   ;;  %v453_v62 = vld [vmem:[#allocation2 + $0x10] sm:$0x3]  ;;  %vm12994_vm1 = vmand %vm494_vm5, %vm495_vm8 }
  0x34   : > { %v511_v48 = vadd.f32 %v12930_v13, %v509_v38  ;;  %vm520_vm14 = vsmask.f32 7440  ;;  %v424_v50 = vrot.slane %v422_v41, 6  ;;  %v427_v51 = vrot.slane %v425_v42, 7  ;;  %v497_v6 = vld [vmem:[#allocation2 + $0x10] sm:$0xc]  ;;  %vm13000_vm4 = vmor %vm469_vm6, %vm470_vm7 }
  0x35   : > { %v12964_v52 = vor.u32 %v1270_v43, %v1266_v31  ;;  %v473_v53 = vshrl.u32 %v10900_v44, 16  ;;  %v433_v54 = vrot.slane %v431_v45, 6  ;;  %v436_v55 = vrot.slane %v434_v46, 7  ;;  %11447 = vmatpush3.bf16.msra.mxu0 %v12476_v26  ;;  %v12988_v7 = vld [vmem:[%s17797_s3 + $0xb8] sm:$0xff]   ;;  %vm13008_vm5 = vmand %vm544_vm9, %vm545_vm10  ;;  %v10334_v27 = vld [vmem:[%s12917_s23 + $0x30] sm:$0xff] }
  0x36   : > { %v476_v58 = vshll.u32 %v10900_v44, 16  ;;  %v482_v59 = vshrl.u32 %v10901_v47, 16  ;;  %v17934_v60 = vmov 0  ;;  %v428_v61 = vor.u32 %v427_v51, %v424_v50  ;;  %11499 = vmatpush3.bf16.msra.mxu1 %v12477_v29  ;;  %11448 = vmatprep.subr.bf16.mxu0 %v12478_v40  ;;  %v547_v16 = vld [vmem:[#allocation2 + $0x18] sm:$0x8]  ;;  %vm13022_vm8 = vmand %vm501_vm12, %vm469_vm6  ;;  %v10338_v35 = vld [vmem:[%s12917_s23 + $0x40] sm:$0xff] }
  0x37   : > { %v17935_v60 = vsel %vm12974_vm13, 4294967295, %v17934_v60  ;;  %v475_v63 = vrot.slane %v473_v53, 5  ;;  %v485_v0 = vshll.u32 %v10901_v47, 16  ;;  %v512_v1 = vadd.f32 %v12930_v13, %v510_v39  ;;  %11500 = vmatprep.subr.bf16.mxu1 %v12479_v49  ;;  %v10335_v28 = vld [vmem:[%s12917_s23 + $0x38] sm:$0xff]  ;;  %v10342_v41 = vld [vmem:[%s12917_s23 + $0x50] sm:$0xff] }
  0x38   : > { %17936 = vst [vmem:[#allocation6_spill] sm:$0xff] %v17935_v60  ;;  %v437_v2 = vor.u32 %v436_v55, %v433_v54  ;;  %v478_v4 = vrot.slane %v476_v58, 6  ;;  %v484_v5 = vrot.slane %v482_v59, 5  ;;  %v10902_v8 = vpack.c.bf16 %v511_v48, %v511_v48  ;;  %v503_v33 = vld [vmem:[#allocation2 + $0x18] sm:$0x7] }
  0x39   : > { %v429_v9 = vrot.slane %v428_v61, 4  ;;  %v447_v10 = vsel %vm12968_vm15, %v428_v61, %v446_v57  ;;  %v487_v11 = vrot.slane %v485_v0, 6  ;;  %v10903_v15 = vpack.c.bf16 %v512_v1, %v512_v1  ;;  %11449 = vmatpush3.bf16.msra.mxu0 %v12478_v40  ;;  %v10339_v40 = vld [vmem:[%s12917_s23 + $0x48] sm:$0xff]  ;;  %v10343_v46 = vld [vmem:[%s12917_s23 + $0x58] sm:$0xff]  ;;  %v553_v54 = vld [vmem:[#allocation2 + $0x20] sm:$0xf] }
  0x3a   : > { %448 = vst [vmem:[#allocation2 + $0x8] sm:$0xe] %v447_v10  ;;  %v439_v17 = vrot.slane %v437_v2, 4  ;;  %v479_v19 = vor.u32 %v478_v4, %v475_v63  ;;  %v523_v20 = vshll.u32 %v10902_v8, 16  ;;  %v526_v21 = vshrl.u32 %v10902_v8, 16  ;;  %11501 = vmatpush3.bf16.msra.mxu1 %v12479_v49  ;;  %11538 = vmatprep.subr.bf16.mxu0 %v12988_v7 }
  0x3b   : > { %v438_v22 = vsel %vm12974_vm13, %v429_v9, %v437_v2  ;;  %v488_v23 = vor.u32 %v487_v11, %v484_v5  ;;  %v532_v24 = vshll.u32 %v10903_v15, 16  ;;  %v536_v26 = vshrl.u32 %v10903_v15, 16  ;;  %v1054_v3 = vld [vmem:[#allocation2 + $0x84] sm:$0x8]  ;;  %v1058_v25 = vld [vmem:[#allocation2 + $0x8c] sm:$0xf] }
  0x3c   : > { %vm592_vm7 = vsmask.f32 7938  ;;  %450 = vst.msk [vmem:[#allocation2 + $0xc] sm:$0xf] %vm17823_vm11, %v438_v22  ;;  %v454_v29 = vsel %vm12981_vm3, %v439_v17, %v453_v62  ;;  %v480_v30 = vrot.slane %v479_v19, 4  ;;  %v498_v31 = vsel %vm12994_vm1, %v479_v19, %v497_v6 }
  0x3d   : > { %v525_v34 = vrot.slane %v523_v20, 5  ;;  %vm569_vm9 = vsmask.f32 256  ;;  %vm570_vm10 = vsmask.f32 4368  ;;  %v490_v36 = vrot.slane %v488_v23, 4 }
  0x3e   : > { %455 = vst [vmem:[#allocation2 + $0x10] sm:$0x3] %v454_v29  ;;  %499 = vst [vmem:[#allocation2 + $0x10] sm:$0xc] %v498_v31  ;;  %v528_v37 = vrot.slane %v526_v21, 4  ;;  %v534_v38 = vrot.slane %v532_v24, 5  ;;  %v489_v42 = vsel %vm13000_vm4, %v480_v30, %v488_v23  ;;  %v559_v44 = vmul.f32 %v10334_v27, %v12925_v12 }
  0x3f   : > { %v538_v39 = vrot.slane %v536_v26, 4  ;;  %v548_v43 = vsel %vm13008_vm5, %v525_v34, %v547_v16  ;;  %v560_v45 = vmul.f32 %v10335_v28, %v12925_v12  ;;  %500 = vst.msk [vmem:[#allocation2 + $0x14] sm:$0xf] %vm17823_vm11, %v489_v42  ;;  %v504_v47 = vsel %vm13022_vm8, %v490_v36, %v503_v33  ;;  %v594_v22 = vld [vmem:[#allocation2 + $0x24] sm:$0xf] }
  0x40   : > { %vm17947_vm6 = vsmask.f32 3328  ;;  %v529_v49 = vor.u32 %v528_v37, %v525_v34  ;;  %549 = vst [vmem:[#allocation2 + $0x18] sm:$0x8] %v548_v43  ;;  %v606_v51 = vmul.f32 %v10338_v35, %v12925_v12  ;;  %505 = vst [vmem:[#allocation2 + $0x18] sm:$0x7] %v504_v47  ;;  %v561_v55 = vadd.f32 %v12930_v13, %v559_v44 }
  0x41   : > { %vm13041_vm12 = vmor %vm17947_vm6, %vm520_vm14  ;;  %v539_v50 = vor.u32 %v538_v39, %v534_v38  ;;  %v562_v57 = vadd.f32 %v12930_v13, %v560_v45  ;;  %v607_v58 = vmul.f32 %v10339_v40, %v12925_v12  ;;  %v648_v59 = vmul.f32 %v10342_v41, %v12925_v12  ;;  %v600_v44 = vld [vmem:[#allocation2 + $0x2c] sm:$0x1]  ;;  %v10346_v45 = vld [vmem:[%s12917_s23 + $0x60] sm:$0xff] }
  0x42   : > { %vm17950_vm2 = vmmov %vm17947_vm6  ;;  %v530_v61 = vrot.slane %v529_v49, 4  ;;  %v608_v63 = vadd.f32 %v12930_v13, %v606_v51  ;;  %v649_v0 = vmul.f32 %v10343_v46, %v12925_v12  ;;  %v10904_v1 = vpack.c.bf16 %v561_v55, %v561_v55  ;;  %v12486_v49 = vld [vmem:[%s17797_s3 + $0xb0] sm:$0xff]  }
  0x43   : > { %vm13048_vm0 = vmand %vm17823_vm11, %vm17950_vm2  ;;  %v540_v62 = vrot.slane %v539_v50, 4  ;;  %v10905_v2 = vpack.c.bf16 %v562_v57, %v562_v57  ;;  %v609_v4 = vadd.f32 %v12930_v13, %v607_v58  ;;  %v650_v5 = vadd.f32 %v12930_v13, %v648_v59  ;;  %v12481_v6 = vld [vmem:[#allocation2 + $0x8] sm:$0xff]   ;;  %v12500_v55 = vld [vmem:[%s17797_s3 + $0xf0] sm:$0xff]  }
  0x44   : > { %v535_v8 = vsel %vm13041_vm12, %v530_v61, %v534_v38  ;;  %v10906_v10 = vpack.c.bf16 %v608_v63, %v608_v63  ;;  %v651_v11 = vadd.f32 %v12930_v13, %v649_v0  ;;  %v573_v15 = vshrl.u32 %v10904_v1, 16  ;;  %11503 = vmatmul.mubr.bf16.vlgmr.msra.gmra.mxu1 %v12481_v6  ;;  %vm13068_vm2 = vmand %vm17823_vm11, %vm592_vm7  ;;  %v12498_v38 = vld [vmem:[%s17797_s3 + $0xf8] sm:$0xff]  }
  0x45   : > { %v554_v9 = vsel %vm13048_vm0, %v540_v62, %v553_v54  ;;  %550 = vst.msk [vmem:[#allocation2 + $0x1c] sm:$0xf] %vm17823_vm11, %v535_v8  ;;  %v576_v16 = vshll.u32 %v10904_v1, 16  ;;  %v581_v17 = vshrl.u32 %v10905_v2, 16  ;;  %v584_v19 = vshll.u32 %v10905_v2, 16  ;;  %vm13076_vm14 = vmor %vm569_vm9, %vm570_vm10  ;;  %11590 = vmatprep.subr.bf16.mxu1 %v12498_v38  ;;  %v10347_v8 = vld [vmem:[%s12917_s23 + $0x68] sm:$0xff] }
  0x46   : > { %555 = vst [vmem:[#allocation2 + $0x20] sm:$0xf] %v554_v9  ;;  %v1273_v20 = vshll.u32 %v12481_v6, 16  ;;  %v1277_v21 = vshrl.u32 %v12481_v6, 16  ;;  %v617_v23 = vshrl.u32 %v10906_v10, 16  ;;  %v620_v24 = vshll.u32 %v10906_v10, 16  ;;  %11591 = vmatpush3.bf16.msra.mxu1 %v12498_v38 }
  0x47   : > { %v12482_v26 = vld [vmem:[#allocation2 + $0x10] sm:$0xff]   ;;  %v575_v27 = vrot.slane %v573_v15, 7  ;;  %v583_v29 = vrot.slane %v581_v17, 7  ;;  %v10907_v30 = vpack.c.bf16 %v609_v4, %v609_v4  ;;  %v13072_v31 = vpack.c.bf16 %v650_v5, %v650_v5  ;;  %v638_v54 = vld [vmem:[#allocation2 + $0x2c] sm:$0xe]  ;;  %11592 = vmatprep.subr.bf16.mxu1 %v12500_v55 }
  0x48   : > { %v1275_v33 = vrot.slane %v1273_v20, 1  ;;  %v619_v35 = vrot.slane %v617_v23, 6  ;;  %v622_v36 = vrot.slane %v620_v24, 7  ;;  %v10909_v37 = vpack.c.bf16 %v651_v11, %v651_v11  ;;  %11506 = vmatprep.mubr.bf16.mxu1 %v12482_v26  ;;  %v642_v23 = vld [vmem:[#allocation2 + $0x34] sm:$0x3]  ;;  %v12489_v24 = vld [vmem:[%s17797_s3 + $0xa8] sm:$0xff]  }
  0x49   : > { %v1281_v39 = vshll.u32 %v12482_v26, 16  ;;  %v1285_v40 = vshrl.u32 %v12482_v26, 16  ;;  %v578_v41 = vor.u32 %v576_v16, %v575_v27  ;;  %v579_v42 = vrot.slane %v575_v27, 4  ;;  %v13360_v48 = vld [vmem:[#allocation2 + $0x10] sm:$0xff]  }
  0x4a   : > { %vm17957_vm7 = vcmask 57344   ;;  %vm17960_vm10 = vsmask.f32 7424  ;;  %v1279_v47 = vor.u32 %v1277_v21, %v1275_v33  ;;  %v586_v50 = vor.u32 %v584_v19, %v583_v29  ;;  %11593 = vmatpush3.bf16.msra.mxu1 %v12500_v55 }
  0x4b   : > { %vm13085_vm6 = vmand %vm17957_vm7, %vm569_vm9  ;;  %v1276_v46 = vsel %vm17960_vm10, %v12964_v52, %v1275_v33  ;;  %v588_v51 = vrot.slane %v583_v29, 4  ;;  %v1283_v57 = vrot.slane %v1281_v39, 1  ;;  %v595_v58 = vsel %vm13068_vm2, %v578_v41, %v594_v22  ;;  %v10350_v33 = vld [vmem:[%s12917_s23 + $0x70] sm:$0xff]  ;;  %v12492_v41 = vld [vmem:[%s17797_s3 + $0xa0] sm:$0xff]  }
  0x4c   : > { %11450 = vmatprep.mubr.bf16.mxu0 %v1276_v46  ;;  %v623_v59 = vor.u32 %v622_v36, %v619_v35  ;;  %v626_v52 = vshrl.u32 %v10907_v30, 16  ;;  %v12484_v61 = vld [vmem:[#allocation2 + $0x18] sm:$0xff]   ;;  %596 = vst [vmem:[#allocation2 + $0x24] sm:$0xf] %v595_v58  ;;  %v587_v62 = vsel %vm13076_vm14, %v579_v42, %v586_v50  ;;  %v629_v0 = vshll.u32 %v10907_v30, 16  ;;  %vm17961_vm9 = vmmov %vm17960_vm10 }
  0x4d   : > { %v601_v63 = vsel %vm13085_vm6, %v588_v51, %v600_v44  ;;  %v690_v1 = vmul.f32 %v10346_v45, %v12925_v12  ;;  %v1284_v2 = vsel %vm17961_vm9, %v1279_v47, %v1283_v57  ;;  %v1287_v4 = vor.u32 %v1285_v40, %v1283_v57  ;;  %597 = vst.msk [vmem:[#allocation2 + $0x28] sm:$0xf] %vm17823_vm11, %v587_v62  ;;  %v10351_v35 = vld [vmem:[%s12917_s23 + $0x78] sm:$0xff]  ;;  %vm17962_vm7 = vmmov %vm17961_vm9  ;;  %v680_v40 = vld [vmem:[#allocation2 + $0x34] sm:$0xc] }
  0x4e   : > { %602 = vst [vmem:[#allocation2 + $0x2c] sm:$0x1] %v601_v63  ;;  %v639_v5 = vsel %vm12968_vm15, %v623_v59, %v638_v54  ;;  %v624_v6 = vrot.slane %v623_v59, 4  ;;  %11451 = vmatmul.mubr.bf16.vlgmr.msra.gmra.mxu0 %v1284_v2  ;;  %v1289_v9 = vshll.u32 %v12484_v61, 16  ;;  %v1293_v10 = vshrl.u32 %v12484_v61, 16  ;;  %11507 = vmatmul.mubr.bf16.gmra.mxu1 %v12484_v61  ;;  %vm17963_vm10 = vmmov %vm17962_vm7 }
  0x4f   : > { %640 = vst [vmem:[#allocation2 + $0x2c] sm:$0xe] %v639_v5  ;;  %v628_v11 = vrot.slane %v626_v52, 6  ;;  %v631_v15 = vrot.slane %v629_v0, 7  ;;  %11539 = vmatpush3.bf16.msra.mxu0 %v12988_v7  ;;  %v659_v16 = vshrl.u32 %v13072_v31, 16  ;;  %v662_v17 = vshll.u32 %v13072_v31, 16  ;;  %vm17964_vm9 = vmmov %vm17962_vm7 }
  0x50   : > { %v668_v19 = vshrl.u32 %v10909_v37, 16  ;;  %v671_v20 = vshll.u32 %v10909_v37, 16  ;;  %v1291_v21 = vrot.slane %v1289_v9, 1  ;;  %11540 = vmatprep.subr.bf16.mxu0 %v12486_v49  ;;  %v692_v26 = vadd.f32 %v12930_v13, %v690_v1  ;;  %v684_v46 = vld [vmem:[#allocation2 + $0x3c] sm:$0x7]  ;;  %v12505_v9 = vld [vmem:[%s17797_s3 + $0xe0] sm:$0xff]  }
  0x51   : > { %v632_v22 = vor.u32 %v631_v15, %v628_v11  ;;  %v691_v7 = vmul.f32 %v10347_v8, %v12925_v12  ;;  %v661_v27 = vrot.slane %v659_v16, 5  ;;  %v664_v29 = vrot.slane %v662_v17, 6  ;;  %v722_v62 = vld [vmem:[#allocation2 + $0x3c] sm:$0x8] }
  0x52   : > { %v670_v30 = vrot.slane %v668_v19, 5  ;;  %v673_v31 = vrot.slane %v671_v20, 6  ;;  %v1292_v36 = vsel %vm17962_vm7, %v1287_v4, %v1291_v21  ;;  %v1295_v37 = vor.u32 %v1293_v10, %v1291_v21  ;;  %v12495_v17 = vld [vmem:[%s17797_s3 + $0x98] sm:$0xff]  }
  0x53   : > { %v633_v38 = vsel %vm12974_vm13, %v624_v6, %v632_v22  ;;  %v634_v39 = vrot.slane %v632_v22, 4  ;;  %11454 = vmatprep.mubr.bf16.mxu0 %v1292_v36  ;;  %v12485_v42 = vld [vmem:[#allocation2 + $0x20] sm:$0xff]   ;;  %11541 = vmatpush3.bf16.msra.mxu0 %v12486_v49  ;;  %v665_v44 = vor.u32 %v664_v29, %v661_v27  ;;  %v10910_v47 = vpack.c.bf16 %v692_v26, %v692_v26  ;;  %v12503_v49 = vld [vmem:[%s17797_s3 + $0xe8] sm:$0xff]  }
  0x54   : > { %641 = vst.msk [vmem:[#allocation2 + $0x30] sm:$0xf] %vm17823_vm11, %v633_v38  ;;  %v674_v45 = vor.u32 %v673_v31, %v670_v30  ;;  %11542 = vmatprep.subr.bf16.mxu0 %v12489_v24  ;;  %v693_v51 = vadd.f32 %v12930_v13, %v691_v7  ;;  %v732_v54 = vmul.f32 %v10350_v33, %v12925_v12  ;;  %v1297_v57 = vshll.u32 %v12485_v42, 16  ;;  %v10358_v30 = vld [vmem:[%s12917_s23 + $0x90] sm:$0xff]  ;;  %v10359_v31 = vld [vmem:[%s12917_s23 + $0x98] sm:$0xff] }
  0x55   : > { %v643_v50 = vsel %vm12981_vm3, %v634_v39, %v642_v23  ;;  %v733_v55 = vmul.f32 %v10351_v35, %v12925_v12  ;;  %v1301_v59 = vshrl.u32 %v12485_v42, 16  ;;  %11510 = vmatprep.mubr.bf16.mxu1 %v12485_v42  ;;  %v681_v52 = vsel %vm12994_vm1, %v665_v44, %v680_v40  ;;  %11594 = vmatprep.subr.bf16.mxu1 %v12503_v49  ;;  %v10354_v23 = vld [vmem:[%s12917_s23 + $0x80] sm:$0xff]  ;;  %v12508_v38 = vld [vmem:[%s17797_s3 + $0xd8] sm:$0xff]  }
  0x56   : > { %v12487_v58 = vld [vmem:[#allocation2 + $0x28] sm:$0xff]   ;;  %644 = vst [vmem:[#allocation2 + $0x34] sm:$0x3] %v643_v50  ;;  %v666_v61 = vrot.slane %v665_v44, 4  ;;  %682 = vst [vmem:[#allocation2 + $0x34] sm:$0xc] %v681_v52  ;;  %v10911_v1 = vpack.c.bf16 %v693_v51, %v693_v51  ;;  %11595 = vmatpush3.bf16.msra.mxu1 %v12503_v49  ;;  %v734_v29 = vadd.f32 %v12930_v13, %v732_v54 }
  0x57   : > { %v676_v63 = vrot.slane %v674_v45, 4  ;;  %v701_v0 = vshll.u32 %v10910_v47, 16  ;;  %v704_v2 = vshrl.u32 %v10910_v47, 16  ;;  %v1299_v4 = vrot.slane %v1297_v57, 1  ;;  %11511 = vmatmul.mubr.bf16.gmra.mxu1 %v12487_v58  ;;  %11543 = vmatpush3.bf16.msra.mxu0 %v12489_v24  ;;  %v10355_v24 = vld [vmem:[%s12917_s23 + $0x88] sm:$0xff] }
  0x58   : > { %v1305_v5 = vshll.u32 %v12487_v58, 16  ;;  %v1309_v6 = vshrl.u32 %v12487_v58, 16  ;;  %v675_v8 = vsel %vm13000_vm4, %v666_v61, %v674_v45  ;;  %v710_v16 = vshll.u32 %v10911_v1, 16  ;;  %11544 = vmatprep.subr.bf16.mxu0 %v12492_v41  ;;  %11596 = vmatprep.subr.bf16.mxu1 %v12505_v9  ;;  %v726_v40 = vld [vmem:[#allocation2 + $0x44] sm:$0xf] }
  0x59   : > { %683 = vst.msk [vmem:[#allocation2 + $0x38] sm:$0xf] %vm17823_vm11, %v675_v8  ;;  %v685_v10 = vsel %vm13022_vm8, %v676_v63, %v684_v46  ;;  %v703_v11 = vrot.slane %v701_v0, 5  ;;  %v706_v15 = vrot.slane %v704_v2, 4  ;;  %v1300_v19 = vsel %vm17963_vm10, %v1295_v37, %v1299_v4  ;;  %v12499_v46 = vld [vmem:[%s17797_s3 + $0x90] sm:$0xff]   ;;  %vm17965_vm10 = vmmov %vm17962_vm7 }
  0x5a   : > { %v1303_v20 = vor.u32 %v1301_v59, %v1299_v4  ;;  %v1307_v21 = vrot.slane %v1305_v5, 1  ;;  %686 = vst [vmem:[#allocation2 + $0x3c] sm:$0x7] %v685_v10  ;;  %v714_v22 = vshrl.u32 %v10911_v1, 16  ;;  %11455 = vmatmul.mubr.bf16.gmra.mxu0 %v1300_v19  ;;  %v712_v27 = vrot.slane %v710_v16, 5  ;;  %11597 = vmatpush3.bf16.msra.mxu1 %v12505_v9  ;;  %v12509_v59 = vld [vmem:[%s17797_s3 + $0xd0] sm:$0xff]  }
  0x5b   : > { %v723_v26 = vsel %vm13008_vm5, %v703_v11, %v722_v62  ;;  %v707_v7 = vor.u32 %v706_v15, %v703_v11  ;;  %11545 = vmatpush3.bf16.msra.mxu0 %v12492_v41  ;;  %v735_v37 = vadd.f32 %v12930_v13, %v733_v55  ;;  %v10912_v42 = vpack.c.bf16 %v734_v29, %v734_v29  ;;  %v762_v0 = vld [vmem:[#allocation2 + $0x48] sm:$0xf]  ;;  %v766_v4 = vld [vmem:[#allocation2 + $0x50] sm:$0x1] }
  0x5c   : > { %v1308_v33 = vsel %vm17964_vm9, %v1303_v20, %v1307_v21  ;;  %v1311_v35 = vor.u32 %v1309_v6, %v1307_v21  ;;  %724 = vst [vmem:[#allocation2 + $0x3c] sm:$0x8] %v723_v26  ;;  %v716_v36 = vrot.slane %v714_v22, 4  ;;  %v772_v44 = vmul.f32 %v10354_v23, %v12925_v12  ;;  %11546 = vmatprep.subr.bf16.mxu0 %v12495_v17  ;;  %v12504_v15 = vld [vmem:[%s17797_s3 + $0x88] sm:$0xff]   ;;  %vm17966_vm9 = vmmov %vm17962_vm7 }
  0x5d   : > { %11458 = vmatprep.mubr.bf16.mxu0 %v1308_v33  ;;  %v708_v39 = vrot.slane %v707_v7, 4  ;;  %v773_v45 = vmul.f32 %v10355_v24, %v12925_v12  ;;  %v12488_v41 = vld [vmem:[#allocation2 + $0x30] sm:$0xff]   ;;  %v10913_v50 = vpack.c.bf16 %v735_v37, %v735_v37  ;;  %v814_v51 = vmul.f32 %v10358_v30, %v12925_v12  ;;  %11598 = vmatprep.subr.bf16.mxu1 %v12508_v38  ;;  %v12513_v22 = vld [vmem:[%s17797_s3 + $0xc8] sm:$0xff]   ;;  %v12511_v37 = vld [vmem:[%s17797_s3 + $0x80] sm:$0xff]  }
  0x5e   : > { %v717_v47 = vor.u32 %v716_v36, %v712_v27  ;;  %v815_v54 = vmul.f32 %v10359_v31, %v12925_v12  ;;  %v743_v49 = vshrl.u32 %v10912_v42, 16  ;;  %v746_v57 = vshll.u32 %v10912_v42, 16  ;;  %11514 = vmatprep.mubr.bf16.mxu1 %v12488_v41  ;;  %11599 = vmatpush3.bf16.msra.mxu1 %v12508_v38  ;;  %v10363_v29 = vld [vmem:[%s12917_s23 + $0xa8] sm:$0xff] }
  0x5f   : > { %v713_v55 = vsel %vm13041_vm12, %v708_v39, %v712_v27  ;;  %v774_v58 = vadd.f32 %v12930_v13, %v772_v44  ;;  %v1313_v52 = vshll.u32 %v12488_v41, 16  ;;  %v1317_v61 = vshrl.u32 %v12488_v41, 16  ;;  %11547 = vmatpush3.bf16.msra.mxu0 %v12495_v17  ;;  %11600 = vmatprep.subr.bf16.mxu1 %v12509_v59  ;;  %v10362_v27 = vld [vmem:[%s12917_s23 + $0xa0] sm:$0xff] }
  0x60   : > { %v718_v62 = vrot.slane %v717_v47, 4  ;;  %725 = vst.msk [vmem:[#allocation2 + $0x40] sm:$0xf] %vm17823_vm11, %v713_v55  ;;  %v751_v63 = vshrl.u32 %v10913_v50, 16  ;;  %v745_v1 = vrot.slane %v743_v49, 7  ;;  %v754_v2 = vshll.u32 %v10913_v50, 16  ;;  %11548 = vmatprep.subr.bf16.mxu0 %v12499_v46 }
  0x61   : > { %v775_v5 = vadd.f32 %v12930_v13, %v773_v45  ;;  %v10914_v6 = vpack.c.bf16 %v774_v58, %v774_v58  ;;  %v1315_v8 = vrot.slane %v1313_v52, 1  ;;  %v816_v11 = vadd.f32 %v12930_v13, %v814_v51  ;;  %v12514_v41 = vld [vmem:[%s17797_s3 + $0xc0] sm:$0xff]  }
  0x62   : > { %v727_v9 = vsel %vm13048_vm0, %v718_v62, %v726_v40  ;;  %v753_v10 = vrot.slane %v751_v63, 7  ;;  %v748_v17 = vor.u32 %v746_v57, %v745_v1  ;;  %v749_v19 = vrot.slane %v745_v1, 4  ;;  %11601 = vmatpush3.bf16.msra.mxu1 %v12509_v59  ;;  %v804_v59 = vld [vmem:[#allocation2 + $0x50] sm:$0xe]  ;;  %v808_v63 = vld [vmem:[#allocation2 + $0x58] sm:$0x3] }
  0x63   : > { %v12490_v16 = vld [vmem:[#allocation2 + $0x38] sm:$0xff]   ;;  %728 = vst [vmem:[#allocation2 + $0x44] sm:$0xf] %v727_v9  ;;  %v10915_v20 = vpack.c.bf16 %v775_v5, %v775_v5  ;;  %v783_v21 = vshrl.u32 %v10914_v6, 16  ;;  %v1316_v23 = vsel %vm17962_vm7, %v1311_v35, %v1315_v8  ;;  %v1319_v24 = vor.u32 %v1317_v61, %v1315_v8  ;;  %11549 = vmatpush3.bf16.msra.mxu0 %v12499_v46 }
  0x64   : > { %v756_v26 = vor.u32 %v754_v2, %v753_v10  ;;  %v758_v7 = vrot.slane %v753_v10, 4  ;;  %11459 = vmatmul.mubr.bf16.gmra.mxu0 %v1316_v23  ;;  %v1321_v30 = vshll.u32 %v12490_v16, 16  ;;  %v1325_v31 = vshrl.u32 %v12490_v16, 16  ;;  %11515 = vmatmul.mubr.bf16.gmra.mxu1 %v12490_v16  ;;  %v846_v16 = vld [vmem:[#allocation2 + $0x58] sm:$0xc] }
  0x65   : > { %v763_v33 = vsel %vm13068_vm2, %v748_v17, %v762_v0  ;;  %v785_v36 = vrot.slane %v783_v21, 6  ;;  %v786_v39 = vshll.u32 %v10914_v6, 16  ;;  %v792_v40 = vshrl.u32 %v10915_v20, 16  ;;  %11550 = vmatprep.subr.bf16.mxu0 %v12504_v15  ;;  %11602 = vmatprep.subr.bf16.mxu1 %v12513_v22  ;;  %v10366_v17 = vld [vmem:[%s12917_s23 + $0xb0] sm:$0xff] }
  0x66   : > { %v757_v35 = vsel %vm13076_vm14, %v749_v19, %v756_v26  ;;  %764 = vst [vmem:[#allocation2 + $0x48] sm:$0xf] %v763_v33  ;;  %v767_v38 = vsel %vm13085_vm6, %v758_v7, %v766_v4  ;;  %v1323_v42 = vrot.slane %v1321_v30, 1  ;;  %v795_v44 = vshll.u32 %v10915_v20, 16  ;;  %11603 = vmatpush3.bf16.msra.mxu1 %v12513_v22 }
  0x67   : > { %765 = vst.msk [vmem:[#allocation2 + $0x4c] sm:$0xf] %vm17823_vm11, %v757_v35  ;;  %768 = vst [vmem:[#allocation2 + $0x50] sm:$0x1] %v767_v38  ;;  %v817_v45 = vadd.f32 %v12930_v13, %v815_v54  ;;  %v10916_v46 = vpack.c.bf16 %v816_v11, %v816_v11  ;;  %v788_v47 = vrot.slane %v786_v39, 7  ;;  %v794_v50 = vrot.slane %v792_v40, 6  ;;  %11551 = vmatpush3.bf16.msra.mxu0 %v12504_v15 }
  0x68   : > { %v856_v51 = vmul.f32 %v10362_v27, %v12925_v12  ;;  %v857_v55 = vmul.f32 %v10363_v29, %v12925_v12  ;;  %v1324_v49 = vsel %vm17965_vm10, %v1319_v24, %v1323_v42  ;;  %v1327_v57 = vor.u32 %v1325_v31, %v1323_v42  ;;  %11552 = vmatprep.subr.bf16.mxu0 %v12511_v37  ;;  %v13208_v54 = vld [vmem:[%s17797_s3 + $0x138] sm:$0xff]   ;;  %v850_v38 = vld [vmem:[#allocation2 + $0x60] sm:$0x7]  ;;  %v888_v39 = vld [vmem:[#allocation2 + $0x60] sm:$0x8] }
  0x69   : > { %v797_v58 = vrot.slane %v795_v44, 7  ;;  %v10917_v52 = vpack.c.bf16 %v817_v45, %v817_v45  ;;  %11462 = vmatprep.mubr.bf16.mxu0 %v1324_v49  ;;  %v789_v62 = vor.u32 %v788_v47, %v785_v36  ;;  %v825_v0 = vshrl.u32 %v10916_v46, 16  ;;  %11604 = vmatprep.subr.bf16.mxu1 %v12514_v41  ;;  %v10367_v45 = vld [vmem:[%s12917_s23 + $0xb8] sm:$0xff]  ;;  %vm17967_vm10 = vmmov %vm17962_vm7 }
  0x6a   : > { %v13210_v61 = vld [vmem:[#allocation2 + $0x40] sm:$0xff]   ;;  %v828_v1 = vshll.u32 %v10916_v46, 16  ;;  %v858_v2 = vadd.f32 %v12930_v13, %v856_v51  ;;  %v859_v8 = vadd.f32 %v12930_v13, %v857_v55  ;;  %11605 = vmatpush3.bf16.msra.mxu1 %v12514_v41  ;;  %v898_v31 = vmul.f32 %v10366_v17, %v12925_v12 }
  0x6b   : > { %v798_v4 = vor.u32 %v797_v58, %v794_v50  ;;  %v834_v5 = vshrl.u32 %v10917_v52, 16  ;;  %v837_v6 = vshll.u32 %v10917_v52, 16  ;;  %v1329_v9 = vshll.u32 %v13210_v61, 16  ;;  %11518 = vmatprep.mubr.bf16.mxu1 %v13210_v61  ;;  %11553 = vmatpush3.bf16.msra.mxu0 %v12511_v37  ;;  %v10370_v46 = vld [vmem:[%s12917_s23 + $0xc0] sm:$0xff]  ;;  %v10371_v52 = vld [vmem:[%s12917_s23 + $0xc8] sm:$0xff] }
  0x6c   : > { %v1333_v10 = vshrl.u32 %v13210_v61, 16  ;;  %v790_v11 = vrot.slane %v789_v62, 4  ;;  %v805_v15 = vsel %vm12968_vm15, %v789_v62, %v804_v59  ;;  %v827_v20 = vrot.slane %v825_v0, 5  ;;  %11642 = vmatprep.subr.bf16.mxu0 %v13208_v54  ;;  %v13242_v58 = vld [vmem:[%s17796_s2] ss:$0 sm:$0xff]  ;;  %v10374_v62 = vld [vmem:[%s12917_s23 + $0xd0] sm:$0xff] }
  0x6d   : > { %806 = vst [vmem:[#allocation2 + $0x50] sm:$0xe] %v805_v15  ;;  %v800_v19 = vrot.slane %v798_v4, 4  ;;  %v830_v21 = vrot.slane %v828_v1, 6  ;;  %v836_v22 = vrot.slane %v834_v5, 5  ;;  %v1331_v13 = vrot.slane %v1329_v9, 1 }
  0x6e   : > { %v13221_v23 = vld [vmem:[#allocation2 + $0x48] sm:$0xff]   ;;  %v799_v24 = vsel %vm12974_vm13, %v790_v11, %v798_v4  ;;  %v839_v26 = vrot.slane %v837_v6, 6  ;;  %v10918_v7 = vpack.c.bf16 %v858_v2, %v858_v2  ;;  %v10919_v30 = vpack.c.bf16 %v859_v8, %v859_v8  ;;  %v13258_v15 = vld [vmem:[%s17795_s1] ss:$0 sm:$0xff] }
  0x6f   : > { %807 = vst.msk [vmem:[#allocation2 + $0x54] sm:$0xf] %vm17823_vm11, %v799_v24  ;;  %v809_v27 = vsel %vm12981_vm3, %v800_v19, %v808_v63  ;;  %v831_v29 = vor.u32 %v830_v21, %v827_v20  ;;  %v1332_v33 = vsel %vm17966_vm9, %v1327_v57, %v1331_v13  ;;  %v1335_v36 = vor.u32 %v1333_v10, %v1331_v13  ;;  %v892_v11 = vld [vmem:[#allocation2 + $0x68] sm:$0xf]  ;;  %vm17968_vm9 = vmmov %vm17962_vm7 }
  0x70   : > { %v1337_v37 = vshll.u32 %v13221_v23, 16  ;;  %v1341_v35 = vshrl.u32 %v13221_v23, 16  ;;  %11519 = vmatmul.mubr.bf16.gmra.mxu1 %v13221_v23  ;;  %810 = vst [vmem:[#allocation2 + $0x58] sm:$0x3] %v809_v27  ;;  %11463 = vmatmul.mubr.bf16.gmra.mxu0 %v1332_v33  ;;  %v840_v42 = vor.u32 %v839_v26, %v836_v22  ;;  %v867_v44 = vshll.u32 %v10918_v7, 16 }
  0x71   : > { %v832_v40 = vrot.slane %v831_v29, 4  ;;  %v847_v12 = vsel %vm12994_vm1, %v831_v29, %v846_v16  ;;  %v870_v47 = vshrl.u32 %v10918_v7, 16  ;;  %v876_v50 = vshll.u32 %v10919_v30, 16  ;;  %v928_v27 = vld [vmem:[#allocation2 + $0x6c] sm:$0xf] }
  0x72   : > { %v1339_v41 = vrot.slane %v1337_v37, 1  ;;  %848 = vst [vmem:[#allocation2 + $0x58] sm:$0xc] %v847_v12  ;;  %v880_v51 = vshrl.u32 %v10919_v30, 16  ;;  %v842_v49 = vrot.slane %v840_v42, 4  ;;  %v869_v57 = vrot.slane %v867_v44, 5 }
  0x73   : > { %v841_v55 = vsel %vm13000_vm4, %v832_v40, %v840_v42  ;;  %v900_v59 = vadd.f32 %v13242_v58, %v898_v31  ;;  %v872_v1 = vrot.slane %v870_v47, 4  ;;  %v878_v2 = vrot.slane %v876_v50, 5  ;;  %v10375_v40 = vld [vmem:[%s12917_s23 + $0xd8] sm:$0xff] }
  0x74   : > { %v1340_v63 = vsel %vm17962_vm7, %v1335_v36, %v1339_v41  ;;  %v1343_v0 = vor.u32 %v1341_v35, %v1339_v41  ;;  %849 = vst.msk [vmem:[#allocation2 + $0x5c] sm:$0xf] %vm17823_vm11, %v841_v55  ;;  %v851_v4 = vsel %vm13022_vm8, %v842_v49, %v850_v38  ;;  %v889_v5 = vsel %vm13008_vm5, %v869_v57, %v888_v39  ;;  %v10378_v41 = vld [vmem:[%s12917_s23 + $0xe0] sm:$0xff] }
  0x75   : > { %11466 = vmatprep.mubr.bf16.mxu0 %v1340_v63  ;;  %v882_v6 = vrot.slane %v880_v51, 4  ;;  %v10920_v8 = vpack.c.bf16 %v900_v59, %v900_v59  ;;  %852 = vst [vmem:[#allocation2 + $0x60] sm:$0x7] %v851_v4  ;;  %v873_v10 = vor.u32 %v872_v1, %v869_v57  ;;  %890 = vst [vmem:[#allocation2 + $0x60] sm:$0x8] %v889_v5 }
  0x76   : > { %v13253_v9 = vld [vmem:[#allocation2 + $0x50] sm:$0xff]   ;;  %v899_v16 = vmul.f32 %v13258_v15, %v10367_v45  ;;  %v938_v17 = vmul.f32 %v13258_v15, %v10370_v46  ;;  %v939_v19 = vmul.f32 %v13258_v15, %v10371_v52  ;;  %v980_v13 = vmul.f32 %v13258_v15, %v10374_v62 }
  0x77   : > { %v883_v20 = vor.u32 %v882_v6, %v878_v2  ;;  %v909_v21 = vshrl.u32 %v10920_v8, 16  ;;  %v912_v22 = vshll.u32 %v10920_v8, 16  ;;  %v1345_v24 = vshll.u32 %v13253_v9, 16  ;;  %11522 = vmatprep.mubr.bf16.mxu1 %v13253_v9  ;;  %v932_v52 = vld [vmem:[#allocation2 + $0x74] sm:$0x1] }
  0x78   : > { %v1349_v26 = vshrl.u32 %v13253_v9, 16  ;;  %v874_v7 = vrot.slane %v873_v10, 4  ;;  %v901_v29 = vadd.f32 %v13242_v58, %v899_v16  ;;  %v940_v33 = vadd.f32 %v13242_v58, %v938_v17  ;;  %v970_v6 = vld [vmem:[#allocation2 + $0x74] sm:$0xe] }
  0x79   : > { %v884_v30 = vrot.slane %v883_v20, 4  ;;  %v911_v31 = vrot.slane %v909_v21, 7  ;;  %v941_v36 = vadd.f32 %v13242_v58, %v939_v19  ;;  %v1347_v37 = vrot.slane %v1345_v24, 1  ;;  %v13291_v20 = vld [vmem:[%s17797_s3 + $0x178] sm:$0xff]   ;;  %v13447_v43 = vld [vmem:[#allocation2 + $0x50] sm:$0xff]  }
  0x7a   : > { %v879_v35 = vsel %vm13041_vm12, %v874_v7, %v878_v2  ;;  %v10921_v38 = vpack.c.bf16 %v901_v29, %v901_v29  ;;  %v982_v39 = vadd.f32 %v13242_v58, %v980_v13  ;;  %v10922_v46 = vpack.c.bf16 %v940_v33, %v940_v33  ;;  %11694 = vmatprep.subr.bf16.mxu1 %v13291_v20 }
  0x7b   : > { %v13274_v42 = vld [vmem:[#allocation2 + $0x58] sm:$0xff]   ;;  %891 = vst.msk [vmem:[#allocation2 + $0x64] sm:$0xf] %vm17823_vm11, %v879_v35  ;;  %v893_v12 = vsel %vm13048_vm0, %v884_v30, %v892_v11  ;;  %v914_v44 = vor.u32 %v912_v22, %v911_v31  ;;  %v915_v45 = vrot.slane %v911_v31, 4  ;;  %v1348_v47 = vsel %vm17967_vm10, %v1343_v0, %v1347_v37 }
  0x7c   : > { %v1351_v50 = vor.u32 %v1349_v26, %v1347_v37  ;;  %894 = vst [vmem:[#allocation2 + $0x68] sm:$0xf] %v893_v12  ;;  %v917_v51 = vshrl.u32 %v10921_v38, 16  ;;  %v920_v55 = vshll.u32 %v10921_v38, 16  ;;  %11467 = vmatmul.mubr.bf16.gmra.mxu0 %v1348_v47  ;;  %v1353_v49 = vshll.u32 %v13274_v42, 16  ;;  %11523 = vmatmul.mubr.bf16.gmra.mxu1 %v13274_v42  ;;  %v10379_v26 = vld [vmem:[%s12917_s23 + $0xe8] sm:$0xff] }
  0x7d   : > { %v1357_v57 = vshrl.u32 %v13274_v42, 16  ;;  %v929_v59 = vsel %vm13068_vm2, %v914_v44, %v928_v27  ;;  %v949_v62 = vshrl.u32 %v10922_v46, 16  ;;  %v952_v1 = vshll.u32 %v10922_v46, 16  ;;  %v10382_v38 = vld [vmem:[%s12917_s23 + $0xf0] sm:$0xff] }
  0x7e   : > { %930 = vst [vmem:[#allocation2 + $0x6c] sm:$0xf] %v929_v59  ;;  %v919_v63 = vrot.slane %v917_v51, 7  ;;  %v10923_v0 = vpack.c.bf16 %v941_v36, %v941_v36  ;;  %v10924_v2 = vpack.c.bf16 %v982_v39, %v982_v39  ;;  %v1355_v4 = vrot.slane %v1353_v49, 1 }
  0x7f   : > { %v951_v5 = vrot.slane %v949_v62, 6  ;;  %v981_v8 = vmul.f32 %v13258_v15, %v10375_v40  ;;  %v1022_v10 = vmul.f32 %v13258_v15, %v10378_v41  ;;  %v954_v17 = vrot.slane %v952_v1, 7 }
  0x80   : > { %v922_v11 = vor.u32 %v920_v55, %v919_v63  ;;  %v924_v16 = vrot.slane %v919_v63, 4  ;;  %v958_v19 = vshrl.u32 %v10923_v0, 16  ;;  %v1356_v21 = vsel %vm17968_vm9, %v1351_v50, %v1355_v4  ;;  %v1012_v50 = vld [vmem:[#allocation2 + $0x7c] sm:$0xc] }
  0x81   : > { %v1359_v22 = vor.u32 %v1357_v57, %v1355_v4  ;;  %v961_v13 = vshll.u32 %v10923_v0, 16  ;;  %v991_v24 = vshrl.u32 %v10924_v2, 16  ;;  %11470 = vmatprep.mubr.bf16.mxu0 %v1356_v21  ;;  %v955_v30 = vor.u32 %v954_v17, %v951_v5 }
  0x82   : > { %v13295_v7 = vld [vmem:[#allocation2 + $0x60] sm:$0xff]   ;;  %v923_v27 = vsel %vm13076_vm14, %v915_v45, %v922_v11  ;;  %v933_v29 = vsel %vm13085_vm6, %v924_v16, %v932_v52  ;;  %v960_v31 = vrot.slane %v958_v19, 6  ;;  %v994_v37 = vshll.u32 %v10924_v2, 16  ;;  %v974_v45 = vld [vmem:[#allocation2 + $0x7c] sm:$0x3] }
  0x83   : > { %931 = vst.msk [vmem:[#allocation2 + $0x70] sm:$0xf] %vm17823_vm11, %v923_v27  ;;  %934 = vst [vmem:[#allocation2 + $0x74] sm:$0x1] %v933_v29  ;;  %v963_v33 = vrot.slane %v961_v13, 7  ;;  %v993_v36 = vrot.slane %v991_v24, 5  ;;  %v983_v35 = vadd.f32 %v13242_v58, %v981_v8  ;;  %11526 = vmatprep.mubr.bf16.mxu1 %v13295_v7  ;;  %v971_v12 = vsel %vm12968_vm15, %v955_v30, %v970_v6 }
  0x84   : > { %v1361_v39 = vshll.u32 %v13295_v7, 16  ;;  %v1365_v40 = vshrl.u32 %v13295_v7, 16  ;;  %v956_v44 = vrot.slane %v955_v30, 4  ;;  %972 = vst [vmem:[#allocation2 + $0x74] sm:$0xe] %v971_v12  ;;  %v996_v47 = vrot.slane %v994_v37, 6  ;;  %vm17969_vm15 = vmmov %vm17962_vm7 }
  0x85   : > { %v13310_v46 = vld [vmem:[#allocation2 + $0x68] sm:$0xff]   ;;  %v964_v41 = vor.u32 %v963_v33, %v960_v31  ;;  %v10925_v51 = vpack.c.bf16 %v983_v35, %v983_v35  ;;  %v1024_v55 = vadd.f32 %v13242_v58, %v1022_v10  ;;  %v1023_v57 = vmul.f32 %v13258_v15, %v10379_v26  ;;  %v1016_v31 = vld [vmem:[#allocation2 + $0x84] sm:$0x7] }
  0x86   : > { %v1363_v49 = vrot.slane %v1361_v39, 1  ;;  %v1064_v59 = vmul.f32 %v13258_v15, %v10382_v38  ;;  %v1369_v52 = vshll.u32 %v13310_v46, 16  ;;  %v1373_v56 = vshrl.u32 %v13310_v46, 16  ;;  %11527 = vmatmul.mubr.bf16.gmra.mxu1 %v13310_v46 }
  0x87   : > { %v965_v62 = vsel %vm12974_vm13, %v956_v44, %v964_v41  ;;  %v966_v63 = vrot.slane %v964_v41, 4  ;;  %v997_v2 = vor.u32 %v996_v47, %v993_v36  ;;  %v1000_v4 = vshrl.u32 %v10925_v51, 16 }
  0x88   : > { %v1364_v1 = vsel %vm17969_vm15, %v1359_v22, %v1363_v49  ;;  %v1367_v0 = vor.u32 %v1365_v40, %v1363_v49  ;;  %973 = vst.msk [vmem:[#allocation2 + $0x78] sm:$0xf] %vm17823_vm11, %v965_v62  ;;  %v1371_v5 = vrot.slane %v1369_v52, 1  ;;  %v1003_v8 = vshll.u32 %v10925_v51, 16  ;;  %v2237_v62 = vld [vmem:[#allocation2 + $0x8] sm:$0xe] }
  0x89   : > { %11471 = vmatmul.mubr.bf16.gmra.mxu0 %v1364_v1  ;;  %v975_v6 = vsel %vm12981_vm3, %v966_v63, %v974_v45  ;;  %v10926_v10 = vpack.c.bf16 %v1024_v55, %v1024_v55  ;;  %v1013_v11 = vsel %vm12994_vm1, %v997_v2, %v1012_v50  ;;  %v998_v16 = vrot.slane %v997_v2, 4  ;;  %vm17970_vm3 = vmmov %vm17962_vm7  ;;  %v13350_v2 = vld [vmem:[#allocation2 + $0xc] sm:$0xf] }
  0x8a   : > { %976 = vst [vmem:[#allocation2 + $0x7c] sm:$0x3] %v975_v6  ;;  %v1002_v17 = vrot.slane %v1000_v4, 5  ;;  %v1025_v19 = vadd.f32 %v13242_v58, %v1023_v57  ;;  %v1372_v21 = vsel %vm17962_vm7, %v1367_v0, %v1371_v5  ;;  %1014 = vst [vmem:[#allocation2 + $0x7c] sm:$0xc] %v1013_v11  ;;  %v1005_v22 = vrot.slane %v1003_v8, 6 }
  0x8b   : > { %v1033_v13 = vshll.u32 %v10926_v10, 16  ;;  %11474 = vmatprep.mubr.bf16.mxu0 %v1372_v21  ;;  %v13328_v24 = vld [vmem:[#allocation2 + $0x70] sm:$0xff]   ;;  %v1036_v27 = vshrl.u32 %v10926_v10, 16  ;;  %v1066_v29 = vadd.f32 %v13242_v58, %v1064_v59  ;;  %v1375_v30 = vor.u32 %v1373_v56, %v1371_v5  ;;  %vm17972_vm1 = vmmov %vm17970_vm3 }
  0x8c   : > { %v10927_v26 = vpack.c.bf16 %v1025_v19, %v1025_v19  ;;  %v1006_v14 = vor.u32 %v1005_v22, %v1002_v17  ;;  %v1377_v36 = vshll.u32 %v13328_v24, 16  ;;  %v1381_v37 = vshrl.u32 %v13328_v24, 16  ;;  %11530 = vmatprep.mubr.bf16.mxu1 %v13328_v24  ;;  %v1094_v5 = vld [vmem:[#allocation2 + $0x90] sm:$0xf]  ;;  %v1899_v22 = vld [vmem:[#allocation2] sm:$0xe] }
  0x8d   : > { %v1035_v33 = vrot.slane %v1033_v13, 5  ;;  %v1038_v35 = vrot.slane %v1036_v27, 4  ;;  %v10928_v50 = vpack.c.bf16 %v1066_v29, %v1066_v29 }
  0x8e   : > { %v1042_v38 = vshll.u32 %v10927_v26, 16  ;;  %v1007_v39 = vsel %vm13000_vm4, %v998_v16, %v1006_v14  ;;  %v1008_v40 = vrot.slane %v1006_v14, 4  ;;  %v1046_v44 = vshrl.u32 %v10927_v26, 16  ;;  %vm17971_vm4 = vmmov %vm17970_vm3  ;;  %v13372_v14 = vld [vmem:[#allocation2 + $0x18] sm:$0xff]  }
  0x8f   : > { %v1055_v12 = vsel %vm13008_vm5, %v1035_v33, %v1054_v3  ;;  %v1379_v45 = vrot.slane %v1377_v36, 1  ;;  %1015 = vst.msk [vmem:[#allocation2 + $0x80] sm:$0xf] %vm17823_vm11, %v1007_v39  ;;  %v1039_v41 = vor.u32 %v1038_v35, %v1035_v33  ;;  %v1075_v59 = vshrl.u32 %v10928_v50, 16  ;;  %vm17973_vm5 = vmmov %vm17972_vm1 }
  0x90   : > { %1056 = vst [vmem:[#allocation2 + $0x84] sm:$0x8] %v1055_v12  ;;  %v1044_v47 = vrot.slane %v1042_v38, 5  ;;  %v1017_v51 = vsel %vm13022_vm8, %v1008_v40, %v1016_v31  ;;  %v1048_v55 = vrot.slane %v1046_v44, 4  ;;  %v1078_v56 = vshll.u32 %v10928_v50, 16  ;;  %v13374_v31 = vld [vmem:[#allocation2 + $0x20] sm:$0xff]   ;;  %vm17974_vm8 = vmmov %vm17972_vm1 }
  0x91   : > { %v1380_v49 = vsel %vm17970_vm3, %v1375_v30, %v1379_v45  ;;  %v13342_v18 = vld [vmem:[#allocation2 + $0x78] sm:$0xff]   ;;  %1018 = vst [vmem:[#allocation2 + $0x84] sm:$0x7] %v1017_v51  ;;  %v1040_v57 = vrot.slane %v1039_v41, 4  ;;  %v1383_v63 = vor.u32 %v1381_v37, %v1379_v45  ;;  %v13348_v0 = vrot.slane %v1075_v59, 7  ;;  %v12733_v45 = vld [vmem:[#allocation2 + $0x8] sm:$0xff]  }
  0x92   : > { %11475 = vmatmul.mubr.bf16.gmra.mxu0 %v1380_v49  ;;  %v1049_v52 = vor.u32 %v1048_v55, %v1044_v47  ;;  %v1385_v1 = vshll.u32 %v13342_v18, 16  ;;  %11531 = vmatmul.mubr.bf16.gmra.mxu1 %v13342_v18  ;;  %v1389_v10 = vshrl.u32 %v13342_v18, 16  ;;  %v13358_v16 = vcombine.low %v2237_v62, %v13350_v2  ;;  %v12732_v30 = vld [vmem:[#allocation2 + $0x4] sm:$0xf] }
  0x93   : > { %v1045_v32 = vsel %vm13041_vm12, %v1040_v57, %v1044_v47  ;;  %v1080_v8 = vor.u32 %v1078_v56, %v13348_v0  ;;  %v2385_v26 = vrot.slane %v13360_v48, 1  ;;  %v10453_v28 = vcombine.low %v1899_v22, %v12732_v30  ;;  %v10383_v56 = vld [vmem:[%s12917_s23 + $0xf8] sm:$0xff] }
  0x94   : > { %v1050_v4 = vrot.slane %v1049_v52, 4  ;;  %1057 = vst.msk [vmem:[#allocation2 + $0x88] sm:$0xf] %vm17823_vm11, %v1045_v32  ;;  %v1387_v6 = vrot.slane %v1385_v1, 1  ;;  %v2384_v3 = vrot.slane %v13358_v16, 1  ;;  %v1922_v41 = vrot.slane %v12733_v45, 1 }
  0x95   : > { %v1095_v19 = vsel %vm13068_vm2, %v1080_v8, %v1094_v5  ;;  %v1921_v44 = vrot.slane %v10453_v28, 1  ;;  %v2387_v47 = vrot.slane %v13372_v14, 1  ;;  %v2389_v51 = vrot.slane %v13374_v31, 1  ;;  %v13391_v52 = vld [vmem:[#allocation2 + $0x28] sm:$0xff]   ;;  %v13396_v1 = vld [vmem:[#allocation2 + $0x30] sm:$0xff]   ;;  %v12735_v8 = vld [vmem:[#allocation2 + $0x18] sm:$0xff]  }
  0x96   : > { %v1059_v11 = vsel %vm13048_vm0, %v1050_v4, %v1058_v25  ;;  %v1388_v17 = vsel %vm17971_vm4, %v1383_v63, %v1387_v6  ;;  %1096 = vst [vmem:[#allocation2 + $0x90] sm:$0xf] %v1095_v19  ;;  %v1391_v13 = vor.u32 %v1389_v10, %v1387_v6  ;;  %vm17841_vm0 = vcmask 1046528   ;;  %v12535_v32 = vld [vmem:[%s17797_s3 + $0x170] sm:$0xff]  }
  0x97   : > { %1060 = vst [vmem:[#allocation2 + $0x8c] sm:$0xf] %v1059_v11  ;;  %11478 = vmatprep.mubr.bf16.mxu0 %v1388_v17  ;;  %v2386_v37 = vsel %vm17841_vm0, %v2384_v3, %v2385_v26  ;;  %v1923_v25 = vsel %vm17841_vm0, %v1921_v44, %v1922_v41  ;;  %v2388_v59 = vsel %vm17841_vm0, %v2385_v26, %v2387_v47  ;;  %v12734_v4 = vld [vmem:[#allocation2 + $0x10] sm:$0xff]   ;;  %v1926_v10 = vrot.slane %v12735_v8, 1  ;;  %v12538_v17 = vld [vmem:[%s17797_s3 + $0x168] sm:$0xff]   ;;  %v13415_v26 = vld [vmem:[#allocation2 + $0x38] sm:$0xff]  }
  0x98   : > { %v13365_v21 = vld [vmem:[#allocation2 + $0x80] sm:$0xff]   ;;  %v2390_v63 = vsel %vm17841_vm0, %v2387_v47, %v2389_v51  ;;  %v1924_v5 = vrot.slane %v12734_v4, 1  ;;  %v1065_v6 = vmul.f32 %v13258_v15, %v10383_v56  ;;  %v2391_v11 = vrot.slane %v13391_v52, 1  ;;  %v13444_v56 = vld [vmem:[#allocation2 + $0x48] sm:$0xff]   ;;  %v12739_v4 = vld [vmem:[#allocation2 + $0x38] sm:$0xff]  }
  0x99   : > { %v1393_v53 = vshll.u32 %v13365_v21, 16  ;;  %11534 = vmatprep.mubr.bf16.mxu1 %v13365_v21  ;;  %v1397_v29 = vshrl.u32 %v13365_v21, 16  ;;  %v2393_v22 = vrot.slane %v13396_v1, 1  ;;  %v1081_v30 = vrot.slane %v13348_v0, 4  ;;  %v12524_v0 = vld [vmem:[%s17797_s3 + $0x128] sm:$0xff]  }
  0x9a   : > { %v1067_v19 = vadd.f32 %v13242_v58, %v1065_v6  ;;  %v1927_v15 = vsel %vm17841_vm0, %v1924_v5, %v1926_v10  ;;  %v2392_v3 = vsel %vm17841_vm0, %v2389_v51, %v2391_v11  ;;  %v2395_v45 = vrot.slane %v13415_v26, 1  ;;  %v12530_v6 = vld [vmem:[%s17797_s3 + $0x118] sm:$0xff]  }
  0x9b   : > { %v1395_v27 = vrot.slane %v1393_v53, 1  ;;  %v2394_v28 = vsel %vm17841_vm0, %v2391_v11, %v2393_v22  ;;  %v2399_v8 = vrot.slane %v13444_v56, 1  ;;  %v12548_v11 = vld [vmem:[%s17797_s3 + $0x148] sm:$0xff]   ;;  %vm17836_vm12 = vcmask 1045504  }
  0x9c   : > { %v10929_v53 = vpack.c.bf16 %v1067_v19, %v1067_v19  ;;  %vm17826_vm2 = vsmask.f32 6400 }
  0x9d   : > { %v1396_v33 = vsel %vm17972_vm1, %v1391_v13, %v1395_v27  ;;  %v13380_v35 = vld [vmem:[#allocation2 + $0x90] ss:$0 sps:$4 sm:$0x11]   ;;  %v1399_v38 = vor.u32 %v1397_v29, %v1395_v27  ;;  %v1925_v13 = vsel %vm17841_vm0, %v1922_v41, %v1924_v5  ;;  %v13417_v27 = vld [vmem:[#allocation2 + $0x40] sm:$0xff]   ;;  %v1934_v5 = vrot.slane %v12739_v4, 1 }
  0x9e   : > { %v13377_v36 = vld [vmem:[#allocation2 + $0x88] sm:$0xff]   ;;  %11479 = vmatmul.mubr.bf16.gmra.mxu0 %v1396_v33  ;;  %v1409_v12 = vshll.u32 %v13380_v35, 16  ;;  %v1083_v58 = vshrl.u32 %v10929_v53, 16  ;;  %v1086_v29 = vshll.u32 %v10929_v53, 16  ;;  %v12540_v33 = vld [vmem:[%s17797_s3 + $0x160] sm:$0xff]   ;;  %v13466_v53 = vld [vmem:[#allocation2 + $0x58] sm:$0xff]  }
  0x9f   : > { %v1401_v39 = vshll.u32 %v13377_v36, 16  ;;  %v1405_v40 = vshrl.u32 %v13377_v36, 16  ;;  %11535 = vmatmul.mubr.bf16.gmra.mxu1 %v13377_v36  ;;  %v13523_v4 = vld [vmem:[#allocation2 + $0x88] sm:$0xff]  }
  0xa0   : > { %11606 = vmatprep.mubr.bf16.mxu1 %v2386_v37  ;;  %v1411_v55 = vrot.slane %v1409_v12, 1  ;;  %v1098_v37 = vld [vmem:[#allocation2 + $0x98] sm:$0x1]  ;;  %v12737_v12 = vld [vmem:[#allocation2 + $0x28] sm:$0xff]  }
  0xa1   : > { %v1403_v50 = vrot.slane %v1401_v39, 1  ;;  %v1930_v44 = vrot.slane %v12737_v12, 1 }
  0xa3   : > { %v1404_v49 = vsel %vm17973_vm5, %v1399_v38, %v1403_v50  ;;  %v1407_v57 = vor.u32 %v1405_v40, %v1403_v50  ;;  %v12736_v38 = vld [vmem:[#allocation2 + $0x20] sm:$0xff]   ;;  %v1085_v40 = vrot.slane %v1083_v58, 7  ;;  %v12543_v50 = vld [vmem:[%s17797_s3 + $0x158] sm:$0xff]   ;;  %v1936_v58 = vrot.slane %v13210_v61, 1 }
  0xa4   : > { %11482 = vmatprep.mubr.bf16.mxu0 %v1404_v49  ;;  %v1928_v39 = vrot.slane %v12736_v38, 1  ;;  %v13484_v61 = vld [vmem:[%s17797_s3 + $0x1f8] sm:$0xff]   ;;  %v12545_v38 = vld [vmem:[%s17797_s3 + $0x100] sm:$0xff]  }
  0xa5   : > { %v1412_v62 = vsel %vm17974_vm8, %v1407_v57, %v1411_v55  ;;  %v1088_v41 = vor.u32 %v1086_v29, %v1085_v40  ;;  %v1090_v47 = vrot.slane %v1085_v40, 4  ;;  %v1938_v29 = vrot.slane %v13221_v23, 1  ;;  %v13492_v40 = vld [vmem:[#allocation2 + $0x68] sm:$0xff]  }
  0xa6   : > { %11483 = vmatmul.mubr.bf16.gmra.mxu0 %v1412_v62  ;;  %v1929_v51 = vsel %vm17841_vm0, %v1926_v10, %v1928_v39  ;;  %v1931_v57 = vsel %vm17841_vm0, %v1928_v39, %v1930_v44  ;;  %v12544_v62 = vld [vmem:[%s17797_s3 + $0x150] sm:$0xff]   ;;  %v2401_v10 = vrot.slane %v13447_v43, 1 }
  0xa7   : > { %11554 = vmatprep.mubr.bf16.mxu0 %v1923_v25  ;;  %11607 = vmatmul.mubr.bf16.vlgmr.msra.gmra.mxu1 %v2388_v59  ;;  %v1089_v55 = vsel %vm13076_vm14, %v1081_v30, %v1088_v41  ;;  %v1099_v49 = vsel %vm13085_vm6, %v1090_v47, %v1098_v37  ;;  %v12527_v25 = vld [vmem:[%s17797_s3 + $0x120] sm:$0xff]   ;;  %v2396_v59 = vsel %vm17841_vm0, %v2393_v22, %v2395_v45  ;;  %v12534_v22 = vld [vmem:[%s17797_s3 + $0x110] sm:$0xff]   ;;  %v12539_v30 = vld [vmem:[%s17797_s3 + $0x108] sm:$0xff]   ;;  %v2407_v47 = vrot.slane %v13492_v40, 1 }
  0xa8   : > { %11610 = vmatprep.mubr.bf16.mxu1 %v2390_v63  ;;  %11695 = vmatpush3.bf16.msra.mxu1 %v13291_v20  ;;  %v12520_v20 = vld [vmem:[%s17797_s3 + $0x130] sm:$0xff]   ;;  %1097 = vst.msk [vmem:[#allocation2 + $0x94] sm:$0xf] %vm17823_vm11, %v1089_v55  ;;  %1100 = vst [vmem:[#allocation2 + $0x98] sm:$0x1] %v1099_v49  ;;  %v1937_v37 = vsel %vm17841_vm0, %v1934_v5, %v1936_v58  ;;  %v1939_v23 = vsel %vm17841_vm0, %v1936_v58, %v1938_v29  ;;  %v13503_v41 = vld [vmem:[%s17797_s3 + $0x1b8] sm:$0xff]  }
  0xa9   : > { %11696 = vmatprep.subr.bf16.mxu1 %v12535_v32  ;;  %v12738_v63 = vld [vmem:[#allocation2 + $0x30] sm:$0xff]   ;;  %v13514_v49 = vld [vmem:[#allocation2 + $0x80] sm:$0xff]   ;;  %v2726_v58 = vshll.u32 %v13358_v16, 16  ;;  %vm17824_vm14 = vsmask.f32 5376  ;;  %vm17825_vm6 = vcmask 1044480  }
  0xac   : > { %11697 = vmatpush3.bf16.msra.mxu1 %v12535_v32  ;;  %v1932_v32 = vrot.slane %v12738_v63, 1 }
  0xad   : > { %11698 = vmatprep.subr.bf16.mxu1 %v12538_v17 }
  0xae   : > { %11555 = vmatmul.mubr.bf16.vlgmr.msra.gmra.mxu0 %v1925_v13  ;;  %v1935_v19 = vsel %vm17841_vm0, %v1932_v32, %v1934_v5 }
  0xaf   : > { %11643 = vmatpush3.bf16.msra.mxu0 %v13208_v54  ;;  %11558 = vmatprep.mubr.bf16.mxu0 %v1927_v15  ;;  %v2397_v54 = vrot.slane %v13417_v27, 1  ;;  %v2402_v15 = vsel %vm17841_vm0, %v2399_v8, %v2401_v10 }
  0xb0   : > { %11644 = vmatprep.subr.bf16.mxu0 %v12520_v20  ;;  %11611 = vmatmul.mubr.bf16.gmra.mxu1 %v2392_v3  ;;  %v12549_v3 = vld [vmem:[%s17797_s3 + $0x140] sm:$0xff]  }
  0xb1   : > { %11614 = vmatprep.mubr.bf16.mxu1 %v2394_v28  ;;  %11699 = vmatpush3.bf16.msra.mxu1 %v12538_v17  ;;  %v2398_v34 = vsel %vm17841_vm0, %v2395_v45, %v2397_v54  ;;  %v1933_v17 = vsel %vm17841_vm0, %v1930_v44, %v1932_v32  ;;  %v2400_v13 = vsel %vm17841_vm0, %v2397_v54, %v2399_v8  ;;  %v2403_v28 = vrot.slane %v13466_v53, 1  ;;  %v13495_v44 = vld [vmem:[#allocation2 + $0x70] sm:$0xff]  }
  0xb2   : > { %11700 = vmatprep.subr.bf16.mxu1 %v12540_v33  ;;  %v1942_v45 = vrot.slane %v13274_v42, 1  ;;  %v2409_v54 = vrot.slane %v13495_v44, 1  ;;  %v2415_v8 = vrot.slane %v13523_v4, 1 }
  0xb3   : > { %11645 = vmatpush3.bf16.msra.mxu0 %v12520_v20  ;;  %v13469_v20 = vld [vmem:[#allocation2 + $0x60] sm:$0xff]   ;;  %v2404_v39 = vsel %vm17841_vm0, %v2401_v10, %v2403_v28 }
  0xb4   : > { %11646 = vmatprep.subr.bf16.mxu0 %v12524_v0  ;;  %v2410_v55 = vsel %vm17841_vm0, %v2407_v47, %v2409_v54 }
  0xb5   : > { %11701 = vmatpush3.bf16.msra.mxu1 %v12540_v33  ;;  %v2405_v33 = vrot.slane %v13469_v20, 1 }
  0xb6   : > { %11559 = vmatmul.mubr.bf16.gmra.mxu0 %v1929_v51  ;;  %11702 = vmatprep.subr.bf16.mxu1 %v12543_v50  ;;  %v13511_v51 = vld [vmem:[#allocation2 + $0x78] sm:$0xff]  }
  0xb7   : > { %11562 = vmatprep.mubr.bf16.mxu0 %v1931_v57  ;;  %11647 = vmatpush3.bf16.msra.mxu0 %v12524_v0  ;;  %v2406_v12 = vsel %vm17841_vm0, %v2403_v28, %v2405_v33  ;;  %v1940_v0 = vrot.slane %v13253_v9, 1  ;;  %v2408_v42 = vsel %vm17841_vm0, %v2405_v33, %v2407_v47  ;;  %v1944_v57 = vrot.slane %v13295_v7, 1  ;;  %v13526_v7 = vld [vmem:[#allocation2 + $0x90] sm:$0xff]  }
  0xb8   : > { %11615 = vmatmul.mubr.bf16.gmra.mxu1 %v2396_v59  ;;  %11648 = vmatprep.subr.bf16.mxu0 %v12527_v25  ;;  %v2411_v59 = vrot.slane %v13511_v51, 1  ;;  %v2417_v10 = vrot.slane %v13526_v7, 1  ;;  %v1954_v28 = vrot.slane %v13377_v36, 1  ;;  %v2743_v36 = vshll.u32 %v13372_v14, 16 }
  0xb9   : > { %11618 = vmatprep.mubr.bf16.mxu1 %v2398_v34  ;;  %11703 = vmatpush3.bf16.msra.mxu1 %v12543_v50  ;;  %v1941_v50 = vsel %vm17841_vm0, %v1938_v29, %v1940_v0  ;;  %v1943_v9 = vsel %vm17841_vm0, %v1940_v0, %v1942_v45  ;;  %v2413_v34 = vrot.slane %v13514_v49, 1  ;;  %v2731_v29 = vshrl.u32 %v13360_v48, 16 }
  0xba   : > { %11704 = vmatprep.subr.bf16.mxu1 %v12544_v62  ;;  %v2412_v32 = vsel %vm17841_vm0, %v2409_v54, %v2411_v59  ;;  %v1956_v47 = vrot.slane %v13380_v35, 1 }
  0xbb   : > { %11649 = vmatpush3.bf16.msra.mxu0 %v12527_v25  ;;  %v1946_v25 = vrot.slane %v13310_v46, 1  ;;  %v2414_v5 = vsel %vm17841_vm0, %v2411_v59, %v2413_v34  ;;  %v1948_v46 = vrot.slane %v13328_v24, 1  ;;  %v2418_v24 = vsel %vm17841_vm0, %v2415_v8, %v2417_v10 }
  0xbc   : > { %11650 = vmatprep.subr.bf16.mxu0 %v12530_v6  ;;  %v3196_v59 = vrot.slane %v13372_v14, 2  ;;  %v1957_v35 = vsel %vm17841_vm0, %v1954_v28, %v1956_v47 }
  0xbd   : > { %11705 = vmatpush3.bf16.msra.mxu1 %v12544_v62  ;;  %v1945_v62 = vsel %vm17841_vm0, %v1942_v45, %v1944_v57  ;;  %v1947_v63 = vsel %vm17841_vm0, %v1944_v57, %v1946_v25  ;;  %v2740_v45 = vshrl.u32 %v13372_v14, 16  ;;  %v12557_v14 = vld [vmem:[%s17797_s3 + $0x1f0] sm:$0xff]  }
  0xbe   : > { %11563 = vmatmul.mubr.bf16.gmra.mxu0 %v1933_v17  ;;  %11706 = vmatprep.subr.bf16.mxu1 %v12548_v11  ;;  %v12547_v17 = vld [vmem:[#allocation2 + $0x98] ss:$0 sps:$4 sm:$0x11]  }
  0xbf   : > { %11566 = vmatprep.mubr.bf16.mxu0 %v1935_v19  ;;  %11651 = vmatpush3.bf16.msra.mxu0 %v12530_v6  ;;  %v1950_v6 = vrot.slane %v13342_v18, 1  ;;  %v3171_v19 = vld [vmem:[#allocation2 + $0x8] sm:$0xc]  ;;  %v2723_v18 = vshrl.u32 %v13358_v16, 16  ;;  %v2419_v33 = vrot.slane %v12547_v17, 1  ;;  %v2742_v57 = vrot.slane %v2740_v45, 1 }
  0xc0   : > { %11619 = vmatmul.mubr.bf16.gmra.mxu1 %v2400_v13  ;;  %11652 = vmatprep.subr.bf16.mxu0 %v12534_v22  ;;  %v2416_v13 = vsel %vm17841_vm0, %v2413_v34, %v2415_v8  ;;  %v3198_v34 = vrot.slane %v13374_v31, 2  ;;  %v2779_v17 = vshll.u32 %v13415_v26, 16  ;;  %v2806_v45 = vshll.u32 %v13447_v43, 16 }
  0xc1   : > { %11622 = vmatprep.mubr.bf16.mxu1 %v2402_v15  ;;  %11707 = vmatpush3.bf16.msra.mxu1 %v12548_v11  ;;  %v1949_v11 = vsel %vm17841_vm0, %v1946_v25, %v1948_v46  ;;  %v1952_v15 = vrot.slane %v13365_v21, 1  ;;  %v2420_v0 = vsel %vm17841_vm0, %v2417_v10, %v2419_v33  ;;  %v2745_v25 = vrot.slane %v2743_v36, 2  ;;  %v12558_v33 = vld [vmem:[%s17797_s3 + $0x1e8] sm:$0xff]  }
  0xc2   : > { %11708 = vmatprep.subr.bf16.mxu1 %v12549_v3  ;;  %v2776_v10 = vshrl.u32 %v13415_v26, 16 }
  0xc3   : > { %11653 = vmatpush3.bf16.msra.mxu0 %v12534_v22  ;;  %v1951_v22 = vsel %vm17841_vm0, %v1948_v46, %v1950_v6  ;;  %v1953_v21 = vsel %vm17841_vm0, %v1950_v6, %v1952_v15  ;;  %v1955_v16 = vsel %vm17841_vm0, %v1952_v15, %v1954_v28  ;;  %v2788_v15 = vshll.u32 %v13417_v27, 16 }
  0xc4   : > { %11654 = vmatprep.subr.bf16.mxu0 %v12539_v30  ;;  %v3204_v28 = vrot.slane %v13415_v26, 2 }
  0xc5   : > { %11709 = vmatpush3.bf16.msra.mxu1 %v12549_v3  ;;  %v10546_v3 = vcombine.low %v3171_v19, %v13350_v2  ;;  %v2733_v2 = vrot.slane %v2731_v29, 1  ;;  %v2785_v19 = vshrl.u32 %v13417_v27, 16 }
  0xc6   : > { %11567 = vmatmul.mubr.bf16.gmra.mxu0 %v1937_v37  ;;  %11798 = vmatprep.subr.bf16.mxu1 %v13484_v61  ;;  %v2725_v37 = vrot.slane %v2723_v18, 1 }
  0xc7   : > { %11570 = vmatprep.mubr.bf16.mxu0 %v1939_v23  ;;  %11655 = vmatpush3.bf16.msra.mxu0 %v12539_v30  ;;  %v2734_v30 = vshll.u32 %v13360_v48, 16  ;;  %v3193_v23 = vrot.slane %v10546_v3, 2 }
  0xc8   : > { %11623 = vmatmul.mubr.bf16.gmra.mxu1 %v2404_v39  ;;  %11656 = vmatprep.subr.bf16.mxu0 %v12545_v38  ;;  %v2728_v39 = vrot.slane %v2726_v58, 2  ;;  %v3202_v58 = vrot.slane %v13396_v1, 2 }
  0xc9   : > { %11626 = vmatprep.mubr.bf16.mxu1 %v2406_v12  ;;  %v2736_v12 = vrot.slane %v2734_v30, 2  ;;  %v13572_v30 = vrot.slane %v2776_v10, 1  ;;  %v3214_v10 = vrot.slane %v13469_v20, 2 }
  0xcb   : > { %11657 = vmatpush3.bf16.msra.mxu0 %v12545_v38  ;;  %v3194_v38 = vrot.slane %v13360_v48, 2  ;;  %v2729_v48 = vor.u32 %v2728_v39, %v2725_v37  ;;  %v13581_v37 = vrot.slane %v2785_v19, 1  ;;  %v2794_v39 = vshrl.u32 %v13444_v56, 16 }
  0xcc   : > { %11746 = vmatprep.subr.bf16.mxu0 %v13503_v41 }
  0xcd   : > { %v3195_v54 = vsel %vm17836_vm12, %v3193_v23, %v3194_v38  ;;  %v12551_v23 = vld [vmem:[%s17797_s3 + $0x1b0] sm:$0xff]  }
  0xce   : > { %11571 = vmatmul.mubr.bf16.gmra.mxu0 %v1941_v50  ;;  %v2737_v50 = vor.u32 %v2736_v12, %v2733_v2  ;;  %v2797_v2 = vshll.u32 %v13444_v56, 16  ;;  %v3206_v12 = vrot.slane %v13417_v27, 2 }
  0xcf   : > { %11574 = vmatprep.mubr.bf16.mxu0 %v1943_v9  ;;  %v2749_v9 = vshrl.u32 %v13374_v31, 16 }
  0xd0   : > { %11627 = vmatmul.mubr.bf16.gmra.mxu1 %v2408_v42  ;;  %v2752_v42 = vshll.u32 %v13374_v31, 16  ;;  %v3197_v31 = vsel %vm17836_vm12, %v3194_v38, %v3196_v59  ;;  %v13587_v38 = vrot.slane %v2788_v15, 2  ;;  %v2839_v15 = vshrl.u32 %v13495_v44, 16 }
  0xd1   : > { %11630 = vmatprep.mubr.bf16.mxu1 %v2410_v55  ;;  %v2758_v55 = vshrl.u32 %v13391_v52, 16  ;;  %v2751_v46 = vrot.slane %v2749_v9, 1  ;;  %v2821_v9 = vshrl.u32 %v13469_v20, 16 }
  0xd2   : > { %v2754_v6 = vrot.slane %v2752_v42, 2  ;;  %v2791_v26 = vor.u32 %v13587_v38, %v13581_v37  ;;  %v2857_v38 = vshrl.u32 %v13514_v49, 16 }
  0xd3   : > { %v2760_v8 = vrot.slane %v2758_v55, 1  ;;  %v12552_v55 = vld [vmem:[%s17797_s3 + $0x1a8] sm:$0xff]  }
  0xd4   : > { %v2755_v29 = vor.u32 %v2754_v6, %v2751_v46  ;;  %v3210_v46 = vrot.slane %v13447_v43, 2 }
  0xd6   : > { %11575 = vmatmul.mubr.bf16.gmra.mxu0 %v1945_v62  ;;  %v2738_v62 = vsel %vm17826_vm2, %v2729_v48, %v2737_v50 }
  0xd7   : > { %11578 = vmatprep.mubr.bf16.mxu0 %v1947_v63  ;;  %v2761_v63 = vshll.u32 %v13391_v52, 16 }
  0xd8   : > { %11631 = vmatmul.mubr.bf16.gmra.mxu1 %v2412_v32  ;;  %v2767_v32 = vshrl.u32 %v13396_v1, 16 }
  0xd9   : > { %11634 = vmatprep.mubr.bf16.mxu1 %v2414_v5  ;;  %v2770_v5 = vshll.u32 %v13396_v1, 16 }
  0xda   : > { %v2769_v18 = vrot.slane %v2767_v32, 1 }
  0xdb   : > { %v2772_v3 = vrot.slane %v2770_v5, 2  ;;  %v13620_v5 = vrot.slane %v2806_v45, 2  ;;  %v3220_v45 = vrot.slane %v13511_v51, 2 }
  0xdd   : > { %v2773_v32 = vor.u32 %v2772_v3, %v2769_v18  ;;  %v2848_v18 = vshrl.u32 %v13511_v51, 16 }
  0xde   : > { %11579 = vmatmul.mubr.bf16.gmra.mxu0 %v1949_v11  ;;  %v2746_v11 = vor.u32 %v2745_v25, %v2742_v57  ;;  %v2824_v57 = vshll.u32 %v13469_v20, 16  ;;  %v2830_v25 = vshrl.u32 %v13492_v40, 16 }
  0xdf   : > { %11582 = vmatprep.mubr.bf16.mxu0 %v1951_v22  ;;  %v3199_v22 = vsel %vm17836_vm12, %v3196_v59, %v3198_v34  ;;  %v13612_v59 = vrot.slane %v2794_v39, 1  ;;  %v3207_v39 = vsel %vm17836_vm12, %v3204_v28, %v3206_v12 }
  0xe0   : > { %11635 = vmatmul.mubr.bf16.gmra.mxu1 %v2416_v13  ;;  %v3200_v13 = vrot.slane %v13391_v52, 2  ;;  %v2747_v52 = vsel %vm17826_vm2, %v2737_v50, %v2746_v11  ;;  %v2756_v36 = vsel %vm17826_vm2, %v2746_v11, %v2755_v29  ;;  %v2815_v50 = vshll.u32 %v13466_v53, 16  ;;  %v12553_v11 = vld [vmem:[%s17797_s3 + $0x1a0] sm:$0xff]  }
  0xe1   : > { %11638 = vmatprep.mubr.bf16.mxu1 %v2418_v24  ;;  %v2763_v24 = vrot.slane %v2761_v63, 2  ;;  %v13639_v19 = vrot.slane %v2830_v25, 1 }
  0xe2   : > { %v3201_v48 = vsel %vm17836_vm12, %v3198_v34, %v3200_v13  ;;  %v3203_v42 = vsel %vm17836_vm12, %v3200_v13, %v3202_v58  ;;  %v13625_v6 = vrot.slane %v2815_v50, 2 }
  0xe3   : > { %v2764_v47 = vor.u32 %v2763_v24, %v2760_v8  ;;  %v3212_v8 = vrot.slane %v13466_v53, 2  ;;  %v2842_v24 = vshll.u32 %v13495_v44, 16 }
  0xe5   : > { %v2765_v63 = vsel %vm17826_vm2, %v2755_v29, %v2764_v47  ;;  %v2774_v3 = vsel %vm17826_vm2, %v2764_v47, %v2773_v32  ;;  %v12562_v29 = vld [vmem:[%s17797_s3 + $0x1d0] sm:$0xff]   ;;  %v12566_v47 = vld [vmem:[%s17797_s3 + $0x1c0] sm:$0xff]  }
  0xe6   : > { %11583 = vmatmul.mubr.bf16.gmra.mxu0 %v1953_v21  ;;  %v13579_v21 = vrot.slane %v2779_v17, 2  ;;  %v13637_v17 = vrot.slane %v2824_v57, 2  ;;  %v12563_v57 = vld [vmem:[%s17797_s3 + $0x180] sm:$0xff]  }
  0xe7   : > { %11586 = vmatprep.mubr.bf16.mxu0 %v1955_v16  ;;  %v3208_v16 = vrot.slane %v13444_v56, 2 }
  0xe8   : > { %11639 = vmatmul.mubr.bf16.gmra.mxu1 %v2420_v0  ;;  %v2803_v0 = vshrl.u32 %v13447_v43, 16  ;;  %v2782_v1 = vor.u32 %v13579_v21, %v13572_v30  ;;  %v12556_v30 = vld [vmem:[%s17797_s3 + $0x190] sm:$0xff]   ;;  %v13680_v21 = vrot.slane %v2848_v18, 1 }
  0xe9   : > { %11710 = vmatprep.mubr.bf16.mxu1 %v3195_v54  ;;  %v12560_v54 = vld [vmem:[%s17797_s3 + $0x1e0] sm:$0xff]   ;;  %v3211_v50 = vsel %vm17836_vm12, %v3208_v16, %v3210_v46 }
  0xea   : > { %v13616_v34 = vrot.slane %v2803_v0, 1  ;;  %v13670_v0 = vrot.slane %v2842_v24, 2 }
  0xee   : > { %11587 = vmatmul.mubr.bf16.gmra.mxu0 %v1957_v35  ;;  %v13614_v35 = vrot.slane %v2797_v2, 2  ;;  %v12554_v2 = vld [vmem:[%s17797_s3 + $0x198] sm:$0xff]  }
  0xef   : > { %11658 = vmatprep.mubr.bf16.mxu0 %v2738_v62  ;;  %v2833_v62 = vshll.u32 %v13492_v40, 16 }
  0xf0   : > { %11711 = vmatmul.mubr.bf16.vlgmr.msra.gmra.mxu1 %v3197_v31  ;;  %v13635_v31 = vrot.slane %v2821_v9, 1  ;;  %v12559_v9 = vld [vmem:[%s17797_s3 + $0x188] sm:$0xff]   ;;  %v2800_v27 = vor.u32 %v13614_v35, %v13612_v59  ;;  %v2869_v35 = vshll.u32 %v13523_v4, 16 }
  0xf1   : > { %11714 = vmatprep.mubr.bf16.mxu1 %v3199_v22  ;;  %11799 = vmatpush3.bf16.msra.mxu1 %v13484_v61  ;;  %v2812_v61 = vshrl.u32 %v13466_v53, 16  ;;  %v3216_v22 = vrot.slane %v13492_v40, 2  ;;  %v13642_v13 = vrot.slane %v2833_v62, 2  ;;  %v2878_v40 = vshll.u32 %v13526_v7, 16 }
  0xf2   : > { %11800 = vmatprep.subr.bf16.mxu1 %v12557_v14  ;;  %v2801_v25 = vsel %vm17826_vm2, %v2791_v26, %v2800_v27  ;;  %v2827_v53 = vor.u32 %v13637_v17, %v13635_v31  ;;  %v2875_v31 = vshrl.u32 %v13526_v7, 16 }
  0xf5   : > { %11801 = vmatpush3.bf16.msra.mxu1 %v12557_v14  ;;  %v12561_v14 = vld [vmem:[%s17797_s3 + $0x1d8] sm:$0xff]  }
  0xf6   : > { %11659 = vmatmul.mubr.bf16.vlgmr.msra.gmra.mxu0 %v2747_v52  ;;  %11802 = vmatprep.subr.bf16.mxu1 %v12558_v33  ;;  %v2851_v52 = vshll.u32 %v13511_v51, 16 }
  0xf7   : > { %11747 = vmatpush3.bf16.msra.mxu0 %v13503_v41  ;;  %11662 = vmatprep.mubr.bf16.mxu0 %v2756_v36  ;;  %v13623_v41 = vrot.slane %v2812_v61, 1  ;;  %v2783_v61 = vsel %vm17826_vm2, %v2773_v32, %v2782_v1  ;;  %v2792_v36 = vsel %vm17826_vm2, %v2782_v1, %v2791_v26  ;;  %v3224_v1 = vrot.slane %v13523_v4, 2 }
  0xf8   : > { %11748 = vmatprep.subr.bf16.mxu0 %v12551_v23  ;;  %11715 = vmatmul.mubr.bf16.gmra.mxu1 %v3201_v48  ;;  %v13684_v37 = vrot.slane %v2851_v52, 2 }
  0xf9   : > { %11718 = vmatprep.mubr.bf16.mxu1 %v3203_v42  ;;  %11803 = vmatpush3.bf16.msra.mxu1 %v12558_v33  ;;  %v3205_v33 = vsel %vm17836_vm12, %v3202_v58, %v3204_v28  ;;  %v13668_v58 = vrot.slane %v2839_v15, 1  ;;  %v12565_v28 = vld [vmem:[%s17797_s3 + $0x1c8] sm:$0xff]   ;;  %v2809_v42 = vor.u32 %v13620_v5, %v13616_v34  ;;  %v3222_v34 = vrot.slane %v13514_v49, 2  ;;  %v13732_v15 = vld [vmem:[%s17797_s3 + $0x238] sm:$0xff]  }
  0xfa   : > { %11804 = vmatprep.subr.bf16.mxu1 %v12560_v54  ;;  %v2818_v43 = vor.u32 %v13625_v6, %v13623_v41 }
  0xfb   : > { %11749 = vmatpush3.bf16.msra.mxu0 %v12551_v23  ;;  %v3218_v23 = vrot.slane %v13495_v44, 2  ;;  %v2810_v62 = vsel %vm17826_vm2, %v2800_v27, %v2809_v42  ;;  %v2845_v20 = vor.u32 %v13670_v0, %v13668_v58  ;;  %v13778_v0 = vld [vmem:[#allocation2 + $0x18] sm:$0xff]  }
  0xfc   : > { %11750 = vmatprep.subr.bf16.mxu0 %v12552_v55  ;;  %v2819_v41 = vsel %vm17826_vm2, %v2809_v42, %v2818_v43  ;;  %v2828_v17 = vsel %vm17826_vm2, %v2818_v43, %v2827_v53  ;;  %v4006_v51 = vshll.u32 %v13778_v0, 16 }
  0xfd   : > { %11805 = vmatpush3.bf16.msra.mxu1 %v12560_v54  ;;  %v3209_v54 = vsel %vm17836_vm12, %v3206_v12, %v3208_v16  ;;  %v2860_v16 = vshll.u32 %v13514_v49, 16  ;;  %v3221_v42 = vsel %vm17836_vm12, %v3218_v23, %v3220_v45 }
  0xfe   : > { %11663 = vmatmul.mubr.bf16.gmra.mxu0 %v2765_v63  ;;  %11806 = vmatprep.subr.bf16.mxu1 %v12561_v14  ;;  %v3213_v63 = vsel %vm17836_vm12, %v3210_v46, %v3212_v8 }
  0xff   : > { %11666 = vmatprep.mubr.bf16.mxu0 %v2774_v3  ;;  %11751 = vmatpush3.bf16.msra.mxu0 %v12552_v55  ;;  %v2866_v55 = vshrl.u32 %v13523_v4, 16  ;;  %v2862_v52 = vrot.slane %v2860_v16, 2  ;;  %v3223_v16 = vsel %vm17836_vm12, %v3220_v45, %v3222_v34 }
 0x100   : > { %11719 = vmatmul.mubr.bf16.gmra.mxu1 %v3205_v33  ;;  %11752 = vmatprep.subr.bf16.mxu0 %v12553_v11  ;;  %v2859_v33 = vrot.slane %v2857_v38, 1 }
 0x101   : > { %11722 = vmatprep.mubr.bf16.mxu1 %v3207_v39  ;;  %11807 = vmatpush3.bf16.msra.mxu1 %v12561_v14  ;;  %v3215_v14 = vsel %vm17836_vm12, %v3212_v8, %v3214_v10  ;;  %v3509_v39 = vld [vmem:[#allocation2 + $0x10] sm:$0xc] }
 0x102   : > { %11808 = vmatprep.subr.bf16.mxu1 %v12562_v29  ;;  %v2863_v44 = vor.u32 %v2862_v52, %v2859_v33  ;;  %v13812_v33 = vld [vmem:[#allocation2 + $0x20] sm:$0xff]   ;;  %v13814_v52 = vld [vmem:[#allocation2 + $0x28] sm:$0xff]  }
 0x103   : > { %11753 = vmatpush3.bf16.msra.mxu0 %v12553_v11 }
 0x104   : > { %11754 = vmatprep.subr.bf16.mxu0 %v12554_v2  ;;  %v11504_v48 = vpop.f32.mrf.mxu1 }
 0x105   : > { %11809 = vmatpush3.bf16.msra.mxu1 %v12562_v29 }
 0x106   : > { %11667 = vmatmul.mubr.bf16.gmra.mxu0 %v2783_v61  ;;  %11810 = vmatprep.subr.bf16.mxu1 %v12565_v28  ;;  %v1756_v12 = vpop.f32.mrf.mxu1  ;;  %v3219_v61 = vsel %vm17836_vm12, %v3216_v22, %v3218_v23  ;;  %v12564_v23 = vld [vmem:[#allocation2 + $0x98] ss:$0 sps:$4 sm:$0x33]  }
 0x107   : > { %11670 = vmatprep.mubr.bf16.mxu0 %v2792_v36  ;;  %11755 = vmatpush3.bf16.msra.mxu0 %v12554_v2  ;;  %v13742_v2 = vld [vmem:[#allocation2 + $0x14] sm:$0xf]  ;;  %v2836_v36 = vor.u32 %v13642_v13, %v13639_v19 }
 0x108   : > { %11723 = vmatmul.mubr.bf16.gmra.mxu1 %v3209_v54  ;;  %11756 = vmatprep.subr.bf16.mxu0 %v12556_v30  ;;  %v11505_v56 = vpop.f32.mrf.mxu1 }
 0x109   : > { %11726 = vmatprep.mubr.bf16.mxu1 %v3211_v50  ;;  %11811 = vmatpush3.bf16.msra.mxu1 %v12565_v28  ;;  %v2837_v50 = vsel %vm17826_vm2, %v2827_v53, %v2836_v36 }
 0x10a   : > { %11812 = vmatprep.subr.bf16.mxu1 %v12566_v47  ;;  %v1759_v59 = vpop.f32.mrf.mxu1 }
 0x10b   : > { %11757 = vmatpush3.bf16.msra.mxu0 %v12556_v30  ;;  %v3217_v30 = vsel %vm17836_vm12, %v3214_v10, %v3216_v22  ;;  %v3226_v22 = vrot.slane %v13526_v7, 2 }
 0x10c   : > { %11758 = vmatprep.subr.bf16.mxu0 %v12559_v9 }
 0x10d   : > { %11813 = vmatpush3.bf16.msra.mxu1 %v12566_v47  ;;  %v13764_v47 = vcombine.low %v3509_v39, %v13742_v2 }
 0x10e   : > { %v11452_v32 = vpop.f32.mrf.mxu0  ;;  %v11508_v5 = vpop.f32.mrf.mxu1  ;;  %11671 = vmatmul.mubr.bf16.gmra.mxu0 %v2801_v25  ;;  %v2854_v25 = vor.u32 %v13684_v37, %v13680_v21  ;;  %v2871_v21 = vrot.slane %v2869_v35, 2 }
 0x10f   : > { %v13727_v11 = vadd.f32 %v11504_v48, %v11452_v32  ;;  %11674 = vmatprep.mubr.bf16.mxu0 %v2810_v62  ;;  %11759 = vmatpush3.bf16.msra.mxu0 %v12559_v9  ;;  %v3995_v13 = vshrl.u32 %v13764_v47, 16  ;;  %v3998_v27 = vshll.u32 %v13764_v47, 16  ;;  %v4003_v32 = vshrl.u32 %v13778_v0, 16 }
 0x110   : > { %v1513_v46 = vpop.f32.mrf.mxu0  ;;  %v1772_v24 = vpop.f32.mrf.mxu1  ;;  %11727 = vmatmul.mubr.bf16.gmra.mxu1 %v3213_v63  ;;  %11760 = vmatprep.subr.bf16.mxu0 %v12563_v57  ;;  %v2855_v45 = vsel %vm17826_vm2, %v2845_v20, %v2854_v25  ;;  %v2864_v43 = vsel %vm17826_vm2, %v2854_v25, %v2863_v44  ;;  %v3656_v7 = vrot.slane %v13764_v47, 2 }
 0x111   : > { %v13738_v18 = vadd.f32 %v1756_v12, %v1513_v46  ;;  %11730 = vmatprep.mubr.bf16.mxu1 %v3215_v14  ;;  %v2846_v12 = vsel %vm17826_vm2, %v2836_v36, %v2845_v20  ;;  %v2877_v46 = vrot.slane %v2875_v31, 1  ;;  %v3997_v4 = vrot.slane %v3995_v13, 2 }
 0x112   : > { %v11453_v8 = vpop.f32.mrf.mxu0  ;;  %v11509_v3 = vpop.f32.mrf.mxu1  ;;  %v2887_v31 = vshll.u32 %v12564_v23, 16  ;;  %v4012_v20 = vshrl.u32 %v13812_v33, 16 }
 0x113   : > { %v13740_v29 = vadd.f32 %v11505_v56, %v11453_v8  ;;  %11761 = vmatpush3.bf16.msra.mxu0 %v12563_v57  ;;  %v3225_v8 = vsel %vm17836_vm12, %v3222_v34, %v3224_v1  ;;  %v2884_v34 = vshrl.u32 %v12564_v23, 16 }
 0x114   : > { %v1516_v6 = vpop.f32.mrf.mxu0  ;;  %v1775_v26 = vpop.f32.mrf.mxu1  ;;  %11850 = vmatprep.subr.bf16.mxu0 %v13732_v15  ;;  %v4014_v25 = vrot.slane %v4012_v20, 2 }
 0x115   : > { %v13748_v28 = vadd.f32 %v1759_v59, %v1516_v6  ;;  %v4005_v6 = vrot.slane %v4003_v32, 2 }
 0x116   : > { %11675 = vmatmul.mubr.bf16.gmra.mxu0 %v2819_v41  ;;  %v4000_v41 = vrot.slane %v3998_v27, 3  ;;  %v4024_v27 = vshll.u32 %v13814_v52, 16 }
 0x117   : > { %v11512_v38 = vpop.f32.mrf.mxu1  ;;  %11678 = vmatprep.mubr.bf16.mxu0 %v2828_v17 }
 0x118   : > { %11731 = vmatmul.mubr.bf16.gmra.mxu1 %v3217_v30 }
 0x119   : > { %v1788_v10 = vpop.f32.mrf.mxu1  ;;  %11734 = vmatprep.mubr.bf16.mxu1 %v3219_v61 }
 0x11a   : > { %v11456_v54 = vpop.f32.mrf.mxu0 }
 0x11b   : > { %v13768_v48 = vadd.f32 %v11508_v5, %v11456_v54  ;;  %v11513_v19 = vpop.f32.mrf.mxu1  ;;  %v2868_v5 = vrot.slane %v2866_v55, 1  ;;  %v4021_v54 = vshrl.u32 %v13814_v52, 16 }
 0x11c   : > { %v1529_v9 = vpop.f32.mrf.mxu0 }
 0x11d   : > { %v13776_v58 = vadd.f32 %v1772_v24, %v1529_v9  ;;  %v1791_v62 = vpop.f32.mrf.mxu1  ;;  %v2880_v24 = vrot.slane %v2878_v40, 2  ;;  %v2872_v49 = vor.u32 %v2871_v21, %v2868_v5 }
 0x11e   : > { %v11457_v56 = vpop.f32.mrf.mxu0  ;;  %11679 = vmatmul.mubr.bf16.gmra.mxu0 %v2837_v50  ;;  %v4001_v50 = vor.u32 %v4000_v41, %v3997_v4 }
 0x11f   : > { %v13790_v57 = vadd.f32 %v11509_v3, %v11457_v56  ;;  %11682 = vmatprep.mubr.bf16.mxu0 %v2846_v12  ;;  %v3227_v3 = vsel %vm17836_vm12, %v3224_v1, %v3226_v22  ;;  %v2881_v1 = vor.u32 %v2880_v24, %v2877_v46  ;;  %v2873_v12 = vsel %vm17826_vm2, %v2863_v44, %v2872_v49  ;;  %v13834_v44 = vld [vmem:[#allocation2 + $0x38] sm:$0xff]  }
 0x120   : > { %v1532_v59 = vpop.f32.mrf.mxu0  ;;  %11735 = vmatmul.mubr.bf16.gmra.mxu1 %v3221_v42  ;;  %v2889_v42 = vrot.slane %v2887_v31, 2  ;;  %v4039_v41 = vshrl.u32 %v13834_v44, 16 }
 0x121   : > { %v13794_v63 = vadd.f32 %v1775_v26, %v1532_v59  ;;  %11738 = vmatprep.mubr.bf16.mxu1 %v3223_v16  ;;  %v4008_v26 = vrot.slane %v4006_v51, 3  ;;  %v2882_v56 = vsel %vm17826_vm2, %v2872_v49, %v2881_v1  ;;  %v4023_v51 = vrot.slane %v4021_v54, 2 }
 0x122   : > { %v4041_v54 = vrot.slane %v4039_v41, 2 }
 0x123   : > { %v4009_v9 = vor.u32 %v4008_v26, %v4005_v6  ;;  %v4042_v6 = vshll.u32 %v13834_v44, 16 }
 0x124   : > { %v11460_v37 = vpop.f32.mrf.mxu0  ;;  %v11516_v14 = vpop.f32.mrf.mxu1 }
 0x125   : > { %v13804_v53 = vadd.f32 %v11512_v38, %v11460_v37  ;;  %v3228_v38 = vrot.slane %v12564_v23, 2  ;;  %v4010_v23 = vsel %vm17824_vm14, %v4001_v50, %v4009_v9  ;;  %v13856_v50 = vld [vmem:[#allocation2 + $0x48] sm:$0xff]  }
 0x126   : > { %v1545_v55 = vpop.f32.mrf.mxu0  ;;  %v1804_v35 = vpop.f32.mrf.mxu1  ;;  %11683 = vmatmul.mubr.bf16.gmra.mxu0 %v2855_v45  ;;  %v4026_v45 = vrot.slane %v4024_v27, 3 }
 0x127   : > { %v13816_v39 = vadd.f32 %v1788_v10, %v1545_v55  ;;  %11686 = vmatprep.mubr.bf16.mxu0 %v2864_v43  ;;  %v4015_v10 = vshll.u32 %v13812_v33, 16  ;;  %v3229_v16 = vsel %vm17836_vm12, %v3226_v22, %v3228_v38  ;;  %v3657_v22 = vrot.slane %v13778_v0, 2 }
 0x128   : > { %v11461_v17 = vpop.f32.mrf.mxu0  ;;  %v11517_v30 = vpop.f32.mrf.mxu1  ;;  %11739 = vmatmul.mubr.bf16.gmra.mxu1 %v3225_v8  ;;  %v4027_v4 = vor.u32 %v4026_v45, %v4023_v51 }
 0x129   : > { %v13818_v61 = vadd.f32 %v11513_v19, %v11461_v17  ;;  %11742 = vmatprep.mubr.bf16.mxu1 %v3227_v3  ;;  %v2886_v19 = vrot.slane %v2884_v34, 1  ;;  %v4017_v59 = vrot.slane %v4015_v10, 3  ;;  %v3658_v49 = vsel %vm17836_vm12, %v3656_v7, %v3657_v22 }
 0x12a   : > { %v1548_v36 = vpop.f32.mrf.mxu0  ;;  %v1807_v13 = vpop.f32.mrf.mxu1 }
 0x12b   : > { %v13823_v40 = vadd.f32 %v1791_v62, %v1548_v36  ;;  %v13831_v62 = vld [vmem:[#allocation2 + $0x30] sm:$0xff]   ;;  %v2890_v5 = vor.u32 %v2889_v42, %v2886_v19  ;;  %v4018_v24 = vor.u32 %v4017_v59, %v4014_v25 }
 0x12c   : > { %v4030_v8 = vshrl.u32 %v13831_v62, 16  ;;  %v4033_v3 = vshll.u32 %v13831_v62, 16 }
 0x12d   : > { %v2891_v47 = vsel %vm17826_vm2, %v2881_v1, %v2890_v5  ;;  %v4019_v31 = vsel %vm17824_vm14, %v4009_v9, %v4018_v24  ;;  %v4028_v10 = vsel %vm17824_vm14, %v4018_v24, %v4027_v4  ;;  %v4044_v1 = vrot.slane %v4042_v6, 3  ;;  %v12573_v5 = vld [vmem:[%s17797_s3 + $0x230] sm:$0xff]  }
 0x12e   : > { %11687 = vmatmul.mubr.bf16.gmra.mxu0 %v2873_v12  ;;  %v4032_v38 = vrot.slane %v4030_v8, 2  ;;  %v4035_v36 = vrot.slane %v4033_v3, 3  ;;  %v3661_v9 = vrot.slane %v13814_v52, 2  ;;  %v13872_v3 = vld [vmem:[#allocation2 + $0x50] sm:$0xff]  }
 0x12f   : > { %11690 = vmatprep.mubr.bf16.mxu0 %v2882_v56  ;;  %v4045_v42 = vor.u32 %v4044_v1, %v4041_v54  ;;  %v4057_v56 = vshrl.u32 %v13856_v50, 16  ;;  %v4069_v54 = vshll.u32 %v13872_v3, 16 }
 0x130   : > { %v11520_v32 = vpop.f32.mrf.mxu1  ;;  %v11464_v21 = vpop.f32.mrf.mxu0  ;;  %11743 = vmatmul.mubr.bf16.gmra.mxu1 %v3229_v16  ;;  %v4036_v12 = vor.u32 %v4035_v36, %v4032_v38  ;;  %v4060_v16 = vshll.u32 %v13856_v50, 16 }
 0x131   : > { %v13838_v37 = vadd.f32 %v11516_v14, %v11464_v21  ;;  %11814 = vmatprep.mubr.bf16.mxu1 %v4010_v23  ;;  %v4059_v6 = vrot.slane %v4057_v56, 2  ;;  %v12579_v56 = vld [vmem:[%s17797_s3 + $0x220] sm:$0xff]  }
 0x132   : > { %v1820_v43 = vpop.f32.mrf.mxu1  ;;  %v1561_v46 = vpop.f32.mrf.mxu0  ;;  %v4037_v7 = vsel %vm17824_vm14, %v4027_v4, %v4036_v12  ;;  %v4046_v41 = vsel %vm17824_vm14, %v4036_v12, %v4045_v42 }
 0x133   : > { %v13842_v55 = vadd.f32 %v1804_v35, %v1561_v46  ;;  %v13851_v35 = vld [vmem:[#allocation2 + $0x40] sm:$0xff]  }
 0x134   : > { %v11465_v26 = vpop.f32.mrf.mxu0  ;;  %v11521_v14 = vpop.f32.mrf.mxu1  ;;  %v4048_v19 = vshrl.u32 %v13851_v35, 16 }
 0x135   : > { %v13848_v34 = vadd.f32 %v11517_v30, %v11465_v26  ;;  %v3659_v30 = vrot.slane %v13812_v33, 2  ;;  %v3663_v26 = vrot.slane %v13831_v62, 2 }
 0x136   : > { %v1564_v17 = vpop.f32.mrf.mxu0  ;;  %11691 = vmatmul.mubr.bf16.gmra.mxu0 %v2891_v47  ;;  %v1823_v27 = vpop.f32.mrf.mxu1  ;;  %v4050_v24 = vrot.slane %v4048_v19, 2  ;;  %v13877_v47 = vld [vmem:[#allocation2 + $0x58] sm:$0xff]  }
 0x137   : > { %v13853_v20 = vadd.f32 %v1807_v13, %v1564_v17  ;;  %11762 = vmatprep.mubr.bf16.mxu0 %v3658_v49  ;;  %v4051_v13 = vshll.u32 %v13851_v35, 16  ;;  %v3660_v25 = vsel %vm17836_vm12, %v3657_v22, %v3659_v30  ;;  %v3662_v51 = vsel %vm17836_vm12, %v3659_v30, %v3661_v9  ;;  %v12576_v17 = vld [vmem:[%s17797_s3 + $0x228] sm:$0xff]  }
 0x138   : > { %11815 = vmatmul.mubr.bf16.vlgmr.msra.gmra.mxu1 %v4019_v31  ;;  %v4078_v12 = vshll.u32 %v13877_v47, 16  ;;  %v3664_v19 = vsel %vm17836_vm12, %v3661_v9, %v3663_v26 }
 0x139   : > { %11818 = vmatprep.mubr.bf16.mxu1 %v4028_v10  ;;  %v4053_v8 = vrot.slane %v4051_v13, 3 }
 0x13a   : > { %v4080_v9 = vrot.slane %v4078_v12, 3 }
 0x13b   : > { %v4054_v36 = vor.u32 %v4053_v8, %v4050_v24  ;;  %v3667_v8 = vrot.slane %v13851_v35, 2 }
 0x13c   : > { %v11468_v59 = vpop.f32.mrf.mxu0  ;;  %v11524_v23 = vpop.f32.mrf.mxu1 }
 0x13d   : > { %v13866_v45 = vadd.f32 %v11520_v32, %v11468_v59  ;;  %v4062_v32 = vrot.slane %v4060_v16, 3  ;;  %v4055_v16 = vsel %vm17824_vm14, %v4045_v42, %v4054_v36  ;;  %v4071_v59 = vrot.slane %v4069_v54, 3 }
 0x13e   : > { %v1577_v21 = vpop.f32.mrf.mxu0  ;;  %v1836_v46 = vpop.f32.mrf.mxu1  ;;  %11763 = vmatmul.mubr.bf16.vlgmr.msra.gmra.mxu0 %v3660_v25  ;;  %v3669_v42 = vrot.slane %v13856_v50, 2 }
 0x13f   : > { %v13874_v22 = vadd.f32 %v1820_v43, %v1577_v21  ;;  %11851 = vmatpush3.bf16.msra.mxu0 %v13732_v15  ;;  %11766 = vmatprep.mubr.bf16.mxu0 %v3662_v51  ;;  %v3665_v43 = vrot.slane %v13834_v44, 2  ;;  %v4066_v15 = vshrl.u32 %v13872_v3, 16  ;;  %v4063_v30 = vor.u32 %v4062_v32, %v4059_v6  ;;  %v13899_v51 = vld [vmem:[#allocation2 + $0x60] sm:$0xff]   ;;  %v12582_v32 = vld [vmem:[%s17797_s3 + $0x218] sm:$0xff]  }
 0x140   : > { %v11469_v4 = vpop.f32.mrf.mxu0  ;;  %v11525_v49 = vpop.f32.mrf.mxu1  ;;  %11852 = vmatprep.subr.bf16.mxu0 %v12573_v5  ;;  %11819 = vmatmul.mubr.bf16.gmra.mxu1 %v4037_v7 }
 0x141   : > { %v13881_v31 = vadd.f32 %v11521_v14, %v11469_v4  ;;  %11822 = vmatprep.mubr.bf16.mxu1 %v4046_v41  ;;  %v4075_v14 = vshrl.u32 %v13877_v47, 16  ;;  %v3666_v13 = vsel %vm17836_vm12, %v3663_v26, %v3665_v43  ;;  %v4064_v21 = vsel %vm17824_vm14, %v4054_v36, %v4063_v30 }
 0x142   : > { %v1580_v38 = vpop.f32.mrf.mxu0  ;;  %v1839_v10 = vpop.f32.mrf.mxu1  ;;  %v4087_v36 = vshll.u32 %v13899_v51, 16  ;;  %v3668_v12 = vsel %vm17836_vm12, %v3665_v43, %v3667_v8 }
 0x143   : > { %v13889_v1 = vadd.f32 %v1823_v27, %v1580_v38  ;;  %11853 = vmatpush3.bf16.msra.mxu0 %v12573_v5  ;;  %v4068_v27 = vrot.slane %v4066_v15, 2  ;;  %v4077_v7 = vrot.slane %v4075_v14, 2  ;;  %v13902_v5 = vld [vmem:[#allocation2 + $0x68] sm:$0xff]   ;;  %v4084_v38 = vshrl.u32 %v13899_v51, 16 }
 0x144   : > { %11854 = vmatprep.subr.bf16.mxu0 %v12576_v17  ;;  %v4093_v54 = vshrl.u32 %v13902_v5, 16  ;;  %v4096_v14 = vshll.u32 %v13902_v5, 16 }
 0x145   : > { %v4072_v4 = vor.u32 %v4071_v59, %v4068_v27 }
 0x146   : > { %v11528_v25 = vpop.f32.mrf.mxu1  ;;  %11767 = vmatmul.mubr.bf16.gmra.mxu0 %v3664_v19 }
 0x147   : > { %11770 = vmatprep.mubr.bf16.mxu0 %v3666_v13  ;;  %11855 = vmatpush3.bf16.msra.mxu0 %v12576_v17  ;;  %v4073_v59 = vsel %vm17824_vm14, %v4063_v30, %v4072_v4  ;;  %v3673_v30 = vrot.slane %v13877_v47, 2 }
 0x148   : > { %v1852_v41 = vpop.f32.mrf.mxu1  ;;  %11823 = vmatmul.mubr.bf16.gmra.mxu1 %v4055_v16  ;;  %11856 = vmatprep.subr.bf16.mxu0 %v12579_v56  ;;  %v3670_v16 = vsel %vm17836_vm12, %v3667_v8, %v3669_v42  ;;  %v4098_v8 = vrot.slane %v4096_v14, 3 }
 0x149   : > { %v11472_v24 = vpop.f32.mrf.mxu0  ;;  %11826 = vmatprep.mubr.bf16.mxu1 %v4064_v21  ;;  %v4086_v21 = vrot.slane %v4084_v38, 2 }
 0x14a   : > { %v13905_v6 = vadd.f32 %v11524_v23, %v11472_v24  ;;  %v11529_v17 = vpop.f32.mrf.mxu1  ;;  %v4081_v23 = vor.u32 %v4080_v9, %v4077_v7  ;;  %v4089_v7 = vrot.slane %v4087_v36, 3  ;;  %v13925_v9 = vld [vmem:[#allocation2 + $0x70] sm:$0xff]   ;;  %v4095_v24 = vrot.slane %v4093_v54, 2 }
 0x14b   : > { %v1593_v26 = vpop.f32.mrf.mxu0  ;;  %11857 = vmatpush3.bf16.msra.mxu0 %v12579_v56  ;;  %17977 = vst [vmem:[#allocation9_spill] sm:$0xff] %v13925_v9  ;;  %v4105_v54 = vshll.u32 %v13925_v9, 16 }
 0x14c   : > { %v13913_v15 = vadd.f32 %v1836_v46, %v1593_v26  ;;  %11858 = vmatprep.subr.bf16.mxu0 %v12582_v32  ;;  %v12585_v46 = vld [vmem:[%s17797_s3 + $0x210] sm:$0xff]   ;;  %v1855_v56 = vpop.f32.mrf.mxu1  ;;  %v13930_v26 = vld [vmem:[#allocation2 + $0x78] sm:$0xff]   ;;  %v4090_v36 = vor.u32 %v4089_v7, %v4086_v21 }
 0x14d   : > { %v11473_v19 = vpop.f32.mrf.mxu0  ;;  %17979 = vst [vmem:[#allocation11_spill] sm:$0xff] %v13930_v26 }
 0x14e   : > { %17975 = vst [vmem:[#allocation7_spill] sm:$0xff] %v13913_v15  ;;  %v13918_v13 = vadd.f32 %v11525_v49, %v11473_v19  ;;  %11771 = vmatmul.mubr.bf16.gmra.mxu0 %v3668_v12  ;;  %v4082_v49 = vsel %vm17824_vm14, %v4072_v4, %v4081_v23  ;;  %v3671_v19 = vrot.slane %v13872_v3, 2  ;;  %v4102_v4 = vshrl.u32 %v13925_v9, 16 }
 0x14f   : > { %v1596_v27 = vpop.f32.mrf.mxu0  ;;  %11774 = vmatprep.mubr.bf16.mxu0 %v3670_v16  ;;  %11859 = vmatpush3.bf16.msra.mxu0 %v12582_v32  ;;  %v4099_v16 = vor.u32 %v4098_v8, %v4095_v24  ;;  %v4111_v32 = vshrl.u32 %v13930_v26, 16  ;;  %v4091_v24 = vsel %vm17824_vm14, %v4081_v23, %v4090_v36 }
 0x150   : > { %17976 = vst [vmem:[#allocation8_spill] sm:$0xff] %v13918_v13  ;;  %v13927_v43 = vadd.f32 %v1839_v10, %v1596_v27  ;;  %11827 = vmatmul.mubr.bf16.gmra.mxu1 %v4073_v59  ;;  %11860 = vmatprep.subr.bf16.mxu0 %v12585_v46  ;;  %v12588_v10 = vld [vmem:[%s17797_s3 + $0x208] sm:$0xff]   ;;  %v4114_v27 = vshll.u32 %v13930_v26, 16  ;;  %v3672_v59 = vsel %vm17836_vm12, %v3669_v42, %v3671_v19  ;;  %v4104_v8 = vrot.slane %v4102_v4, 2 }
 0x151   : > { %11830 = vmatprep.mubr.bf16.mxu1 %v4082_v49  ;;  %v3674_v21 = vsel %vm17836_vm12, %v3671_v19, %v3673_v30  ;;  %v13956_v19 = vld [vmem:[#allocation2 + $0x88] sm:$0xff]   ;;  %v3675_v13 = vrot.slane %v13899_v51, 2  ;;  %v3677_v4 = vrot.slane %v13902_v5, 2 }
 0x152   : > { %17978 = vst [vmem:[#allocation10_spill] sm:$0xff] %v13927_v43  ;;  %v11476_v38 = vpop.f32.mrf.mxu0  ;;  %v11532_v12 = vpop.f32.mrf.mxu1 }
 0x153   : > { %v13939_v14 = vadd.f32 %v11528_v25, %v11476_v38  ;;  %11861 = vmatpush3.bf16.msra.mxu0 %v12585_v46  ;;  %v12592_v25 = vld [vmem:[%s17797_s3 + $0x200] sm:$0xff]   ;;  %v4107_v38 = vrot.slane %v4105_v54, 3  ;;  %v4116_v46 = vrot.slane %v4114_v27, 3  ;;  %v4129_v27 = vshrl.u32 %v13956_v19, 16 }
 0x154   : > { %v1609_v60 = vpop.f32.mrf.mxu0  ;;  %v1868_v7 = vpop.f32.mrf.mxu1  ;;  %11862 = vmatprep.subr.bf16.mxu0 %v12588_v10 }
 0x155   : > { %17980 = vst [vmem:[#allocation12_spill] sm:$0xff] %v13939_v14  ;;  %v13944_v43 = vadd.f32 %v1852_v41, %v1609_v60  ;;  %v13951_v14 = vld [vmem:[#allocation2 + $0x80] sm:$0xff]   ;;  %v4100_v60 = vsel %vm17824_vm14, %v4090_v36, %v4099_v16  ;;  %v4113_v41 = vrot.slane %v4111_v32, 2 }
 0x156   : > { %v11477_v49 = vpop.f32.mrf.mxu0  ;;  %17982 = vst [vmem:[#allocation14_spill] sm:$0xff] %v13951_v14  ;;  %11775 = vmatmul.mubr.bf16.gmra.mxu0 %v3672_v59  ;;  %v11533_v15 = vpop.f32.mrf.mxu1  ;;  %v4120_v36 = vshrl.u32 %v13951_v14, 16  ;;  %v4123_v54 = vshll.u32 %v13951_v14, 16  ;;  %v4132_v59 = vshll.u32 %v13956_v19, 16 }
 0x157   : > { %17981 = vst [vmem:[#allocation13_spill] sm:$0xff] %v13944_v43  ;;  %v13953_v42 = vadd.f32 %v11529_v17, %v11477_v49  ;;  %11778 = vmatprep.mubr.bf16.mxu0 %v3674_v21  ;;  %11863 = vmatpush3.bf16.msra.mxu0 %v12588_v10  ;;  %v4108_v17 = vor.u32 %v4107_v38, %v4104_v8  ;;  %v13969_v8 = vld [vmem:[#allocation2 + $0x90] sm:$0xff]  }
 0x158   : > { %v1612_v43 = vpop.f32.mrf.mxu0  ;;  %11831 = vmatmul.mubr.bf16.gmra.mxu1 %v4091_v24  ;;  %11864 = vmatprep.subr.bf16.mxu0 %v12592_v25  ;;  %v4117_v32 = vor.u32 %v4116_v46, %v4113_v41  ;;  %v3676_v21 = vsel %vm17836_vm12, %v3673_v30, %v3675_v13  ;;  %v1871_v10 = vpop.f32.mrf.mxu1  ;;  %v4122_v49 = vrot.slane %v4120_v36, 2  ;;  %v4125_v24 = vrot.slane %v4123_v54, 3 }
 0x159   : > { %17983 = vst [vmem:[#allocation15_spill] sm:$0xff] %v13953_v42  ;;  %v13959_v23 = vadd.f32 %v1855_v56, %v1612_v43  ;;  %11834 = vmatprep.mubr.bf16.mxu1 %v4100_v60  ;;  %v3678_v43 = vsel %vm17836_vm12, %v3675_v13, %v3677_v4  ;;  %v4109_v56 = vsel %vm17824_vm14, %v4099_v16, %v4108_v17  ;;  %v4131_v41 = vrot.slane %v4129_v27, 2 }
 0x15a   : > { %v4118_v60 = vsel %vm17824_vm14, %v4108_v17, %v4117_v32  ;;  %v4134_v46 = vrot.slane %v4132_v59, 3  ;;  %v3679_v13 = vrot.slane %v13925_v9, 2  ;;  %v3681_v16 = vrot.slane %v13930_v26, 2 }
 0x15b   : > { %17984 = vst [vmem:[#allocation16_spill] sm:$0xff] %v13959_v23  ;;  %11865 = vmatpush3.bf16.msra.mxu0 %v12592_v25  ;;  %v13972_v23 = vld [vmem:[#allocation2 + $0x98] sm:$0xff]   ;;  %v4138_v17 = vshrl.u32 %v13969_v8, 16  ;;  %v4141_v27 = vshll.u32 %v13969_v8, 16 }
 0x15c   : > { %17985 = vst [vmem:[#allocation17_spill] sm:$0xff] %v13972_v23 }
 0x15e   : > { %v11480_v38 = vpop.f32.mrf.mxu0  ;;  %11779 = vmatmul.mubr.bf16.gmra.mxu0 %v3676_v21  ;;  %v4126_v21 = vor.u32 %v4125_v24, %v4122_v49 }
 0x15f   : > { %v13974_v42 = vadd.f32 %v11532_v12, %v11480_v38  ;;  %11782 = vmatprep.mubr.bf16.mxu0 %v3678_v43  ;;  %v11536_v30 = vpop.f32.mrf.mxu1  ;;  %v4135_v12 = vor.u32 %v4134_v46, %v4131_v41  ;;  %v4147_v43 = vshrl.u32 %v13972_v23, 16  ;;  %v4150_v38 = vshll.u32 %v13972_v23, 16  ;;  %v13993_v46 = vld [vmem:[#allocation2 + $0xa0] ss:$0 sps:$4 sm:$0x77]  }
 0x160   : > { %v1625_v25 = vpop.f32.mrf.mxu0  ;;  %11835 = vmatmul.mubr.bf16.gmra.mxu1 %v4109_v56  ;;  %v3680_v56 = vsel %vm17836_vm12, %v3677_v4, %v3679_v13  ;;  %v4127_v24 = vsel %vm17824_vm14, %v4117_v32, %v4126_v21  ;;  %v4143_v41 = vrot.slane %v4141_v27, 3  ;;  %17990 = vst [vmem:[#allocation22_spill] sm:$0xff] %v13993_v46  ;;  %v3685_v32 = vrot.slane %v13956_v19, 2 }
 0x161   : > { %17986 = vst [vmem:[#allocation18_spill] sm:$0xff] %v13974_v42  ;;  %v13978_v36 = vadd.f32 %v1868_v7, %v1625_v25  ;;  %v1884_v54 = vpop.f32.mrf.mxu1  ;;  %11838 = vmatprep.mubr.bf16.mxu1 %v4118_v60  ;;  %v3682_v25 = vsel %vm17836_vm12, %v3679_v13, %v3681_v16  ;;  %v4152_v4 = vrot.slane %v4150_v38, 3 }
 0x162   : > { %v11481_v59 = vpop.f32.mrf.mxu0 }
 0x163   : > { %17987 = vst [vmem:[#allocation19_spill] sm:$0xff] %v13978_v36  ;;  %v13984_v9 = vadd.f32 %v11533_v15, %v11481_v59  ;;  %v11537_v26 = vpop.f32.mrf.mxu1  ;;  %v4140_v36 = vrot.slane %v4138_v17, 2  ;;  %v4136_v15 = vsel %vm17824_vm14, %v4126_v21, %v4135_v12  ;;  %v4149_v59 = vrot.slane %v4147_v43, 2 }
 0x164   : > { %v1628_v7 = vpop.f32.mrf.mxu0  ;;  %v4159_v21 = vshll.u32 %v13993_v46, 16 }
 0x165   : > { %17988 = vst [vmem:[#allocation20_spill] sm:$0xff] %v13984_v9  ;;  %v13988_v60 = vadd.f32 %v1871_v10, %v1628_v7  ;;  %v13990_v49 = vpop.f32.mrf.mxu1  ;;  %v3683_v10 = vrot.slane %v13951_v14, 2 }
 0x166   : > { %17989 = vst [vmem:[#allocation21_spill] sm:$0xff] %v13990_v49  ;;  %v11484_v42 = vpop.f32.mrf.mxu0  ;;  %11783 = vmatmul.mubr.bf16.gmra.mxu0 %v3680_v56  ;;  %v4144_v49 = vor.u32 %v4143_v41, %v4140_v36  ;;  %v4156_v56 = vshrl.u32 %v13993_v46, 16  ;;  %v4161_v41 = vrot.slane %v4159_v21, 3 }
 0x167   : > { %v13996_v9 = vadd.f32 %v11536_v30, %v11484_v42  ;;  %11786 = vmatprep.mubr.bf16.mxu0 %v3682_v25  ;;  %v11608_v13 = vpop.f32.mrf.mxu1  ;;  %v4153_v42 = vor.u32 %v4152_v4, %v4149_v59  ;;  %v3684_v38 = vsel %vm17836_vm12, %v3681_v16, %v3683_v10  ;;  %v3687_v16 = vrot.slane %v13969_v8, 2 }
 0x168   : > { %v1641_v7 = vpop.f32.mrf.mxu0  ;;  %11839 = vmatmul.mubr.bf16.gmra.mxu1 %v4127_v24  ;;  %v3686_v24 = vsel %vm17836_vm12, %v3683_v10, %v3685_v32  ;;  %v4158_v36 = vrot.slane %v4156_v56, 2  ;;  %v3689_v10 = vrot.slane %v13972_v23, 2  ;;  %v4443_v56 = vld [vmem:[#allocation2 + $0x10] sm:$0x8] }
 0x169   : > { %v14000_v17 = vadd.f32 %v1884_v54, %v1641_v7  ;;  %v2521_v27 = vpop.f32.mrf.mxu1  ;;  %11842 = vmatprep.mubr.bf16.mxu1 %v4136_v15  ;;  %v4145_v15 = vsel %vm17824_vm14, %v4135_v12, %v4144_v49  ;;  %v4154_v46 = vsel %vm17824_vm14, %v4144_v49, %v4153_v42 }
 0x16a   : > { %v11485_v43 = vpop.f32.mrf.mxu0  ;;  %v4162_v12 = vor.u32 %v4161_v41, %v4158_v36  ;;  %v3690_v23 = vsel %vm17836_vm12, %v3687_v16, %v3689_v10 }
 0x16b   : > { %v14004_v30 = vadd.f32 %v11537_v26, %v11485_v43  ;;  %v11609_v25 = vpop.f32.mrf.mxu1 }
 0x16c   : > { %v14007_v14 = vpop.f32.mrf.mxu0  ;;  %v4163_v36 = vsel %vm17824_vm14, %v4153_v42, %v4162_v12 }
 0x16d   : > { %17991 = vst [vmem:[#allocation23_spill] sm:$0xff] %v14007_v14  ;;  %v14010_v54 = vpop.f32.mrf.mxu1 }
 0x16e   : > { %17992 = vst [vmem:[#allocation24_spill] sm:$0xff] %v14010_v54  ;;  %v11556_v7 = vpop.f32.mrf.mxu0  ;;  %11787 = vmatmul.mubr.bf16.gmra.mxu0 %v3684_v38 }
 0x16f   : > { %v2203_v26 = vadd.f32 %v11556_v7, %v13727_v11  ;;  %11790 = vmatprep.mubr.bf16.mxu0 %v3686_v24  ;;  %v3688_v24 = vsel %vm17836_vm12, %v3685_v32, %v3687_v16  ;;  %v12593_v7 = vld [vmem:[#allocation2 + $0xa0] ss:$0 sps:$4 sm:$0x33]  }
 0x170   : > { %v2058_v59 = vpop.f32.mrf.mxu0  ;;  %v11612_v4 = vpop.f32.mrf.mxu1  ;;  %11843 = vmatmul.mubr.bf16.gmra.mxu1 %v4145_v15 }
 0x171   : > { %v2201_v43 = vadd.f32 %v2058_v59, %v13738_v18  ;;  %v14018_v54 = vadd.f32 %v11608_v13, %v2203_v26  ;;  %11846 = vmatprep.mubr.bf16.mxu1 %v4154_v46  ;;  %v10639_v18 = vcombine.low %v4443_v56, %v13742_v2  ;;  %v4466_v2 = vrot.slane %v13778_v0, 3 }
 0x172   : > { %v11557_v21 = vpop.f32.mrf.mxu0  ;;  %v2537_v38 = vpop.f32.mrf.mxu1 }
 0x173   : > { %v2204_v49 = vadd.f32 %v11557_v21, %v13740_v29  ;;  %v14021_v11 = vadd.f32 %v2521_v27, %v2201_v43  ;;  %v3691_v27 = vrot.slane %v12593_v7, 2  ;;  %v4465_v16 = vrot.slane %v10639_v18, 3 }
 0x174   : > { %v2061_v14 = vpop.f32.mrf.mxu0  ;;  %v11613_v15 = vpop.f32.mrf.mxu1  ;;  %v4470_v7 = vrot.slane %v13814_v52, 3 }
 0x175   : > { %v14027_v13 = vadd.f32 %v2061_v14, %v13748_v28  ;;  %v14029_v46 = vadd.f32 %v11609_v25, %v2204_v49  ;;  %v4467_v21 = vsel %vm17825_vm6, %v4465_v16, %v4466_v2 }
 0x176   : > { %v11560_v41 = vpop.f32.mrf.mxu0  ;;  %11791 = vmatmul.mubr.bf16.gmra.mxu0 %v3688_v24  ;;  %v14032_v29 = vpop.f32.mrf.mxu1 }
 0x177   : > { %v2207_v32 = vadd.f32 %v11560_v41, %v13768_v48  ;;  %11794 = vmatprep.mubr.bf16.mxu0 %v3690_v23  ;;  %v3692_v48 = vsel %vm17836_vm12, %v3689_v10, %v3691_v27 }
 0x178   : > { %v2074_v26 = vpop.f32.mrf.mxu0  ;;  %v11616_v59 = vpop.f32.mrf.mxu1  ;;  %11847 = vmatmul.mubr.bf16.gmra.mxu1 %v4163_v36 }
 0x179   : > { %v2205_v28 = vadd.f32 %v2074_v26, %v13776_v58  ;;  %v14037_v14 = vadd.f32 %v11612_v4, %v2207_v32 }
 0x17a   : > { %v11561_v42 = vpop.f32.mrf.mxu0  ;;  %v2553_v25 = vpop.f32.mrf.mxu1 }
 0x17b   : > { %v2208_v43 = vadd.f32 %v11561_v42, %v13790_v57  ;;  %v14040_v12 = vadd.f32 %v2537_v38, %v2205_v28  ;;  %v4468_v57 = vrot.slane %v13812_v33, 3 }
 0x17c   : > { %v2077_v23 = vpop.f32.mrf.mxu0  ;;  %v11617_v56 = vpop.f32.mrf.mxu1 }
 0x17d   : > { %v14045_v49 = vadd.f32 %v2077_v23, %v13794_v63  ;;  %v14047_v0 = vadd.f32 %v11613_v15, %v2208_v43  ;;  %v4469_v27 = vsel %vm17825_vm6, %v4466_v2, %v4468_v57  ;;  %v4471_v33 = vsel %vm17825_vm6, %v4468_v57, %v4470_v7 }
 0x17e   : > { %v11564_v58 = vpop.f32.mrf.mxu0  ;;  %11795 = vmatmul.mubr.bf16.gmra.mxu0 %v3692_v48  ;;  %v14049_v4 = vpop.f32.mrf.mxu1 }
 0x17f   : > { %v2211_v24 = vadd.f32 %v11564_v58, %v13804_v53  ;;  %11866 = vmatprep.mubr.bf16.mxu0 %v4467_v21 }
 0x180   : > { %v2090_v38 = vpop.f32.mrf.mxu0  ;;  %v11620_v10 = vpop.f32.mrf.mxu1 }
 0x181   : > { %v2209_v18 = vadd.f32 %v2090_v38, %v13816_v39  ;;  %v14055_v36 = vadd.f32 %v11616_v59, %v2211_v24 }
 0x182   : > { %v11565_v63 = vpop.f32.mrf.mxu0  ;;  %v2569_v15 = vpop.f32.mrf.mxu1 }
 0x183   : > { %v2212_v41 = vadd.f32 %v11565_v63, %v13818_v61  ;;  %v14058_v32 = vadd.f32 %v2553_v25, %v2209_v18  ;;  %v4472_v61 = vrot.slane %v13831_v62, 3  ;;  %v4474_v25 = vrot.slane %v13834_v44, 3 }
 0x184   : > { %v2093_v53 = vpop.f32.mrf.mxu0  ;;  %v11621_v26 = vpop.f32.mrf.mxu1  ;;  %v4478_v63 = vrot.slane %v13856_v50, 3 }
 0x185   : > { %v14063_v16 = vadd.f32 %v2093_v53, %v13823_v40  ;;  %v14065_v52 = vadd.f32 %v11617_v56, %v2212_v41  ;;  %v4473_v58 = vsel %vm17825_vm6, %v4470_v7, %v4472_v61  ;;  %v4475_v62 = vsel %vm17825_vm6, %v4472_v61, %v4474_v25 }
 0x186   : > { %v11568_v39 = vpop.f32.mrf.mxu0  ;;  %11867 = vmatmul.mubr.bf16.vlgmr.msra.gmra.mxu0 %v4469_v27  ;;  %v14067_v59 = vpop.f32.mrf.mxu1 }
 0x187   : > { %v2215_v28 = vadd.f32 %v11568_v39, %v13838_v37  ;;  %11870 = vmatprep.mubr.bf16.mxu0 %v4471_v33 }
 0x188   : > { %v2106_v42 = vpop.f32.mrf.mxu0  ;;  %v11624_v2 = vpop.f32.mrf.mxu1 }
 0x189   : > { %v2213_v43 = vadd.f32 %v2106_v42, %v13842_v55  ;;  %v14073_v48 = vadd.f32 %v11620_v10, %v2215_v28 }
 0x18a   : > { %v11569_v40 = vpop.f32.mrf.mxu0  ;;  %v2585_v23 = vpop.f32.mrf.mxu1 }
 0x18b   : > { %v2216_v56 = vadd.f32 %v11569_v40, %v13848_v34  ;;  %v14076_v21 = vadd.f32 %v2569_v15, %v2213_v43  ;;  %v4476_v34 = vrot.slane %v13851_v35, 3  ;;  %v4482_v43 = vrot.slane %v13877_v47, 3  ;;  %v17993_v40 = vld [vmem:[#allocation7_spill] sm:$0xff] }
 0x18c   : > { %v2109_v37 = vpop.f32.mrf.mxu0  ;;  %v11625_v24 = vpop.f32.mrf.mxu1 }
 0x18d   : > { %v14081_v57 = vadd.f32 %v2109_v37, %v13853_v20  ;;  %v14083_v44 = vadd.f32 %v11621_v26, %v2216_v56  ;;  %v4477_v33 = vsel %vm17825_vm6, %v4474_v25, %v4476_v34  ;;  %v4479_v35 = vsel %vm17825_vm6, %v4476_v34, %v4478_v63  ;;  %v17994_v37 = vld [vmem:[#allocation8_spill] sm:$0xff]  ;;  %v17995_v34 = vld [vmem:[#allocation10_spill] sm:$0xff] }
 0x18e   : > { %v11572_v55 = vpop.f32.mrf.mxu0  ;;  %11871 = vmatmul.mubr.bf16.gmra.mxu0 %v4473_v58  ;;  %v14085_v38 = vpop.f32.mrf.mxu1 }
 0x18f   : > { %v2219_v10 = vadd.f32 %v11572_v55, %v13866_v45  ;;  %11874 = vmatprep.mubr.bf16.mxu0 %v4475_v62 }
 0x190   : > { %v2122_v18 = vpop.f32.mrf.mxu0  ;;  %v11628_v7 = vpop.f32.mrf.mxu1 }
 0x191   : > { %v2217_v15 = vadd.f32 %v2122_v18, %v13874_v22  ;;  %v14091_v41 = vadd.f32 %v11624_v2, %v2219_v10 }
 0x192   : > { %v11573_v20 = vpop.f32.mrf.mxu0  ;;  %v2601_v27 = vpop.f32.mrf.mxu1 }
 0x193   : > { %v2220_v53 = vadd.f32 %v11573_v20, %v13881_v31  ;;  %v14094_v26 = vadd.f32 %v2585_v23, %v2217_v15  ;;  %v4480_v31 = vrot.slane %v13872_v3, 3  ;;  %v17996_v20 = vld [vmem:[#allocation12_spill] sm:$0xff] }
 0x194   : > { %v2125_v45 = vpop.f32.mrf.mxu0  ;;  %v11629_v39 = vpop.f32.mrf.mxu1 }
 0x195   : > { %v14099_v28 = vadd.f32 %v2125_v45, %v13889_v1  ;;  %v14101_v50 = vadd.f32 %v11625_v24, %v2220_v53  ;;  %v4481_v55 = vsel %vm17825_vm6, %v4478_v63, %v4480_v31  ;;  %v4483_v3 = vsel %vm17825_vm6, %v4480_v31, %v4482_v43 }
 0x196   : > { %v11576_v22 = vpop.f32.mrf.mxu0  ;;  %11875 = vmatmul.mubr.bf16.gmra.mxu0 %v4477_v33  ;;  %v14103_v61 = vpop.f32.mrf.mxu1  ;;  %v4486_v45 = vrot.slane %v13902_v5, 3 }
 0x197   : > { %v2223_v42 = vadd.f32 %v11576_v22, %v13905_v6  ;;  %11878 = vmatprep.mubr.bf16.mxu0 %v4479_v35  ;;  %v17997_v35 = vld [vmem:[#allocation13_spill] sm:$0xff] }
 0x198   : > { %v2138_v2 = vpop.f32.mrf.mxu0  ;;  %v11632_v25 = vpop.f32.mrf.mxu1 }
 0x199   : > { %v2221_v23 = vadd.f32 %v2138_v2, %v17993_v40  ;;  %v14109_v56 = vadd.f32 %v11628_v7, %v2223_v42  ;;  %v17998_v2 = vld [vmem:[#allocation15_spill] sm:$0xff] }
 0x19a   : > { %v11577_v1 = vpop.f32.mrf.mxu0  ;;  %v2617_v58 = vpop.f32.mrf.mxu1 }
 0x19b   : > { %v2224_v24 = vadd.f32 %v11577_v1, %v17994_v37  ;;  %v14112_v62 = vadd.f32 %v2601_v27, %v2221_v23  ;;  %v4484_v27 = vrot.slane %v13899_v51, 3 }
 0x19c   : > { %v2141_v6 = vpop.f32.mrf.mxu0  ;;  %v11633_v10 = vpop.f32.mrf.mxu1 }
 0x19d   : > { %v14117_v18 = vadd.f32 %v2141_v6, %v17995_v34  ;;  %v14119_v47 = vadd.f32 %v11629_v39, %v2224_v24  ;;  %v4485_v1 = vsel %vm17825_vm6, %v4482_v43, %v4484_v27  ;;  %v4487_v51 = vsel %vm17825_vm6, %v4484_v27, %v4486_v45  ;;  %v18000_v34 = vld [vmem:[#allocation18_spill] sm:$0xff] }
 0x19e   : > { %v11580_v15 = vpop.f32.mrf.mxu0  ;;  %11879 = vmatmul.mubr.bf16.gmra.mxu0 %v4481_v55  ;;  %v14121_v7 = vpop.f32.mrf.mxu1  ;;  %v17999_v55 = vld [vmem:[#allocation16_spill] sm:$0xff] }
 0x19f   : > { %v2227_v53 = vadd.f32 %v11580_v15, %v17996_v20  ;;  %11882 = vmatprep.mubr.bf16.mxu0 %v4483_v3 }
 0x1a0   : > { %v2154_v33 = vpop.f32.mrf.mxu0  ;;  %v11636_v63 = vpop.f32.mrf.mxu1 }
 0x1a1   : > { %v2225_v22 = vadd.f32 %v2154_v33, %v17997_v35  ;;  %v14127_v42 = vadd.f32 %v11632_v25, %v2227_v53  ;;  %v18002_v33 = vld [vmem:[#allocation11_spill] sm:$0xff] }
 0x1a2   : > { %v11581_v31 = vpop.f32.mrf.mxu0  ;;  %v2633_v39 = vpop.f32.mrf.mxu1  ;;  %v4490_v35 = vrot.slane %v18002_v33, 3 }
 0x1a3   : > { %v2228_v40 = vadd.f32 %v11581_v31, %v17998_v2  ;;  %v14130_v23 = vadd.f32 %v2617_v58, %v2225_v22  ;;  %v18001_v58 = vld [vmem:[#allocation9_spill] sm:$0xff]  ;;  %v18003_v22 = vld [vmem:[#allocation19_spill] sm:$0xff] }
 0x1a4   : > { %v2157_v37 = vpop.f32.mrf.mxu0  ;;  %v11637_v24 = vpop.f32.mrf.mxu1  ;;  %v4488_v20 = vrot.slane %v18001_v58, 3  ;;  %v12596_v2 = vld [vmem:[#allocation3 + $0x78] sm:$0xff]  }
 0x1a5   : > { %v14135_v6 = vadd.f32 %v2157_v37, %v17999_v55  ;;  %v14137_v5 = vadd.f32 %v11633_v10, %v2228_v40  ;;  %v18004_v37 = vld [vmem:[#allocation20_spill] sm:$0xff]  ;;  %11902 = vmatprep.subr.bf16.mxu1 %v12596_v2 }
 0x1a6   : > { %v11584_v3 = vpop.f32.mrf.mxu0  ;;  %11883 = vmatmul.mubr.bf16.gmra.mxu0 %v4485_v1  ;;  %v14139_v25 = vpop.f32.mrf.mxu1  ;;  %v4491_v58 = vsel %vm17825_vm6, %v4488_v20, %v4490_v35  ;;  %11903 = vmatpush3.bf16.msra.mxu1 %v12596_v2 }
 0x1a7   : > { %v2231_v15 = vadd.f32 %v11584_v3, %v18000_v34  ;;  %11886 = vmatprep.mubr.bf16.mxu0 %v4487_v51  ;;  %v4489_v3 = vsel %vm17825_vm6, %v4486_v45, %v4488_v20 }
 0x1a8   : > { %v2170_v53 = vpop.f32.mrf.mxu0  ;;  %v11640_v43 = vpop.f32.mrf.mxu1 }
 0x1a9   : > { %v2229_v27 = vadd.f32 %v2170_v53, %v18003_v22  ;;  %v14145_v31 = vadd.f32 %v11636_v63, %v2231_v15  ;;  %v18006_v22 = vld [vmem:[#allocation14_spill] sm:$0xff] }
 0x1aa   : > { %v11585_v10 = vpop.f32.mrf.mxu0  ;;  %v2649_v40 = vpop.f32.mrf.mxu1  ;;  %v4492_v45 = vrot.slane %v18006_v22, 3 }
 0x1ab   : > { %v2232_v1 = vadd.f32 %v11585_v10, %v18004_v37  ;;  %v14148_v55 = vadd.f32 %v2633_v39, %v2229_v27  ;;  %v4494_v37 = vrot.slane %v13956_v19, 3 }
 0x1ac   : > { %v2173_v51 = vpop.f32.mrf.mxu0  ;;  %v11641_v34 = vpop.f32.mrf.mxu1 }
 0x1ad   : > { %v14153_v33 = vadd.f32 %v2173_v51, %v13988_v60  ;;  %v14155_v63 = vadd.f32 %v11637_v24, %v2232_v1  ;;  %v4493_v51 = vsel %vm17825_vm6, %v4490_v35, %v4492_v45  ;;  %v4495_v22 = vsel %vm17825_vm6, %v4492_v45, %v4494_v37 }
 0x1ae   : > { %v11588_v15 = vpop.f32.mrf.mxu0  ;;  %11887 = vmatmul.mubr.bf16.gmra.mxu0 %v4489_v3  ;;  %v14157_v53 = vpop.f32.mrf.mxu1 }
 0x1af   : > { %18005 = vst [vmem:[#allocation7_spill] sm:$0xff] %v14155_v63  ;;  %v2235_v39 = vadd.f32 %v11588_v15, %v13996_v9  ;;  %11890 = vmatprep.mubr.bf16.mxu0 %v4491_v58  ;;  %v12597_v9 = vld [vmem:[#allocation3 + $0x70] sm:$0xff]  }
 0x1b0   : > { %v2186_v27 = vpop.f32.mrf.mxu0  ;;  %v11712_v10 = vpop.f32.mrf.mxu1  ;;  %11904 = vmatprep.subr.bf16.mxu1 %v12597_v9 }
 0x1b1   : > { %v2233_v20 = vadd.f32 %v2186_v27, %v14000_v17  ;;  %v14163_v2 = vadd.f32 %v11640_v43, %v2235_v39  ;;  %11905 = vmatpush3.bf16.msra.mxu1 %v12597_v9  ;;  %v4496_v43 = vrot.slane %v13969_v8, 3  ;;  %v18008_v39 = vld [vmem:[#allocation17_spill] sm:$0xff] }
 0x1b2   : > { %v11589_v60 = vpop.f32.mrf.mxu0  ;;  %v3330_v24 = vpop.f32.mrf.mxu1  ;;  %v4498_v27 = vrot.slane %v18008_v39, 3 }
 0x1b3   : > { %v2236_v1 = vadd.f32 %v11589_v60, %v14004_v30  ;;  %v14166_v3 = vadd.f32 %v2649_v40, %v2233_v20  ;;  %v4497_v9 = vsel %vm17825_vm6, %v4494_v37, %v4496_v43 }
 0x1b4   : > { %v14169_v58 = vpop.f32.mrf.mxu0  ;;  %v11713_v15 = vpop.f32.mrf.mxu1 }
 0x1b5   : > { %v14172_v63 = vadd.f32 %v11641_v34, %v2236_v1 }
 0x1b6   : > { %v11660_v19 = vpop.f32.mrf.mxu0  ;;  %11891 = vmatmul.mubr.bf16.gmra.mxu0 %v4493_v51  ;;  %v14174_v17 = vpop.f32.mrf.mxu1 }
 0x1b7   : > { %18007 = vst [vmem:[#allocation8_spill] sm:$0xff] %v14172_v63  ;;  %v3137_v30 = vadd.f32 %v11660_v19, %v14018_v54  ;;  %11894 = vmatprep.mubr.bf16.mxu0 %v4495_v22  ;;  %v12598_v54 = vld [vmem:[#allocation3 + $0x68] sm:$0xff]   ;;  %v4499_v19 = vsel %vm17825_vm6, %v4496_v43, %v4498_v27 }
 0x1b8   : > { %v2992_v35 = vpop.f32.mrf.mxu0  ;;  %v11716_v40 = vpop.f32.mrf.mxu1  ;;  %11906 = vmatprep.subr.bf16.mxu1 %v12598_v54 }
 0x1b9   : > { %v3135_v20 = vadd.f32 %v2992_v35, %v14021_v11  ;;  %v14180_v45 = vadd.f32 %v11712_v10, %v3137_v30  ;;  %11907 = vmatpush3.bf16.msra.mxu1 %v12598_v54 }
 0x1ba   : > { %v11661_v34 = vpop.f32.mrf.mxu0  ;;  %v3346_v60 = vpop.f32.mrf.mxu1 }
 0x1bb   : > { %v3138_v1 = vadd.f32 %v11661_v34, %v14029_v46  ;;  %v14183_v51 = vadd.f32 %v3330_v24, %v3135_v20  ;;  %v18011_v24 = vld [vmem:[#allocation22_spill] sm:$0xff] }
 0x1bc   : > { %v14186_v22 = vpop.f32.mrf.mxu0  ;;  %v11717_v8 = vpop.f32.mrf.mxu1  ;;  %v4500_v30 = vrot.slane %v18011_v24, 3 }
 0x1bd   : > { %18009 = vst [vmem:[#allocation10_spill] sm:$0xff] %v14183_v51  ;;  %v14189_v63 = vadd.f32 %v11713_v15, %v3138_v1 }
 0x1be   : > { %v11664_v11 = vpop.f32.mrf.mxu0  ;;  %11895 = vmatmul.mubr.bf16.gmra.mxu0 %v4497_v9  ;;  %v14191_v10 = vpop.f32.mrf.mxu1  ;;  %v4501_v9 = vsel %vm17825_vm6, %v4498_v27, %v4500_v30 }
 0x1bf   : > { %18010 = vst [vmem:[#allocation12_spill] sm:$0xff] %v14189_v63  ;;  %v3141_v46 = vadd.f32 %v11664_v11, %v14037_v14  ;;  %11898 = vmatprep.mubr.bf16.mxu0 %v4499_v19  ;;  %v12599_v11 = vld [vmem:[#allocation3 + $0x60] sm:$0xff]  }
 0x1c0   : > { %v3008_v37 = vpop.f32.mrf.mxu0  ;;  %v11720_v35 = vpop.f32.mrf.mxu1  ;;  %11908 = vmatprep.subr.bf16.mxu1 %v12599_v11 }
 0x1c1   : > { %v3139_v39 = vadd.f32 %v3008_v37, %v14040_v12  ;;  %v14196_v20 = vadd.f32 %v11716_v40, %v3141_v46  ;;  %11909 = vmatpush3.bf16.msra.mxu1 %v12599_v11 }
 0x1c2   : > { %v11665_v43 = vpop.f32.mrf.mxu0  ;;  %v3362_v15 = vpop.f32.mrf.mxu1 }
 0x1c3   : > { %18012 = vst [vmem:[#allocation13_spill] sm:$0xff] %v14196_v20  ;;  %v3142_v34 = vadd.f32 %v11665_v43, %v14047_v0  ;;  %v14199_v1 = vadd.f32 %v3346_v60, %v3139_v39  ;;  %v4982_v0 = vlaneseq  ;;  %v12600_v60 = vld [vmem:[#allocation3 + $0x38] sm:$0xff]  }
 0x1c4   : > { %v14202_v54 = vpop.f32.mrf.mxu0  ;;  %v11721_v14 = vpop.f32.mrf.mxu1  ;;  %11954 = vmatprep.subr.bf16.mxu0 %v12600_v60 }
 0x1c5   : > { %18013 = vst [vmem:[#allocation15_spill] sm:$0xff] %v14199_v1  ;;  %v14204_v19 = vadd.f32 %v11717_v8, %v3142_v34  ;;  %11955 = vmatpush3.bf16.msra.mxu0 %v12600_v60 }
 0x1c6   : > { %v11668_v24 = vpop.f32.mrf.mxu0  ;;  %11899 = vmatmul.mubr.bf16.gmra.mxu0 %v4501_v9  ;;  %v14206_v63 = vpop.f32.mrf.mxu1  ;;  %v14217_v9 = vshrl.u32 %v4982_v0, 7 }
 0x1c7   : > { %18014 = vst [vmem:[#allocation16_spill] sm:$0xff] %v14204_v19  ;;  %v3145_v12 = vadd.f32 %v11668_v24, %v14055_v36  ;;  %v12602_v24 = vld [vmem:[#allocation3 + $0x30] sm:$0xff]  }
 0x1c8   : > { %v3024_v40 = vpop.f32.mrf.mxu0  ;;  %v11724_v46 = vpop.f32.mrf.mxu1  ;;  %18017 = vst [vmem:[#allocation11_spill] sm:$0xff] %v14217_v9  ;;  %11956 = vmatprep.subr.bf16.mxu0 %v12602_v24 }
 0x1c9   : > { %v3143_v27 = vadd.f32 %v3024_v40, %v14058_v32  ;;  %v14210_v30 = vadd.f32 %v11720_v35, %v3145_v12  ;;  %11957 = vmatpush3.bf16.msra.mxu0 %v12602_v24 }
 0x1ca   : > { %v11669_v37 = vpop.f32.mrf.mxu0  ;;  %v3378_v8 = vpop.f32.mrf.mxu1 }
 0x1cb   : > { %18015 = vst [vmem:[#allocation18_spill] sm:$0xff] %v14210_v30  ;;  %v3146_v39 = vadd.f32 %v11669_v37, %v14065_v52  ;;  %v14213_v43 = vadd.f32 %v3362_v15, %v3143_v27  ;;  %v14225_v52 = vadd.s32 16, %v14217_v9 }
 0x1cc   : > { %v14215_v34 = vpop.f32.mrf.mxu0  ;;  %v11725_v36 = vpop.f32.mrf.mxu1 }
 0x1cd   : > { %18016 = vst [vmem:[#allocation9_spill] sm:$0xff] %v14213_v43  ;;  %v14219_v11 = vadd.f32 %v11721_v14, %v3146_v39 }
 0x1ce   : > { %v11672_v19 = vpop.f32.mrf.mxu0  ;;  %v14221_v32 = vpop.f32.mrf.mxu1 }
 0x1cf   : > { %18018 = vst [vmem:[#allocation19_spill] sm:$0xff] %v14219_v11  ;;  %18019 = vst [vmem:[#allocation20_spill] sm:$0xff] %v14221_v32  ;;  %v3149_v35 = vadd.f32 %v11672_v19, %v14073_v48  ;;  %v14236_v19 = vmul.u32.u64.low 3817748708, %v14225_v52  ;;  %v14237_v11 = vmul.u32.u64.high 3817748708, %v14225_v52, %v14236_v19 }
 0x1d0   : > { %v3040_v12 = vpop.f32.mrf.mxu0  ;;  %v11728_v40 = vpop.f32.mrf.mxu1 }
 0x1d1   : > { %v3147_v15 = vadd.f32 %v3040_v12, %v14076_v21  ;;  %v14228_v60 = vadd.f32 %v11724_v46, %v3149_v35  ;;  %v14242_v24 = vmul.u32.u64.low 3817748708, %v14217_v9  ;;  %v14243_v21 = vmul.u32.u64.high 3817748708, %v14217_v9, %v14242_v24 }
 0x1d2   : > { %v11673_v0 = vpop.f32.mrf.mxu0  ;;  %v3394_v14 = vpop.f32.mrf.mxu1  ;;  %v5047_v1 = vshrl.u32 %v14237_v11, 4 }
 0x1d3   : > { %18020 = vst [vmem:[#allocation14_spill] sm:$0xff] %v14228_v60  ;;  %v3150_v27 = vadd.f32 %v11673_v0, %v14083_v44  ;;  %v14231_v37 = vadd.f32 %v3378_v8, %v3147_v15  ;;  %v14248_v44 = vadd.s32 24, %v14217_v9  ;;  %v12603_v0 = vld [vmem:[#allocation3 + $0x28] sm:$0xff]  }
 0x1d4   : > { %v14233_v39 = vpop.f32.mrf.mxu0  ;;  %v11729_v48 = vpop.f32.mrf.mxu1  ;;  %11958 = vmatprep.subr.bf16.mxu0 %v12603_v0  ;;  %v5048_v11 = vmul.u32 18, %v5047_v1 }
 0x1d5   : > { %18021 = vst [vmem:[#allocation17_spill] sm:$0xff] %v14231_v37  ;;  %v14239_v43 = vadd.f32 %v11725_v36, %v3150_v27  ;;  %11959 = vmatpush3.bf16.msra.mxu0 %v12603_v0  ;;  %v12605_v0 = vld [vmem:[#allocation3 + $0x20] sm:$0xff]  }
 0x1d6   : > { %v11676_v46 = vpop.f32.mrf.mxu0  ;;  %v14245_v35 = vpop.f32.mrf.mxu1  ;;  %11960 = vmatprep.subr.bf16.mxu0 %v12605_v0 }
 0x1d7   : > { %18022 = vst [vmem:[#allocation22_spill] sm:$0xff] %v14239_v43  ;;  %18023 = vst [vmem:[#allocation25_spill] sm:$0xff] %v14245_v35  ;;  %v3153_v8 = vadd.f32 %v11676_v46, %v14091_v41  ;;  %v14255_v43 = vmul.u32.u64.low 3817748708, %v14248_v44  ;;  %v14256_v24 = vmul.u32.u64.high 3817748708, %v14248_v44, %v14255_v43 }
 0x1d8   : > { %v3056_v12 = vpop.f32.mrf.mxu0  ;;  %v11732_v15 = vpop.f32.mrf.mxu1 }
 0x1d9   : > { %v3151_v37 = vadd.f32 %v3056_v12, %v14094_v26  ;;  %v14252_v19 = vadd.f32 %v11728_v40, %v3153_v8  ;;  %v14265_v26 = vadd.s32 8, %v14217_v9  ;;  %v5025_v8 = vshrl.u32 %v14243_v21, 4  ;;  %11961 = vmatpush3.bf16.msra.mxu0 %v12605_v0 }
 0x1da   : > { %v11677_v36 = vpop.f32.mrf.mxu0  ;;  %v3410_v27 = vpop.f32.mrf.mxu1  ;;  %v5058_v32 = vshrl.u32 %v14256_v24, 4  ;;  %v2673_v24 = vadd.f32 %v14049_v4, %v14063_v16  ;;  %v14320_v4 = vadd.f32 %v14103_v61, %v14117_v18  ;;  %v14338_v18 = vadd.s32 40, %v14217_v9 }
 0x1db   : > { %18024 = vst [vmem:[#allocation26_spill] sm:$0xff] %v14252_v19  ;;  %v3154_v60 = vadd.f32 %v11677_v36, %v14101_v50  ;;  %v14259_v30 = vadd.f32 %v3394_v14, %v3151_v37  ;;  %v14273_v50 = vadd.s32 48, %v14217_v9  ;;  %v12601_v37 = vld [vmem:[#allocation3 + $0x58] sm:$0xff]   ;;  %v5026_v35 = vmul.u32 18, %v5025_v8 }
 0x1dc   : > { %v14261_v41 = vpop.f32.mrf.mxu0  ;;  %v11733_v46 = vpop.f32.mrf.mxu1  ;;  %v14277_v19 = vmul.u32.u64.low 3817748708, %v14265_v26  ;;  %v14278_v20 = vmul.u32.u64.high 3817748708, %v14265_v26, %v14277_v19  ;;  %11910 = vmatprep.subr.bf16.mxu1 %v12601_v37  ;;  %v2669_v8 = vadd.f32 %v14032_v29, %v14045_v49  ;;  %v12606_v29 = vld [vmem:[#allocation3 + $0x18] sm:$0xff]   ;;  %v14316_v49 = vadd.f32 %v14085_v38, %v14099_v28 }
 0x1dd   : > { %18025 = vst [vmem:[#allocation27_spill] sm:$0xff] %v14259_v30  ;;  %v14267_v40 = vadd.f32 %v11729_v48, %v3154_v60  ;;  %v18028_v60 = vld [vmem:[#allocation23_spill] sm:$0xff]  ;;  %v18029_v48 = vld [vmem:[#allocation21_spill] sm:$0xff]  ;;  %v14287_v1 = vmul.u32.u64.low 3817748708, %v14273_v50  ;;  %v14288_v51 = vmul.u32.u64.high 3817748708, %v14273_v50, %v14287_v1  ;;  %11911 = vmatpush3.bf16.msra.mxu1 %v12601_v37  ;;  %v14291_v19 = vadd.s32 32, %v14217_v9  ;;  %11962 = vmatprep.subr.bf16.mxu0 %v12606_v29 }
 0x1de   : > { %v11680_v12 = vpop.f32.mrf.mxu0  ;;  %v14270_v43 = vpop.f32.mrf.mxu1  ;;  %v1888_v21 = vadd.f32 %v18029_v48, %v18028_v60  ;;  %v14304_v37 = vadd.f32 %v14067_v59, %v14081_v57  ;;  %v14309_v48 = vsub.s32 %v14225_v52, %v5048_v11  ;;  %v14328_v52 = vsub.s32 %v14217_v9, %v5026_v35  ;;  %11963 = vmatpush3.bf16.msra.mxu0 %v12606_v29 }
 0x1df   : > { %18026 = vst [vmem:[#allocation28_spill] sm:$0xff] %v14267_v40  ;;  %18027 = vst [vmem:[#allocation29_spill] sm:$0xff] %v14270_v43  ;;  %v3157_v14 = vadd.f32 %v11680_v12, %v14109_v56  ;;  %v3140_v28 = vadd.f32 %v14202_v54, %v2669_v8  ;;  %v14372_v29 = vadd.f32 %v14139_v25, %v14153_v33 }
 0x1e0   : > { %v3072_v36 = vpop.f32.mrf.mxu0  ;;  %v11736_v30 = vpop.f32.mrf.mxu1  ;;  %18031 = vst [vmem:[#allocation23_spill] sm:$0xff] %v14309_v48  ;;  %v2234_v16 = vadd.f32 %v14169_v58, %v1888_v21  ;;  %vm5417_vm10 = vcmp.ne.s32.totalorder %v14309_v48, 0  ;;  %vm5453_vm9 = vcmp.lt.s32.totalorder %v14309_v48, 0  ;;  %vm5415_vm15 = vcmp.ne.s32.totalorder %v14328_v52, 0 }
 0x1e1   : > { %v3155_v40 = vadd.f32 %v3072_v36, %v14112_v62  ;;  %v14283_v43 = vadd.f32 %v11732_v15, %v3157_v14  ;;  %v18030_v62 = vld [vmem:[#allocation24_spill] sm:$0xff]  ;;  %vm5451_vm7 = vcmp.lt.s32.totalorder %v14328_v52, 0  ;;  %vm14381_vm3 = vmand %vm5453_vm9, %vm5417_vm10  ;;  %v14394_v33 = vadd.s32 18, %v14328_v52 }
 0x1e2   : > { %v11681_v56 = vpop.f32.mrf.mxu0  ;;  %v3426_v12 = vpop.f32.mrf.mxu1  ;;  %v2665_v15 = vadd.f32 %v18030_v62, %v14027_v13  ;;  %v14312_v13 = vadd.s32 56, %v14217_v9  ;;  %18033 = vst [vmem:[#allocation24_spill] sm:$0xff] %v14328_v52  ;;  %v5091_v62 = vshrl.u32 %v14288_v51, 4  ;;  %vm14402_vm4 = vmand %vm5451_vm7, %vm5415_vm15 }
 0x1e3   : > { %v3158_v14 = vadd.f32 %v11681_v56, %v14119_v47  ;;  %v14298_v36 = vadd.f32 %v3410_v27, %v3155_v40  ;;  %v5059_v27 = vmul.u32 18, %v5058_v32  ;;  %v5036_v32 = vshrl.u32 %v14278_v20, 4  ;;  %18042 = vst [vmem:[#allocation36_spill] sm:$0xff] %v14394_v33 }
 0x1e4   : > { %v14306_v60 = vpop.f32.mrf.mxu0  ;;  %v11737_v0 = vpop.f32.mrf.mxu1  ;;  %v14331_v40 = vmul.u32.u64.low 3817748708, %v14291_v19  ;;  %v14332_v11 = vmul.u32.u64.high 3817748708, %v14291_v19, %v14331_v40  ;;  %v3136_v38 = vadd.f32 %v14186_v22, %v2665_v15  ;;  %v14524_v33 = vadd.s32 120, %v14217_v9 }
 0x1e5   : > { %v14323_v59 = vadd.f32 %v11733_v46, %v3158_v14  ;;  %v14343_v35 = vmul.u32.u64.low 3817748708, %v14312_v13  ;;  %v14344_v21 = vmul.u32.u64.high 3817748708, %v14312_v13, %v14343_v35  ;;  %v14356_v20 = vsub.s32 %v14248_v44, %v5059_v27 }
 0x1e6   : > { %v11684_v57 = vpop.f32.mrf.mxu0  ;;  %v14325_v47 = vpop.f32.mrf.mxu1  ;;  %v14363_v15 = vmul.u32.u64.low 3817748708, %v14338_v18  ;;  %v14364_v8 = vmul.u32.u64.high 3817748708, %v14338_v18, %v14363_v15  ;;  %v14368_v14 = vadd.f32 %v14121_v7, %v14135_v6  ;;  %v3144_v44 = vadd.f32 %v14215_v34, %v2673_v24  ;;  %v12607_v34 = vld [vmem:[#allocation3 + $0x10] sm:$0xff]  }
 0x1e7   : > { %18032 = vst [vmem:[#allocation21_spill] sm:$0xff] %v14323_v59  ;;  %v3161_v61 = vadd.f32 %v11684_v57, %v14127_v42  ;;  %v14351_v42 = vadd.s32 18, %v14309_v48  ;;  %18036 = vst [vmem:[#allocation32_spill] sm:$0xff] %v14356_v20  ;;  %v14386_v7 = vadd.f32 %v14157_v53, %v2234_v16  ;;  %v14389_v6 = vadd.f32 %v14174_v17, %v3136_v38 }
 0x1e8   : > { %v3088_v58 = vpop.f32.mrf.mxu0  ;;  %v11740_v46 = vpop.f32.mrf.mxu1  ;;  %v18043_v40 = vmov 0  ;;  %vm5418_vm1 = vcmp.ne.s32.totalorder %v14356_v20, 0  ;;  %vm5454_vm5 = vcmp.lt.s32.totalorder %v14356_v20, 0  ;;  %v5069_v53 = vshrl.u32 %v14332_v11, 4  ;;  %11964 = vmatprep.subr.bf16.mxu0 %v12607_v34 }
 0x1e9   : > { %v3159_v22 = vadd.f32 %v3088_v58, %v14130_v23  ;;  %v14347_v56 = vadd.f32 %v11736_v30, %v3161_v61  ;;  %18035 = vst [vmem:[#allocation31_spill] sm:$0xff] %v14351_v42  ;;  %v18044_v40 = vsel %vm14402_vm4, 4294967295, %v18043_v40  ;;  %v14410_v17 = vadd.s32 80, %v14217_v9  ;;  %11965 = vmatpush3.bf16.msra.mxu0 %v12607_v34  ;;  %vm14441_vm8 = vmand %vm5454_vm5, %vm5418_vm1 }
 0x1ea   : > { %v11685_v54 = vpop.f32.mrf.mxu0  ;;  %v3442_v1 = vpop.f32.mrf.mxu1  ;;  %18045 = vst [vmem:[#allocation37_spill] sm:$0xff] %v18044_v40  ;;  %v14413_v16 = vadd.f32 %v14191_v10, %v3140_v28  ;;  %v5092_v58 = vmul.u32 18, %v5091_v62  ;;  %v5070_v62 = vmul.u32 18, %v5069_v53 }
 0x1eb   : > { %18034 = vst [vmem:[#allocation30_spill] sm:$0xff] %v14347_v56  ;;  %v3162_v23 = vadd.f32 %v11685_v54, %v14137_v5  ;;  %v14360_v30 = vadd.f32 %v3426_v12, %v3159_v22  ;;  %v18038_v5 = vmov 0  ;;  %v5037_v12 = vmul.u32 18, %v5036_v32 }
 0x1ec   : > { %v14375_v57 = vpop.f32.mrf.mxu0  ;;  %v11741_v51 = vpop.f32.mrf.mxu1  ;;  %v18039_v5 = vsel %vm14381_vm3, 4294967295, %v18038_v5  ;;  %v14421_v32 = vadd.f32 %v14206_v63, %v3144_v44  ;;  %v14424_v22 = vadd.s32 18, %v14356_v20  ;;  %v14453_v44 = vadd.s32 88, %v14217_v9 }
 0x1ed   : > { %18037 = vst [vmem:[#allocation33_spill] sm:$0xff] %v14360_v30  ;;  %18040 = vst [vmem:[#allocation34_spill] sm:$0xff] %v18039_v5  ;;  %v14391_v25 = vadd.f32 %v11737_v0, %v3162_v23  ;;  %v12604_v0 = vld [vmem:[#allocation3 + $0x50] sm:$0xff]   ;;  %v14427_v10 = vsub.s32 %v14265_v26, %v5037_v12  ;;  %v18049_v26 = vmov 0  ;;  %v18052_v12 = vld [vmem:[#allocation7_spill] sm:$0xff]  ;;  %v14485_v61 = vsub.s32 %v14291_v19, %v5070_v62 }
 0x1ee   : > { %v11688_v24 = vpop.f32.mrf.mxu0  ;;  %v14396_v27 = vpop.f32.mrf.mxu1  ;;  %18046 = vst [vmem:[#allocation38_spill] sm:$0xff] %v14424_v22  ;;  %11912 = vmatprep.subr.bf16.mxu1 %v12604_v0  ;;  %v18050_v26 = vsel %vm14441_vm8, 4294967295, %v18049_v26  ;;  %v14449_v23 = vmul.u32.u64.low 3817748708, %v14410_v17  ;;  %v14450_v15 = vmul.u32.u64.high 3817748708, %v14410_v17, %v14449_v23  ;;  %v14504_v62 = vadd.s32 112, %v14217_v9 }
 0x1ef   : > { %18041 = vst [vmem:[#allocation35_spill] sm:$0xff] %v14391_v25  ;;  %v3165_v38 = vadd.f32 %v11688_v24, %v14145_v31  ;;  %18047 = vst [vmem:[#allocation39_spill] sm:$0xff] %v14427_v10  ;;  %v5102_v31 = vshrl.u32 %v14344_v21, 4  ;;  %11913 = vmatpush3.bf16.msra.mxu1 %v12604_v0  ;;  %v14446_v21 = vadd.s32 64, %v14217_v9  ;;  %v5080_v0 = vshrl.u32 %v14364_v8, 4  ;;  %v18089_v25 = vld [vmem:[#allocation12_spill] sm:$0xff] }
 0x1f0   : > { %v3104_v11 = vpop.f32.mrf.mxu0  ;;  %v11744_v35 = vpop.f32.mrf.mxu1  ;;  %18051 = vst [vmem:[#allocation41_spill] sm:$0xff] %v18050_v26  ;;  %vm5416_vm10 = vcmp.ne.s32.totalorder %v14427_v10, 0  ;;  %vm5452_vm9 = vcmp.lt.s32.totalorder %v14427_v10, 0  ;;  %v14477_v8 = vadd.s32 72, %v14217_v9  ;;  %v14482_v53 = vadd.s32 18, %v14427_v10  ;;  %18057 = vst [vmem:[#allocation45_spill] sm:$0xff] %v14485_v61 }
 0x1f1   : > { %v3163_v28 = vadd.f32 %v3104_v11, %v14148_v55  ;;  %v14431_v54 = vadd.f32 %v11740_v46, %v3165_v38  ;;  %v14459_v38 = vsub.s32 %v14273_v50, %v5092_v58  ;;  %v5081_v20 = vmul.u32 18, %v5080_v0  ;;  %vm14551_vm11 = vmand %vm5452_vm9, %vm5416_vm10 }
 0x1f2   : > { %v11689_v55 = vpop.f32.mrf.mxu0  ;;  %v3458_v46 = vpop.f32.mrf.mxu1  ;;  %v14473_v50 = vmul.u32.u64.low 3817748708, %v14446_v21  ;;  %v14474_v58 = vmul.u32.u64.high 3817748708, %v14446_v21, %v14473_v50  ;;  %18056 = vst [vmem:[#allocation44_spill] sm:$0xff] %v14482_v53  ;;  %vm5419_vm1 = vcmp.ne.s32.totalorder %v14485_v61, 0  ;;  %vm5455_vm5 = vcmp.lt.s32.totalorder %v14485_v61, 0 }
 0x1f3   : > { %18048 = vst [vmem:[#allocation40_spill] sm:$0xff] %v14431_v54  ;;  %v3166_v34 = vadd.f32 %v11689_v55, %v18052_v12  ;;  %v14456_v24 = vadd.f32 %v3442_v1, %v3163_v28  ;;  %18054 = vst [vmem:[#allocation42_spill] sm:$0xff] %v14459_v38  ;;  %v5103_v55 = vmul.u32 18, %v5102_v31  ;;  %v12609_v1 = vld [vmem:[#allocation3 + $0x8] sm:$0xff]   ;;  %vm5421_vm15 = vcmp.ne.s32.totalorder %v14459_v38, 0 }
 0x1f4   : > { %v14462_v11 = vpop.f32.mrf.mxu0  ;;  %v11745_v63 = vpop.f32.mrf.mxu1  ;;  %11966 = vmatprep.subr.bf16.mxu0 %v12609_v1  ;;  %vm5457_vm7 = vcmp.lt.s32.totalorder %v14459_v38, 0 }
 0x1f5   : > { %18053 = vst [vmem:[#allocation7_spill] sm:$0xff] %v14456_v24  ;;  %v14470_v28 = vadd.f32 %v11741_v51, %v3166_v34  ;;  %v14488_v31 = vmul.u32.u64.low 3817748708, %v14453_v44  ;;  %v14489_v51 = vmul.u32.u64.high 3817748708, %v14453_v44, %v14488_v31  ;;  %v14493_v34 = vadd.f32 %v14233_v39, %v14304_v37  ;;  %11967 = vmatpush3.bf16.msra.mxu0 %v12609_v1  ;;  %vm14574_vm10 = vmand %vm5457_vm7, %vm5421_vm15 }
 0x1f6   : > { %v11692_v23 = vpop.f32.mrf.mxu0  ;;  %v14479_v12 = vpop.f32.mrf.mxu1  ;;  %v14501_v19 = vsub.s32 %v14312_v13, %v5103_v55  ;;  %v12608_v31 = vld [vmem:[#allocation3 + $0x48] sm:$0xff]   ;;  %v14507_v39 = vadd.s32 96, %v14217_v9  ;;  %v14513_v0 = vmul.u32.u64.low 3817748708, %v14477_v8  ;;  %v14514_v1 = vmul.u32.u64.high 3817748708, %v14477_v8, %v14513_v0  ;;  %vm14592_vm15 = vmand %vm5455_vm5, %vm5419_vm1 }
 0x1f7   : > { %18055 = vst [vmem:[#allocation43_spill] sm:$0xff] %v14470_v28  ;;  %v3169_v50 = vadd.f32 %v11692_v23, %v14163_v2  ;;  %v14519_v13 = vadd.s32 18, %v14459_v38  ;;  %v5135_v55 = vshrl.u32 %v14450_v15, 4  ;;  %11914 = vmatprep.subr.bf16.mxu1 %v12608_v31  ;;  %v14645_v24 = vadd.s32 104, %v14217_v9 }
 0x1f8   : > { %v3120_v22 = vpop.f32.mrf.mxu0  ;;  %v14497_v26 = vpop.f32.mrf.mxu1  ;;  %18058 = vst [vmem:[#allocation46_spill] sm:$0xff] %v14501_v19  ;;  %11915 = vmatpush3.bf16.msra.mxu1 %v12608_v31  ;;  %v14538_v15 = vmul.u32.u64.low 3817748708, %v14504_v62  ;;  %v14539_v48 = vmul.u32.u64.high 3817748708, %v14504_v62, %v14538_v15  ;;  %v14542_v42 = vmul.u32.u64.low 3817748708, %v14507_v39  ;;  %v14543_v5 = vmul.u32.u64.high 3817748708, %v14507_v39, %v14542_v42 }
 0x1f9   : > { %v3167_v2 = vadd.f32 %v3120_v22, %v14166_v3  ;;  %v14510_v37 = vadd.f32 %v11744_v35, %v3169_v50  ;;  %18060 = vst [vmem:[#allocation48_spill] sm:$0xff] %v14519_v13  ;;  %v18061_v3 = vld [vmem:[#allocation8_spill] sm:$0xff]  ;;  %v14531_v50 = vsub.s32 %v14338_v18, %v5081_v20  ;;  %v18065_v18 = vmov 0 }
 0x1fa   : > { %v11693_v23 = vpop.f32.mrf.mxu0  ;;  %v14516_v52 = vpop.f32.mrf.mxu1  ;;  %v18066_v18 = vsel %vm14551_vm11, 4294967295, %v18065_v18  ;;  %vm5422_vm14 = vcmp.ne.s32.totalorder %v14501_v19, 0  ;;  %vm5458_vm6 = vcmp.lt.s32.totalorder %v14501_v19, 0  ;;  %v5113_v20 = vshrl.u32 %v14474_v58, 4 }
 0x1fb   : > { %18059 = vst [vmem:[#allocation47_spill] sm:$0xff] %v14510_v37  ;;  %v3170_v35 = vadd.f32 %v11693_v23, %v18061_v3  ;;  %v14527_v22 = vadd.f32 %v3458_v46, %v3167_v2  ;;  %18063 = vst [vmem:[#allocation49_spill] sm:$0xff] %v14531_v50  ;;  %v12610_v46 = vld [vmem:[#allocation3] sm:$0xff]   ;;  %v5136_v42 = vmul.u32 18, %v5135_v55  ;;  %v3152_v15 = vadd.f32 %v14261_v41, %v14316_v49  ;;  %v18081_v37 = vld [vmem:[#allocation20_spill] sm:$0xff] }
 0x1fc   : > { %v14533_v0 = vpop.f32.mrf.mxu0  ;;  %v14535_v40 = vpop.f32.mrf.mxu1  ;;  %18067 = vst [vmem:[#allocation51_spill] sm:$0xff] %v18066_v18  ;;  %11968 = vmatprep.subr.bf16.mxu0 %v12610_v46  ;;  %v18068_v58 = vmov 0  ;;  %vm5420_vm9 = vcmp.ne.s32.totalorder %v14531_v50, 0  ;;  %vm5456_vm2 = vcmp.lt.s32.totalorder %v14531_v50, 0  ;;  %v18071_v55 = vmov 0  ;;  %vm14609_vm7 = vmand %vm5458_vm6, %vm5422_vm14 }
 0x1fd   : > { %18062 = vst [vmem:[#allocation8_spill] sm:$0xff] %v14527_v22  ;;  %v14545_v2 = vadd.f32 %v11745_v63, %v3170_v35  ;;  %v5146_v63 = vshrl.u32 %v14489_v51, 4  ;;  %v14562_v3 = vmul.u32.u64.low 3817748708, %v14524_v33  ;;  %v14563_v35 = vmul.u32.u64.high 3817748708, %v14524_v33, %v14562_v3  ;;  %11969 = vmatpush3.bf16.msra.mxu0 %v12610_v46  ;;  %vm14631_vm14 = vmand %vm5456_vm2, %vm5420_vm9 }
 0x1fe   : > { %v11764_v31 = vpop.f32.mrf.mxu0  ;;  %v14558_v23 = vpop.f32.mrf.mxu1  ;;  %v18069_v58 = vsel %vm14574_vm10, 4294967295, %v18068_v58  ;;  %v3156_v51 = vadd.f32 %v14306_v60, %v14320_v4  ;;  %v18072_v55 = vsel %vm14592_vm15, 4294967295, %v18071_v55  ;;  %v14597_v46 = vadd.s32 18, %v14485_v61  ;;  %v6287_v4 = vld [vmem:[#allocation2] sm:$0xf]  ;;  %v18076_v3 = vld [vmem:[#allocation10_spill] sm:$0xff] }
 0x1ff   : > { %18064 = vst [vmem:[#allocation50_spill] sm:$0xff] %v14545_v2  ;;  %v14568_v2 = vadd.f32 %v11764_v31, %v14180_v45  ;;  %18070 = vst [vmem:[#allocation52_spill] sm:$0xff] %v18069_v58  ;;  %v14600_v60 = vadd.s32 18, %v14501_v19  ;;  %v6288_v31 = vld [vmem:[#allocation2 + $0x4] sm:$0xf]  ;;  %v18077_v45 = vmov 0  ;;  %v14619_v28 = vadd.f32 %v18081_v37, %v14493_v34 }
 0x200   : > { %v3793_v41 = vpop.f32.mrf.mxu0  ;;  %v14582_v49 = vpop.f32.mrf.mxu1  ;;  %18073 = vst [vmem:[#allocation53_spill] sm:$0xff] %v18072_v55  ;;  %18074 = vst [vmem:[#allocation54_spill] sm:$0xff] %v14597_v46  ;;  %v18078_v45 = vsel %vm14609_vm7, 4294967295, %v18077_v45  ;;  %v14614_v10 = vadd.s32 18, %v14531_v50  ;;  %v5114_v53 = vmul.u32 18, %v5113_v20  ;;  %v5124_v18 = vshrl.u32 %v14514_v1, 4 }
 0x201   : > { %18075 = vst [vmem:[#allocation55_spill] sm:$0xff] %v14600_v60  ;;  %v14603_v22 = vadd.f32 %v3793_v41, %v18076_v3  ;;  %18079 = vst [vmem:[#allocation10_spill] sm:$0xff] %v18078_v45  ;;  %v18083_v20 = vmov 0  ;;  %v14636_v1 = vsub.s32 %v14410_v17, %v5136_v42  ;;  %v5147_v34 = vmul.u32 18, %v5146_v63  ;;  %v18087_v37 = vld [vmem:[#allocation25_spill] sm:$0xff]  ;;  %v12611_v17 = vld [vmem:[#allocation3 + $0x40] sm:$0xff]  }
 0x202   : > { %18080 = vst [vmem:[#allocation56_spill] sm:$0xff] %v14614_v10  ;;  %18082 = vst [vmem:[#allocation20_spill] sm:$0xff] %v14619_v28  ;;  %v11765_v41 = vpop.f32.mrf.mxu0  ;;  %v14621_v3 = vpop.f32.mrf.mxu1  ;;  %v18084_v20 = vsel %vm14631_vm14, 4294967295, %v18083_v20  ;;  %v14639_v54 = vadd.f32 %v18087_v37, %v3152_v15  ;;  %v14647_v38 = vcombine.low %v6287_v4, %v6288_v31  ;;  %v5179_v42 = vshrl.u32 %v14539_v48, 4  ;;  %v18090_v15 = vld [vmem:[#allocation29_spill] sm:$0xff]  ;;  %11916 = vmatprep.subr.bf16.mxu1 %v12611_v17 }
 0x203   : > { %18085 = vst [vmem:[#allocation57_spill] sm:$0xff] %v18084_v20  ;;  %18086 = vst [vmem:[#allocation58_spill] sm:$0xff] %v14636_v1  ;;  %v14642_v30 = vadd.f32 %v11765_v41, %v18089_v25  ;;  %v5157_v63 = vshrl.u32 %v14543_v5, 4  ;;  %v14664_v4 = vadd.f32 %v18090_v15, %v3156_v51  ;;  %v14671_v41 = vsub.s32 %v14446_v21, %v5114_v53  ;;  %v18094_v31 = vld [vmem:[#allocation13_spill] sm:$0xff] }
 0x204   : > { %18088 = vst [vmem:[#allocation25_spill] sm:$0xff] %v14639_v54  ;;  %v14649_v13 = vpop.f32.mrf.mxu0  ;;  %v14651_v58 = vpop.f32.mrf.mxu1  ;;  %v5125_v37 = vmul.u32 18, %v5124_v18  ;;  %11970 = vmatprep.mubr.bf16.mxu0 %v14647_v38  ;;  %v3160_v48 = vadd.f32 %v14375_v57, %v14368_v14  ;;  %vm5425_vm2 = vcmp.ne.s32.totalorder %v14636_v1, 0  ;;  %v14680_v51 = vsub.s32 %v14453_v44, %v5147_v34  ;;  %11917 = vmatpush3.bf16.msra.mxu1 %v12611_v17 }
 0x205   : > { %18091 = vst [vmem:[#allocation12_spill] sm:$0xff] %v14664_v4  ;;  %18092 = vst [vmem:[#allocation29_spill] sm:$0xff] %v14671_v41  ;;  %v5190_v15 = vshrl.u32 %v14563_v35, 4  ;;  %vm5461_vm6 = vcmp.lt.s32.totalorder %v14636_v1, 0  ;;  %v14688_v53 = vmul.u32.u64.low 3817748708, %v14645_v24  ;;  %v14689_v18 = vmul.u32.u64.high 3817748708, %v14645_v24, %v14688_v53 }
 0x206   : > { %v11768_v25 = vpop.f32.mrf.mxu0  ;;  %v14676_v5 = vpop.f32.mrf.mxu1  ;;  %18093 = vst [vmem:[#allocation59_spill] sm:$0xff] %v14680_v51  ;;  %v14694_v50 = vadd.s32 18, %v14636_v1  ;;  %v5180_v44 = vmul.u32 18, %v5179_v42  ;;  %v5158_v34 = vmul.u32 18, %v5157_v63  ;;  %v14697_v35 = vadd.s32 144, %v14217_v9  ;;  %vm14766_vm12 = vmand %vm5461_vm6, %vm5425_vm2 }
 0x207   : > { %v14684_v21 = vadd.f32 %v11768_v25, %v18094_v31  ;;  %v18096_v25 = vld [vmem:[#allocation15_spill] sm:$0xff]  ;;  %vm5423_vm1 = vcmp.ne.s32.totalorder %v14671_v41, 0  ;;  %vm5459_vm5 = vcmp.lt.s32.totalorder %v14671_v41, 0  ;;  %v14705_v53 = vsub.s32 %v14477_v8, %v5125_v37 }
 0x208   : > { %v3809_v14 = vpop.f32.mrf.mxu0  ;;  %v14691_v57 = vpop.f32.mrf.mxu1  ;;  %18095 = vst [vmem:[#allocation13_spill] sm:$0xff] %v14694_v50  ;;  %v14710_v42 = vadd.s32 18, %v14671_v41  ;;  %v5191_v63 = vmul.u32 18, %v5190_v15  ;;  %v14714_v17 = vadd.s32 128, %v14217_v9  ;;  %v14721_v8 = vadd.s32 18, %v14680_v51  ;;  %vm14783_vm2 = vmand %vm5459_vm5, %vm5423_vm1 }
 0x209   : > { %v14700_v31 = vadd.f32 %v3809_v14, %v18096_v25  ;;  %18097 = vst [vmem:[#allocation15_spill] sm:$0xff] %v14705_v53  ;;  %v18099_v14 = vld [vmem:[#allocation16_spill] sm:$0xff]  ;;  %v14724_v37 = vadd.s32 152, %v14217_v9  ;;  %v14731_v15 = vsub.s32 %v14504_v62, %v5180_v44  ;;  %v14734_v45 = vsub.s32 %v14507_v39, %v5158_v34 }
 0x20a   : > { %v11769_v10 = vpop.f32.mrf.mxu0  ;;  %v14707_v20 = vpop.f32.mrf.mxu1  ;;  %18098 = vst [vmem:[#allocation60_spill] sm:$0xff] %v14710_v42  ;;  %18100 = vst [vmem:[#allocation16_spill] sm:$0xff] %v14721_v8  ;;  %v3164_v61 = vadd.f32 %v14462_v11, %v14372_v29  ;;  %v14745_v46 = vadd.s32 136, %v14217_v9  ;;  %v14750_v39 = vadd.s32 18, %v14705_v53  ;;  %v14753_v44 = vsub.s32 %v14524_v33, %v5191_v63  ;;  %v18106_v29 = vld [vmem:[#allocation18_spill] sm:$0xff] }
 0x20b   : > { %v14717_v25 = vadd.f32 %v11769_v10, %v18099_v14  ;;  %18101 = vst [vmem:[#allocation61_spill] sm:$0xff] %v14731_v15  ;;  %18102 = vst [vmem:[#allocation62_spill] sm:$0xff] %v14734_v45  ;;  %v14737_v10 = vmul.u32.u64.low 3817748708, %v14697_v35  ;;  %v14738_v14 = vmul.u32.u64.high 3817748708, %v14697_v35, %v14737_v10  ;;  %v18107_v4 = vmov 0 }
 0x20c   : > { %v14726_v19 = vpop.f32.mrf.mxu0  ;;  %v14728_v60 = vpop.f32.mrf.mxu1  ;;  %18104 = vst [vmem:[#allocation64_spill] sm:$0xff] %v14750_v39  ;;  %18105 = vst [vmem:[#allocation65_spill] sm:$0xff] %v14753_v44  ;;  %v14756_v34 = vmul.u32.u64.low 3817748708, %v14714_v17  ;;  %v14757_v10 = vmul.u32.u64.high 3817748708, %v14714_v17, %v14756_v34  ;;  %v18108_v4 = vsel %vm14766_vm12, 4294967295, %v18107_v4  ;;  %v5168_v54 = vshrl.u32 %v14689_v18, 4 }
 0x20d   : > { %18109 = vst [vmem:[#allocation18_spill] sm:$0xff] %v18108_v4  ;;  %v14772_v33 = vmul.u32.u64.low 3817748708, %v14724_v37  ;;  %v14773_v63 = vmul.u32.u64.high 3817748708, %v14724_v37, %v14772_v33  ;;  %v3168_v34 = vadd.f32 %v14533_v0, %v14386_v7  ;;  %vm5429_vm6 = vcmp.ne.s32.totalorder %v14731_v15, 0  ;;  %v18114_v18 = vld [vmem:[#allocation9_spill] sm:$0xff] }
 0x20e   : > { %v11772_v55 = vpop.f32.mrf.mxu0  ;;  %v14747_v62 = vpop.f32.mrf.mxu1  ;;  %vm5465_vm0 = vcmp.lt.s32.totalorder %v14731_v15, 0  ;;  %vm5427_vm9 = vcmp.ne.s32.totalorder %v14734_v45, 0  ;;  %vm18115_vm14 = vcmp.ne.s32.totalorder %v14680_v51, 0  ;;  %vm18116_vm13 = vcmp.lt.s32.totalorder %v14680_v51, 0 }
 0x20f   : > { %18103 = vst [vmem:[#allocation63_spill] sm:$0xff] %v14747_v62  ;;  %v14760_v11 = vadd.f32 %v11772_v55, %v18106_v29  ;;  %v18111_v29 = vmov 0  ;;  %vm14797_vm7 = vmand %vm18116_vm13, %vm18115_vm14  ;;  %v18117_v7 = vmov 0  ;;  %v14807_v59 = vadd.f32 %v14325_v47, %v3160_v48  ;;  %v18129_v48 = vld [vmem:[#allocation19_spill] sm:$0xff] }
 0x210   : > { %v3825_v56 = vpop.f32.mrf.mxu0  ;;  %v14777_v55 = vpop.f32.mrf.mxu1  ;;  %v18112_v29 = vsel %vm14783_vm2, 4294967295, %v18111_v29  ;;  %v18118_v7 = vsel %vm14797_vm7, 4294967295, %v18117_v7  ;;  %v14803_v0 = vmul.u32.u64.low 3817748708, %v14745_v46  ;;  %v14804_v28 = vmul.u32.u64.high 3817748708, %v14745_v46, %v14803_v0  ;;  %vm14836_vm1 = vmand %vm5465_vm0, %vm5429_vm6 }
 0x211   : > { %18110 = vst [vmem:[#allocation66_spill] sm:$0xff] %v14777_v55  ;;  %18113 = vst [vmem:[#allocation67_spill] sm:$0xff] %v18112_v29  ;;  %v14791_v33 = vadd.f32 %v3825_v56, %v18114_v18  ;;  %vm18122_vm13 = vcmp.ne.s32.totalorder %v14705_v53, 0  ;;  %vm18123_vm14 = vcmp.lt.s32.totalorder %v14705_v53, 0  ;;  %v18124_v62 = vmov 0  ;;  %v18144_v53 = vld [vmem:[#allocation17_spill] sm:$0xff] }
 0x212   : > { %18119 = vst [vmem:[#allocation9_spill] sm:$0xff] %v18118_v7  ;;  %18120 = vst [vmem:[#allocation68_spill] sm:$0xff] %v14807_v59  ;;  %v11773_v55 = vpop.f32.mrf.mxu0  ;;  %v14809_v56 = vpop.f32.mrf.mxu1  ;;  %v14824_v0 = vadd.s32 18, %v14731_v15  ;;  %v14827_v47 = vadd.s32 18, %v14734_v45  ;;  %v18130_v18 = vmov 0  ;;  %v5169_v1 = vmul.u32 18, %v5168_v54 }
 0x213   : > { %18121 = vst [vmem:[#allocation69_spill] sm:$0xff] %v14809_v56  ;;  %vm14819_vm5 = vmand %vm18123_vm14, %vm18122_vm13  ;;  %v14830_v59 = vadd.f32 %v11773_v55, %v18129_v48  ;;  %v18131_v18 = vsel %vm14836_vm1, 4294967295, %v18130_v18  ;;  %vm5430_vm13 = vcmp.ne.s32.totalorder %v14753_v44, 0  ;;  %vm5466_vm14 = vcmp.lt.s32.totalorder %v14753_v44, 0 }
 0x214   : > { %v18125_v62 = vsel %vm14819_vm5, 4294967295, %v18124_v62  ;;  %18127 = vst [vmem:[#allocation71_spill] sm:$0xff] %v14824_v0  ;;  %18128 = vst [vmem:[#allocation72_spill] sm:$0xff] %v14827_v47  ;;  %v14842_v50 = vpop.f32.mrf.mxu0  ;;  %v14844_v4 = vpop.f32.mrf.mxu1  ;;  %vm18134_vm0 = vcmp.lt.s32.totalorder %v14734_v45, 0  ;;  %v18135_v54 = vmov 0  ;;  %v14864_v56 = vadd.s32 176, %v14217_v9 }
 0x215   : > { %18126 = vst [vmem:[#allocation70_spill] sm:$0xff] %v18125_v62  ;;  %18132 = vst [vmem:[#allocation19_spill] sm:$0xff] %v18131_v18  ;;  %v14867_v55 = vadd.f32 %v14396_v27, %v3164_v61  ;;  %v14870_v41 = vadd.f32 %v14479_v12, %v3168_v34  ;;  %v14877_v51 = vadd.s32 18, %v14753_v44  ;;  %v3937_v8 = vadd.f32 %v14649_v13, %v14389_v6  ;;  %v18146_v13 = vld [vmem:[#allocation22_spill] sm:$0xff] }
 0x216   : > { %18133 = vst [vmem:[#allocation73_spill] sm:$0xff] %v14844_v4  ;;  %vm14858_vm6 = vmand %vm18134_vm0, %vm5427_vm9  ;;  %v5223_v4 = vshrl.u32 %v14738_v14, 4  ;;  %v14881_v14 = vadd.f32 %v14497_v26, %v14568_v2  ;;  %v11776_v27 = vpop.f32.mrf.mxu0  ;;  %v14885_v61 = vpop.f32.mrf.mxu1  ;;  %v18139_v34 = vmov 0  ;;  %v5201_v26 = vshrl.u32 %v14757_v10, 4  ;;  %v18142_v2 = vld [vmem:[#allocation14_spill] sm:$0xff] }
 0x217   : > { %v18136_v54 = vsel %vm14858_vm6, 4294967295, %v18135_v54  ;;  %18138 = vst [vmem:[#allocation75_spill] sm:$0xff] %v14877_v51  ;;  %vm14895_vm9 = vmand %vm5466_vm14, %vm5430_vm13  ;;  %v14901_v6 = vadd.f32 %v11776_v27, %v18142_v2  ;;  %v14908_v12 = vsub.s32 %v14645_v24, %v5169_v1  ;;  %v5234_v48 = vshrl.u32 %v14773_v63, 4 }
 0x218   : > { %18137 = vst [vmem:[#allocation74_spill] sm:$0xff] %v18136_v54  ;;  %v18140_v34 = vsel %vm14895_vm9, 4294967295, %v18139_v34  ;;  %v14913_v15 = vadd.f32 %v14516_v52, %v14603_v22  ;;  %v3841_v0 = vpop.f32.mrf.mxu0  ;;  %v14915_v18 = vpop.f32.mrf.mxu1  ;;  %v5224_v10 = vmul.u32 18, %v5223_v4  ;;  %v6453_v1 = vshll.u32 %v14647_v38, 16 }
 0x219   : > { %18141 = vst [vmem:[#allocation76_spill] sm:$0xff] %v18140_v34  ;;  %18143 = vst [vmem:[#allocation14_spill] sm:$0xff] %v14908_v12  ;;  %v14918_v27 = vmul.u32.u64.low 3817748708, %v14864_v56  ;;  %v14919_v2 = vmul.u32.u64.high 3817748708, %v14864_v56, %v14918_v27  ;;  %v14922_v54 = vadd.f32 %v3841_v0, %v18144_v53  ;;  %v5212_v52 = vshrl.u32 %v14804_v28, 4 }
 0x21a   : > { %v14932_v22 = vadd.f32 %v14535_v40, %v14642_v30  ;;  %v14935_v4 = vadd.f32 %v14558_v23, %v3937_v8  ;;  %v11777_v63 = vpop.f32.mrf.mxu0  ;;  %v14937_v27 = vpop.f32.mrf.mxu1  ;;  %v5202_v53 = vmul.u32 18, %v5201_v26  ;;  %v14940_v0 = vadd.s32 160, %v14217_v9 }
 0x21b   : > { %v14943_v24 = vadd.f32 %v11777_v63, %v18146_v13  ;;  %vm5428_vm13 = vcmp.ne.s32.totalorder %v14908_v12, 0  ;;  %v5235_v28 = vmul.u32 18, %v5234_v48  ;;  %v14947_v44 = vadd.s32 184, %v14217_v9 }
 0x21c   : > { %18145 = vst [vmem:[#allocation17_spill] sm:$0xff] %v14935_v4  ;;  %v14949_v30 = vpop.f32.mrf.mxu0  ;;  %v14951_v40 = vpop.f32.mrf.mxu1  ;;  %v14955_v23 = vadd.s32 18, %v14908_v12  ;;  %v14958_v8 = vsub.s32 %v14697_v35, %v5224_v10  ;;  %v6451_v26 = vshrl.u32 %v14647_v38, 16  ;;  %v3941_v48 = vadd.f32 %v14726_v19, %v14413_v16  ;;  %v18150_v10 = vld [vmem:[#allocation26_spill] sm:$0xff] }
 0x21d   : > { %v5213_v13 = vmul.u32 18, %v5212_v52  ;;  %v6455_v63 = vrot.slane %v6453_v1, 1  ;;  %v14964_v51 = vadd.s32 168, %v14217_v9  ;;  %v14969_v47 = vsub.s32 %v14714_v17, %v5202_v53  ;;  %v18153_v53 = vld [vmem:[#allocation27_spill] sm:$0xff] }
 0x21e   : > { %18147 = vst [vmem:[#allocation22_spill] sm:$0xff] %v14955_v23  ;;  %18148 = vst [vmem:[#allocation77_spill] sm:$0xff] %v14958_v8  ;;  %v11780_v34 = vpop.f32.mrf.mxu0  ;;  %v14966_v45 = vpop.f32.mrf.mxu1  ;;  %v14972_v39 = vmul.u32.u64.low 3817748708, %v14940_v0  ;;  %v14973_v35 = vmul.u32.u64.high 3817748708, %v14940_v0, %v14972_v39  ;;  %v14976_v38 = vadd.s32 208, %v14217_v9  ;;  %v14982_v19 = vsub.s32 %v14724_v37, %v5235_v28 }
 0x21f   : > { %18149 = vst [vmem:[#allocation78_spill] sm:$0xff] %v14969_v47  ;;  %v14979_v16 = vadd.f32 %v11780_v34, %v18150_v10  ;;  %v14985_v1 = vmul.u32.u64.low 3817748708, %v14947_v44  ;;  %v14986_v52 = vmul.u32.u64.high 3817748708, %v14947_v44, %v14985_v1  ;;  %vm5469_vm14 = vcmp.lt.s32.totalorder %v14958_v8, 0 }
 0x220   : > { %18151 = vst [vmem:[#allocation26_spill] sm:$0xff] %v14982_v19  ;;  %v3857_v62 = vpop.f32.mrf.mxu0  ;;  %v14988_v17 = vpop.f32.mrf.mxu1  ;;  %v14993_v39 = vadd.s32 18, %v14958_v8  ;;  %v5267_v34 = vshrl.u32 %v14919_v2, 4  ;;  %vm18154_vm9 = vcmp.lt.s32.totalorder %v14908_v12, 0  ;;  %v18155_v37 = vmov 0 }
 0x221   : > { %v14997_v10 = vadd.f32 %v3857_v62, %v18153_v53  ;;  %vm15003_vm6 = vmand %vm18154_vm9, %vm5428_vm13  ;;  %v15008_v28 = vsub.s32 %v14745_v46, %v5213_v13  ;;  %v15011_v1 = vmul.u32.u64.low 3817748708, %v14964_v51  ;;  %v15012_v7 = vmul.u32.u64.high 3817748708, %v14964_v51, %v15011_v1  ;;  %v18160_v46 = vld [vmem:[#allocation28_spill] sm:$0xff] }
 0x222   : > { %18152 = vst [vmem:[#allocation79_spill] sm:$0xff] %v14993_v39  ;;  %v18156_v37 = vsel %vm15003_vm6, 4294967295, %v18155_v37  ;;  %v11781_v42 = vpop.f32.mrf.mxu0  ;;  %v15014_v2 = vpop.f32.mrf.mxu1  ;;  %v15019_v62 = vmul.u32.u64.low 3817748708, %v14976_v38  ;;  %v15020_v53 = vmul.u32.u64.high 3817748708, %v14976_v38, %v15019_v62  ;;  %v15024_v29 = vadd.f32 %v14582_v49, %v14684_v21 }
 0x223   : > { %18157 = vst [vmem:[#allocation27_spill] sm:$0xff] %v18156_v37  ;;  %18158 = vst [vmem:[#allocation80_spill] sm:$0xff] %v15008_v28  ;;  %v15027_v13 = vadd.f32 %v11781_v42, %v18160_v46  ;;  %vm18161_vm9 = vcmp.ne.s32.totalorder %v14958_v8, 0  ;;  %v18162_v1 = vmov 0  ;;  %v15039_v62 = vadd.f32 %v14621_v3, %v14700_v31 }
 0x224   : > { %18159 = vst [vmem:[#allocation81_spill] sm:$0xff] %v15024_v29  ;;  %vm15031_vm13 = vmand %vm5469_vm14, %vm18161_vm9  ;;  %v15041_v4 = vpop.f32.mrf.mxu0  ;;  %v15043_v49 = vpop.f32.mrf.mxu1  ;;  %v15050_v42 = vadd.s32 18, %v14969_v47  ;;  %v5268_v46 = vmul.u32 18, %v5267_v34  ;;  %v15054_v29 = vadd.f32 %v14651_v58, %v14717_v25  ;;  %vm18166_vm14 = vcmp.ne.s32.totalorder %v14969_v47, 0 }
 0x225   : > { %v18163_v1 = vsel %vm15031_vm13, 4294967295, %v18162_v1  ;;  %vm18167_vm9 = vcmp.lt.s32.totalorder %v14969_v47, 0  ;;  %v18168_v3 = vmov 0  ;;  %v15065_v31 = vadd.s32 18, %v14982_v19 }
 0x226   : > { %18164 = vst [vmem:[#allocation28_spill] sm:$0xff] %v18163_v1  ;;  %18165 = vst [vmem:[#allocation82_spill] sm:$0xff] %v15050_v42  ;;  %vm5468_vm6 = vcmp.lt.s32.totalorder %v15008_v28, 0  ;;  %v15070_v34 = vadd.f32 %v14676_v5, %v3941_v48  ;;  %v3945_v58 = vadd.f32 %v14842_v50, %v14421_v32  ;;  %v11784_v25 = vpop.f32.mrf.mxu0  ;;  %v15074_v21 = vpop.f32.mrf.mxu1  ;;  %v18174_v23 = vmov 0 }
 0x227   : > { %vm15060_vm1 = vmand %vm18167_vm9, %vm18166_vm14  ;;  %18171 = vst [vmem:[#allocation84_spill] sm:$0xff] %v15065_v31  ;;  %vm18172_vm14 = vcmp.ne.s32.totalorder %v14982_v19, 0  ;;  %vm18173_vm9 = vcmp.lt.s32.totalorder %v14982_v19, 0  ;;  %v15088_v5 = vor.u32 %v6455_v63, %v6451_v26  ;;  %v15091_v32 = vadd.f32 %v11784_v25, %v14283_v43  ;;  %v18184_v25 = vld [vmem:[#allocation63_spill] sm:$0xff] }
 0x228   : > { %v18169_v3 = vsel %vm15060_vm1, 4294967295, %v18168_v3  ;;  %vm15084_vm0 = vmand %vm18173_vm9, %vm18172_vm14  ;;  %v15094_v50 = vadd.s32 18, %v15008_v28  ;;  %v5245_v48 = vshrl.u32 %v14973_v35, 4  ;;  %v5278_v12 = vshrl.u32 %v14986_v52, 4  ;;  %v3873_v26 = vpop.f32.mrf.mxu0  ;;  %v15106_v63 = vpop.f32.mrf.mxu1 }
 0x229   : > { %18170 = vst [vmem:[#allocation83_spill] sm:$0xff] %v18169_v3  ;;  %v18175_v23 = vsel %vm15084_vm0, 4294967295, %v18174_v23  ;;  %18177 = vst [vmem:[#allocation86_spill] sm:$0xff] %v15088_v5  ;;  %v15100_v8 = vadd.f32 %v14691_v57, %v14760_v11  ;;  %v15104_v39 = vadd.f32 %v14707_v20, %v14791_v33  ;;  %vm18179_vm14 = vcmp.ne.s32.totalorder %v15008_v28, 0  ;;  %v18197_v3 = vld [vmem:[#allocation33_spill] sm:$0xff] }
 0x22a   : > { %18176 = vst [vmem:[#allocation85_spill] sm:$0xff] %v18175_v23  ;;  %18178 = vst [vmem:[#allocation87_spill] sm:$0xff] %v15094_v50  ;;  %v18180_v35 = vmov 0  ;;  %v15121_v57 = vsub.s32 %v14864_v56, %v5268_v46  ;;  %v15125_v20 = vadd.f32 %v14728_v60, %v14830_v59  ;;  %v15128_v11 = vadd.f32 %v3873_v26, %v14298_v36  ;;  %v18185_v56 = vld [vmem:[#allocation66_spill] sm:$0xff]  ;;  %v11785_v5 = vpop.f32.mrf.mxu0  ;;  %v15142_v59 = vpop.f32.mrf.mxu1  ;;  %v12616_v60 = vld [vmem:[#allocation3 + $0xb8] sm:$0xff]  }
 0x22b   : > { %vm15116_vm9 = vmand %vm5468_vm6, %vm18179_vm14  ;;  %v5256_v52 = vshrl.u32 %v15012_v7, 4  ;;  %v15136_v43 = vadd.f32 %v18184_v25, %v3945_v58  ;;  %v15140_v46 = vadd.f32 %v18185_v56, %v14901_v6  ;;  %v5311_v36 = vshrl.u32 %v15020_v53, 4  ;;  %v18186_v23 = vld [vmem:[#allocation21_spill] sm:$0xff]  ;;  %12006 = vmatprep.subr.bf16.mxu1 %v12616_v60  ;;  %v18188_v53 = vld [vmem:[#allocation20_spill] sm:$0xff] }
 0x22c   : > { %v18181_v35 = vsel %vm15116_vm9, 4294967295, %v18180_v35  ;;  %18183 = vst [vmem:[#allocation89_spill] sm:$0xff] %v15121_v57  ;;  %v15146_v26 = vadd.s32 192, %v14217_v9  ;;  %v15149_v33 = vadd.f32 %v11785_v5, %v18186_v23  ;;  %v5246_v58 = vmul.u32 18, %v5245_v48  ;;  %v18187_v25 = vld [vmem:[#allocation69_spill] sm:$0xff]  ;;  %v3876_v19 = vpop.f32.mrf.mxu0 }
 0x22d   : > { %18182 = vst [vmem:[#allocation88_spill] sm:$0xff] %v18181_v35  ;;  %v5279_v6 = vmul.u32 18, %v5278_v12  ;;  %v15157_v56 = vadd.f32 %v18187_v25, %v14922_v54  ;;  %vm5437_vm6 = vcmp.ne.s32.totalorder %v15121_v57, 0  ;;  %vm5473_vm14 = vcmp.lt.s32.totalorder %v15121_v57, 0  ;;  %v15166_v35 = vpop.f32.mrf.mxu1  ;;  %v18190_v25 = vld [vmem:[#allocation73_spill] sm:$0xff] }
 0x22e   : > { %v15162_v23 = vadd.s32 216, %v14217_v9  ;;  %v3949_v5 = vadd.f32 %v14949_v30, %v18188_v53  ;;  %v15169_v12 = vadd.s32 18, %v15121_v57  ;;  %v5257_v48 = vmul.u32 18, %v5256_v52  ;;  %v11788_v60 = vpop.f32.mrf.mxu0  ;;  %v18192_v30 = vld [vmem:[#allocation30_spill] sm:$0xff]  ;;  %vm15185_vm9 = vmand %vm5473_vm14, %vm5437_vm6 }
 0x22f   : > { %v15172_v54 = vadd.s32 200, %v14217_v9  ;;  %v15176_v7 = vadd.f32 %v18190_v25, %v14943_v24  ;;  %v5312_v28 = vmul.u32 18, %v5311_v36  ;;  %v15183_v53 = vadd.f32 %v11788_v60, %v18192_v30 }
 0x230   : > { %18189 = vst [vmem:[#allocation63_spill] sm:$0xff] %v15169_v12  ;;  %v15179_v50 = vmul.u32.u64.low 3817748708, %v15146_v26  ;;  %v15180_v31 = vmul.u32.u64.high 3817748708, %v15146_v26, %v15179_v50  ;;  %v18193_v47 = vmov 0  ;;  %v15190_v52 = vsub.s32 %v14940_v0, %v5246_v58  ;;  %v3889_v36 = vpop.f32.mrf.mxu0  ;;  %v15209_v0 = vpop.f32.mrf.mxu1 }
 0x231   : > { %18191 = vst [vmem:[#allocation66_spill] sm:$0xff] %v15176_v7  ;;  %v18194_v47 = vsel %vm15185_vm9, 4294967295, %v18193_v47  ;;  %v15193_v42 = vsub.s32 %v14947_v44, %v5279_v6  ;;  %v15196_v24 = vadd.s32 240, %v14217_v9  ;;  %v15207_v1 = vadd.f32 %v3889_v36, %v18197_v3 }
 0x232   : > { %18195 = vst [vmem:[#allocation21_spill] sm:$0xff] %v18194_v47  ;;  %18196 = vst [vmem:[#allocation69_spill] sm:$0xff] %v15190_v52  ;;  %v15199_v25 = vmul.u32.u64.low 3817748708, %v15162_v23  ;;  %v15200_v50 = vmul.u32.u64.high 3817748708, %v15162_v23, %v15199_v25  ;;  %v15203_v60 = vmul.u32.u64.low 3817748708, %v15172_v54  ;;  %v15204_v30 = vmul.u32.u64.high 3817748708, %v15172_v54, %v15203_v60 }
 0x233   : > { %v15212_v44 = vsub.s32 %v14964_v51, %v5257_v48  ;;  %v15215_v58 = vmul.u32.u64.low 3817748708, %v15196_v24  ;;  %v15216_v6 = vmul.u32.u64.high 3817748708, %v15196_v24, %v15215_v58  ;;  %v15219_v37 = vadd.f32 %v14885_v61, %v3949_v5  ;;  %v11789_v25 = vpop.f32.mrf.mxu0  ;;  %v18200_v51 = vld [vmem:[#allocation35_spill] sm:$0xff] }
 0x234   : > { %v15226_v3 = vsub.s32 %v14976_v38, %v5312_v28  ;;  %v5289_v36 = vshrl.u32 %v15180_v31, 4  ;;  %v15230_v48 = vadd.f32 %v11789_v25, %v18200_v51  ;;  %vm5471_vm14 = vcmp.lt.s32.totalorder %v15190_v52, 0  ;;  %v18201_v31 = vld [vmem:[#allocation25_spill] sm:$0xff]  ;;  %v15243_v25 = vpop.f32.mrf.mxu1 }
 0x235   : > { %18198 = vst [vmem:[#allocation20_spill] sm:$0xff] %v15219_v37  ;;  %v15235_v61 = vadd.s32 18, %v15190_v52  ;;  %v3892_v5 = vpop.f32.mrf.mxu0  ;;  %v5322_v38 = vshrl.u32 %v15200_v50, 4  ;;  %v5300_v28 = vshrl.u32 %v15204_v30, 4  ;;  %v3953_v58 = vadd.f32 %v15041_v4, %v18201_v31 }
 0x236   : > { %18199 = vst [vmem:[#allocation73_spill] sm:$0xff] %v15226_v3  ;;  %vm5436_vm6 = vcmp.ne.s32.totalorder %v15212_v44, 0  ;;  %v5290_v51 = vmul.u32 18, %v5289_v36  ;;  %vm18202_vm13 = vcmp.ne.s32.totalorder %v15190_v52, 0  ;;  %v18203_v57 = vmov 0  ;;  %v18206_v36 = vld [vmem:[#allocation40_spill] sm:$0xff] }
 0x237   : > { %v11792_v60 = vpop.f32.mrf.mxu0  ;;  %vm15249_vm0 = vmand %vm5471_vm14, %vm18202_vm13  ;;  %v15254_v50 = vadd.s32 18, %v15193_v42  ;;  %v5355_v4 = vshrl.u32 %v15216_v6, 4  ;;  %v15261_v30 = vadd.f32 %v14915_v18, %v14979_v16  ;;  %vm18207_vm13 = vcmp.ne.s32.totalorder %v15193_v42, 0  ;;  %v18212_v18 = vld [vmem:[#allocation12_spill] sm:$0xff] }
 0x238   : > { %v18204_v57 = vsel %vm15249_vm0, 4294967295, %v18203_v57  ;;  %v15264_v31 = vadd.f32 %v11792_v60, %v18206_v36  ;;  %vm18208_vm14 = vcmp.lt.s32.totalorder %v15193_v42, 0  ;;  %v18209_v12 = vmov 0 }
 0x239   : > { %18205 = vst [vmem:[#allocation30_spill] sm:$0xff] %v15261_v30  ;;  %vm15270_vm1 = vmand %vm18208_vm14, %vm18207_vm13  ;;  %v15275_v47 = vadd.s32 18, %v15212_v44  ;;  %v5323_v37 = vmul.u32 18, %v5322_v38  ;;  %v15279_v6 = vadd.f32 %v14937_v27, %v14997_v10  ;;  %v3957_v16 = vadd.f32 %v3876_v19, %v18212_v18  ;;  %v3905_v60 = vpop.f32.mrf.mxu0  ;;  %v18217_v27 = vld [vmem:[#allocation7_spill] sm:$0xff]  ;;  %v4376_v19 = vpop.f32.mrf.mxu1 }
 0x23a   : > { %v18210_v12 = vsel %vm15270_vm1, 4294967295, %v18209_v12  ;;  %vm18213_vm5 = vcmp.lt.s32.totalorder %v15212_v44, 0  ;;  %v18214_v36 = vmov 0  ;;  %v15291_v30 = vadd.s32 18, %v15226_v3 }
 0x23b   : > { %18211 = vst [vmem:[#allocation33_spill] sm:$0xff] %v15279_v6  ;;  %vm15286_vm9 = vmand %vm18213_vm5, %vm5436_vm6  ;;  %v5301_v7 = vmul.u32 18, %v5300_v28  ;;  %v15295_v38 = vadd.f32 %v14951_v40, %v15027_v13  ;;  %v3964_v10 = vadd.f32 %v3905_v60, %v18217_v27  ;;  %vm18218_vm5 = vcmp.ne.s32.totalorder %v15226_v3, 0  ;;  %v11793_v60 = vpop.f32.mrf.mxu0 }
 0x23c   : > { %v18215_v36 = vsel %vm15286_vm9, 4294967295, %v18214_v36  ;;  %18216 = vst [vmem:[#allocation35_spill] sm:$0xff] %v15291_v30  ;;  %vm18219_vm6 = vcmp.lt.s32.totalorder %v15226_v3, 0  ;;  %v18220_v6 = vmov 0  ;;  %v15311_v28 = vsub.s32 %v15146_v26, %v5290_v51  ;;  %v18223_v26 = vld [vmem:[#allocation43_spill] sm:$0xff] }
 0x23d   : > { %vm15306_vm13 = vmand %vm18219_vm6, %vm18218_vm5  ;;  %v15314_v40 = vadd.f32 %v14966_v45, %v3953_v58  ;;  %v15318_v13 = vadd.f32 %v14988_v17, %v15091_v32  ;;  %v5356_v18 = vmul.u32 18, %v5355_v4  ;;  %v15326_v52 = vadd.f32 %v15014_v2, %v15128_v11  ;;  %v3908_v4 = vpop.f32.mrf.mxu0 }
 0x23e   : > { %v18221_v6 = vsel %vm15306_vm13, 4294967295, %v18220_v6  ;;  %v3967_v51 = vadd.f32 %v11793_v60, %v18223_v26  ;;  %v15334_v17 = vsub.s32 %v15162_v23, %v5323_v37  ;;  %v15338_v32 = vadd.f32 %v15043_v49, %v15149_v33  ;;  %v18228_v33 = vld [vmem:[#allocation68_spill] sm:$0xff]  ;;  %v11845_v23 = vpop.f32.mrf.mxu1 }
 0x23f   : > { %18222 = vst [vmem:[#allocation25_spill] sm:$0xff] %v18221_v6  ;;  %v15341_v58 = vadd.f32 %v15074_v21, %v3957_v16  ;;  %v15348_v11 = vsub.s32 %v15172_v54, %v5301_v7  ;;  %v15352_v37 = vadd.f32 %v15106_v63, %v15183_v53  ;;  %v15356_v49 = vadd.f32 %v15142_v59, %v15207_v1  ;;  %v11796_v16 = vpop.f32.mrf.mxu0  ;;  %v18230_v54 = vld [vmem:[#allocation47_spill] sm:$0xff] }
 0x240   : > { %v3961_v21 = vadd.f32 %v3892_v5, %v18228_v33  ;;  %v15362_v60 = vadd.s32 18, %v15311_v28  ;;  %v15365_v7 = vsub.s32 %v15196_v24, %v5356_v18  ;;  %v5011_v63 = vadd.s32 224, %v14217_v9  ;;  %v4379_v18 = vpop.f32.mrf.mxu1  ;;  %v18231_v33 = vld [vmem:[#allocation8_spill] sm:$0xff] }
 0x241   : > { %18224 = vst [vmem:[#allocation40_spill] sm:$0xff] %v15341_v58  ;;  %18225 = vst [vmem:[#allocation12_spill] sm:$0xff] %v15348_v11  ;;  %v15369_v53 = vadd.f32 %v11796_v16, %v18230_v54  ;;  %v5014_v1 = vadd.s32 248, %v14217_v9  ;;  %v3921_v59 = vpop.f32.mrf.mxu0  ;;  %v15375_v5 = vadd.s32 18, %v15334_v17  ;;  %v15384_v16 = vadd.s32 18, %v15348_v11 }
 0x242   : > { %18226 = vst [vmem:[#allocation7_spill] sm:$0xff] %v15352_v37  ;;  %18227 = vst [vmem:[#allocation43_spill] sm:$0xff] %v15356_v49  ;;  %v15378_v26 = vmul.u32.u64.low 3817748708, %v5011_v63  ;;  %v15379_v24 = vmul.u32.u64.high 3817748708, %v5011_v63, %v15378_v26  ;;  %v3968_v2 = vadd.f32 %v3921_v59, %v18231_v33  ;;  %v15387_v54 = vadd.s32 232, %v14217_v9  ;;  %v18237_v49 = vld [vmem:[#allocation50_spill] sm:$0xff] }
 0x243   : > { %18229 = vst [vmem:[#allocation68_spill] sm:$0xff] %v15365_v7  ;;  %18232 = vst [vmem:[#allocation47_spill] sm:$0xff] %v15384_v16  ;;  %v3965_v45 = vadd.f32 %v3908_v4, %v14867_v55  ;;  %v11797_v27 = vpop.f32.mrf.mxu0  ;;  %vm18233_vm13 = vcmp.ne.s32.totalorder %v15311_v28, 0  ;;  %vm18234_vm5 = vcmp.lt.s32.totalorder %v15311_v28, 0  ;;  %v18235_v26 = vmov 0 }
 0x244   : > { %vm15394_vm6 = vmand %vm18234_vm5, %vm18233_vm13  ;;  %vm5445_vm9 = vcmp.ne.s32.totalorder %v15365_v7, 0  ;;  %v15399_v59 = vmul.u32.u64.low 3817748708, %v5014_v1  ;;  %v15400_v33 = vmul.u32.u64.high 3817748708, %v5014_v1, %v15399_v59  ;;  %v15403_v3 = vadd.f32 %v11797_v27, %v18237_v49 }
 0x245   : > { %v18236_v26 = vsel %vm15394_vm6, 4294967295, %v18235_v26  ;;  %vm18239_vm14 = vcmp.ne.s32.totalorder %v15334_v17, 0  ;;  %vm18240_vm1 = vcmp.lt.s32.totalorder %v15334_v17, 0  ;;  %v18241_v55 = vmov 0  ;;  %v3924_v49 = vpop.f32.mrf.mxu0 }
 0x246   : > { %18238 = vst [vmem:[#allocation8_spill] sm:$0xff] %v15403_v3  ;;  %vm15409_vm0 = vmand %vm18240_vm1, %vm18239_vm14  ;;  %vm5481_vm13 = vcmp.lt.s32.totalorder %v15365_v7, 0  ;;  %v15415_v4 = vmul.u32.u64.low 3817748708, %v15387_v54  ;;  %v15416_v30 = vmul.u32.u64.high 3817748708, %v15387_v54, %v15415_v4  ;;  %v15420_v59 = vadd.f32 %v15166_v35, %v15230_v48  ;;  %v11848_v48 = vpop.f32.mrf.mxu1 }
 0x247   : > { %v18242_v55 = vsel %vm15409_vm0, 4294967295, %v18241_v55  ;;  %v15423_v27 = vadd.f32 %v15209_v0, %v3961_v21  ;;  %vm18245_vm5 = vcmp.ne.s32.totalorder %v15348_v11, 0  ;;  %vm18246_vm1 = vcmp.lt.s32.totalorder %v15348_v11, 0 }
 0x248   : > { %18243 = vst [vmem:[#allocation50_spill] sm:$0xff] %v15420_v59  ;;  %vm15429_vm14 = vmand %vm18246_vm1, %vm18245_vm5  ;;  %v18247_v3 = vmov 0  ;;  %v5333_v6 = vshrl.u32 %v15379_v24, 4  ;;  %v15435_v4 = vadd.s32 272, %v14217_v9  ;;  %v15439_v35 = vadd.f32 %v15243_v25, %v15264_v31  ;;  %v18254_v59 = vld [vmem:[#allocation23_spill] sm:$0xff]  ;;  %v18263_v9 = vld [vmem:[#allocation36_spill] sm:$0xff] }
 0x249   : > { %18244 = vst [vmem:[#allocation90_spill] sm:$0xff] %v15423_v27  ;;  %v18248_v3 = vsel %vm15429_vm14, 4294967295, %v18247_v3  ;;  %v15441_v0 = vadd.f32 %v4376_v19, %v3964_v10  ;;  %v18253_v27 = vld [vmem:[#allocation31_spill] sm:$0xff]  ;;  %v15457_v25 = vadd.s32 18, %v15365_v7  ;;  %v15459_v31 = vadd.f32 %v11845_v23, %v3967_v51  ;;  %v11868_v10 = vpop.f32.mrf.mxu0  ;;  %v15464_v19 = vld [vmem:[%s17798_s4] ss:$0 sm:$0xff] }
 0x24a   : > { %18249 = vst [vmem:[#allocation91_spill] sm:$0xff] %v15435_v4  ;;  %18250 = vst [vmem:[#allocation92_spill] sm:$0xff] %v15439_v35  ;;  %v18255_v37 = vsel %vm14381_vm3, %v18253_v27, %v18254_v59  ;;  %v18259_v59 = vmov 0  ;;  %v5334_v51 = vmul.u32 18, %v5333_v6  ;;  %v5366_v23 = vshrl.u32 %v15400_v33, 4  ;;  %v18272_v35 = vld [vmem:[#allocation32_spill] sm:$0xff] }
 0x24b   : > { %18251 = vst [vmem:[#allocation93_spill] sm:$0xff] %v15441_v0  ;;  %vm15448_vm5 = vcmp.lt.s32.totalorder %v18255_v37, 16  ;;  %18258 = vst [vmem:[#allocation34_spill] sm:$0xff] %v15459_v31  ;;  %v15479_v27 = vadd.f32 %v4379_v18, %v3965_v45  ;;  %v4747_v21 = vadd.f32 %v11868_v10, %v14881_v14  ;;  %v18264_v31 = vld [vmem:[#allocation24_spill] sm:$0xff]  ;;  %v5344_v33 = vshrl.u32 %v15416_v30, 4  ;;  %v4602_v45 = vpop.f32.mrf.mxu0  ;;  %v4392_v10 = vpop.f32.mrf.mxu1 }
 0x24c   : > { %vm15474_vm3 = vmand %vm5481_vm13, %vm5445_vm9  ;;  %v18265_v37 = vsel %vm14402_vm4, %v18263_v9, %v18264_v31  ;;  %v15499_v14 = vld [vmem:[%s17799_s5] ss:$0 sm:$0xff]  ;;  %v15501_v18 = vsub.s32 %v5011_v63, %v5334_v51  ;;  %v5367_v9 = vmul.u32 18, %v5366_v23  ;;  %v4745_v6 = vadd.f32 %v4602_v45, %v14913_v15 }
 0x24d   : > { %v18260_v59 = vsel %vm15474_vm3, 4294967295, %v18259_v59  ;;  %18261 = vst [vmem:[#allocation31_spill] sm:$0xff] %v15479_v27  ;;  %vm15487_vm1 = vcmp.lt.s32.totalorder %v18265_v37, 16  ;;  %v15504_v24 = vmul.u32.u64.low 3817748708, %v15435_v4  ;;  %v15505_v31 = vmul.u32.u64.high 3817748708, %v15435_v4, %v15504_v24  ;;  %v18271_v27 = vld [vmem:[#allocation38_spill] sm:$0xff]  ;;  %v11869_v15 = vpop.f32.mrf.mxu0 }
 0x24e   : > { %18268 = vst [vmem:[#allocation23_spill] sm:$0xff] %v15501_v18  ;;  %v4790_v37 = vmul.f32 %v15464_v19, %v4747_v21  ;;  %v18273_v11 = vsel %vm14441_vm8, %v18271_v27, %v18272_v35  ;;  %v5345_v51 = vmul.u32 18, %v5344_v33  ;;  %v15526_v23 = vld [vmem:[%s17800_s6] ss:$0 sm:$0xff]  ;;  %vm5443_vm9 = vcmp.ne.s32.totalorder %v15501_v18, 0 }
 0x24f   : > { %18269 = vst [vmem:[#allocation37_spill] sm:$0xff] %v15505_v31  ;;  %vm15515_vm4 = vcmp.lt.s32.totalorder %v18273_v11, 16  ;;  %vm5479_vm8 = vcmp.lt.s32.totalorder %v15501_v18, 0  ;;  %v15531_v11 = vadd.s32 18, %v15501_v18  ;;  %v15533_v35 = vsub.s32 %v5014_v1, %v5367_v9  ;;  %v4605_v63 = vpop.f32.mrf.mxu0  ;;  %v18284_v1 = vld [vmem:[#allocation44_spill] sm:$0xff]  ;;  %v18285_v9 = vld [vmem:[#allocation39_spill] sm:$0xff] }
 0x250   : > { %v15536_v27 = vadd.f32 %v11848_v48, %v15369_v53  ;;  %v4833_v21 = vadd.f32 %v15499_v14, %v4790_v37  ;;  %v4788_v33 = vmul.f32 %v15464_v19, %v4745_v6  ;;  %v4748_v45 = vadd.f32 %v11869_v15, %v14932_v22  ;;  %vm15541_vm13 = vmand %vm5479_vm8, %vm5443_vm9  ;;  %v18312_v18 = vld [vmem:[#allocation10_spill] sm:$0xff] }
 0x251   : > { %18276 = vst [vmem:[#allocation36_spill] sm:$0xff] %v15531_v11  ;;  %18277 = vst [vmem:[#allocation24_spill] sm:$0xff] %v15533_v35  ;;  %v18279_v24 = vmov 0  ;;  %v15545_v30 = vadd.f32 %v4392_v10, %v3968_v2  ;;  %v18286_v31 = vsel %vm14551_vm11, %v18284_v1, %v18285_v9  ;;  %vm5446_vm14 = vcmp.ne.s32.totalorder %v15533_v35, 0  ;;  %v18294_v10 = vld [vmem:[#allocation17_spill] sm:$0xff]  ;;  %v11872_v15 = vpop.f32.mrf.mxu0  ;;  %v18296_v9 = vld [vmem:[#allocation48_spill] sm:$0xff] }
 0x252   : > { %18278 = vst [vmem:[#allocation41_spill] sm:$0xff] %v15536_v27  ;;  %v18280_v24 = vsel %vm15541_vm13, 4294967295, %v18279_v24  ;;  %vm15552_vm3 = vcmp.lt.s32.totalorder %v18286_v31, 16  ;;  %vm5482_vm0 = vcmp.lt.s32.totalorder %v15533_v35, 0  ;;  %v15559_v22 = vadd.s32 18, %v15533_v35  ;;  %v18302_v1 = vld [vmem:[#allocation81_spill] sm:$0xff] }
 0x253   : > { %18281 = vst [vmem:[#allocation38_spill] sm:$0xff] %v18280_v24  ;;  %18282 = vst [vmem:[#allocation32_spill] sm:$0xff] %v15545_v30  ;;  %vm4869_vm9 = vcmp.ge.f32.partialorder %v4833_v21, 0.0  ;;  %v4912_v2 = vmul.f32 %v15526_v23, %v4833_v21  ;;  %v4831_v48 = vadd.f32 %v15499_v14, %v4788_v33  ;;  %vm6243_vm8 = vcmask 1043457   ;;  %v18297_v30 = vld [vmem:[#allocation42_spill] sm:$0xff]  ;;  %v18314_v11 = vld [vmem:[#allocation55_spill] sm:$0xff] }
 0x254   : > { %18289 = vst [vmem:[#allocation51_spill] sm:$0xff] %v15559_v22  ;;  %v4791_v4 = vmul.f32 %v15464_v19, %v4748_v45  ;;  %vm15564_vm11 = vmand %vm5482_vm0, %vm5446_vm14  ;;  %v18290_v6 = vmov 0  ;;  %v15569_v31 = vadd.f32 %v3924_v49, %v14870_v41  ;;  %v4746_v37 = vadd.f32 %v4605_v63, %v18294_v10  ;;  %v18315_v24 = vld [vmem:[#allocation46_spill] sm:$0xff] }
 0x255   : > { %v18291_v6 = vsel %vm15564_vm11, 4294967295, %v18290_v6  ;;  %v18298_v27 = vsel %vm14574_vm10, %v18296_v9, %v18297_v30  ;;  %v15586_v41 = vsub.s32 %v15387_v54, %v5345_v51  ;;  %v4948_v49 = vsel %vm4869_vm9, %v4833_v21, %v4912_v2 }
 0x256   : > { %18292 = vst [vmem:[#allocation44_spill] sm:$0xff] %v18291_v6  ;;  %18293 = vst [vmem:[#allocation39_spill] sm:$0xff] %v15569_v31  ;;  %vm15577_vm6 = vcmp.lt.s32.totalorder %v18298_v27, 16  ;;  %vm4867_vm0 = vcmp.ge.f32.partialorder %v4831_v48, 0.0  ;;  %v4910_v63 = vmul.f32 %v15526_v23, %v4831_v48  ;;  %v4834_v10 = vadd.f32 %v15499_v14, %v4791_v4  ;;  %v4618_v31 = vpop.f32.mrf.mxu0 }
 0x257   : > { %18301 = vst [vmem:[#allocation17_spill] sm:$0xff] %v15586_v41  ;;  %v5705_v27 = vsel %vm15448_vm5, %v4948_v49, 0.0  ;;  %v4789_v30 = vmul.f32 %v15464_v19, %v4746_v37  ;;  %v4751_v9 = vadd.f32 %v11872_v15, %v18302_v1  ;;  %v4749_v15 = vadd.f32 %v4618_v31, %v15039_v62  ;;  %v18304_v62 = vld [vmem:[#allocation54_spill] sm:$0xff]  ;;  %v18305_v31 = vld [vmem:[#allocation45_spill] sm:$0xff] }
 0x258   : > { %v10932_v51 = vpack.c.bf16 %v5705_v27, %v5705_v27  ;;  %v4946_v21 = vsel %vm4867_vm0, %v4831_v48, %v4910_v63  ;;  %vm4870_vm10 = vcmp.ge.f32.partialorder %v4834_v10, 0.0  ;;  %v4913_v2 = vmul.f32 %v15526_v23, %v4834_v10  ;;  %v11873_v49 = vpop.f32.mrf.mxu0 }
 0x259   : > { %v5703_v4 = vsel %vm15487_vm1, %v4946_v21, 0.0  ;;  %v4832_v58 = vadd.f32 %v15499_v14, %v4789_v30  ;;  %v4794_v37 = vmul.f32 %v15464_v19, %v4751_v9 }
 0x25a   : > { %v5867_v1 = vshrl.u32 %v10932_v51, 16  ;;  %v5870_v45 = vshll.u32 %v10932_v51, 16  ;;  %v10930_v41 = vpack.c.bf16 %v5703_v4, %v5703_v4  ;;  %v4949_v6 = vsel %vm4870_vm10, %v4834_v10, %v4913_v2  ;;  %v4621_v27 = vpop.f32.mrf.mxu0 }
 0x25b   : > { %v5706_v48 = vsel %vm15515_vm4, %v4949_v6, 0.0  ;;  %vm4868_vm14 = vcmp.ge.f32.partialorder %v4832_v58, 0.0  ;;  %v4911_v63 = vmul.f32 %v15526_v23, %v4832_v58  ;;  %v4837_v0 = vadd.f32 %v15499_v14, %v4794_v37 }
 0x25c   : > { %v5869_v21 = vrot.slane %v5867_v1, 6  ;;  %v5872_v30 = vrot.slane %v5870_v45, 7  ;;  %v5848_v54 = vshrl.u32 %v10930_v41, 16  ;;  %v5851_v9 = vshll.u32 %v10930_v41, 16  ;;  %v11876_v4 = vpop.f32.mrf.mxu0 }
 0x25d   : > { %v18306_v51 = vsel %vm14592_vm15, %v18304_v62, %v18305_v31  ;;  %v10933_v16 = vpack.c.bf16 %v5706_v48, %v5706_v48  ;;  %v4947_v6 = vsel %vm4868_vm14, %v4832_v58, %v4911_v63  ;;  %vm4873_vm1 = vcmp.ge.f32.partialorder %v4837_v0, 0.0 }
 0x25e   : > { %vm15613_vm5 = vcmp.lt.s32.totalorder %v18306_v51, 16  ;;  %v4916_v2 = vmul.f32 %v15526_v23, %v4837_v0  ;;  %v5873_v37 = vor.u32 %v5872_v30, %v5869_v21  ;;  %v5850_v1 = vrot.slane %v5848_v54, 6  ;;  %v4634_v63 = vpop.f32.mrf.mxu0 }
 0x25f   : > { %v5853_v45 = vrot.slane %v5851_v9, 7  ;;  %v5704_v41 = vsel %vm15552_vm3, %v4947_v6, 0.0  ;;  %vm18309_vm4 = vsmask.f32 7942  ;;  %v5877_v62 = vshrl.u32 %v10933_v16, 16 }
 0x260   : > { %vm15622_vm9 = vmand %vm6243_vm8, %vm18309_vm4  ;;  %v5880_v31 = vshll.u32 %v10933_v16, 16  ;;  %v10931_v48 = vpack.c.bf16 %v5704_v41, %v5704_v41  ;;  %v4952_v58 = vsel %vm4873_vm1, %v4837_v0, %v4916_v2  ;;  %v5875_v51 = vrot.slane %v5873_v37, 4  ;;  %v12740_v2 = vld [vmem:[#allocation2 + $0x8] sm:$0xe] }
 0x261   : > { %v5854_v22 = vor.u32 %v5853_v45, %v5850_v1  ;;  %v5709_v54 = vsel %vm15577_vm6, %v4952_v58, 0.0  ;;  %v4792_v21 = vmul.f32 %v15464_v19, %v4749_v15  ;;  %v5879_v53 = vrot.slane %v5877_v62, 6 }
 0x262   : > { %v5882_v30 = vrot.slane %v5880_v31, 7  ;;  %v5857_v9 = vshrl.u32 %v10931_v48, 16  ;;  %v5860_v6 = vshll.u32 %v10931_v48, 16  ;;  %vm18313_vm15 = vnez %v18312_v18  ;;  %v18319_v48 = vld [vmem:[#allocation6_spill] sm:$0xff] }
 0x263   : > { %v18316_v7 = vsel %vm18313_vm15, %v18314_v11, %v18315_v24  ;;  %v5855_v0 = vrot.slane %v5854_v22, 4  ;;  %v6245_v33 = vsel %vm15622_vm9, %v5854_v22, %v12740_v2  ;;  %v10936_v1 = vpack.c.bf16 %v5709_v54, %v5709_v54  ;;  %v11877_v11 = vpop.f32.mrf.mxu0 }
 0x264   : > { %vm15634_vm3 = vcmp.lt.s32.totalorder %v18316_v7, 16  ;;  %v4835_v15 = vadd.f32 %v15499_v14, %v4792_v21  ;;  %6246 = vst [vmem:[#allocation2 + $0x8] sm:$0xe] %v6245_v33  ;;  %v15641_v45 = vor.u32 %v5882_v30, %v5879_v53  ;;  %v5859_v41 = vrot.slane %v5857_v9, 6  ;;  %v18321_v21 = vld [vmem:[#allocation57_spill] sm:$0xff]  ;;  %v18323_v53 = vld [vmem:[#allocation56_spill] sm:$0xff] }
 0x265   : > { %v5862_v18 = vrot.slane %v5860_v6, 7  ;;  %v4752_v62 = vadd.f32 %v11873_v49, %v15054_v29  ;;  %v5907_v7 = vshrl.u32 %v10936_v1, 16  ;;  %v5910_v24 = vshll.u32 %v10936_v1, 16  ;;  %v18324_v30 = vld [vmem:[#allocation49_spill] sm:$0xff] }
 0x266   : > { %vm4871_vm6 = vcmp.ge.f32.partialorder %v4835_v15, 0.0  ;;  %v4914_v31 = vmul.f32 %v15526_v23, %v4835_v15  ;;  %vm18320_vm8 = vnez %v18319_v48  ;;  %v5885_v35 = vrot.slane %v15641_v45, 4 }
 0x267   : > { %v5884_v22 = vsel %vm18320_vm8, %v5875_v51, %v15641_v45  ;;  %v5863_v58 = vor.u32 %v5862_v18, %v5859_v41  ;;  %v4795_v54 = vmul.f32 %v15464_v19, %v4752_v62  ;;  %vm18322_vm0 = vnez %v18321_v21  ;;  %v4637_v18 = vpop.f32.mrf.mxu0 }
 0x268   : > { %v18325_v29 = vsel %vm18322_vm0, %v18323_v53, %v18324_v30  ;;  %6249 = vst [vmem:[#allocation2 + $0x14] sm:$0xf] %v5884_v22  ;;  %v5909_v9 = vrot.slane %v5907_v7, 6  ;;  %v5912_v6 = vrot.slane %v5910_v24, 7  ;;  %v4950_v2 = vsel %vm4871_vm6, %v4835_v15, %v4914_v31  ;;  %v18342_v24 = vld [vmem:[#allocation59_spill] sm:$0xff] }
 0x269   : > { %vm15655_vm10 = vcmp.lt.s32.totalorder %v18325_v29, 16  ;;  %v4750_v51 = vadd.f32 %v4621_v27, %v15070_v34  ;;  %v5864_v33 = vsel %vm18320_vm8, %v5855_v0, %v5863_v58  ;;  %v5865_v1 = vrot.slane %v5863_v58, 4  ;;  %v18329_v34 = vld [vmem:[#allocation13_spill] sm:$0xff]  ;;  %v18330_v27 = vld [vmem:[#allocation58_spill] sm:$0xff] }
 0x26a   : > { %v5707_v45 = vsel %vm15613_vm5, %v4950_v2, 0.0  ;;  %v4838_v41 = vadd.f32 %v15499_v14, %v4795_v54  ;;  %6247 = vst [vmem:[#allocation2 + $0xc] sm:$0xf] %v5864_v33  ;;  %v15665_v62 = vor.u32 %v5912_v6, %v5909_v9  ;;  %v4755_v15 = vadd.f32 %v11876_v4, %v15100_v8  ;;  %v18336_v2 = vld [vmem:[#allocation29_spill] sm:$0xff] }
 0x26b   : > { %v10934_v21 = vpack.c.bf16 %v5707_v45, %v5707_v45  ;;  %v4793_v7 = vmul.f32 %v15464_v19, %v4750_v51  ;;  %v18331_v0 = vsel %vm14766_vm12, %v18329_v34, %v18330_v27  ;;  %v5874_v10 = vsel %vm18320_vm8, %v5865_v1, %v5873_v37  ;;  %v18335_v37 = vld [vmem:[#allocation60_spill] sm:$0xff]  ;;  %v12629_v1 = vld [vmem:[#allocation3 + $0xf8] sm:$0xff]  }
 0x26c   : > { %vm15674_vm14 = vcmp.lt.s32.totalorder %v18331_v0, 16  ;;  %vm4874_vm5 = vcmp.ge.f32.partialorder %v4838_v41, 0.0  ;;  %v4917_v22 = vmul.f32 %v15526_v23, %v4838_v41  ;;  %v4753_v58 = vadd.f32 %v4634_v63, %v15104_v39  ;;  %6248 = vst [vmem:[#allocation2 + $0x10] sm:$0xf] %v5874_v10  ;;  %v11880_v63 = vpop.f32.mrf.mxu0  ;;  %12058 = vmatprep.subr.bf16.mxu0 %v12629_v1 }
 0x26d   : > { %v5915_v8 = vrot.slane %v15665_v62, 4  ;;  %v5887_v4 = vshrl.u32 %v10934_v21, 16  ;;  %v5890_v54 = vshll.u32 %v10934_v21, 16  ;;  %v4836_v53 = vadd.f32 %v15499_v14, %v4793_v7 }
 0x26e   : > { %v4953_v30 = vsel %vm4874_vm5, %v4838_v41, %v4917_v22  ;;  %v4798_v29 = vmul.f32 %v15464_v19, %v4755_v15  ;;  %v4796_v9 = vmul.f32 %v15464_v19, %v4753_v58  ;;  %v18337_v51 = vsel %vm14783_vm2, %v18335_v37, %v18336_v2  ;;  %v18341_v15 = vld [vmem:[#allocation16_spill] sm:$0xff] }
 0x26f   : > { %vm15691_vm12 = vcmp.lt.s32.totalorder %v18337_v51, 16  ;;  %v4756_v39 = vadd.f32 %v11877_v11, %v15125_v20  ;;  %v5889_v45 = vrot.slane %v5887_v4, 6  ;;  %v5892_v21 = vrot.slane %v5890_v54, 7 }
 0x270   : > { %v5710_v41 = vsel %vm15634_vm3, %v4953_v30, 0.0  ;;  %vm4872_vm1 = vcmp.ge.f32.partialorder %v4836_v53, 0.0  ;;  %v18343_v34 = vsel %vm14797_vm7, %v18341_v15, %v18342_v24  ;;  %v4915_v20 = vmul.f32 %v15526_v23, %v4836_v53 }
 0x271   : > { %vm15703_vm2 = vcmp.lt.s32.totalorder %v18343_v34, 16  ;;  %v10937_v0 = vpack.c.bf16 %v5710_v41, %v5710_v41  ;;  %v4841_v11 = vadd.f32 %v15499_v14, %v4798_v29  ;;  %v4839_v10 = vadd.f32 %v15499_v14, %v4796_v9  ;;  %v15715_v37 = vld [vmem:[#allocation2 + $0x8] sm:$0xff]  }
 0x272   : > { %v15710_v16 = vor.u32 %v5892_v21, %v5889_v45  ;;  %v4799_v22 = vmul.f32 %v15464_v19, %v4756_v39  ;;  %v4754_v58 = vadd.f32 %v4637_v18, %v15136_v43  ;;  %v4759_v4 = vadd.f32 %v11880_v63, %v15140_v46  ;;  %v12632_v43 = vld [vmem:[#allocation3 + $0xf0] sm:$0xff]   ;;  %11971 = vmatmul.mubr.bf16.vlgmr.msra.gmra.mxu0 %v15715_v37  ;;  %v15730_v21 = vpop.f32.mrf.mxu0  ;;  %v18346_v34 = vld [vmem:[#allocation70_spill] sm:$0xff] }
 0x273   : > { %v5917_v54 = vshrl.u32 %v10937_v0, 16  ;;  %v5920_v30 = vshll.u32 %v10937_v0, 16  ;;  %v4951_v6 = vsel %vm4872_vm1, %v4836_v53, %v4915_v20  ;;  %vm4877_vm7 = vcmp.ge.f32.partialorder %v4841_v11, 0.0  ;;  %v15725_v53 = vld [vmem:[#allocation2 + $0x10] sm:$0xff]   ;;  %12059 = vmatpush3.bf16.msra.mxu0 %v12629_v1  ;;  %v18348_v0 = vld [vmem:[#allocation64_spill] sm:$0xff] }
 0x274   : > { %v5894_v29 = vsel %vm18320_vm8, %v5885_v35, %v15710_v16  ;;  %v5895_v9 = vrot.slane %v15710_v16, 4  ;;  %v5708_v2 = vsel %vm15655_vm10, %v4951_v6, 0.0  ;;  %v4920_v51 = vmul.f32 %v15526_v23, %v4841_v11  ;;  %v18349_v20 = vld [vmem:[#allocation15_spill] sm:$0xff]  ;;  %11974 = vmatprep.mubr.bf16.mxu0 %v15725_v53  ;;  %12060 = vmatprep.subr.bf16.mxu0 %v12632_v43 }
 0x275   : > { %6250 = vst [vmem:[#allocation2 + $0x18] sm:$0xf] %v5894_v29  ;;  %v5919_v46 = vrot.slane %v5917_v54, 6  ;;  %v5922_v18 = vrot.slane %v5920_v30, 7  ;;  %v10935_v39 = vpack.c.bf16 %v5708_v2, %v5708_v2  ;;  %vm4875_vm4 = vcmp.ge.f32.partialorder %v4839_v10, 0.0  ;;  %v12634_v1 = vld [vmem:[#allocation3 + $0xe8] sm:$0xff]  }
 0x276   : > { %v4956_v63 = vsel %vm4877_vm7, %v4841_v11, %v4920_v51  ;;  %v4918_v35 = vmul.f32 %v15526_v23, %v4839_v10  ;;  %v4842_v45 = vadd.f32 %v15499_v14, %v4799_v22  ;;  %v4797_v49 = vmul.f32 %v15464_v19, %v4754_v58 }
 0x277   : > { %v15732_v41 = vor.u32 %v5922_v18, %v5919_v46  ;;  %v5897_v7 = vshrl.u32 %v10935_v39, 16  ;;  %v5900_v15 = vshll.u32 %v10935_v39, 16  ;;  %v5713_v24 = vsel %vm15674_vm14, %v4956_v63, 0.0  ;;  %v18353_v39 = vld [vmem:[#allocation19_spill] sm:$0xff]  ;;  %v18356_v63 = vld [vmem:[#allocation61_spill] sm:$0xff]  ;;  %12061 = vmatpush3.bf16.msra.mxu0 %v12632_v43 }
 0x278   : > { %vm18347_vm9 = vnez %v18346_v34  ;;  %v10940_v22 = vpack.c.bf16 %v5713_v24, %v5713_v24  ;;  %v4954_v58 = vsel %vm4875_vm4, %v4839_v10, %v4918_v35  ;;  %vm4878_vm3 = vcmp.ge.f32.partialorder %v4842_v45, 0.0  ;;  %v18355_v10 = vld [vmem:[#allocation71_spill] sm:$0xff]  ;;  %12062 = vmatprep.subr.bf16.mxu0 %v12634_v1 }
 0x279   : > { %v18350_v11 = vsel %vm18347_vm9, %v18348_v0, %v18349_v20  ;;  %v4921_v31 = vmul.f32 %v15526_v23, %v4842_v45  ;;  %v5924_v54 = vsel %vm18320_vm8, %v5915_v8, %v15732_v41  ;;  %v5925_v30 = vrot.slane %v15732_v41, 4  ;;  %v11881_v8 = vpop.f32.mrf.mxu0  ;;  %v18377_v24 = vld [vmem:[#allocation27_spill] sm:$0xff] }
 0x27a   : > { %vm15741_vm15 = vcmp.lt.s32.totalorder %v18350_v11, 16  ;;  %v5899_v6 = vrot.slane %v5897_v7, 6  ;;  %v5902_v29 = vrot.slane %v5900_v15, 7  ;;  %6253 = vst [vmem:[#allocation2 + $0x24] sm:$0xf] %v5924_v54  ;;  %v5947_v2 = vshrl.u32 %v10940_v22, 16 }
 0x27b   : > { %v5950_v51 = vshll.u32 %v10940_v22, 16  ;;  %v5711_v46 = vsel %vm15691_vm12, %v4954_v58, 0.0  ;;  %v4957_v18 = vsel %vm4878_vm3, %v4842_v45, %v4921_v31  ;;  %vm18354_vm6 = vnez %v18353_v39  ;;  %v12637_v45 = vld [vmem:[#allocation3 + $0xe0] sm:$0xff]   ;;  %12063 = vmatpush3.bf16.msra.mxu0 %v12634_v1 }
 0x27c   : > { %v18357_v35 = vsel %vm18354_vm6, %v18355_v10, %v18356_v63  ;;  %v5903_v41 = vor.u32 %v5902_v29, %v5899_v6  ;;  %v10938_v7 = vpack.c.bf16 %v5711_v46, %v5711_v46  ;;  %v5714_v15 = vsel %vm15703_vm2, %v4957_v18, 0.0  ;;  %v18362_v46 = vld [vmem:[#allocation72_spill] sm:$0xff]  ;;  %v18363_v18 = vld [vmem:[#allocation62_spill] sm:$0xff]  ;;  %12064 = vmatprep.subr.bf16.mxu0 %v12637_v45  ;;  %v12639_v63 = vld [vmem:[#allocation3 + $0xd8] sm:$0xff]  }
 0x27d   : > { %vm15759_vm0 = vcmp.lt.s32.totalorder %v18357_v35, 16  ;;  %v4840_v33 = vadd.f32 %v15499_v14, %v4797_v49  ;;  %v5949_v34 = vrot.slane %v5947_v2, 6  ;;  %v5952_v0 = vrot.slane %v5950_v51, 7  ;;  %v4653_v49 = vpop.f32.mrf.mxu0 }
 0x27e   : > { %v10941_v20 = vpack.c.bf16 %v5714_v15, %v5714_v15  ;;  %v4802_v11 = vmul.f32 %v15464_v19, %v4759_v4  ;;  %v5904_v22 = vsel %vm18320_vm8, %v5895_v9, %v5903_v41  ;;  %v5905_v58 = vrot.slane %v5903_v41, 4  ;;  %v18360_v9 = vld [vmem:[#allocation74_spill] sm:$0xff]  ;;  %v18369_v15 = vld [vmem:[#allocation75_spill] sm:$0xff] }
 0x27f   : > { %v5927_v31 = vshrl.u32 %v10938_v7, 16  ;;  %v5930_v43 = vshll.u32 %v10938_v7, 16  ;;  %6251 = vst [vmem:[#allocation2 + $0x1c] sm:$0xf] %v5904_v22  ;;  %v15769_v54 = vor.u32 %v5952_v0, %v5949_v34  ;;  %vm4876_vm10 = vcmp.ge.f32.partialorder %v4840_v33, 0.0  ;;  %v18367_v7 = vld [vmem:[#allocation76_spill] sm:$0xff]  ;;  %12065 = vmatpush3.bf16.msra.mxu0 %v12637_v45 }
 0x280   : > { %v5957_v27 = vshrl.u32 %v10941_v20, 16  ;;  %v5960_v6 = vshll.u32 %v10941_v20, 16  ;;  %v5914_v29 = vsel %vm18320_vm8, %v5905_v58, %v15665_v62  ;;  %v4919_v51 = vmul.f32 %v15526_v23, %v4840_v33  ;;  %v18370_v34 = vld [vmem:[#allocation65_spill] sm:$0xff]  ;;  %12066 = vmatprep.subr.bf16.mxu0 %v12639_v63  ;;  %v18394_v20 = vld [vmem:[#allocation82_spill] sm:$0xff] }
 0x281   : > { %v5929_v2 = vrot.slane %v5927_v31, 6  ;;  %v5932_v4 = vrot.slane %v5930_v43, 7  ;;  %vm18361_vm14 = vnez %v18360_v9  ;;  %6252 = vst [vmem:[#allocation2 + $0x20] sm:$0xf] %v5914_v29  ;;  %v5955_v1 = vrot.slane %v15769_v54, 4  ;;  %v18374_v43 = vld [vmem:[#allocation66_spill] sm:$0xff]  ;;  %v11884_v9 = vpop.f32.mrf.mxu0 }
 0x282   : > { %v18364_v39 = vsel %vm18361_vm14, %v18362_v46, %v18363_v18  ;;  %v5959_v35 = vrot.slane %v5957_v27, 6  ;;  %v5962_v62 = vrot.slane %v5960_v6, 7  ;;  %v4845_v41 = vadd.f32 %v15499_v14, %v4802_v11 }
 0x283   : > { %vm15780_vm5 = vcmp.lt.s32.totalorder %v18364_v39, 16  ;;  %vm18368_vm12 = vnez %v18367_v7  ;;  %v5933_v22 = vor.u32 %v5932_v4, %v5929_v2  ;;  %v4955_v58 = vsel %vm4876_vm10, %v4840_v33, %v4919_v51  ;;  %12067 = vmatpush3.bf16.msra.mxu0 %v12639_v63 }
 0x284   : > { %v18371_v0 = vsel %vm18368_vm12, %v18369_v15, %v18370_v34  ;;  %v4757_v31 = vadd.f32 %v15730_v21, %v15157_v56  ;;  %v4760_v27 = vadd.f32 %v11881_v8, %v18374_v43  ;;  %v15799_v6 = vor.u32 %v5962_v62, %v5959_v35  ;;  %v12641_v56 = vld [vmem:[#allocation3 + $0xd0] sm:$0xff]   ;;  %v18376_v34 = vld [vmem:[#allocation30_spill] sm:$0xff] }
 0x285   : > { %vm15791_vm1 = vcmp.lt.s32.totalorder %v18371_v0, 16  ;;  %v5712_v11 = vsel %vm15741_vm15, %v4955_v58, 0.0  ;;  %vm4881_vm2 = vcmp.ge.f32.partialorder %v4845_v41, 0.0  ;;  %v4924_v29 = vmul.f32 %v15526_v23, %v4845_v41  ;;  %v18375_v15 = vld [vmem:[#allocation20_spill] sm:$0xff]  ;;  %v18379_v43 = vld [vmem:[#allocation22_spill] sm:$0xff]  ;;  %12068 = vmatprep.subr.bf16.mxu0 %v12641_v56 }
 0x286   : > { %v5934_v2 = vsel %vm18320_vm8, %v5925_v30, %v5933_v22  ;;  %v5935_v4 = vrot.slane %v5933_v22, 4  ;;  %v10939_v33 = vpack.c.bf16 %v5712_v11, %v5712_v11  ;;  %v4800_v51 = vmul.f32 %v15464_v19, %v4757_v31  ;;  %v15815_v35 = vld [vmem:[#allocation2 + $0x18] sm:$0xff]  }
 0x287   : > { %6254 = vst [vmem:[#allocation2 + $0x28] sm:$0xf] %v5934_v2  ;;  %v5964_v21 = vsel %vm18320_vm8, %v5955_v1, %v15799_v6  ;;  %v5965_v16 = vrot.slane %v15799_v6, 4  ;;  %v4960_v8 = vsel %vm4881_vm2, %v4845_v41, %v4924_v29  ;;  %v4803_v46 = vmul.f32 %v15464_v19, %v4760_v27  ;;  %v4666_v41 = vpop.f32.mrf.mxu0  ;;  %v18380_v27 = vld [vmem:[#allocation14_spill] sm:$0xff]  ;;  %11975 = vmatmul.mubr.bf16.gmra.mxu0 %v15815_v35 }
 0x288   : > { %6257 = vst [vmem:[#allocation2 + $0x34] sm:$0xf] %v5964_v21  ;;  %v5937_v45 = vshrl.u32 %v10939_v33, 16  ;;  %v5940_v18 = vshll.u32 %v10939_v33, 16  ;;  %v5717_v30 = vsel %vm15759_vm0, %v4960_v8, 0.0  ;;  %v4843_v39 = vadd.f32 %v15499_v14, %v4800_v51  ;;  %v18384_v33 = vld [vmem:[#allocation28_spill] sm:$0xff]  ;;  %12069 = vmatpush3.bf16.msra.mxu0 %v12641_v56 }
 0x289   : > { %v10944_v62 = vpack.c.bf16 %v5717_v30, %v5717_v30  ;;  %v4846_v7 = vadd.f32 %v15499_v14, %v4803_v46  ;;  %v4758_v1 = vadd.f32 %v4653_v49, %v18375_v15  ;;  %v4763_v0 = vadd.f32 %v11884_v9, %v18376_v34  ;;  %v15831_v49 = vld [vmem:[#allocation2 + $0x20] sm:$0xff]   ;;  %v18386_v51 = vld [vmem:[#allocation79_spill] sm:$0xff] }
 0x28a   : > { %v5939_v22 = vrot.slane %v5937_v45, 6  ;;  %v5942_v58 = vrot.slane %v5940_v18, 7  ;;  %vm4879_vm7 = vcmp.ge.f32.partialorder %v4843_v39, 0.0  ;;  %v4922_v31 = vmul.f32 %v15526_v23, %v4843_v39  ;;  %v18387_v21 = vld [vmem:[#allocation77_spill] sm:$0xff]  ;;  %v12644_v45 = vld [vmem:[#allocation3 + $0xc8] sm:$0xff]   ;;  %11978 = vmatprep.mubr.bf16.mxu0 %v15831_v49 }
 0x28b   : > { %vm18378_vm4 = vnez %v18377_v24  ;;  %v5987_v63 = vshrl.u32 %v10944_v62, 16  ;;  %v5990_v9 = vshll.u32 %v10944_v62, 16  ;;  %vm4882_vm15 = vcmp.ge.f32.partialorder %v4846_v7, 0.0  ;;  %12070 = vmatprep.subr.bf16.mxu0 %v12644_v45 }
 0x28c   : > { %v18381_v11 = vsel %vm18378_vm4, %v18379_v43, %v18380_v27  ;;  %v4925_v2 = vmul.f32 %v15526_v23, %v4846_v7  ;;  %vm18385_vm3 = vnez %v18384_v33  ;;  %v5943_v18 = vor.u32 %v5942_v58, %v5939_v22  ;;  %v12647_v33 = vld [vmem:[#allocation3 + $0xc0] sm:$0xff]   ;;  %12071 = vmatpush3.bf16.msra.mxu0 %v12644_v45 }
 0x28d   : > { %vm15826_vm9 = vcmp.lt.s32.totalorder %v18381_v11, 16  ;;  %v18388_v8 = vsel %vm18385_vm3, %v18386_v51, %v18387_v21  ;;  %v4958_v30 = vsel %vm4879_vm7, %v4843_v39, %v4922_v31  ;;  %v4801_v15 = vmul.f32 %v15464_v19, %v4758_v1  ;;  %v11885_v11 = vpop.f32.mrf.mxu0  ;;  %v18395_v21 = vld [vmem:[#allocation78_spill] sm:$0xff]  ;;  %12072 = vmatprep.subr.bf16.mxu0 %v12647_v33 }
 0x28e   : > { %vm15839_vm6 = vcmp.lt.s32.totalorder %v18388_v8, 16  ;;  %v4806_v34 = vmul.f32 %v15464_v19, %v4763_v0  ;;  %v5989_v62 = vrot.slane %v5987_v63, 6  ;;  %v5992_v24 = vrot.slane %v5990_v9, 7  ;;  %v18391_v63 = vld [vmem:[#allocation33_spill] sm:$0xff] }
 0x28f   : > { %v5715_v43 = vsel %vm15780_vm5, %v4958_v30, 0.0  ;;  %v4961_v27 = vsel %vm4882_vm15, %v4846_v7, %v4925_v2  ;;  %v5944_v51 = vsel %vm18320_vm8, %v5935_v4, %v5943_v18  ;;  %v5945_v22 = vrot.slane %v5943_v18, 4  ;;  %v18392_v2 = vld [vmem:[#allocation83_spill] sm:$0xff] }
 0x290   : > { %v10942_v39 = vpack.c.bf16 %v5715_v43, %v5715_v43  ;;  %v5718_v1 = vsel %vm15791_vm1, %v4961_v27, 0.0  ;;  %6255 = vst [vmem:[#allocation2 + $0x2c] sm:$0xf] %v5944_v51  ;;  %v15852_v0 = vor.u32 %v5992_v24, %v5989_v62  ;;  %v4844_v10 = vadd.f32 %v15499_v14, %v4801_v15  ;;  %12073 = vmatpush3.bf16.msra.mxu0 %v12647_v33 }
 0x291   : > { %v10945_v58 = vpack.c.bf16 %v5718_v1, %v5718_v1  ;;  %v4849_v7 = vadd.f32 %v15499_v14, %v4806_v34  ;;  %v5954_v56 = vsel %vm18320_vm8, %v5945_v22, %v15769_v54  ;;  %v4761_v9 = vadd.f32 %v4666_v41, %v18391_v63  ;;  %v4669_v54 = vpop.f32.mrf.mxu0 }
 0x292   : > { %v5967_v31 = vshrl.u32 %v10942_v39, 16  ;;  %v5970_v4 = vshll.u32 %v10942_v39, 16  ;;  %vm18393_vm0 = vnez %v18392_v2  ;;  %6256 = vst [vmem:[#allocation2 + $0x30] sm:$0xf] %v5954_v56  ;;  %v5995_v30 = vrot.slane %v15852_v0, 4  ;;  %v18399_v2 = vld [vmem:[#allocation85_spill] sm:$0xff] }
 0x293   : > { %v18396_v8 = vsel %vm18393_vm0, %v18394_v20, %v18395_v21  ;;  %v5997_v15 = vshrl.u32 %v10945_v58, 16  ;;  %v6000_v34 = vshll.u32 %v10945_v58, 16  ;;  %vm4880_vm14 = vcmp.ge.f32.partialorder %v4844_v10, 0.0  ;;  %v18401_v20 = vld [vmem:[#allocation84_spill] sm:$0xff]  ;;  %v18402_v21 = vld [vmem:[#allocation26_spill] sm:$0xff]  ;;  %v11888_v33 = vpop.f32.mrf.mxu0 }
 0x294   : > { %vm15865_vm10 = vcmp.lt.s32.totalorder %v18396_v8, 16  ;;  %v5969_v62 = vrot.slane %v5967_v31, 6  ;;  %v5972_v24 = vrot.slane %v5970_v4, 7  ;;  %v4923_v41 = vmul.f32 %v15526_v23, %v4844_v10 }
 0x295   : > { %vm4885_vm5 = vcmp.ge.f32.partialorder %v4849_v7, 0.0  ;;  %v5999_v43 = vrot.slane %v5997_v15, 6  ;;  %v6002_v27 = vrot.slane %v6000_v34, 7  ;;  %v4928_v51 = vmul.f32 %v15526_v23, %v4849_v7  ;;  %v18409_v15 = vld [vmem:[#allocation80_spill] sm:$0xff] }
 0x296   : > { %v4804_v22 = vmul.f32 %v15464_v19, %v4761_v9  ;;  %v5973_v39 = vor.u32 %v5972_v24, %v5969_v62  ;;  %v4959_v1 = vsel %vm4880_vm14, %v4844_v10, %v4923_v41  ;;  %v4764_v56 = vadd.f32 %v11885_v11, %v15295_v38  ;;  %v18406_v10 = vld [vmem:[#allocation88_spill] sm:$0xff] }
 0x297   : > { %v4762_v58 = vadd.f32 %v4669_v54, %v15314_v40  ;;  %v15875_v63 = vor.u32 %v6002_v27, %v5999_v43  ;;  %v5716_v45 = vsel %vm15826_vm9, %v4959_v1, 0.0  ;;  %v4964_v31 = vsel %vm4885_vm5, %v4849_v7, %v4928_v51  ;;  %v18408_v7 = vld [vmem:[#allocation87_spill] sm:$0xff]  ;;  %v15904_v62 = vld [vmem:[#allocation2 + $0x28] sm:$0xff]  }
 0x298   : > { %v4847_v4 = vadd.f32 %v15499_v14, %v4804_v22  ;;  %vm18400_vm12 = vnez %v18399_v2  ;;  %v5974_v38 = vsel %vm18320_vm8, %v5965_v16, %v5973_v39  ;;  %v5975_v40 = vrot.slane %v5973_v39, 4  ;;  %11979 = vmatmul.mubr.bf16.gmra.mxu0 %v15904_v62  ;;  %v18421_v54 = vld [vmem:[#allocation69_spill] sm:$0xff] }
 0x299   : > { %v18403_v8 = vsel %vm18400_vm12, %v18401_v20, %v18402_v21  ;;  %v10943_v29 = vpack.c.bf16 %v5716_v45, %v5716_v45  ;;  %v5721_v11 = vsel %vm15839_vm6, %v4964_v31, 0.0  ;;  %vm18407_vm2 = vnez %v18406_v10  ;;  %6258 = vst [vmem:[#allocation2 + $0x38] sm:$0xf] %v5974_v38  ;;  %v15913_v51 = vld [vmem:[#allocation2 + $0x30] sm:$0xff]   ;;  %v18413_v20 = vld [vmem:[#allocation21_spill] sm:$0xff] }
 0x29a   : > { %vm15885_vm1 = vcmp.lt.s32.totalorder %v18403_v8, 16  ;;  %v18410_v34 = vsel %vm18407_vm2, %v18408_v7, %v18409_v15  ;;  %v6004_v6 = vsel %vm18320_vm8, %v5995_v30, %v15875_v63  ;;  %v6005_v16 = vrot.slane %v15875_v63, 4  ;;  %v18415_v21 = vld [vmem:[#allocation63_spill] sm:$0xff]  ;;  %v18416_v8 = vld [vmem:[#allocation89_spill] sm:$0xff]  ;;  %11982 = vmatprep.mubr.bf16.mxu0 %v15913_v51 }
 0x29b   : > { %vm15900_vm7 = vcmp.lt.s32.totalorder %v18410_v34, 16  ;;  %v10948_v46 = vpack.c.bf16 %v5721_v11, %v5721_v11  ;;  %vm4883_vm4 = vcmp.ge.f32.partialorder %v4847_v4, 0.0  ;;  %6261 = vst [vmem:[#allocation2 + $0x44] sm:$0xf] %v6004_v6  ;;  %v5977_v24 = vshrl.u32 %v10943_v29, 16  ;;  %v4682_v6 = vpop.f32.mrf.mxu0 }
 0x29c   : > { %v5980_v41 = vshll.u32 %v10943_v29, 16  ;;  %v4926_v43 = vmul.f32 %v15526_v23, %v4847_v4  ;;  %v4807_v27 = vmul.f32 %v15464_v19, %v4764_v56  ;;  %v4805_v1 = vmul.f32 %v15464_v19, %v4762_v58 }
 0x29d   : > { %v6027_v22 = vshrl.u32 %v10948_v46, 16  ;;  %v6030_v39 = vshll.u32 %v10948_v46, 16  ;;  %v4767_v30 = vadd.f32 %v11888_v33, %v15318_v13  ;;  %v5979_v63 = vrot.slane %v5977_v24, 6 }
 0x29e   : > { %v5982_v45 = vrot.slane %v5980_v41, 7  ;;  %v4962_v31 = vsel %vm4883_vm4, %v4847_v4, %v4926_v43  ;;  %v4850_v2 = vadd.f32 %v15499_v14, %v4807_v27  ;;  %vm18414_vm9 = vnez %v18413_v20  ;;  %v11889_v20 = vpop.f32.mrf.mxu0 }
 0x29f   : > { %v18417_v56 = vsel %vm18414_vm9, %v18415_v21, %v18416_v8  ;;  %v6029_v29 = vrot.slane %v6027_v22, 6  ;;  %v6032_v58 = vrot.slane %v6030_v39, 7  ;;  %v5719_v13 = vsel %vm15865_vm10, %v4962_v31, 0.0 }
 0x2a0   : > { %vm15923_vm15 = vcmp.lt.s32.totalorder %v18417_v56, 16  ;;  %v4848_v4 = vadd.f32 %v15499_v14, %v4805_v1  ;;  %v5983_v11 = vor.u32 %v5982_v45, %v5979_v63  ;;  %v10946_v10 = vpack.c.bf16 %v5719_v13, %v5719_v13 }
 0x2a1   : > { %vm4886_vm3 = vcmp.ge.f32.partialorder %v4850_v2, 0.0  ;;  %v4929_v7 = vmul.f32 %v15526_v23, %v4850_v2  ;;  %v15932_v15 = vor.u32 %v6032_v58, %v6029_v29  ;;  %v4810_v33 = vmul.f32 %v15464_v19, %v4767_v30 }
 0x2a2   : > { %vm4884_vm6 = vcmp.ge.f32.partialorder %v4848_v4, 0.0  ;;  %v4927_v34 = vmul.f32 %v15526_v23, %v4848_v4  ;;  %v5984_v46 = vsel %vm18320_vm8, %v5975_v40, %v5983_v11  ;;  %v5985_v18 = vrot.slane %v5983_v11, 4 }
 0x2a3   : > { %v6007_v24 = vshrl.u32 %v10946_v10, 16  ;;  %v6010_v41 = vshll.u32 %v10946_v10, 16  ;;  %6259 = vst [vmem:[#allocation2 + $0x3c] sm:$0xf] %v5984_v46  ;;  %v6035_v43 = vrot.slane %v15932_v15, 4  ;;  %v4965_v27 = vsel %vm4886_vm3, %v4850_v2, %v4929_v7 }
 0x2a4   : > { %v4963_v22 = vsel %vm4884_vm6, %v4848_v4, %v4927_v34  ;;  %v4853_v39 = vadd.f32 %v15499_v14, %v4810_v33  ;;  %v5994_v1 = vsel %vm18320_vm8, %v5985_v18, %v15852_v0  ;;  %v5722_v45 = vsel %vm15885_vm1, %v4965_v27, 0.0 }
 0x2a5   : > { %v6009_v63 = vrot.slane %v6007_v24, 6  ;;  %v6012_v30 = vrot.slane %v6010_v41, 7  ;;  %6260 = vst [vmem:[#allocation2 + $0x40] sm:$0xf] %v5994_v1  ;;  %v10949_v40 = vpack.c.bf16 %v5722_v45, %v5722_v45  ;;  %v5720_v31 = vsel %vm15900_vm7, %v4963_v22, 0.0 }
 0x2a6   : > { %vm4889_vm0 = vcmp.ge.f32.partialorder %v4853_v39, 0.0  ;;  %v4932_v2 = vmul.f32 %v15526_v23, %v4853_v39  ;;  %v10947_v8 = vpack.c.bf16 %v5720_v31, %v5720_v31  ;;  %v6458_v56 = vshll.u32 %v15715_v37, 16 }
 0x2a7   : > { %v6013_v21 = vor.u32 %v6012_v30, %v6009_v63  ;;  %v6462_v0 = vshrl.u32 %v15715_v37, 16  ;;  %v6037_v29 = vshrl.u32 %v10949_v40, 16  ;;  %v6040_v58 = vshll.u32 %v10949_v40, 16 }
 0x2a8   : > { %v4968_v13 = vsel %vm4889_vm0, %v4853_v39, %v4932_v2  ;;  %v4765_v9 = vadd.f32 %v4682_v6, %v15326_v52  ;;  %vm18420_vm10 = vnez %v18204_v57  ;;  %v6017_v34 = vshrl.u32 %v10947_v8, 16  ;;  %v4685_v6 = vpop.f32.mrf.mxu0 }
 0x2a9   : > { %v18422_v4 = vsel %vm18420_vm10, %v15235_v61, %v18421_v54  ;;  %v6014_v10 = vsel %vm18320_vm8, %v6005_v16, %v6013_v21  ;;  %v6015_v7 = vrot.slane %v6013_v21, 4  ;;  %v6020_v37 = vshll.u32 %v10947_v8, 16  ;;  %v18425_v16 = vld [vmem:[#allocation86_spill] sm:$0xff]  ;;  %v12620_v54 = vld [vmem:[#allocation3 + $0xb0] sm:$0xff]  }
 0x2aa   : > { %vm15956_vm14 = vcmp.lt.s32.totalorder %v18422_v4, 16  ;;  %6262 = vst [vmem:[#allocation2 + $0x48] sm:$0xf] %v6014_v10  ;;  %v6039_v33 = vrot.slane %v6037_v29, 6  ;;  %v6042_v46 = vrot.slane %v6040_v58, 7  ;;  %v5725_v52 = vsel %vm15923_vm15, %v4968_v13, 0.0 }
 0x2ab   : > { %v6460_v57 = vrot.slane %v6458_v56, 1  ;;  %v6019_v18 = vrot.slane %v6017_v34, 6  ;;  %v6022_v61 = vrot.slane %v6020_v37, 7  ;;  %v10952_v24 = vpack.c.bf16 %v5725_v52, %v5725_v52  ;;  %v15965_v27 = vld [vmem:[#allocation2 + $0x38] sm:$0xff]   ;;  %v11892_v56 = vpop.f32.mrf.mxu0  ;;  %v18441_v52 = vld [vmem:[#allocation73_spill] sm:$0xff] }
 0x2ac   : > { %v4808_v41 = vmul.f32 %v15464_v19, %v4765_v9  ;;  %v15967_v22 = vor.u32 %v6042_v46, %v6039_v33  ;;  %vm18426_vm5 = vsmask.f32 7424  ;;  %v6466_v63 = vshll.u32 %v15725_v53, 16  ;;  %11983 = vmatmul.mubr.bf16.gmra.mxu0 %v15965_v27  ;;  %v15983_v21 = vld [vmem:[#allocation2 + $0x40] sm:$0xff]  }
 0x2ad   : > { %v6461_v39 = vsel %vm18426_vm5, %v18425_v16, %v6460_v57  ;;  %v6464_v1 = vor.u32 %v6462_v0, %v6460_v57  ;;  %vm18427_vm12 = vnez %v18210_v12  ;;  %v6023_v45 = vor.u32 %v6022_v61, %v6019_v18  ;;  %11986 = vmatprep.mubr.bf16.mxu0 %v15983_v21  ;;  %vm18435_vm9 = vmmov %vm18426_vm5  ;;  %v18438_v46 = vld [vmem:[#allocation25_spill] sm:$0xff]  ;;  %v4698_v61 = vpop.f32.mrf.mxu0 }
 0x2ae   : > { %v18428_v38 = vsel %vm18427_vm12, %v15254_v50, %v15193_v42  ;;  %v6067_v40 = vshrl.u32 %v10952_v24, 16  ;;  %v6070_v31 = vshll.u32 %v10952_v24, 16  ;;  %11918 = vmatprep.mubr.bf16.mxu1 %v6461_v39  ;;  %v4851_v2 = vadd.f32 %v15499_v14, %v4808_v41  ;;  %v16030_v41 = vld [vmem:[%s17798_s4] ss:$0 sm:$0xff]  ;;  %vm18450_vm12 = vmmov %vm18435_vm9 }
 0x2af   : > { %vm15977_vm1 = vcmp.lt.s32.totalorder %v18428_v38, 16  ;;  %v6044_v12 = vsel %vm18320_vm8, %v6035_v43, %v15967_v22  ;;  %v6045_v42 = vrot.slane %v15967_v22, 4  ;;  %v6468_v50 = vrot.slane %v6466_v63, 1  ;;  %v16037_v63 = vld [vmem:[%s17800_s6] ss:$0 sm:$0xff] }
 0x2b0   : > { %v4768_v8 = vadd.f32 %v11889_v20, %v15338_v32  ;;  %6265 = vst [vmem:[#allocation2 + $0x54] sm:$0xf] %v6044_v12  ;;  %v6024_v0 = vsel %vm18320_vm8, %v6015_v7, %v6023_v45  ;;  %v6025_v29 = vrot.slane %v6023_v45, 4  ;;  %v6069_v58 = vrot.slane %v6067_v40, 6  ;;  %v18437_v7 = vld [vmem:[#allocation7_spill] sm:$0xff] }
 0x2b1   : > { %v6072_v13 = vrot.slane %v6070_v31, 7  ;;  %vm18431_vm2 = vnez %v18215_v36  ;;  %6263 = vst [vmem:[#allocation2 + $0x4c] sm:$0xf] %v6024_v0  ;;  %vm4887_vm4 = vcmp.ge.f32.partialorder %v4851_v2, 0.0  ;;  %v4930_v32 = vmul.f32 %v15526_v23, %v4851_v2  ;;  %v12741_v23 = vld [vmem:[#allocation3 + $0xb8] sm:$0xff]   ;;  %v18445_v12 = vld [vmem:[#allocation43_spill] sm:$0xff] }
 0x2b2   : > { %v18432_v9 = vsel %vm18431_vm2, %v15275_v47, %v15212_v44  ;;  %v6469_v20 = vsel %vm18435_vm9, %v6464_v1, %v6468_v50  ;;  %v4811_v4 = vmul.f32 %v15464_v19, %v4768_v8  ;;  %v6034_v36 = vsel %vm18320_vm8, %v6025_v29, %v15932_v15  ;;  %v18436_v44 = vld [vmem:[#allocation40_spill] sm:$0xff]  ;;  %v18440_v19 = vld [vmem:[#allocation35_spill] sm:$0xff] }
 0x2b3   : > { %vm15997_vm7 = vcmp.lt.s32.totalorder %v18432_v9, 16  ;;  %v16008_v47 = vor.u32 %v6072_v13, %v6069_v58  ;;  %11919 = vmatmul.mubr.bf16.vlgmr.msra.gmra.mxu1 %v6469_v20  ;;  %v4766_v10 = vadd.f32 %v4685_v6, %v18436_v44  ;;  %v4771_v34 = vadd.f32 %v11892_v56, %v18437_v7  ;;  %6264 = vst [vmem:[#allocation2 + $0x50] sm:$0xf] %v6034_v36  ;;  %v12623_v1 = vld [vmem:[#allocation3 + $0xa8] sm:$0xff]   ;;  %v16043_v45 = vld [vmem:[%s17799_s5] ss:$0 sm:$0xff]  ;;  %v11893_v44 = vpop.f32.mrf.mxu0 }
 0x2b4   : > { %v4966_v37 = vsel %vm4887_vm4, %v4851_v2, %v4930_v32  ;;  %v4854_v33 = vadd.f32 %v15499_v14, %v4811_v4  ;;  %12007 = vmatpush3.bf16.msra.mxu1 %v12741_v23  ;;  %vm18439_vm15 = vnez %v18438_v46  ;;  %v6470_v18 = vshrl.u32 %v15725_v53, 16  ;;  %v12627_v13 = vld [vmem:[#allocation3 + $0xa0] sm:$0xff]   ;;  %v18456_v15 = vld [vmem:[#allocation47_spill] sm:$0xff]  ;;  %v18464_v20 = vld [vmem:[#allocation92_spill] sm:$0xff] }
 0x2b5   : > { %v18442_v57 = vsel %vm18439_vm15, %v18440_v19, %v18441_v52  ;;  %v6474_v6 = vshll.u32 %v15815_v35, 16  ;;  %v6075_v24 = vrot.slane %v16008_v47, 4  ;;  %v5723_v14 = vsel %vm15956_vm14, %v4966_v37, 0.0  ;;  %12008 = vmatprep.subr.bf16.mxu1 %v12620_v54  ;;  %vm18463_vm15 = vmmov %vm18450_vm12 }
 0x2b6   : > { %vm16018_vm3 = vcmp.lt.s32.totalorder %v18442_v57, 16  ;;  %v4809_v16 = vmul.f32 %v16030_v41, %v4766_v10  ;;  %v4814_v39 = vmul.f32 %v16030_v41, %v4771_v34  ;;  %v10950_v53 = vpack.c.bf16 %v5723_v14, %v5723_v14 }
 0x2b7   : > { %vm4890_vm6 = vcmp.ge.f32.partialorder %v4854_v33, 0.0  ;;  %v4933_v11 = vmul.f32 %v16037_v63, %v4854_v33  ;;  %v6472_v38 = vor.u32 %v6470_v18, %v6468_v50  ;;  %v6476_v2 = vrot.slane %v6474_v6, 1  ;;  %v12631_v18 = vld [vmem:[#allocation3 + $0x98] sm:$0xff]  }
 0x2b8   : > { %v4852_v40 = vadd.f32 %v16043_v45, %v4809_v16  ;;  %v4857_v31 = vadd.f32 %v16043_v45, %v4814_v39  ;;  %v4769_v8 = vadd.f32 %v4698_v61, %v18445_v12  ;;  %v6047_v56 = vshrl.u32 %v10950_v53, 16  ;;  %12009 = vmatpush3.bf16.msra.mxu1 %v12620_v54  ;;  %v4701_v16 = vpop.f32.mrf.mxu0 }
 0x2b9   : > { %v6050_v0 = vshll.u32 %v10950_v53, 16  ;;  %v4969_v29 = vsel %vm4890_vm6, %v4854_v33, %v4933_v11  ;;  %v6478_v58 = vshrl.u32 %v15815_v35, 16  ;;  %vm18446_vm14 = vnez %v18236_v26  ;;  %12010 = vmatprep.subr.bf16.mxu1 %v12623_v1  ;;  %v16061_v35 = vld [vmem:[#allocation2 + $0x48] sm:$0xff]  }
 0x2ba   : > { %v5726_v50 = vsel %vm15977_vm1, %v4969_v29, 0.0  ;;  %vm4888_vm0 = vcmp.ge.f32.partialorder %v4852_v40, 0.0  ;;  %v4931_v9 = vmul.f32 %v16037_v63, %v4852_v40  ;;  %vm4893_vm10 = vcmp.ge.f32.partialorder %v4857_v31, 0.0  ;;  %11987 = vmatmul.mubr.bf16.gmra.mxu0 %v16061_v35 }
 0x2bb   : > { %v18447_v32 = vsel %vm18446_vm14, %v15362_v60, %v15311_v28  ;;  %v6049_v54 = vrot.slane %v6047_v56, 6  ;;  %v6052_v4 = vrot.slane %v6050_v0, 7  ;;  %v10953_v30 = vpack.c.bf16 %v5726_v50, %v5726_v50  ;;  %v16067_v28 = vld [vmem:[#allocation2 + $0x50] sm:$0xff]  }
 0x2bc   : > { %vm16057_vm5 = vcmp.lt.s32.totalorder %v18447_v32, 16  ;;  %v4936_v36 = vmul.f32 %v16037_v63, %v4857_v31  ;;  %v4967_v10 = vsel %vm4888_vm0, %v4852_v40, %v4931_v9  ;;  %v6477_v7 = vsel %vm18450_vm12, %v6472_v38, %v6476_v2  ;;  %12011 = vmatpush3.bf16.msra.mxu1 %v12623_v1  ;;  %11990 = vmatprep.mubr.bf16.mxu0 %v16067_v28  ;;  %v12636_v32 = vld [vmem:[#allocation3 + $0x90] sm:$0xff]  }
 0x2bd   : > { %v4812_v26 = vmul.f32 %v16030_v41, %v4769_v8  ;;  %v6480_v34 = vor.u32 %v6478_v58, %v6476_v2  ;;  %v6053_v60 = vor.u32 %v6052_v4, %v6049_v54  ;;  %v6077_v37 = vshrl.u32 %v10953_v30, 16  ;;  %11922 = vmatprep.mubr.bf16.mxu1 %v6477_v7  ;;  %12012 = vmatprep.subr.bf16.mxu1 %v12627_v13  ;;  %v18457_v2 = vld [vmem:[#allocation12_spill] sm:$0xff]  ;;  %v18462_v58 = vld [vmem:[#allocation90_spill] sm:$0xff] }
 0x2be   : > { %v6080_v33 = vshll.u32 %v10953_v30, 16  ;;  %v5724_v23 = vsel %vm15997_vm7, %v4967_v10, 0.0  ;;  %v4972_v19 = vsel %vm4893_vm10, %v4857_v31, %v4936_v36  ;;  %v6482_v57 = vshll.u32 %v15831_v49, 16  ;;  %v11896_v36 = vpop.f32.mrf.mxu0 }
 0x2bf   : > { %v10951_v46 = vpack.c.bf16 %v5724_v23, %v5724_v23  ;;  %v4855_v52 = vadd.f32 %v16043_v45, %v4812_v26  ;;  %v6054_v6 = vsel %vm18320_vm8, %v6045_v42, %v6053_v60  ;;  %v6055_v43 = vrot.slane %v6053_v60, 4 }
 0x2c0   : > { %v6079_v61 = vrot.slane %v6077_v37, 6  ;;  %v6082_v14 = vrot.slane %v6080_v33, 7  ;;  %6266 = vst [vmem:[#allocation2 + $0x58] sm:$0xf] %v6054_v6  ;;  %v5729_v53 = vsel %vm16018_vm3, %v4972_v19, 0.0  ;;  %v6484_v22 = vrot.slane %v6482_v57, 1  ;;  %12013 = vmatpush3.bf16.msra.mxu1 %v12627_v13 }
 0x2c1   : > { %v6057_v39 = vshrl.u32 %v10951_v46, 16  ;;  %v6060_v1 = vshll.u32 %v10951_v46, 16  ;;  %vm4891_vm1 = vcmp.ge.f32.partialorder %v4855_v52, 0.0  ;;  %v10956_v38 = vpack.c.bf16 %v5729_v53, %v5729_v53  ;;  %12014 = vmatprep.subr.bf16.mxu1 %v12631_v18 }
 0x2c2   : > { %v16081_v11 = vor.u32 %v6082_v14, %v6079_v61  ;;  %v4934_v40 = vmul.f32 %v16037_v63, %v4855_v52  ;;  %vm18451_vm2 = vnez %v18242_v55  ;;  %vm18455_vm4 = vnez %v18248_v3  ;;  %v18461_v55 = vld [vmem:[#allocation50_spill] sm:$0xff] }
 0x2c3   : > { %v18452_v42 = vsel %vm18451_vm2, %v15375_v5, %v15334_v17  ;;  %v18458_v12 = vsel %vm18455_vm4, %v18456_v15, %v18457_v2  ;;  %v6059_v56 = vrot.slane %v6057_v39, 6  ;;  %v6062_v0 = vrot.slane %v6060_v1, 7  ;;  %v4714_v39 = vpop.f32.mrf.mxu0  ;;  %v18470_v2 = vld [vmem:[#allocation93_spill] sm:$0xff]  ;;  %vm18488_vm4 = vmmov %vm18450_vm12 }
 0x2c4   : > { %vm16089_vm7 = vcmp.lt.s32.totalorder %v18452_v42, 16  ;;  %vm16098_vm9 = vcmp.lt.s32.totalorder %v18458_v12, 16  ;;  %v4772_v29 = vadd.f32 %v11893_v44, %v18461_v55  ;;  %v4770_v17 = vadd.f32 %v4701_v16, %v18462_v58  ;;  %v16113_v44 = vld [vmem:[#allocation3 + $0x178] sm:$0xff]   ;;  %12015 = vmatpush3.bf16.msra.mxu1 %v12631_v18  ;;  %v18473_v55 = vld [vmem:[#allocation23_spill] sm:$0xff] }
 0x2c5   : > { %v6084_v3 = vsel %vm18320_vm8, %v6075_v24, %v16081_v11  ;;  %v6085_v5 = vrot.slane %v16081_v11, 4  ;;  %v6107_v50 = vshrl.u32 %v10956_v38, 16  ;;  %v6110_v9 = vshll.u32 %v10956_v38, 16  ;;  %12162 = vmatprep.subr.bf16.mxu0 %v16113_v44  ;;  %12016 = vmatprep.subr.bf16.mxu1 %v12636_v32 }
 0x2c6   : > { %6269 = vst [vmem:[#allocation2 + $0x64] sm:$0xf] %v6084_v3  ;;  %v6063_v13 = vor.u32 %v6062_v0, %v6059_v56  ;;  %v4970_v54 = vsel %vm4891_vm1, %v4855_v52, %v4934_v40  ;;  %v6485_v4 = vsel %vm18463_vm15, %v6480_v34, %v6484_v22  ;;  %v4815_v30 = vmul.f32 %v16030_v41, %v4772_v29  ;;  %v18466_v52 = vld [vmem:[#allocation68_spill] sm:$0xff] }
 0x2c7   : > { %v6109_v10 = vrot.slane %v6107_v50, 6  ;;  %v6112_v7 = vrot.slane %v6110_v9, 7  ;;  %v5727_v24 = vsel %vm16057_vm5, %v4970_v54, 0.0  ;;  %11923 = vmatmul.mubr.bf16.gmra.mxu1 %v6485_v4  ;;  %v4813_v26 = vmul.f32 %v16030_v41, %v4770_v17  ;;  %v18472_v0 = vld [vmem:[#allocation36_spill] sm:$0xff]  ;;  %v12648_v17 = vld [vmem:[#allocation3 + $0x80] sm:$0xff]  }
 0x2c8   : > { %v6064_v60 = vsel %vm18320_vm8, %v6055_v43, %v6063_v13  ;;  %v6065_v37 = vrot.slane %v6063_v13, 4  ;;  %v10954_v33 = vpack.c.bf16 %v5727_v24, %v5727_v24  ;;  %v4858_v34 = vadd.f32 %v16043_v45, %v4815_v30  ;;  %v12642_v43 = vld [vmem:[#allocation3 + $0x88] sm:$0xff]   ;;  %12017 = vmatpush3.bf16.msra.mxu1 %v12636_v32  ;;  %v18477_v32 = vld [vmem:[#allocation17_spill] sm:$0xff] }
 0x2c9   : > { %6267 = vst [vmem:[#allocation2 + $0x5c] sm:$0xf] %v6064_v60  ;;  %v16122_v23 = vor.u32 %v6112_v7, %v6109_v10  ;;  %v4856_v46 = vadd.f32 %v16043_v45, %v4813_v26  ;;  %v4775_v19 = vadd.f32 %v11896_v36, %v18464_v20  ;;  %vm18465_vm3 = vnez %v18260_v59  ;;  %v11897_v36 = vpop.f32.mrf.mxu0  ;;  %v16168_v24 = vld [vmem:[#allocation3 + $0x138] sm:$0xff]  }
 0x2ca   : > { %v18467_v57 = vsel %vm18465_vm3, %v15457_v25, %v18466_v52  ;;  %v6486_v18 = vshrl.u32 %v15831_v49, 16  ;;  %v6074_v61 = vsel %vm18320_vm8, %v6065_v37, %v16008_v47  ;;  %v6087_v14 = vshrl.u32 %v10954_v33, 16  ;;  %12018 = vmatprep.subr.bf16.mxu1 %v12642_v43 }
 0x2cb   : > { %vm16131_vm6 = vcmp.lt.s32.totalorder %v18467_v57, 16  ;;  %v6090_v16 = vshll.u32 %v10954_v33, 16  ;;  %vm4894_vm0 = vcmp.ge.f32.partialorder %v4858_v34, 0.0  ;;  %6268 = vst [vmem:[#allocation2 + $0x60] sm:$0xf] %v6074_v61  ;;  %v6115_v59 = vrot.slane %v16122_v23, 4 }
 0x2cc   : > { %v4937_v25 = vmul.f32 %v16037_v63, %v4858_v34  ;;  %vm4892_vm10 = vcmp.ge.f32.partialorder %v4856_v46, 0.0  ;;  %v4935_v1 = vmul.f32 %v16037_v63, %v4856_v46  ;;  %v6089_v53 = vrot.slane %v6087_v14, 6  ;;  %12019 = vmatpush3.bf16.msra.mxu1 %v12642_v43  ;;  %v4717_v43 = vpop.f32.mrf.mxu0 }
 0x2cd   : > { %v6092_v49 = vrot.slane %v6090_v16, 7  ;;  %v4818_v38 = vmul.f32 %v16030_v41, %v4775_v19  ;;  %v6488_v40 = vor.u32 %v6486_v18, %v6484_v22  ;;  %v6490_v15 = vshll.u32 %v15904_v62, 16  ;;  %12020 = vmatprep.subr.bf16.mxu1 %v12648_v17 }
 0x2ce   : > { %v4973_v42 = vsel %vm4894_vm0, %v4858_v34, %v4937_v25  ;;  %v4971_v47 = vsel %vm4892_vm10, %v4856_v46, %v4935_v1  ;;  %v4773_v12 = vadd.f32 %v4714_v39, %v18470_v2  ;;  %v18474_v29 = vsel %vm15541_vm13, %v18472_v0, %v18473_v55  ;;  %v18485_v2 = vld [vmem:[#allocation31_spill] sm:$0xff]  ;;  %v11900_v58 = vpop.f32.mrf.mxu0 }
 0x2cf   : > { %vm16150_vm14 = vcmp.lt.s32.totalorder %v18474_v29, 16  ;;  %v6093_v3 = vor.u32 %v6092_v49, %v6089_v53  ;;  %v5730_v22 = vsel %vm16089_vm7, %v4973_v42, 0.0  ;;  %v5728_v50 = vsel %vm16098_vm9, %v4971_v47, 0.0  ;;  %v18479_v49 = vld [vmem:[#allocation51_spill] sm:$0xff]  ;;  %v18484_v47 = vld [vmem:[#allocation34_spill] sm:$0xff] }
 0x2d0   : > { %v4861_v9 = vadd.f32 %v16043_v45, %v4818_v38  ;;  %vm5444_vm5 = vcmp.ne.s32.totalorder %v18477_v32, 0  ;;  %v10957_v13 = vpack.c.bf16 %v5730_v22, %v5730_v22  ;;  %v10955_v54 = vpack.c.bf16 %v5728_v50, %v5728_v50  ;;  %v16166_v7 = vld [vmem:[#allocation2 + $0x58] sm:$0xff]   ;;  %12021 = vmatpush3.bf16.msra.mxu1 %v12648_v17 }
 0x2d1   : > { %v6492_v4 = vrot.slane %v6490_v15, 1  ;;  %v4816_v30 = vmul.f32 %v16030_v41, %v4773_v12  ;;  %v6094_v10 = vsel %vm18320_vm8, %v6085_v5, %v6093_v3  ;;  %v6095_v31 = vrot.slane %v6093_v3, 4  ;;  %11991 = vmatmul.mubr.bf16.gmra.mxu0 %v16166_v7  ;;  %v18480_v38 = vld [vmem:[#allocation24_spill] sm:$0xff]  ;;  %12110 = vmatprep.subr.bf16.mxu1 %v16168_v24 }
 0x2d2   : > { %vm4897_vm13 = vcmp.ge.f32.partialorder %v4861_v9, 0.0  ;;  %v4940_v8 = vmul.f32 %v16037_v63, %v4861_v9  ;;  %6270 = vst [vmem:[#allocation2 + $0x68] sm:$0xf] %v6094_v10  ;;  %v6117_v26 = vshrl.u32 %v10957_v13, 16  ;;  %v6120_v60 = vshll.u32 %v10957_v13, 16  ;;  %v16174_v20 = vld [vmem:[#allocation2 + $0x60] sm:$0xff]  }
 0x2d3   : > { %v6097_v37 = vshrl.u32 %v10955_v54, 16  ;;  %v6100_v33 = vshll.u32 %v10955_v54, 16  ;;  %v6493_v11 = vsel %vm18450_vm12, %v6488_v40, %v6492_v4  ;;  %v4859_v5 = vadd.f32 %v16043_v45, %v4816_v30  ;;  %11994 = vmatprep.mubr.bf16.mxu0 %v16174_v20 }
 0x2d4   : > { %v4976_v34 = vsel %vm4897_vm13, %v4861_v9, %v4940_v8  ;;  %v6494_v46 = vshrl.u32 %v15904_v62, 16  ;;  %v6119_v19 = vrot.slane %v6117_v26, 6  ;;  %v6122_v52 = vrot.slane %v6120_v60, 7  ;;  %11926 = vmatprep.mubr.bf16.mxu1 %v6493_v11 }
 0x2d5   : > { %v6099_v57 = vrot.slane %v6097_v37, 6  ;;  %v6102_v18 = vrot.slane %v6100_v33, 7  ;;  %v5733_v61 = vsel %vm16131_vm6, %v4976_v34, 0.0  ;;  %vm4895_vm1 = vcmp.ge.f32.partialorder %v4859_v5, 0.0  ;;  %v18489_v34 = vld [vmem:[#allocation41_spill] sm:$0xff] }
 0x2d6   : > { %v4938_v14 = vmul.f32 %v16037_v63, %v4859_v5  ;;  %v6496_v16 = vor.u32 %v6494_v46, %v6492_v4  ;;  %v6123_v62 = vor.u32 %v6122_v52, %v6119_v19  ;;  %v10960_v25 = vpack.c.bf16 %v5733_v61, %v5733_v61 }
 0x2d7   : > { %v6103_v39 = vor.u32 %v6102_v18, %v6099_v57  ;;  %v6498_v1 = vshll.u32 %v15913_v51, 16  ;;  %v18481_v40 = vsel %vm15564_vm11, %v18479_v49, %v18480_v38  ;;  %v4776_v15 = vadd.f32 %v11897_v36, %v18484_v47  ;;  %v4730_v49 = vpop.f32.mrf.mxu0 }
 0x2d8   : > { %vm16186_vm2 = vcmp.lt.s32.totalorder %v18481_v40, 16  ;;  %v4974_v42 = vsel %vm4895_vm1, %v4859_v5, %v4938_v14  ;;  %v4774_v12 = vadd.f32 %v4717_v43, %v18485_v2  ;;  %vm5480_vm7 = vcmp.lt.s32.totalorder %v18477_v32, 0  ;;  %v18490_v5 = vld [vmem:[#allocation37_spill] sm:$0xff]  ;;  %vm18497_vm1 = vmmov %vm18488_vm4 }
 0x2d9   : > { %v6124_v56 = vsel %vm18320_vm8, %v6115_v59, %v6123_v62  ;;  %v6125_v0 = vrot.slane %v6123_v62, 4  ;;  %v6104_v55 = vsel %vm18320_vm8, %v6095_v31, %v6103_v39  ;;  %v6105_v29 = vrot.slane %v6103_v39, 4  ;;  %vm16211_vm11 = vmand %vm5480_vm7, %vm5444_vm5 }
 0x2da   : > { %6273 = vst [vmem:[#allocation2 + $0x74] sm:$0xf] %v6124_v56  ;;  %6271 = vst [vmem:[#allocation2 + $0x6c] sm:$0xf] %v6104_v55  ;;  %v6147_v17 = vshrl.u32 %v10960_v25, 16  ;;  %v6150_v3 = vshll.u32 %v10960_v25, 16  ;;  %v4819_v59 = vmul.f32 %v16030_v41, %v4776_v15  ;;  %v4817_v54 = vmul.f32 %v16030_v41, %v4774_v12 }
 0x2db   : > { %v5731_v22 = vsel %vm16150_vm14, %v4974_v42, 0.0  ;;  %v6500_v50 = vrot.slane %v6498_v1, 1  ;;  %v6114_v9 = vsel %vm18320_vm8, %v6105_v29, %v16122_v23  ;;  %v5552_v23 = vadd.s32 18, %v18477_v32  ;;  %v18491_v12 = vld [vmem:[#allocation91_spill] sm:$0xff]  ;;  %vm18493_vm5 = vmmov %vm18488_vm4 }
 0x2dc   : > { %v10958_v13 = vpack.c.bf16 %v5731_v22, %v5731_v22  ;;  %6272 = vst [vmem:[#allocation2 + $0x70] sm:$0xf] %v6114_v9  ;;  %v6149_v30 = vrot.slane %v6147_v17, 6  ;;  %v6152_v36 = vrot.slane %v6150_v3, 7  ;;  %v4862_v26 = vadd.f32 %v16043_v45, %v4819_v59  ;;  %v18492_v3 = vld [vmem:[#allocation32_spill] sm:$0xff] }
 0x2dd   : > { %v6501_v10 = vsel %vm18488_vm4, %v6496_v16, %v6500_v50  ;;  %v4860_v60 = vadd.f32 %v16043_v45, %v4817_v54  ;;  %v5588_v33 = vsel %vm16211_vm11, %v5552_v23, %v18477_v32  ;;  %v4779_v11 = vadd.f32 %v11900_v58, %v18489_v34 }
 0x2de   : > { %v6127_v31 = vshrl.u32 %v10958_v13, 16  ;;  %v6130_v8 = vshll.u32 %v10958_v13, 16  ;;  %11927 = vmatmul.mubr.bf16.gmra.mxu1 %v6501_v10  ;;  %v16219_v37 = vor.u32 %v6152_v36, %v6149_v30  ;;  %v5399_v46 = vshrl.u32 %v18490_v5, 4 }
 0x2df   : > { %vm4898_vm9 = vcmp.ge.f32.partialorder %v4862_v26, 0.0  ;;  %v4941_v57 = vmul.f32 %v16037_v63, %v4862_v26  ;;  %vm4896_vm15 = vcmp.ge.f32.partialorder %v4860_v60, 0.0  ;;  %v4939_v43 = vmul.f32 %v16037_v63, %v4860_v60 }
 0x2e0   : > { %v6129_v19 = vrot.slane %v6127_v31, 6  ;;  %v6132_v52 = vrot.slane %v6130_v8, 7  ;;  %v6155_v18 = vrot.slane %v16219_v37, 4  ;;  %vm5624_vm3 = vcmp.lt.s32.totalorder %v5588_v33, 16  ;;  %v18494_v8 = vld [vmem:[#allocation11_spill] sm:$0xff] }
 0x2e1   : > { %v4977_v14 = vsel %vm4898_vm9, %v4862_v26, %v4941_v57  ;;  %v4822_v16 = vmul.f32 %v16030_v41, %v4779_v11  ;;  %v5400_v32 = vmul.u32 18, %v5399_v46  ;;  %v16230_v62 = vld [vmem:[#allocation2 + $0x68] sm:$0xff]   ;;  %v4975_v25 = vsel %vm4896_vm15, %v4860_v60, %v4939_v43  ;;  %v11901_v60 = vpop.f32.mrf.mxu0  ;;  %vm18498_vm15 = vmmov %vm18497_vm1 }
 0x2e2   : > { %v6133_v61 = vor.u32 %v6132_v52, %v6129_v19  ;;  %v5734_v39 = vsel %vm16186_vm2, %v4977_v14, 0.0  ;;  %v6502_v1 = vshrl.u32 %v15913_v51, 16  ;;  %v6506_v53 = vshll.u32 %v15965_v27, 16  ;;  %11995 = vmatmul.mubr.bf16.gmra.mxu0 %v16230_v62  ;;  %v18495_v19 = vld [vmem:[#allocation8_spill] sm:$0xff] }
 0x2e3   : > { %v10961_v42 = vpack.c.bf16 %v5734_v39, %v5734_v39  ;;  %v5732_v47 = vsel %vm5624_vm3, %v4975_v25, 0.0  ;;  %v16239_v15 = vld [vmem:[#allocation2 + $0x70] sm:$0xff]   ;;  %v4865_v6 = vadd.f32 %v16043_v45, %v4822_v16  ;;  %v5401_v56 = vsub.s32 %v18491_v12, %v5400_v32 }
 0x2e4   : > { %v6134_v38 = vsel %vm18320_vm8, %v6125_v0, %v6133_v61  ;;  %v6135_v40 = vrot.slane %v6133_v61, 4  ;;  %v10959_v2 = vpack.c.bf16 %v5732_v47, %v5732_v47  ;;  %v6504_v51 = vor.u32 %v6502_v1, %v6500_v50  ;;  %11998 = vmatprep.mubr.bf16.mxu0 %v16239_v15  ;;  %v11849_v0 = vpop.f32.mrf.mxu1  ;;  %v18496_v39 = vld [vmem:[#allocation39_spill] sm:$0xff] }
 0x2e5   : > { %6274 = vst [vmem:[#allocation2 + $0x78] sm:$0xf] %v6134_v38  ;;  %v6157_v55 = vshrl.u32 %v10961_v42, 16  ;;  %v6160_v29 = vshll.u32 %v10961_v42, 16  ;;  %v6508_v17 = vrot.slane %v6506_v53, 1  ;;  %v4777_v22 = vadd.f32 %v4730_v49, %v18492_v3  ;;  %v4733_v49 = vpop.f32.mrf.mxu0 }
 0x2e6   : > { %v6137_v9 = vshrl.u32 %v10959_v2, 16  ;;  %v6140_v13 = vshll.u32 %v10959_v2, 16  ;;  %vm4901_vm6 = vcmp.ge.f32.partialorder %v4865_v6, 0.0  ;;  %v4944_v59 = vmul.f32 %v16037_v63, %v4865_v6  ;;  %v4395_v33 = vpop.f32.mrf.mxu1 }
 0x2e7   : > { %v6159_v54 = vrot.slane %v6157_v55, 6  ;;  %v6162_v4 = vrot.slane %v6160_v29, 7  ;;  %vm5449_vm0 = vcmp.ne.s32.totalorder %v5401_v56, 0  ;;  %vm5485_vm10 = vcmp.lt.s32.totalorder %v5401_v56, 0 }
 0x2e8   : > { %v6139_v58 = vrot.slane %v6137_v9, 6  ;;  %v6142_v30 = vrot.slane %v6140_v13, 7  ;;  %v4980_v50 = vsel %vm4901_vm6, %v4865_v6, %v4944_v59  ;;  %vm5521_vm14 = vmand %vm5485_vm10, %vm5449_vm0  ;;  %v5557_v36 = vadd.s32 18, %v5401_v56 }
 0x2e9   : > { %v16246_v10 = vor.u32 %v6162_v4, %v6159_v54  ;;  %v6509_v23 = vsel %vm18493_vm5, %v6504_v51, %v6508_v17  ;;  %v4820_v31 = vmul.f32 %v16030_v41, %v4777_v22  ;;  %v5015_v26 = vadd.s32 256, %v18494_v8 }
 0x2ea   : > { %v6143_v34 = vor.u32 %v6142_v30, %v6139_v58  ;;  %v5593_v11 = vsel %vm5521_vm14, %v5557_v36, %v5401_v56  ;;  %11930 = vmatprep.mubr.bf16.mxu1 %v6509_v23  ;;  %v6510_v5 = vshrl.u32 %v15965_v27, 16  ;;  %v6514_v46 = vshll.u32 %v15983_v21, 16 }
 0x2eb   : > { %v4442_v52 = vadd.f32 %v11849_v0, %v18495_v19  ;;  %v6164_v57 = vsel %vm18320_vm8, %v6155_v18, %v16246_v10  ;;  %vm5629_vm13 = vcmp.lt.s32.totalorder %v5593_v11, 16  ;;  %v4863_v43 = vadd.f32 %v16043_v45, %v4820_v31 }
 0x2ec   : > { %6277 = vst [vmem:[#allocation2 + $0x84] sm:$0xf] %v6164_v57  ;;  %v6144_v61 = vsel %vm18320_vm8, %v6135_v40, %v6143_v34  ;;  %v6145_v14 = vrot.slane %v6143_v34, 4  ;;  %v5737_v16 = vsel %vm5629_vm13, %v4980_v50, 0.0  ;;  %v6512_v32 = vor.u32 %v6510_v5, %v6508_v17 }
 0x2ed   : > { %v4440_v27 = vadd.f32 %v4395_v33, %v18496_v39  ;;  %v6165_v25 = vrot.slane %v16246_v10, 4  ;;  %6275 = vst [vmem:[#allocation2 + $0x7c] sm:$0xf] %v6144_v61  ;;  %v10964_v1 = vpack.c.bf16 %v5737_v16, %v5737_v16  ;;  %v6516_v53 = vrot.slane %v6514_v46, 1 }
 0x2ee   : > { %v6154_v18 = vsel %vm18320_vm8, %v6145_v14, %v16219_v37  ;;  %v16265_v38 = vmul.u32.u64.low 3817748708, %v5015_v26  ;;  %v16266_v42 = vmul.u32.u64.high 3817748708, %v5015_v26, %v16265_v38  ;;  %v4780_v47 = vadd.f32 %v11901_v60, %v4442_v52 }
 0x2ef   : > { %6276 = vst [vmem:[#allocation2 + $0x80] sm:$0xf] %v6154_v18  ;;  %v6187_v40 = vshrl.u32 %v10964_v1, 16  ;;  %v6190_v2 = vshll.u32 %v10964_v1, 16  ;;  %vm4899_vm12 = vcmp.ge.f32.partialorder %v4863_v43, 0.0  ;;  %v6517_v6 = vsel %vm18497_vm1, %v6512_v32, %v6516_v53 }
 0x2f0   : > { %v4942_v12 = vmul.f32 %v16037_v63, %v4863_v43  ;;  %11931 = vmatmul.mubr.bf16.gmra.mxu1 %v6517_v6  ;;  %v4823_v56 = vmul.f32 %v16030_v41, %v4780_v47  ;;  %v5018_v51 = vadd.s32 280, %v18494_v8  ;;  %v4778_v55 = vadd.f32 %v4733_v49, %v4440_v27 }
 0x2f1   : > { %v6189_v29 = vrot.slane %v6187_v40, 6  ;;  %v6192_v37 = vrot.slane %v6190_v2, 7  ;;  %v5016_v17 = vadd.s32 264, %v18494_v8  ;;  %v6518_v3 = vshrl.u32 %v15983_v21, 16 }
 0x2f2   : > { %v5377_v22 = vshrl.u32 %v16266_v42, 4  ;;  %v4866_v0 = vadd.f32 %v16043_v45, %v4823_v56  ;;  %v16276_v9 = vmul.u32.u64.low 3817748708, %v5018_v51  ;;  %v16277_v13 = vmul.u32.u64.high 3817748708, %v5018_v51, %v16276_v9 }
 0x2f3   : > { %v4821_v59 = vmul.f32 %v16030_v41, %v4778_v55  ;;  %v16280_v54 = vmul.u32.u64.low 3817748708, %v5016_v17  ;;  %v16281_v4 = vmul.u32.u64.high 3817748708, %v5016_v17, %v16280_v54  ;;  %v16283_v58 = vor.u32 %v6192_v37, %v6189_v29 }
 0x2f4   : > { %v4978_v30 = vsel %vm4899_vm12, %v4863_v43, %v4942_v12  ;;  %v5378_v50 = vmul.u32 18, %v5377_v22  ;;  %vm4902_vm2 = vcmp.ge.f32.partialorder %v4866_v0, 0.0  ;;  %v16286_v36 = vld [vmem:[#allocation2 + $0x78] sm:$0xff]   ;;  %v4945_v21 = vmul.f32 %v16037_v63, %v4866_v0 }
 0x2f5   : > { %v4864_v23 = vadd.f32 %v16043_v45, %v4821_v59  ;;  %v6520_v31 = vor.u32 %v6518_v3, %v6516_v53  ;;  %v6522_v8 = vshll.u32 %v16061_v35, 16  ;;  %v5410_v41 = vshrl.u32 %v16277_v13, 4  ;;  %11999 = vmatmul.mubr.bf16.gmra.mxu0 %v16286_v36 }
 0x2f6   : > { %v5379_v60 = vsub.s32 %v5015_v26, %v5378_v50  ;;  %v6526_v33 = vshrl.u32 %v16061_v35, 16  ;;  %v6530_v34 = vshll.u32 %v16067_v28, 16  ;;  %v16295_v11 = vld [vmem:[#allocation2 + $0x80] sm:$0xff]   ;;  %v5388_v46 = vshrl.u32 %v16281_v4, 4 }
 0x2f7   : > { %vm4900_vm7 = vcmp.ge.f32.partialorder %v4864_v23, 0.0  ;;  %v4943_v5 = vmul.f32 %v16037_v63, %v4864_v23  ;;  %v6524_v45 = vrot.slane %v6522_v8, 1  ;;  %v5411_v26 = vmul.u32 18, %v5410_v41  ;;  %12002 = vmatprep.mubr.bf16.mxu0 %v16295_v11 }
 0x2f8   : > { %vm5447_vm11 = vcmp.ne.s32.totalorder %v5379_v60, 0  ;;  %vm5483_vm4 = vcmp.lt.s32.totalorder %v5379_v60, 0  ;;  %v5555_v19 = vadd.s32 18, %v5379_v60  ;;  %v4981_v35 = vsel %vm4902_vm2, %v4866_v0, %v4945_v21 }
 0x2f9   : > { %vm5519_vm9 = vmand %vm5483_vm4, %vm5447_vm11  ;;  %v4979_v52 = vsel %vm4900_vm7, %v4864_v23, %v4943_v5  ;;  %v5389_v57 = vmul.u32 18, %v5388_v46  ;;  %v6525_v43 = vsel %vm18498_vm15, %v6520_v31, %v6524_v45  ;;  %v5412_v14 = vsub.s32 %v5018_v51, %v5411_v26  ;;  %v6284_v26 = vld [vmem:[#allocation2 + $0x98] sm:$0x3] }
 0x2fa   : > { %v5591_v61 = vsel %vm5519_vm9, %v5555_v19, %v5379_v60  ;;  %11934 = vmatprep.mubr.bf16.mxu1 %v6525_v43  ;;  %v6528_v63 = vor.u32 %v6526_v33, %v6524_v45  ;;  %v6532_v16 = vrot.slane %v6530_v34, 1  ;;  %v6534_v39 = vshrl.u32 %v16067_v28, 16  ;;  %vm18499_vm11 = vmmov %vm18497_vm1 }
 0x2fb   : > { %vm5627_vm3 = vcmp.lt.s32.totalorder %v5591_v61, 16  ;;  %v5390_v32 = vsub.s32 %v5016_v17, %v5389_v57  ;;  %v6538_v27 = vshll.u32 %v16166_v7, 16  ;;  %vm5450_vm6 = vcmp.ne.s32.totalorder %v5412_v14, 0  ;;  %vm18500_vm4 = vmmov %vm18497_vm1  ;;  %v16326_v61 = vld [vmem:[#allocation2 + $0xc] sm:$0xf] }
 0x2fc   : > { %v5735_v1 = vsel %vm5627_vm3, %v4978_v30, 0.0  ;;  %vm5486_vm0 = vcmp.lt.s32.totalorder %v5412_v14, 0  ;;  %v5558_v53 = vadd.s32 18, %v5412_v14  ;;  %vm6282_vm14 = vcmask 1041408   ;;  %vm18504_vm3 = vmmov %vm18497_vm1 }
 0x2fd   : > { %v10962_v49 = vpack.c.bf16 %v5735_v1, %v5735_v1  ;;  %vm5522_vm10 = vmand %vm5486_vm0, %vm5450_vm6  ;;  %vm5448_vm5 = vcmp.ne.s32.totalorder %v5390_v32, 0  ;;  %vm5484_vm13 = vcmp.lt.s32.totalorder %v5390_v32, 0  ;;  %v5556_v18 = vadd.s32 18, %v5390_v32 }
 0x2fe   : > { %v5594_v38 = vsel %vm5522_vm10, %v5558_v53, %v5412_v14  ;;  %vm5520_vm12 = vmand %vm5484_vm13, %vm5448_vm5  ;;  %v6533_v42 = vsel %vm18497_vm1, %v6528_v63, %v6532_v16  ;;  %v6536_v47 = vor.u32 %v6534_v39, %v6532_v16  ;;  %v6540_v40 = vrot.slane %v6538_v27, 1  ;;  %v7084_v14 = vld [vmem:[#allocation2] sm:$0xe] }
 0x2ff   : > { %v6167_v2 = vshrl.u32 %v10962_v49, 16  ;;  %v6170_v28 = vshll.u32 %v10962_v49, 16  ;;  %vm5630_vm2 = vcmp.lt.s32.totalorder %v5594_v38, 16  ;;  %v5592_v6 = vsel %vm5520_vm12, %v5556_v18, %v5390_v32  ;;  %11935 = vmatmul.mubr.bf16.gmra.mxu1 %v6533_v42  ;;  %v7421_v18 = vld [vmem:[#allocation2 + $0x8] sm:$0xe]  ;;  %vm18505_vm6 = vmmov %vm18497_vm1 }
 0x300   : > { %v5738_v12 = vsel %vm5630_vm2, %v4981_v35, 0.0  ;;  %vm5628_vm7 = vcmp.lt.s32.totalorder %v5592_v6, 16  ;;  %v6541_v56 = vsel %vm18499_vm11, %v6536_v47, %v6540_v40  ;;  %v6542_v51 = vshrl.u32 %v16166_v7, 16  ;;  %vm18506_vm0 = vmmov %vm18497_vm1 }
 0x301   : > { %v6169_v55 = vrot.slane %v6167_v2, 6  ;;  %v6172_v29 = vrot.slane %v6170_v28, 7  ;;  %v10965_v37 = vpack.c.bf16 %v5738_v12, %v5738_v12  ;;  %v5736_v17 = vsel %vm5628_vm7, %v4979_v52, 0.0  ;;  %11938 = vmatprep.mubr.bf16.mxu1 %v6541_v56  ;;  %v12745_v2 = vld [vmem:[#allocation2 + $0x4] sm:$0xf]  ;;  %v16345_v56 = vld [vmem:[#allocation2 + $0x18] sm:$0xff]   ;;  %vm18514_vm7 = vmmov %vm18506_vm0 }
 0x302   : > { %v10963_v3 = vpack.c.bf16 %v5736_v17, %v5736_v17  ;;  %v6544_v22 = vor.u32 %v6542_v51, %v6540_v40  ;;  %v6546_v0 = vshll.u32 %v16174_v20, 16  ;;  %v6554_v9 = vshll.u32 %v16230_v62, 16  ;;  %v16339_v40 = vld [vmem:[#allocation2 + $0x10] sm:$0xff]   ;;  %v16347_v51 = vld [vmem:[#allocation2 + $0x20] sm:$0xff]  }
 0x303   : > { %v6173_v13 = vor.u32 %v6172_v29, %v6169_v55  ;;  %v6197_v59 = vshrl.u32 %v10965_v37, 16  ;;  %v6200_v54 = vshll.u32 %v10965_v37, 16  ;;  %v6550_v4 = vshrl.u32 %v16174_v20, 16 }
 0x304   : > { %v6177_v30 = vshrl.u32 %v10963_v3, 16  ;;  %v6180_v50 = vshll.u32 %v10963_v3, 16  ;;  %v6548_v21 = vrot.slane %v6546_v0, 1  ;;  %v6556_v23 = vrot.slane %v6554_v9, 1  ;;  %v12746_v0 = vld [vmem:[#allocation2 + $0x8] sm:$0xff]  }
 0x305   : > { %v6174_v31 = vsel %vm18320_vm8, %v6165_v25, %v6173_v13  ;;  %v6199_v8 = vrot.slane %v6197_v59, 6  ;;  %v6202_v60 = vrot.slane %v6200_v54, 7  ;;  %v6558_v41 = vshrl.u32 %v16230_v62, 16  ;;  %v16356_v54 = vld [vmem:[#allocation2 + $0x28] sm:$0xff]  }
 0x306   : > { %6278 = vst [vmem:[#allocation2 + $0x88] sm:$0xf] %v6174_v31  ;;  %v6179_v33 = vrot.slane %v6177_v30, 6  ;;  %v6182_v34 = vrot.slane %v6180_v50, 7  ;;  %v6549_v5 = vsel %vm18500_vm4, %v6544_v22, %v6548_v21  ;;  %v6552_v46 = vor.u32 %v6550_v4, %v6548_v21  ;;  %v16358_v4 = vld [vmem:[#allocation2 + $0x30] sm:$0xff]   ;;  %v12748_v21 = vld [vmem:[#allocation2 + $0x18] sm:$0xff]  }
 0x307   : > { %v6195_v20 = vrot.slane %v16283_v58, 4  ;;  %v6175_v45 = vrot.slane %v6173_v13, 4  ;;  %v6203_v19 = vor.u32 %v6202_v60, %v6199_v8  ;;  %11939 = vmatmul.mubr.bf16.gmra.mxu1 %v6549_v5  ;;  %v6562_v10 = vshll.u32 %v16239_v15, 16  ;;  %v12747_v30 = vld [vmem:[#allocation2 + $0x10] sm:$0xff]   ;;  %v16360_v31 = vld [vmem:[#allocation2 + $0x38] sm:$0xff]   ;;  %v16364_v60 = vld [vmem:[#allocation2 + $0x40] sm:$0xff]  }
 0x308   : > { %vm18501_vm9 = vsmask.f32 1280  ;;  %v6183_v35 = vor.u32 %v6182_v34, %v6179_v33  ;;  %v6557_v52 = vsel %vm18504_vm3, %v6552_v46, %v6556_v23  ;;  %v6560_v57 = vor.u32 %v6558_v41, %v6556_v23  ;;  %v16368_v5 = vld [vmem:[#allocation2 + $0x48] sm:$0xff]  }
 0x309   : > { %vm16320_vm15 = vmand %vm6282_vm14, %vm18501_vm9  ;;  %v6570_v43 = vshll.u32 %v16286_v36, 16  ;;  %v6204_v63 = vsel %vm18320_vm8, %v6195_v20, %v6203_v19  ;;  %v6205_v16 = vrot.slane %v6203_v19, 4  ;;  %11942 = vmatprep.mubr.bf16.mxu1 %v6557_v52  ;;  %v6564_v32 = vrot.slane %v6562_v10, 1 }
 0x30a   : > { %v6566_v39 = vshrl.u32 %v16239_v15, 16  ;;  %6281 = vst [vmem:[#allocation2 + $0x94] sm:$0xf] %v6204_v63  ;;  %v6184_v27 = vsel %vm18320_vm8, %v6175_v45, %v6183_v35  ;;  %v6185_v1 = vrot.slane %v6183_v35, 4  ;;  %v6578_v49 = vshll.u32 %v16295_v11, 16 }
 0x30b   : > { %v6572_v53 = vrot.slane %v6570_v43, 1  ;;  %v6285_v38 = vsel %vm16320_vm15, %v6205_v16, %v6284_v26  ;;  %6279 = vst [vmem:[#allocation2 + $0x8c] sm:$0xf] %v6184_v27  ;;  %v16337_v47 = vcombine.low %v7421_v18, %v16326_v61  ;;  %v10722_v28 = vcombine.low %v7084_v14, %v12745_v2  ;;  %v16389_v43 = vld [vmem:[#allocation2 + $0x58] sm:$0xff]   ;;  %v12750_v27 = vld [vmem:[#allocation2 + $0x28] sm:$0xff]   ;;  %v12751_v18 = vld [vmem:[#allocation2 + $0x30] sm:$0xff]  }
 0x30c   : > { %v6568_v42 = vor.u32 %v6566_v39, %v6564_v32  ;;  %6286 = vst [vmem:[#allocation2 + $0x98] sm:$0x3] %v6285_v38  ;;  %v6194_v6 = vsel %vm18320_vm8, %v6185_v1, %v16283_v58  ;;  %v6565_v12 = vsel %vm18505_vm6, %v6560_v57, %v6564_v32  ;;  %v6574_v29 = vshrl.u32 %v16286_v36, 16  ;;  %vm18507_vm8 = vmmov %vm18506_vm0  ;;  %v16387_v57 = vld [vmem:[#allocation2 + $0x50] sm:$0xff]   ;;  %v12749_v32 = vld [vmem:[#allocation2 + $0x20] sm:$0xff]  }
 0x30d   : > { %6280 = vst [vmem:[#allocation2 + $0x90] sm:$0xf] %v6194_v6  ;;  %v6580_v37 = vrot.slane %v6578_v49, 1  ;;  %v7568_v3 = vrot.slane %v16337_v47, 1  ;;  %v7569_v22 = vrot.slane %v16339_v40, 1  ;;  %v6582_v48 = vshrl.u32 %v16295_v11, 16 }
 0x30e   : > { %v6573_v55 = vsel %vm18506_vm0, %v6568_v42, %v6572_v53  ;;  %v6576_v17 = vor.u32 %v6574_v29, %v6572_v53  ;;  %v7105_v58 = vrot.slane %v10722_v28, 1  ;;  %v7106_v9 = vrot.slane %v12746_v0, 1  ;;  %v16395_v42 = vld [vmem:[#allocation2 + $0x60] sm:$0xff]   ;;  %v16407_v0 = vld [vmem:[#allocation2 + $0x48] sm:$0xff]  }
 0x30f   : > { %11943 = vmatmul.mubr.bf16.gmra.mxu1 %v6565_v12  ;;  %v7571_v13 = vrot.slane %v16345_v56, 1  ;;  %v7573_v59 = vrot.slane %v16347_v51, 1  ;;  %v7108_v50 = vrot.slane %v12747_v30, 1  ;;  %v7110_v23 = vrot.slane %v12748_v21, 1  ;;  %v12752_v12 = vld [vmem:[#allocation2 + $0x38] sm:$0xff]  }
 0x310   : > { %11946 = vmatprep.mubr.bf16.mxu1 %v6573_v55  ;;  %v6581_v41 = vsel %vm18507_vm8, %v6576_v17, %v6580_v37  ;;  %vm18508_vm10 = vcmask 1046528   ;;  %v6584_v34 = vor.u32 %v6582_v48, %v6580_v37  ;;  %v7575_v35 = vrot.slane %v16356_v54, 1  ;;  %v12753_v48 = vld [vmem:[#allocation2 + $0x40] sm:$0xff]  }
 0x311   : > { %v7570_v33 = vsel %vm18508_vm10, %v7568_v3, %v7569_v22  ;;  %vm18509_vm5 = vmmov %vm18508_vm10  ;;  %v7577_v52 = vrot.slane %v16358_v4, 1  ;;  %v7112_v39 = vrot.slane %v12749_v32, 1  ;;  %v7114_v1 = vrot.slane %v12750_v27, 1  ;;  %v12668_v30 = vld [vmem:[#allocation3 + $0x170] sm:$0xff]   ;;  %v12670_v27 = vld [vmem:[#allocation3 + $0x168] sm:$0xff]  }
 0x312   : > { %v16362_v8 = vld [vmem:[#allocation2 + $0x88] sm:$0xff]   ;;  %v16375_v45 = vsel %vm18509_vm5, %v7105_v58, %v7106_v9  ;;  %vm18510_vm13 = vmmov %vm18509_vm5  ;;  %v7579_v53 = vrot.slane %v16360_v31, 1  ;;  %v7581_v49 = vrot.slane %v16364_v60, 1  ;;  %v7116_v38 = vrot.slane %v12751_v18, 1  ;;  %v16467_v18 = vld [vmem:[#allocation2 + $0x50] sm:$0xff]  }
 0x313   : > { %12003 = vmatmul.mubr.bf16.gmra.mxu0 %v16362_v8  ;;  %v6586_v46 = vshll.u32 %v16362_v8, 16  ;;  %v7572_v19 = vsel %vm18510_vm13, %v7569_v22, %v7571_v13  ;;  %vm18511_vm12 = vmmov %vm18509_vm5  ;;  %v6590_v63 = vshrl.u32 %v16362_v8, 16  ;;  %v7118_v55 = vrot.slane %v12752_v12, 1 }
 0x314   : > { %v16372_v20 = vld [vmem:[#allocation2 + $0x90] ss:$0 sps:$4 sm:$0x11]   ;;  %v7574_v10 = vsel %vm18511_vm12, %v7571_v13, %v7573_v59  ;;  %12074 = vmatprep.mubr.bf16.mxu0 %v7570_v33  ;;  %vm18512_vm1 = vmmov %vm18509_vm5  ;;  %v7583_v17 = vrot.slane %v16368_v5, 1  ;;  %v7585_v3 = vrot.slane %v16387_v57, 1  ;;  %v7120_v58 = vrot.slane %v12753_v48, 1 }
 0x315   : > { %v16380_v25 = vsel %vm18512_vm1, %v7106_v9, %v7108_v50  ;;  %vm18513_vm2 = vmmov %vm18512_vm1  ;;  %v6588_v14 = vrot.slane %v6586_v46, 1  ;;  %v6594_v16 = vshll.u32 %v16372_v20, 16  ;;  %v17923_v9 = vrot.slane %v16407_v0, 1 }
 0x316   : > { %v16383_v26 = vsel %vm18513_vm2, %v7108_v50, %v7110_v23  ;;  %vm18515_vm11 = vmmov %vm18512_vm1  ;;  %v7587_v13 = vrot.slane %v16389_v43, 1  ;;  %v7909_v48 = vshll.u32 %v16337_v47, 16 }
 0x317   : > { %11947 = vmatmul.mubr.bf16.gmra.mxu1 %v6581_v41  ;;  %v6589_v2 = vsel %vm18514_vm7, %v6584_v34, %v6588_v14  ;;  %v6592_v28 = vor.u32 %v6590_v63, %v6588_v14  ;;  %v6596_v6 = vrot.slane %v6594_v16, 1  ;;  %v7576_v29 = vsel %vm18515_vm11, %v7573_v59, %v7575_v35  ;;  %vm18516_vm4 = vmmov %vm18512_vm1  ;;  %v8354_v41 = vld [vmem:[#allocation2 + $0x8] sm:$0xc] }
 0x318   : > { %11950 = vmatprep.mubr.bf16.mxu1 %v6589_v2  ;;  %v16400_v37 = vsel %vm18516_vm4, %v7575_v35, %v7577_v52  ;;  %vm18517_vm9 = vmmov %vm18512_vm1  ;;  %v10767_v35 = vcombine.low %v8354_v41, %v16326_v61  ;;  %v16435_v63 = vld [vmem:[#allocation2 + $0x68] sm:$0xff]   ;;  %v7132_v16 = vrot.slane %v16239_v15, 1  ;;  %v16446_v61 = vsel %vm18512_vm1, %v7120_v58, %v17923_v9 }
 0x319   : > { %v16405_v22 = vsel %vm18517_vm9, %v7110_v23, %v7112_v39  ;;  %vm18518_vm15 = vmmov %vm18512_vm1  ;;  %v17924_v23 = vrot.slane %v16395_v42, 1  ;;  %v6597_v33 = vsel %vm18506_vm0, %v6592_v28, %v6596_v6  ;;  %v8378_v41 = vrot.slane %v16345_v56, 2  ;;  %v16610_v9 = vld [vmem:[#allocation2 + $0x88] sm:$0xff]  }
 0x31a   : > { %v16412_v59 = vsel %vm18518_vm15, %v7112_v39, %v7114_v1  ;;  %vm18519_vm3 = vmmov %vm18512_vm1  ;;  %v16451_v39 = vld [vmem:[#allocation2 + $0x70] sm:$0xff]   ;;  %v8375_v28 = vrot.slane %v10767_v35, 2  ;;  %v16644_v6 = vld [vmem:[#allocation3 + $0x1b8] sm:$0xff]  }
 0x31b   : > { %v16415_v50 = vsel %vm18519_vm3, %v7577_v52, %v7579_v53  ;;  %vm18520_vm6 = vmmov %vm18512_vm1  ;;  %12075 = vmatmul.mubr.bf16.vlgmr.msra.gmra.mxu0 %v7572_v19  ;;  %v17922_v19 = vrot.slane %v16230_v62, 1  ;;  %vm18532_vm3 = vcmask 1045504  }
 0x31c   : > { %v16418_v21 = vsel %vm18520_vm6, %v7579_v53, %v7581_v49  ;;  %vm18521_vm8 = vmmov %vm18512_vm1  ;;  %12078 = vmatprep.mubr.bf16.mxu0 %v7574_v10  ;;  %12163 = vmatpush3.bf16.msra.mxu0 %v16113_v44  ;;  %v7134_v44 = vrot.slane %v16286_v36, 1  ;;  %v7136_v53 = vrot.slane %v16295_v11, 1 }
 0x31d   : > { %v16423_v34 = vsel %vm18521_vm8, %v7114_v1, %v7116_v38  ;;  %vm18522_vm10 = vmmov %vm18512_vm1  ;;  %12164 = vmatprep.subr.bf16.mxu0 %v12668_v30 }
 0x31e   : > { %v16426_v46 = vsel %vm18522_vm10, %v7116_v38, %v7118_v55  ;;  %vm18523_vm5 = vmmov %vm18512_vm1  ;;  %vm18536_vm10 = vsmask.f32 6400 }
 0x31f   : > { %v16430_v52 = vsel %vm18523_vm5, %v7581_v49, %v7583_v17  ;;  %vm18524_vm13 = vmmov %vm18512_vm1  ;;  %11951 = vmatmul.mubr.bf16.gmra.mxu1 %v6597_v33  ;;  %v7138_v49 = vrot.slane %v16362_v8, 1  ;;  %v8376_v8 = vrot.slane %v16339_v40, 2 }
 0x320   : > { %v16433_v14 = vsel %vm18524_vm13, %v7583_v17, %v7585_v3  ;;  %vm18525_vm12 = vmmov %vm18512_vm1  ;;  %12022 = vmatprep.mubr.bf16.mxu1 %v16375_v45  ;;  %12165 = vmatpush3.bf16.msra.mxu0 %v12668_v30  ;;  %v7140_v17 = vrot.slane %v16372_v20, 1  ;;  %v7917_v30 = vshll.u32 %v16339_v40, 16  ;;  %v8380_v20 = vrot.slane %v16347_v51, 2 }
 0x321   : > { %v16441_v32 = vsel %vm18525_vm12, %v7118_v55, %v7120_v58  ;;  %vm18526_vm2 = vmmov %vm18512_vm1  ;;  %12166 = vmatprep.subr.bf16.mxu0 %v12670_v27  ;;  %v12673_v55 = vld [vmem:[#allocation3 + $0x160] sm:$0xff]   ;;  %v16487_v58 = vsel %vm18532_vm3, %v8375_v28, %v8376_v8 }
 0x322   : > { %v16449_v10 = vsel %vm18526_vm2, %v7585_v3, %v7587_v13  ;;  %vm18527_vm7 = vmmov %vm18512_vm1  ;;  %v7906_v3 = vshrl.u32 %v16337_v47, 16  ;;  %v12656_v47 = vld [vmem:[#allocation3 + $0x130] sm:$0xff]  }
 0x323   : > { %v16457_v15 = vsel %vm18527_vm7, %v7587_v13, %v17924_v23  ;;  %vm18528_vm11 = vmmov %vm18512_vm1  ;;  %v7914_v13 = vshrl.u32 %v16339_v40, 16  ;;  %12079 = vmatmul.mubr.bf16.gmra.mxu0 %v7576_v29  ;;  %v7923_v40 = vshrl.u32 %v16345_v56, 16  ;;  %v12675_v29 = vld [vmem:[#allocation3 + $0x158] sm:$0xff]  }
 0x324   : > { %v16462_v1 = vsel %vm18528_vm11, %v17922_v19, %v7132_v16  ;;  %vm18529_vm4 = vmmov %vm18512_vm1  ;;  %v7908_v35 = vrot.slane %v7906_v3, 1  ;;  %12082 = vmatprep.mubr.bf16.mxu0 %v16400_v37  ;;  %12167 = vmatpush3.bf16.msra.mxu0 %v12670_v27  ;;  %v7932_v3 = vshrl.u32 %v16347_v51, 16 }
 0x325   : > { %v16472_v2 = vsel %vm18529_vm4, %v7132_v16, %v7134_v44  ;;  %vm18530_vm9 = vmmov %vm18512_vm1  ;;  %v7911_v16 = vrot.slane %v7909_v48, 2  ;;  %12168 = vmatprep.subr.bf16.mxu0 %v12673_v55  ;;  %v7925_v27 = vrot.slane %v7923_v40, 1  ;;  %v7935_v48 = vshll.u32 %v16347_v51, 16 }
 0x326   : > { %v16476_v12 = vsel %vm18530_vm9, %v7134_v44, %v7136_v53  ;;  %vm18531_vm15 = vmmov %vm18512_vm1  ;;  %v7916_v44 = vrot.slane %v7914_v13, 1  ;;  %v7950_v40 = vshrl.u32 %v16358_v4, 16 }
 0x327   : > { %v16479_v11 = vsel %vm18531_vm15, %v7136_v53, %v7138_v49  ;;  %vm18533_vm6 = vmmov %vm18512_vm1  ;;  %v7919_v53 = vrot.slane %v7917_v30, 2  ;;  %v7912_v19 = vor.u32 %v7911_v16, %v7908_v35  ;;  %12023 = vmatmul.mubr.bf16.vlgmr.msra.gmra.mxu1 %v16380_v25  ;;  %v7934_v30 = vrot.slane %v7932_v3, 1  ;;  %v12660_v35 = vld [vmem:[#allocation3 + $0x128] sm:$0xff]  }
 0x328   : > { %v16493_v33 = vsel %vm18533_vm6, %v7138_v49, %v7140_v17  ;;  %vm18534_vm0 = vmmov %vm18532_vm3  ;;  %v7926_v17 = vshll.u32 %v16345_v56, 16  ;;  %12026 = vmatprep.mubr.bf16.mxu1 %v16383_v26  ;;  %12111 = vmatpush3.bf16.msra.mxu1 %v16168_v24  ;;  %v7941_v56 = vshrl.u32 %v16356_v54, 16  ;;  %v7937_v16 = vrot.slane %v7935_v48, 2 }
 0x329   : > { %v16498_v28 = vsel %vm18534_vm0, %v8376_v8, %v8378_v41  ;;  %vm18535_vm8 = vmmov %vm18534_vm0  ;;  %v7920_v37 = vor.u32 %v7919_v53, %v7916_v44  ;;  %v8382_v8 = vrot.slane %v16356_v54, 2  ;;  %12112 = vmatprep.subr.bf16.mxu1 %v12656_v47  ;;  %12169 = vmatpush3.bf16.msra.mxu0 %v12673_v55  ;;  %v7944_v26 = vshll.u32 %v16356_v54, 16 }
 0x32a   : > { %v16502_v49 = vsel %vm18535_vm8, %v8378_v41, %v8380_v20  ;;  %v7928_v13 = vrot.slane %v7926_v17, 2  ;;  %v8384_v41 = vrot.slane %v16358_v4, 2  ;;  %vm18537_vm5 = vmmov %vm18534_vm0  ;;  %12170 = vmatprep.subr.bf16.mxu0 %v12675_v29  ;;  %v7943_v53 = vrot.slane %v7941_v56, 1  ;;  %v12677_v17 = vld [vmem:[#allocation3 + $0x150] sm:$0xff]  }
 0x32b   : > { %v16514_v25 = vsel %vm18536_vm10, %v7912_v19, %v7920_v37  ;;  %v16517_v51 = vsel %vm18537_vm5, %v8380_v20, %v8382_v8  ;;  %vm18538_vm13 = vmmov %vm18534_vm0  ;;  %v7938_v3 = vor.u32 %v7937_v16, %v7934_v30  ;;  %v7946_v55 = vrot.slane %v7944_v26, 2  ;;  %12083 = vmatmul.mubr.bf16.gmra.mxu0 %v16415_v50 }
 0x32c   : > { %v7929_v24 = vor.u32 %v7928_v13, %v7925_v27  ;;  %v16521_v44 = vsel %vm18538_vm13, %v8382_v8, %v8384_v41  ;;  %v7953_v19 = vshll.u32 %v16358_v4, 16  ;;  %v8386_v48 = vrot.slane %v16360_v31, 2  ;;  %12113 = vmatpush3.bf16.msra.mxu1 %v12656_v47  ;;  %vm18539_vm12 = vmmov %vm18536_vm10  ;;  %12086 = vmatprep.mubr.bf16.mxu0 %v16418_v21  ;;  %v12663_v13 = vld [vmem:[#allocation3 + $0x120] sm:$0xff]   ;;  %v12680_v21 = vld [vmem:[#allocation3 + $0x148] sm:$0xff]  }
 0x32d   : > { %v7952_v20 = vrot.slane %v7950_v40, 1  ;;  %v8388_v27 = vrot.slane %v16364_v60, 2  ;;  %v7959_v8 = vshrl.u32 %v16360_v31, 16  ;;  %12114 = vmatprep.subr.bf16.mxu1 %v12660_v35  ;;  %vm18540_vm1 = vmmov %vm18536_vm10  ;;  %v7947_v4 = vor.u32 %v7946_v55, %v7943_v53  ;;  %12171 = vmatpush3.bf16.msra.mxu0 %v12675_v29 }
 0x32e   : > { %v16528_v54 = vsel %vm18539_vm12, %v7920_v37, %v7929_v24  ;;  %v16534_v30 = vsel %vm18540_vm1, %v7929_v24, %v7938_v3  ;;  %v7955_v56 = vrot.slane %v7953_v19, 2  ;;  %vm18541_vm2 = vmmov %vm18534_vm0  ;;  %v7962_v16 = vshll.u32 %v16360_v31, 16  ;;  %12172 = vmatprep.subr.bf16.mxu0 %v12677_v17 }
 0x32f   : > { %v16537_v50 = vsel %vm18541_vm2, %v8384_v41, %v8386_v48  ;;  %vm18542_vm7 = vmmov %vm18534_vm0  ;;  %v7961_v37 = vrot.slane %v7959_v8, 1  ;;  %v7968_v26 = vshrl.u32 %v16364_v60, 16  ;;  %12027 = vmatmul.mubr.bf16.gmra.mxu1 %v16405_v22  ;;  %v7971_v41 = vshll.u32 %v16364_v60, 16  ;;  %v12667_v22 = vld [vmem:[#allocation3 + $0x118] sm:$0xff]  }
 0x330   : > { %v16540_v47 = vsel %vm18542_vm7, %v8386_v48, %v8388_v27  ;;  %vm18543_vm11 = vmmov %vm18540_vm1  ;;  %v7956_v53 = vor.u32 %v7955_v56, %v7952_v20  ;;  %v8390_v29 = vrot.slane %v16368_v5, 2  ;;  %12030 = vmatprep.mubr.bf16.mxu1 %v16412_v59  ;;  %12115 = vmatpush3.bf16.msra.mxu1 %v12660_v35  ;;  %v7964_v40 = vrot.slane %v7962_v16, 2  ;;  %v12682_v16 = vld [vmem:[#allocation3 + $0x140] sm:$0xff]  }
 0x331   : > { %v16546_v24 = vsel %vm18543_vm11, %v7938_v3, %v7947_v4  ;;  %v7970_v55 = vrot.slane %v7968_v26, 1  ;;  %v8392_v31 = vrot.slane %v16387_v57, 2  ;;  %v7977_v19 = vshrl.u32 %v16368_v5, 16  ;;  %12116 = vmatprep.subr.bf16.mxu1 %v12663_v13  ;;  %vm18544_vm4 = vmmov %vm18540_vm1  ;;  %12173 = vmatpush3.bf16.msra.mxu0 %v12677_v17 }
 0x332   : > { %v16554_v48 = vsel %vm18544_vm4, %v7947_v4, %v7956_v53  ;;  %v7973_v3 = vrot.slane %v7971_v41, 2  ;;  %vm18545_vm9 = vmmov %vm18534_vm0  ;;  %v7980_v60 = vshll.u32 %v16368_v5, 16  ;;  %v7965_v59 = vor.u32 %v7964_v40, %v7961_v37  ;;  %12174 = vmatprep.subr.bf16.mxu0 %v12680_v21 }
 0x333   : > { %v16557_v20 = vsel %vm18545_vm9, %v8388_v27, %v8390_v29  ;;  %vm18546_vm15 = vmmov %vm18534_vm0  ;;  %v7979_v8 = vrot.slane %v7977_v19, 1  ;;  %v7986_v56 = vshrl.u32 %v16387_v57, 16  ;;  %v7989_v4 = vshll.u32 %v16387_v57, 16  ;;  %12087 = vmatmul.mubr.bf16.gmra.mxu0 %v16430_v52 }
 0x334   : > { %v16561_v35 = vsel %vm18546_vm15, %v8390_v29, %v8392_v31  ;;  %v7974_v26 = vor.u32 %v7973_v3, %v7970_v55  ;;  %v7982_v38 = vrot.slane %v7980_v60, 2  ;;  %v8394_v41 = vrot.slane %v16389_v43, 2  ;;  %12117 = vmatpush3.bf16.msra.mxu1 %v12663_v13  ;;  %vm18547_vm3 = vmmov %vm18540_vm1  ;;  %12090 = vmatprep.mubr.bf16.mxu0 %v16433_v14  ;;  %v12672_v29 = vld [vmem:[#allocation3 + $0x110] sm:$0xff]  }
 0x335   : > { %v16568_v5 = vsel %vm18547_vm3, %v7956_v53, %v7965_v59  ;;  %v7988_v17 = vrot.slane %v7986_v56, 1  ;;  %v8396_v27 = vrot.slane %v16395_v42, 2  ;;  %v7995_v37 = vshrl.u32 %v16389_v43, 16  ;;  %12118 = vmatprep.subr.bf16.mxu1 %v12667_v22  ;;  %vm18548_vm6 = vmmov %vm18540_vm1  ;;  %12175 = vmatpush3.bf16.msra.mxu0 %v12680_v21  ;;  %v16585_v14 = vld [vmem:[#allocation2 + $0x78] sm:$0xff]  }
 0x336   : > { %v16574_v40 = vsel %vm18548_vm6, %v7965_v59, %v7974_v26  ;;  %v7983_v57 = vor.u32 %v7982_v38, %v7979_v8  ;;  %v7991_v55 = vrot.slane %v7989_v4, 2  ;;  %v16577_v52 = vsel %vm18534_vm0, %v8392_v31, %v8394_v41  ;;  %vm18549_vm8 = vmmov %vm18534_vm0  ;;  %12176 = vmatprep.subr.bf16.mxu0 %v12682_v16  ;;  %v16592_v59 = vld [vmem:[#allocation3 + $0x1f8] sm:$0xff]  }
 0x337   : > { %v16580_v13 = vsel %vm18549_vm8, %v8394_v41, %v8396_v27  ;;  %v7997_v53 = vrot.slane %v7995_v37, 1  ;;  %v7998_v19 = vshll.u32 %v16389_v43, 16  ;;  %v8004_v3 = vshrl.u32 %v16395_v42, 16  ;;  %12031 = vmatmul.mubr.bf16.gmra.mxu1 %v16423_v34  ;;  %vm18550_vm10 = vmmov %vm18540_vm1  ;;  %v16595_v43 = vld [vmem:[#allocation2 + $0x80] sm:$0xff]  }
 0x338   : > { %v16588_v38 = vsel %vm18550_vm10, %v7974_v26, %v7983_v57  ;;  %v7992_v60 = vor.u32 %v7991_v55, %v7988_v17  ;;  %v8007_v31 = vshll.u32 %v16395_v42, 16  ;;  %v8398_v21 = vrot.slane %v16435_v63, 2  ;;  %12034 = vmatprep.mubr.bf16.mxu1 %v16426_v46  ;;  %12119 = vmatpush3.bf16.msra.mxu1 %v12667_v22  ;;  %v12678_v26 = vld [vmem:[#allocation3 + $0x108] sm:$0xff]   ;;  %vm18551_vm5 = vmmov %vm18540_vm1 }
 0x339   : > { %v8000_v8 = vrot.slane %v7998_v19, 2  ;;  %v8006_v34 = vrot.slane %v8004_v3, 1  ;;  %v8400_v56 = vrot.slane %v16451_v39, 2  ;;  %v8013_v4 = vshrl.u32 %v16435_v63, 16  ;;  %12120 = vmatprep.subr.bf16.mxu1 %v12672_v29  ;;  %vm18552_vm13 = vmmov %vm18534_vm0  ;;  %12177 = vmatpush3.bf16.msra.mxu0 %v12682_v16  ;;  %v16616_v16 = vld [vmem:[#allocation2 + $0x90] sm:$0xff]  }
 0x33a   : > { %v16600_v41 = vsel %vm18551_vm5, %v7983_v57, %v7992_v60  ;;  %v8009_v17 = vrot.slane %v8007_v31, 2  ;;  %v16603_v37 = vsel %vm18552_vm13, %v8396_v27, %v8398_v21  ;;  %v8016_v46 = vshll.u32 %v16435_v63, 16  ;;  %vm18553_vm12 = vmmov %vm18534_vm0  ;;  %12266 = vmatprep.subr.bf16.mxu0 %v16592_v59 }
 0x33b   : > { %v8001_v22 = vor.u32 %v8000_v8, %v7997_v53  ;;  %v16607_v55 = vsel %vm18553_vm12, %v8398_v21, %v8400_v56  ;;  %v8015_v19 = vrot.slane %v8013_v4, 1  ;;  %v8022_v3 = vshrl.u32 %v16451_v39, 16  ;;  %12091 = vmatmul.mubr.bf16.gmra.mxu0 %v16449_v10  ;;  %v12683_v4 = vld [vmem:[#allocation3 + $0x100] sm:$0xff]   ;;  %vm18554_vm2 = vmmov %vm18540_vm1 }
 0x33c   : > { %v8010_v36 = vor.u32 %v8009_v17, %v8006_v34  ;;  %v8018_v57 = vrot.slane %v8016_v46, 2  ;;  %v8025_v31 = vshll.u32 %v16451_v39, 16  ;;  %v8402_v27 = vrot.slane %v16585_v14, 2  ;;  %12121 = vmatpush3.bf16.msra.mxu1 %v12672_v29  ;;  %12094 = vmatprep.mubr.bf16.mxu0 %v16457_v15  ;;  %vm18555_vm7 = vmmov %vm18534_vm0 }
 0x33d   : > { %v16619_v53 = vsel %vm18540_vm1, %v7992_v60, %v8001_v22  ;;  %v8024_v21 = vrot.slane %v8022_v3, 1  ;;  %v8404_v8 = vrot.slane %v16595_v43, 2  ;;  %v8031_v34 = vshrl.u32 %v16585_v14, 16  ;;  %12122 = vmatprep.subr.bf16.mxu1 %v12678_v26  ;;  %vm18556_vm11 = vmmov %vm18534_vm0 }
 0x33e   : > { %v16625_v17 = vsel %vm18554_vm2, %v8001_v22, %v8010_v36  ;;  %v8019_v46 = vor.u32 %v8018_v57, %v8015_v19  ;;  %v8027_v10 = vrot.slane %v8025_v31, 2  ;;  %v16628_v29 = vsel %vm18555_vm7, %v8400_v56, %v8402_v27  ;;  %vm18557_vm4 = vmmov %vm18540_vm1 }
 0x33f   : > { %v16631_v60 = vsel %vm18556_vm11, %v8402_v27, %v8404_v8  ;;  %v8033_v3 = vrot.slane %v8031_v34, 1  ;;  %v8034_v45 = vshll.u32 %v16585_v14, 16  ;;  %v8040_v23 = vshrl.u32 %v16595_v43, 16  ;;  %12035 = vmatmul.mubr.bf16.gmra.mxu1 %v16441_v32  ;;  %vm18559_vm9 = vmmov %vm18540_vm1 }
 0x340   : > { %v16637_v15 = vsel %vm18557_vm4, %v8010_v36, %v8019_v46  ;;  %v8028_v22 = vor.u32 %v8027_v10, %v8024_v21  ;;  %v8043_v19 = vshll.u32 %v16595_v43, 16  ;;  %v8406_v57 = vrot.slane %v16610_v9, 2  ;;  %12038 = vmatprep.mubr.bf16.mxu1 %v16446_v61  ;;  %12123 = vmatpush3.bf16.msra.mxu1 %v12678_v26  ;;  %vm18561_vm15 = vmmov %vm18534_vm0 }
 0x341   : > { %18558 = vst [vmem:[#allocation52_spill] sm:$0xff] %v16637_v15  ;;  %v8036_v56 = vrot.slane %v8034_v45, 2  ;;  %v8042_v31 = vrot.slane %v8040_v23, 1  ;;  %v17925_v27 = vrot.slane %v16616_v16, 2  ;;  %v8049_v34 = vshrl.u32 %v16610_v9, 16  ;;  %12124 = vmatprep.subr.bf16.mxu1 %v12683_v4  ;;  %vm18563_vm3 = vmmov %vm18534_vm0 }
 0x342   : > { %v16647_v32 = vsel %vm18559_vm9, %v8019_v46, %v8028_v22  ;;  %v8045_v36 = vrot.slane %v8043_v19, 2  ;;  %v16650_v21 = vsel %vm18561_vm15, %v8404_v8, %v8406_v57  ;;  %v8052_v10 = vshll.u32 %v16610_v9, 16  ;;  %vm18570_vm8 = vmmov %vm18540_vm1 }
 0x343   : > { %18560 = vst [vmem:[#allocation48_spill] sm:$0xff] %v16647_v32  ;;  %18562 = vst [vmem:[#allocation42_spill] sm:$0xff] %v16650_v21  ;;  %v8037_v61 = vor.u32 %v8036_v56, %v8033_v3  ;;  %v16656_v23 = vsel %vm18563_vm3, %v8406_v57, %v17925_v27  ;;  %v8051_v45 = vrot.slane %v8049_v34, 1  ;;  %v8058_v26 = vshrl.u32 %v16616_v16, 16 }
 0x344   : > { %v18564_v15 = vrot.slane %v16435_v63, 1  ;;  %v18565_v46 = vrot.slane %v16395_v42, 1  ;;  %vm18566_vm6 = vcmask 1046528   ;;  %v8046_v32 = vor.u32 %v8045_v36, %v8042_v31  ;;  %12125 = vmatpush3.bf16.msra.mxu1 %v12683_v4  ;;  %vm18571_vm10 = vmmov %vm18540_vm1 }
 0x345   : > { %v8054_v8 = vrot.slane %v8052_v10, 2  ;;  %v8061_v21 = vshll.u32 %v16616_v16, 16  ;;  %v18567_v3 = vrot.slane %v16451_v39, 1  ;;  %vm18569_vm0 = vmmov %vm18566_vm6  ;;  %v16671_v34 = vsel %vm18570_vm8, %v8028_v22, %v8037_v61  ;;  %12214 = vmatprep.subr.bf16.mxu1 %v16644_v6 }
 0x346   : > { %v7592_v19 = vsel %vm18566_vm6, %v18565_v46, %v18564_v15  ;;  %v18568_v56 = vmov %v18564_v15  ;;  %v8060_v27 = vrot.slane %v8058_v26, 1  ;;  %v16675_v42 = vsel %vm18571_vm10, %v8037_v61, %v8046_v32  ;;  %vm18574_vm5 = vmmov %vm18569_vm0 }
 0x347   : > { %12095 = vmatmul.mubr.bf16.gmra.mxu0 %v7592_v19  ;;  %v7594_v57 = vsel %vm18569_vm0, %v18568_v56, %v18567_v3  ;;  %v8055_v15 = vor.u32 %v8054_v8, %v8051_v45  ;;  %v8063_v31 = vrot.slane %v8061_v21, 2  ;;  %v18572_v36 = vrot.slane %v16467_v18, 1  ;;  %vm18577_vm13 = vmmov %vm18569_vm0  ;;  %v12756_v19 = vld [vmem:[#allocation2 + $0x60] sm:$0xff]  }
 0x348   : > { %12098 = vmatprep.mubr.bf16.mxu0 %v7594_v57  ;;  %v18573_v10 = vrot.slane %v16407_v0, 1  ;;  %v18575_v4 = vrot.slane %v16166_v7, 1  ;;  %v7595_v46 = vrot.slane %v16585_v14, 1  ;;  %vm18578_vm12 = vmmov %vm18540_vm1  ;;  %v7597_v21 = vrot.slane %v16595_v43, 1 }
 0x349   : > { %v18576_v22 = vmov %v18572_v36  ;;  %v16689_v61 = vsel %vm18578_vm12, %v8046_v32, %v8055_v15  ;;  %v16691_v45 = vor.u32 %v8063_v31, %v8060_v27  ;;  %v7128_v8 = vrot.slane %v12756_v19, 1  ;;  %vm18581_vm2 = vmmov %vm18569_vm0  ;;  %v12679_v7 = vld [vmem:[#allocation2 + $0x98] ss:$0 sps:$4 sm:$0x11]  }
 0x34a   : > { %v7125_v63 = vsel %vm18574_vm5, %v18573_v10, %v18572_v36  ;;  %v7127_v26 = vsel %vm18577_vm13, %v18576_v22, %v18575_v4  ;;  %v18580_v18 = vmov %v18567_v3  ;;  %vm18582_vm7 = vmmov %vm18569_vm0  ;;  %v18583_v27 = vmov %v18575_v4  ;;  %v16712_v36 = vpop.f32.mrf.mxu0  ;;  %v12690_v22 = vld [vmem:[#allocation3 + $0x1f0] sm:$0xff]  }
 0x34b   : > { %12039 = vmatmul.mubr.bf16.gmra.mxu1 %v7125_v63  ;;  %18579 = vst [vmem:[#allocation81_spill] sm:$0xff] %v16691_v45  ;;  %v16696_v0 = vsel %vm18540_vm1, %v8055_v15, %v16691_v45  ;;  %v7596_v3 = vsel %vm18581_vm2, %v18580_v18, %v7595_v46  ;;  %v7598_v14 = vsel %vm18582_vm7, %v7595_v46, %v7597_v21  ;;  %vm18584_vm11 = vmmov %vm18569_vm0  ;;  %v18585_v43 = vrot.slane %v16230_v62, 1  ;;  %v16741_v46 = vld [vmem:[#allocation2 + $0x28] sm:$0xff]   ;;  %v16755_v18 = vld [vmem:[#allocation2 + $0x50] sm:$0xff]  }
 0x34c   : > { %12042 = vmatprep.mubr.bf16.mxu1 %v7127_v26  ;;  %v7129_v32 = vsel %vm18584_vm11, %v18583_v27, %v7128_v8  ;;  %vm18586_vm4 = vmmov %vm18569_vm0  ;;  %v7599_v57 = vrot.slane %v16610_v9, 1  ;;  %v7601_v39 = vrot.slane %v16616_v16, 1  ;;  %v16716_v62 = vpop.f32.mrf.mxu0  ;;  %v7603_v10 = vrot.slane %v12679_v7, 1  ;;  %v16737_v26 = vld [vmem:[#allocation2 + $0x14] sm:$0xf]  ;;  %v16759_v27 = vld [vmem:[#allocation2 + $0x58] sm:$0xff]  }
 0x34d   : > { %v7131_v56 = vsel %vm18586_vm4, %v7128_v8, %v18585_v43  ;;  %vm18587_vm9 = vmmov %vm18569_vm0  ;;  %v16772_v7 = vld [vmem:[#allocation2 + $0x78] sm:$0xff]   ;;  %vm18593_vm6 = vcmask 1044480  }
 0x34e   : > { %v7600_v15 = vsel %vm18587_vm9, %v7597_v21, %v7599_v57  ;;  %vm18588_vm15 = vmmov %vm18569_vm0  ;;  %v16719_v63 = vpop.f32.mrf.mxu0  ;;  %v16745_v21 = vld [vmem:[#allocation2 + $0x38] sm:$0xff]  }
 0x34f   : > { %12099 = vmatmul.mubr.bf16.gmra.mxu0 %v7596_v3  ;;  %v7602_v31 = vsel %vm18588_vm15, %v7599_v57, %v7601_v39  ;;  %vm18589_vm3 = vmmov %vm18569_vm0  ;;  %v12694_v57 = vld [vmem:[#allocation3 + $0x1d8] sm:$0xff]  }
 0x350   : > { %12102 = vmatprep.mubr.bf16.mxu0 %v7598_v14  ;;  %v7604_v9 = vsel %vm18589_vm3, %v7601_v39, %v7603_v10  ;;  %v16724_v4 = vpop.f32.mrf.mxu0  ;;  %v12685_v14 = vld [vmem:[#allocation3 + $0x1b0] sm:$0xff]   ;;  %v16766_v39 = vld [vmem:[#allocation2 + $0x70] sm:$0xff]   ;;  %vm18595_vm0 = vmmov %vm18593_vm6 }
 0x351   : > { %18590 = vst [vmem:[#allocation53_spill] sm:$0xff] %v16724_v4  ;;  %18591 = vst [vmem:[#allocation54_spill] sm:$0xff] %v16766_v39  ;;  %v16774_v10 = vld [vmem:[#allocation2 + $0x80] sm:$0xff]   ;;  %v16790_v4 = vld [vmem:[#allocation2 + $0x90] sm:$0xff]  }
 0x352   : > { %vm18598_vm8 = vmmov %vm18595_vm0 }
 0x353   : > { %12043 = vmatmul.mubr.bf16.gmra.mxu1 %v7129_v32  ;;  %v16761_v32 = vld [vmem:[#allocation2 + $0x60] sm:$0xff]   ;;  %vm18600_vm10 = vmmov %vm18595_vm0 }
 0x354   : > { %12046 = vmatprep.mubr.bf16.mxu1 %v7131_v56  ;;  %vm18602_vm5 = vmmov %vm18595_vm0 }
 0x355   : > { %vm18604_vm13 = vmmov %vm18595_vm0 }
 0x356   : > { %vm18606_vm12 = vmmov %vm18595_vm0 }
 0x357   : > { %12103 = vmatmul.mubr.bf16.gmra.mxu0 %v7600_v15  ;;  %v9650_v15 = vrot.slane %v16741_v46, 3  ;;  %vm18608_vm1 = vmmov %vm18595_vm0 }
 0x358   : > { %12106 = vmatprep.mubr.bf16.mxu0 %v7602_v31  ;;  %vm18610_vm2 = vmmov %vm18595_vm0 }
 0x359   : > { %vm18612_vm7 = vmmov %vm18595_vm0 }
 0x35a   : > { %vm18614_vm11 = vmmov %vm18595_vm0 }
 0x35b   : > { %12047 = vmatmul.mubr.bf16.gmra.mxu1 %v16462_v1  ;;  %v16727_v1 = vpop.f32.mrf.mxu0  ;;  %vm18616_vm4 = vmmov %vm18595_vm0 }
 0x35c   : > { %12050 = vmatprep.mubr.bf16.mxu1 %v16472_v2  ;;  %v12691_v2 = vld [vmem:[#allocation3 + $0x1e8] sm:$0xff]   ;;  %vm18618_vm9 = vmmov %vm18595_vm0 }
 0x35d   : > { %vm18620_vm15 = vmmov %vm18595_vm0 }
 0x35e   : > { %vm18622_vm3 = vmmov %vm18595_vm0 }
 0x35f   : > { %12107 = vmatmul.mubr.bf16.gmra.mxu0 %v7604_v9  ;;  %v16776_v9 = vld [vmem:[#allocation2 + $0x88] sm:$0xff]  }
 0x360   : > { %12178 = vmatprep.mubr.bf16.mxu0 %v16487_v58  ;;  %v9624_v58 = vld [vmem:[#allocation2 + $0x10] sm:$0x8]  ;;  %18592 = vst [vmem:[#allocation45_spill] sm:$0xff] %v16776_v9 }
 0x361   : > { %v10812_v19 = vcombine.low %v9624_v58, %v16737_v26 }
 0x363   : > { %12051 = vmatmul.mubr.bf16.gmra.mxu1 %v16476_v12  ;;  %v16733_v12 = vpop.f32.mrf.mxu0  ;;  %v9645_v43 = vrot.slane %v10812_v19, 3 }
 0x364   : > { %12054 = vmatprep.mubr.bf16.mxu1 %v16479_v11  ;;  %v16735_v11 = vld [vmem:[#allocation2 + $0x18] sm:$0xff]  }
 0x365   : > { %v16753_v8 = vpop.f32.mrf.mxu0  ;;  %v9646_v3 = vrot.slane %v16735_v11, 3 }
 0x367   : > { %12179 = vmatmul.mubr.bf16.vlgmr.msra.gmra.mxu0 %v16498_v28  ;;  %v16739_v28 = vld [vmem:[#allocation2 + $0x20] sm:$0xff]  }
 0x368   : > { %12182 = vmatprep.mubr.bf16.mxu0 %v16502_v49  ;;  %12267 = vmatpush3.bf16.msra.mxu0 %v16592_v59  ;;  %v12693_v49 = vld [vmem:[#allocation3 + $0x1e0] sm:$0xff]   ;;  %v9648_v56 = vrot.slane %v16739_v28, 3 }
 0x369   : > { %12268 = vmatprep.subr.bf16.mxu0 %v12690_v22  ;;  %v16743_v59 = vld [vmem:[#allocation2 + $0x30] sm:$0xff]  }
 0x36a   : > { %v9652_v31 = vrot.slane %v16743_v59, 3  ;;  %v16793_v45 = vsel %vm18598_vm8, %v9648_v56, %v9650_v15  ;;  %vm18627_vm8 = vmmov %vm18595_vm0 }
 0x36b   : > { %12055 = vmatmul.mubr.bf16.gmra.mxu1 %v16493_v33  ;;  %v16747_v33 = vld [vmem:[#allocation2 + $0x40] sm:$0xff]   ;;  %18599 = vst [vmem:[#allocation6_spill] sm:$0xff] %v16793_v45 }
 0x36c   : > { %12126 = vmatprep.mubr.bf16.mxu1 %v16514_v25  ;;  %12269 = vmatpush3.bf16.msra.mxu0 %v12690_v22  ;;  %v16749_v25 = vld [vmem:[#allocation2 + $0x48] sm:$0xff]   ;;  %v16779_v22 = vsel %vm18593_vm6, %v9645_v43, %v9646_v3  ;;  %v9656_v58 = vrot.slane %v16747_v33, 3  ;;  %v16796_v43 = vsel %vm18600_vm10, %v9650_v15, %v9652_v31  ;;  %v16811_v15 = vld [vmem:[#allocation2 + $0xa0] ss:$0 sps:$4 sm:$0x77]   ;;  %vm18624_vm6 = vmmov %vm18595_vm0  ;;  %vm18633_vm10 = vcmask 1045504  }
 0x36d   : > { %12270 = vmatprep.subr.bf16.mxu0 %v12691_v2  ;;  %18594 = vst [vmem:[#allocation10_spill] sm:$0xff] %v16779_v22  ;;  %v9658_v19 = vrot.slane %v16749_v25, 3  ;;  %18601 = vst [vmem:[#allocation57_spill] sm:$0xff] %v16796_v43  ;;  %v16799_v22 = vld [vmem:[#allocation2 + $0x98] sm:$0xff]  }
 0x36f   : > { %12183 = vmatmul.mubr.bf16.gmra.mxu0 %v16517_v51  ;;  %v16764_v51 = vld [vmem:[#allocation2 + $0x68] sm:$0xff]  }
 0x370   : > { %12186 = vmatprep.mubr.bf16.mxu0 %v16521_v44  ;;  %12271 = vmatpush3.bf16.msra.mxu0 %v12691_v2  ;;  %v9654_v44 = vrot.slane %v16745_v21, 3  ;;  %v16782_v2 = vsel %vm18595_vm0, %v9646_v3, %v9648_v56  ;;  %v9660_v3 = vrot.slane %v16755_v18, 3  ;;  %v9662_v56 = vrot.slane %v16759_v27, 3 }
 0x371   : > { %12272 = vmatprep.subr.bf16.mxu0 %v12693_v49  ;;  %18596 = vst [vmem:[#allocation55_spill] sm:$0xff] %v16782_v2  ;;  %v12686_v2 = vld [vmem:[#allocation3 + $0x1a8] sm:$0xff]   ;;  %v9666_v45 = vrot.slane %v16764_v51, 3 }
 0x372   : > { %v16814_v43 = vsel %vm18608_vm1, %v9658_v19, %v9660_v3  ;;  %vm18638_vm1 = vsmask.f32 6400 }
 0x373   : > { %12127 = vmatmul.mubr.bf16.vlgmr.msra.gmra.mxu1 %v16528_v54  ;;  %v16788_v54 = vpop.f32.mrf.mxu0  ;;  %18609 = vst [vmem:[#allocation13_spill] sm:$0xff] %v16814_v43 }
 0x374   : > { %12130 = vmatprep.mubr.bf16.mxu1 %v16534_v30  ;;  %12215 = vmatpush3.bf16.msra.mxu1 %v16644_v6  ;;  %18597 = vst [vmem:[#allocation46_spill] sm:$0xff] %v16788_v54  ;;  %v16802_v30 = vsel %vm18602_vm5, %v9652_v31, %v9654_v44  ;;  %v16805_v6 = vsel %vm18604_vm13, %v9654_v44, %v9656_v58  ;;  %v9668_v31 = vrot.slane %v16766_v39, 3  ;;  %vm18634_vm5 = vsmask.f32 5376 }
 0x375   : > { %12216 = vmatprep.subr.bf16.mxu1 %v12685_v14  ;;  %12273 = vmatpush3.bf16.msra.mxu0 %v12693_v49  ;;  %18603 = vst [vmem:[#allocation56_spill] sm:$0xff] %v16802_v30  ;;  %18605 = vst [vmem:[#allocation49_spill] sm:$0xff] %v16805_v6  ;;  %v16808_v54 = vsel %vm18606_vm12, %v9656_v58, %v9658_v19  ;;  %v9664_v49 = vrot.slane %v16761_v32, 3  ;;  %v12695_v30 = vld [vmem:[#allocation3 + $0x1d0] sm:$0xff]   ;;  %v16820_v44 = vsel %vm18610_vm2, %v9660_v3, %v9662_v56  ;;  %v16826_v19 = vpop.f32.mrf.mxu0 }
 0x376   : > { %18607 = vst [vmem:[#allocation18_spill] sm:$0xff] %v16808_v54  ;;  %12274 = vmatprep.subr.bf16.mxu0 %v12694_v57  ;;  %18611 = vst [vmem:[#allocation58_spill] sm:$0xff] %v16820_v44  ;;  %v9670_v58 = vrot.slane %v16772_v7, 3  ;;  %v9672_v54 = vrot.slane %v16774_v10, 3  ;;  %v9674_v6 = vrot.slane %v16776_v9, 3  ;;  %v16835_v3 = vsel %vm18616_vm4, %v9666_v45, %v9668_v31  ;;  %v12687_v9 = vld [vmem:[#allocation3 + $0x1a0] sm:$0xff]  }
 0x377   : > { %12187 = vmatmul.mubr.bf16.gmra.mxu0 %v16537_v50  ;;  %v16829_v43 = vsel %vm18612_vm7, %v9662_v56, %v9664_v49  ;;  %v16832_v39 = vsel %vm18614_vm11, %v9664_v49, %v9666_v45  ;;  %18617 = vst [vmem:[#allocation29_spill] sm:$0xff] %v16835_v3  ;;  %v9676_v44 = vrot.slane %v16790_v4, 3  ;;  %v9678_v49 = vrot.slane %v16799_v22, 3  ;;  %vm18635_vm13 = vmmov %vm18634_vm5 }
 0x378   : > { %12217 = vmatpush3.bf16.msra.mxu1 %v12685_v14  ;;  %18613 = vst [vmem:[#allocation67_spill] sm:$0xff] %v16829_v43  ;;  %18615 = vst [vmem:[#allocation60_spill] sm:$0xff] %v16832_v39  ;;  %12190 = vmatprep.mubr.bf16.mxu0 %v16540_v47  ;;  %v16840_v50 = vsel %vm18618_vm9, %v9668_v31, %v9670_v58  ;;  %v16843_v14 = vsel %vm18620_vm15, %v9670_v58, %v9672_v54  ;;  %v9680_v3 = vrot.slane %v16811_v15, 3  ;;  %v12698_v47 = vld [vmem:[#allocation3 + $0x1c8] sm:$0xff]   ;;  %v16858_v58 = vpop.f32.mrf.mxu0 }
 0x379   : > { %12218 = vmatprep.subr.bf16.mxu1 %v12686_v2  ;;  %18619 = vst [vmem:[#allocation9_spill] sm:$0xff] %v16840_v50  ;;  %18621 = vst [vmem:[#allocation16_spill] sm:$0xff] %v16843_v14  ;;  %v16846_v56 = vsel %vm18622_vm3, %v9672_v54, %v9674_v6  ;;  %12275 = vmatpush3.bf16.msra.mxu0 %v12694_v57  ;;  %v16850_v45 = vsel %vm18624_vm6, %v9674_v6, %v9676_v44  ;;  %v11920_v54 = vpop.f32.mrf.mxu1  ;;  %v12689_v6 = vld [vmem:[#allocation3 + $0x198] sm:$0xff]  }
 0x37a   : > { %18623 = vst [vmem:[#allocation59_spill] sm:$0xff] %v16846_v56  ;;  %18625 = vst [vmem:[#allocation70_spill] sm:$0xff] %v16850_v45  ;;  %12276 = vmatprep.subr.bf16.mxu0 %v12695_v30  ;;  %v16855_v31 = vsel %vm18595_vm0, %v9676_v44, %v9678_v49  ;;  %v16861_v57 = vsel %vm18627_vm8, %v9678_v49, %v9680_v3  ;;  %v16864_v45 = vadd.f32 %v16712_v36, %v11920_v54  ;;  %v12701_v44 = vld [vmem:[#allocation3 + $0x1c0] sm:$0xff]   ;;  %v12692_v3 = vld [vmem:[#allocation3 + $0x190] sm:$0xff]  }
 0x37b   : > { %12131 = vmatmul.mubr.bf16.gmra.mxu1 %v16546_v24  ;;  %18626 = vst [vmem:[#allocation64_spill] sm:$0xff] %v16855_v31  ;;  %18628 = vst [vmem:[#allocation15_spill] sm:$0xff] %v16861_v57  ;;  %v6698_v24 = vpop.f32.mrf.mxu1  ;;  %v18629_v54 = vld [vmem:[#allocation52_spill] sm:$0xff]  ;;  %v18632_v57 = vrot.slane %v16616_v16, 2  ;;  %v9211_v16 = vshrl.u32 %v16743_v59, 16 }
 0x37c   : > { %12134 = vmatprep.mubr.bf16.mxu1 %v16554_v48  ;;  %12219 = vmatpush3.bf16.msra.mxu1 %v12686_v2  ;;  %v16867_v56 = vadd.f32 %v16716_v62, %v6698_v24  ;;  %v16870_v2 = vpop.f32.mrf.mxu0  ;;  %vm18636_vm12 = vmmov %vm18634_vm5 }
 0x37d   : > { %12220 = vmatprep.subr.bf16.mxu1 %v12687_v9  ;;  %12277 = vmatpush3.bf16.msra.mxu0 %v12695_v30  ;;  %v11921_v48 = vpop.f32.mrf.mxu1  ;;  %v16890_v30 = vld [vmem:[#allocation3 + $0x238] sm:$0xff]   ;;  %vm18639_vm2 = vmmov %vm18633_vm10 }
 0x37e   : > { %12278 = vmatprep.subr.bf16.mxu0 %v12698_v47  ;;  %v16874_v36 = vadd.f32 %v16719_v63, %v11921_v48  ;;  %v16878_v62 = vpop.f32.mrf.mxu0  ;;  %vm18640_vm7 = vmmov %vm18634_vm5 }
 0x37f   : > { %12191 = vmatmul.mubr.bf16.gmra.mxu0 %v16557_v20  ;;  %v12696_v20 = vld [vmem:[#allocation3 + $0x188] sm:$0xff]   ;;  %v16884_v63 = vpop.f32.mrf.mxu1  ;;  %vm18641_vm11 = vmmov %vm18634_vm5 }
 0x380   : > { %12221 = vmatpush3.bf16.msra.mxu1 %v12687_v9  ;;  %12194 = vmatprep.mubr.bf16.mxu0 %v16561_v35  ;;  %v16881_v35 = vpop.f32.mrf.mxu0  ;;  %vm18642_vm4 = vmmov %vm18639_vm2 }
 0x381   : > { %12222 = vmatprep.subr.bf16.mxu1 %v12689_v6  ;;  %12279 = vmatpush3.bf16.msra.mxu0 %v12698_v47  ;;  %vm18643_vm9 = vmmov %vm18639_vm2 }
 0x382   : > { %12280 = vmatprep.subr.bf16.mxu0 %v12701_v44  ;;  %vm18644_vm15 = vmmov %vm18634_vm5 }
 0x383   : > { %12135 = vmatmul.mubr.bf16.gmra.mxu1 %v16568_v5  ;;  %v12702_v5 = vld [vmem:[#allocation3 + $0x180] sm:$0xff]   ;;  %vm18645_vm3 = vmmov %vm18634_vm5 }
 0x384   : > { %12138 = vmatprep.mubr.bf16.mxu1 %v16574_v40  ;;  %12223 = vmatpush3.bf16.msra.mxu1 %v12689_v6  ;;  %v16888_v40 = vpop.f32.mrf.mxu0  ;;  %vm18646_vm6 = vmmov %vm18639_vm2 }
 0x385   : > { %12224 = vmatprep.subr.bf16.mxu1 %v12692_v3  ;;  %12281 = vmatpush3.bf16.msra.mxu0 %v12701_v44  ;;  %vm18647_vm0 = vmmov %vm18639_vm2 }
 0x386   : > { %vm18648_vm8 = vmmov %vm18645_vm3 }
 0x387   : > { %12195 = vmatmul.mubr.bf16.gmra.mxu0 %v16577_v52  ;;  %v11924_v9 = vpop.f32.mrf.mxu1 }
 0x388   : > { %12225 = vmatpush3.bf16.msra.mxu1 %v12692_v3  ;;  %12198 = vmatprep.mubr.bf16.mxu0 %v16580_v13  ;;  %v16893_v52 = vadd.f32 %v16727_v1, %v11924_v9 }
 0x389   : > { %12226 = vmatprep.subr.bf16.mxu1 %v12696_v20  ;;  %v6714_v49 = vpop.f32.mrf.mxu1 }
 0x38a   : > { %v16897_v13 = vadd.f32 %v16733_v12, %v6714_v49 }
 0x38b   : > { %12139 = vmatmul.mubr.bf16.gmra.mxu1 %v16588_v38  ;;  %v16899_v38 = vpop.f32.mrf.mxu0 }
 0x38c   : > { %12142 = vmatprep.mubr.bf16.mxu1 %v16600_v41  ;;  %12227 = vmatpush3.bf16.msra.mxu1 %v12696_v20  ;;  %v11925_v41 = vpop.f32.mrf.mxu1  ;;  %v12697_v20 = vld [vmem:[#allocation2 + $0x98] ss:$0 sps:$4 sm:$0x33]  }
 0x38d   : > { %12228 = vmatprep.subr.bf16.mxu1 %v12702_v5  ;;  %v16904_v47 = vadd.f32 %v16753_v8, %v11925_v41  ;;  %v16908_v1 = vpop.f32.mrf.mxu0  ;;  %v18630_v8 = vld [vmem:[#allocation48_spill] sm:$0xff]  ;;  %v8070_v31 = vshll.u32 %v12697_v20, 16 }
 0x38e   : > { %v16923_v24 = vpop.f32.mrf.mxu1 }
 0x38f   : > { %12199 = vmatmul.mubr.bf16.gmra.mxu0 %v16603_v37  ;;  %v8691_v37 = vld [vmem:[#allocation2 + $0x10] sm:$0xc]  ;;  %v16911_v12 = vpop.f32.mrf.mxu0 }
 0x390   : > { %12229 = vmatpush3.bf16.msra.mxu1 %v12702_v5  ;;  %12202 = vmatprep.mubr.bf16.mxu0 %v16607_v55  ;;  %v16915_v55 = vcombine.low %v8691_v37, %v16737_v26  ;;  %v9193_v37 = vshrl.u32 %v16739_v28, 16 }
 0x391   : > { %12318 = vmatprep.subr.bf16.mxu1 %v16890_v30  ;;  %v16921_v6 = vpop.f32.mrf.mxu0 }
 0x392   : > { %v9179_v44 = vshll.u32 %v16915_v55, 16 }
 0x393   : > { %12143 = vmatmul.mubr.bf16.gmra.mxu1 %v16619_v53  ;;  %v9184_v53 = vshrl.u32 %v16735_v11, 16  ;;  %v16928_v3 = vpop.f32.mrf.mxu0 }
 0x394   : > { %12146 = vmatprep.mubr.bf16.mxu1 %v16625_v17  ;;  %v9187_v17 = vshll.u32 %v16735_v11, 16  ;;  %v9181_v49 = vrot.slane %v9179_v44, 3 }
 0x395   : > { %v9186_v26 = vrot.slane %v9184_v53, 2  ;;  %v16943_v44 = vpop.f32.mrf.mxu0 }
 0x396   : > { %v9189_v48 = vrot.slane %v9187_v17, 3 }
 0x397   : > { %12203 = vmatmul.mubr.bf16.gmra.mxu0 %v16628_v29  ;;  %v9176_v29 = vshrl.u32 %v16915_v55, 16  ;;  %v16952_v39 = vpop.f32.mrf.mxu0 }
 0x398   : > { %12206 = vmatprep.mubr.bf16.mxu0 %v16631_v60  ;;  %v18631_v60 = vld [vmem:[#allocation42_spill] sm:$0xff]  ;;  %v9190_v53 = vor.u32 %v9189_v48, %v9186_v26  ;;  %v8067_v26 = vshrl.u32 %v12697_v20, 16  ;;  %v9195_v48 = vrot.slane %v9193_v37, 2 }
 0x399   : > { %v9178_v9 = vrot.slane %v9176_v29, 2  ;;  %v9205_v29 = vshll.u32 %v16741_v46, 16 }
 0x39b   : > { %12147 = vmatmul.mubr.bf16.gmra.mxu1 %v18629_v54  ;;  %v9196_v54 = vshll.u32 %v16739_v28, 16  ;;  %v9207_v50 = vrot.slane %v9205_v29, 3  ;;  %v8839_v29 = vrot.slane %v16735_v11, 2 }
 0x39c   : > { %12150 = vmatprep.mubr.bf16.mxu1 %v18630_v8 }
 0x39e   : > { %v11928_v5 = vpop.f32.mrf.mxu1 }
 0x39f   : > { %12207 = vmatmul.mubr.bf16.gmra.mxu0 %v18631_v60  ;;  %v16932_v41 = vadd.f32 %v16826_v19, %v11928_v5  ;;  %v8410_v19 = vrot.slane %v12697_v20, 2  ;;  %v9223_v20 = vshll.u32 %v16745_v21, 16 }
 0x3a0   : > { %12210 = vmatprep.mubr.bf16.mxu0 %v16656_v23  ;;  %v6730_v8 = vpop.f32.mrf.mxu1  ;;  %v9202_v23 = vshrl.u32 %v16741_v46, 16 }
 0x3a1   : > { %v16939_v17 = vadd.f32 %v16858_v58, %v6730_v8  ;;  %v9198_v58 = vrot.slane %v9196_v54, 3  ;;  %v9220_v54 = vshrl.u32 %v16745_v21, 16 }
 0x3a2   : > { %v11929_v60 = vpop.f32.mrf.mxu1  ;;  %v9204_v14 = vrot.slane %v9202_v23, 2  ;;  %v16960_v23 = vpop.f32.mrf.mxu0 }
 0x3a3   : > { %12151 = vmatmul.mubr.bf16.gmra.mxu1 %v16671_v34  ;;  %v9182_v34 = vor.u32 %v9181_v49, %v9178_v9  ;;  %v16946_v5 = vadd.f32 %v16870_v2, %v11929_v60  ;;  %v8069_v2 = vrot.slane %v8067_v26, 1  ;;  %v9199_v9 = vor.u32 %v9198_v58, %v9195_v48  ;;  %v18637_v48 = vld [vmem:[#allocation81_spill] sm:$0xff] }
 0x3a4   : > { %12154 = vmatprep.mubr.bf16.mxu1 %v16675_v42  ;;  %v8411_v42 = vsel %vm18633_vm10, %v18632_v57, %v8410_v19  ;;  %v9214_v57 = vshll.u32 %v16743_v59, 16  ;;  %v8072_v49 = vrot.slane %v8070_v31, 2  ;;  %v9208_v37 = vor.u32 %v9207_v50, %v9204_v14  ;;  %v16965_v26 = vpop.f32.mrf.mxu1  ;;  %v16967_v14 = vpop.f32.mrf.mxu0  ;;  %vm18649_vm10 = vmmov %vm18645_vm3 }
 0x3a5   : > { %v9191_v8 = vsel %vm18634_vm5, %v9182_v34, %v9190_v53  ;;  %v9213_v19 = vrot.slane %v9211_v16, 2  ;;  %v9225_v50 = vrot.slane %v9223_v20, 3  ;;  %v8838_v31 = vrot.slane %v16915_v55, 2  ;;  %vm18650_vm5 = vmmov %vm18647_vm0 }
 0x3a6   : > { %v9216_v60 = vrot.slane %v9214_v57, 3  ;;  %v8073_v34 = vor.u32 %v8072_v49, %v8069_v2  ;;  %v9232_v2 = vshll.u32 %v16747_v33, 16  ;;  %v9238_v57 = vshrl.u32 %v16749_v25, 16  ;;  %v16977_v55 = vpop.f32.mrf.mxu0 }
 0x3a7   : > { %12211 = vmatmul.mubr.bf16.gmra.mxu0 %v8411_v42  ;;  %v9209_v42 = vsel %vm18636_vm12, %v9199_v9, %v9208_v37  ;;  %v9241_v49 = vshll.u32 %v16749_v25, 16  ;;  %v8841_v20 = vrot.slane %v16739_v28, 2  ;;  %vm18653_vm12 = vmmov %vm18645_vm3 }
 0x3a8   : > { %12282 = vmatprep.mubr.bf16.mxu0 %v9191_v8  ;;  %v8074_v11 = vsel %vm18638_vm1, %v18637_v48, %v8073_v34  ;;  %v9217_v58 = vor.u32 %v9216_v60, %v9213_v19  ;;  %v9229_v8 = vshrl.u32 %v16747_v33, 16  ;;  %v9240_v48 = vrot.slane %v9238_v57, 2  ;;  %vm18654_vm1 = vmmov %vm18645_vm3 }
 0x3aa   : > { %v9218_v60 = vsel %vm18640_vm7, %v9208_v37, %v9217_v58  ;;  %v8842_v37 = vsel %vm18642_vm4, %v8839_v29, %v8841_v20  ;;  %vm18656_vm7 = vmmov %vm18647_vm0 }
 0x3ab   : > { %12155 = vmatmul.mubr.bf16.gmra.mxu1 %v16689_v61  ;;  %v9200_v61 = vsel %vm18635_vm13, %v9190_v53, %v9199_v9  ;;  %v8840_v53 = vsel %vm18639_vm2, %v8838_v31, %v8839_v29  ;;  %v12713_v29 = vld [vmem:[#allocation3 + $0x228] sm:$0xff]   ;;  %vm18651_vm13 = vmmov %vm18647_vm0 }
 0x3ac   : > { %12158 = vmatprep.mubr.bf16.mxu1 %v16696_v0  ;;  %v9222_v0 = vrot.slane %v9220_v54, 2  ;;  %vm18655_vm2 = vmmov %vm18647_vm0 }
 0x3ad   : > { %vm18660_vm4 = vmmov %vm18654_vm1 }
 0x3ae   : > { %v9226_v16 = vor.u32 %v9225_v50, %v9222_v0  ;;  %v9234_v0 = vrot.slane %v9232_v2, 3 }
 0x3af   : > { %12283 = vmatmul.mubr.bf16.vlgmr.msra.gmra.mxu0 %v9200_v61  ;;  %v8843_v61 = vrot.slane %v16741_v46, 2  ;;  %v12709_v46 = vld [vmem:[#allocation3 + $0x230] sm:$0xff]  }
 0x3b0   : > { %12286 = vmatprep.mubr.bf16.mxu0 %v9209_v42  ;;  %v11932_v9 = vpop.f32.mrf.mxu1  ;;  %v9231_v42 = vrot.slane %v9229_v8, 2  ;;  %v9227_v50 = vsel %vm18641_vm11, %v9217_v58, %v9226_v16  ;;  %v9247_v8 = vshrl.u32 %v16755_v18, 16  ;;  %v9250_v58 = vshll.u32 %v16755_v18, 16  ;;  %vm18659_vm11 = vmmov %vm18654_vm1 }
 0x3b1   : > { %v16980_v54 = vadd.f32 %v16881_v35, %v11932_v9  ;;  %v16989_v35 = vpop.f32.mrf.mxu0  ;;  %v9256_v9 = vshrl.u32 %v16759_v27, 16 }
 0x3b2   : > { %v6746_v19 = vpop.f32.mrf.mxu1 }
 0x3b3   : > { %12159 = vmatmul.mubr.bf16.gmra.mxu1 %v8074_v11  ;;  %v16986_v34 = vadd.f32 %v16888_v40, %v6746_v19  ;;  %v9243_v11 = vrot.slane %v9241_v49, 3  ;;  %v8844_v40 = vsel %vm18643_vm9, %v8841_v20, %v8843_v61  ;;  %v17001_v57 = vpop.f32.mrf.mxu0  ;;  %v8845_v49 = vrot.slane %v16743_v59, 2  ;;  %vm18661_vm9 = vmmov %vm18647_vm0 }
 0x3b4   : > { %12230 = vmatprep.mubr.bf16.mxu1 %v8840_v53  ;;  %v11933_v31 = vpop.f32.mrf.mxu1  ;;  %v9235_v53 = vor.u32 %v9234_v0, %v9231_v42  ;;  %v8847_v19 = vrot.slane %v16745_v21, 2  ;;  %v9249_v42 = vrot.slane %v9247_v8, 2  ;;  %v9252_v0 = vrot.slane %v9250_v58, 3 }
 0x3b5   : > { %v16992_v28 = vadd.f32 %v16899_v38, %v11933_v31  ;;  %v9244_v2 = vor.u32 %v9243_v11, %v9240_v48  ;;  %v9259_v38 = vshll.u32 %v16759_v27, 16  ;;  %v17009_v48 = vpop.f32.mrf.mxu0  ;;  %v12716_v11 = vld [vmem:[#allocation3 + $0x220] sm:$0xff]   ;;  %v8846_v59 = vsel %vm18646_vm6, %v8843_v61, %v8845_v49  ;;  %vm18666_vm6 = vmmov %vm18654_vm1 }
 0x3b6   : > { %v17004_v20 = vpop.f32.mrf.mxu1  ;;  %v8848_v21 = vsel %vm18647_vm0, %v8845_v49, %v8847_v19  ;;  %v9268_v8 = vshll.u32 %v16761_v32, 16  ;;  %v9277_v61 = vshll.u32 %v16764_v51, 16  ;;  %v12719_v49 = vld [vmem:[#allocation3 + $0x218] sm:$0xff]  }
 0x3b7   : > { %12287 = vmatmul.mubr.bf16.gmra.mxu0 %v9218_v60  ;;  %v9236_v60 = vsel %vm18644_vm15, %v9226_v16, %v9235_v53  ;;  %v9261_v31 = vrot.slane %v9259_v38, 3  ;;  %v9253_v16 = vor.u32 %v9252_v0, %v9249_v42  ;;  %v17018_v58 = vpop.f32.mrf.mxu0  ;;  %v8849_v42 = vrot.slane %v16747_v33, 2  ;;  %v12722_v33 = vld [vmem:[#allocation3 + $0x210] sm:$0xff]   ;;  %vm18662_vm15 = vmmov %vm18647_vm0 }
 0x3b8   : > { %12290 = vmatprep.mubr.bf16.mxu0 %v9227_v50  ;;  %v9258_v50 = vrot.slane %v9256_v9, 2  ;;  %v9274_v9 = vshrl.u32 %v16764_v51, 16 }
 0x3bb   : > { %12231 = vmatmul.mubr.bf16.vlgmr.msra.gmra.mxu1 %v8842_v37 }
 0x3bc   : > { %12234 = vmatprep.mubr.bf16.mxu1 %v8844_v40  ;;  %12319 = vmatpush3.bf16.msra.mxu1 %v16890_v30  ;;  %v9245_v30 = vsel %vm18645_vm3, %v9235_v53, %v9244_v2  ;;  %v9265_v40 = vshrl.u32 %v16761_v32, 16  ;;  %v9262_v53 = vor.u32 %v9261_v31, %v9258_v50  ;;  %v9270_v50 = vrot.slane %v9268_v8, 3  ;;  %vm18665_vm3 = vmmov %vm18654_vm1 }
 0x3bd   : > { %12320 = vmatprep.subr.bf16.mxu1 %v12709_v46 }
 0x3bf   : > { %12291 = vmatmul.mubr.bf16.gmra.mxu0 %v9236_v60  ;;  %v11936_v37 = vpop.f32.mrf.mxu1 }
 0x3c0   : > { %12321 = vmatpush3.bf16.msra.mxu1 %v12709_v46  ;;  %12294 = vmatprep.mubr.bf16.mxu0 %v9245_v30  ;;  %v17016_v46 = vadd.f32 %v16911_v12, %v11936_v37  ;;  %v8851_v12 = vrot.slane %v16749_v25, 2  ;;  %v9254_v30 = vsel %vm18648_vm8, %v9244_v2, %v9253_v16  ;;  %v17032_v37 = vpop.f32.mrf.mxu0  ;;  %v8850_v2 = vsel %vm18650_vm5, %v8847_v19, %v8849_v42  ;;  %vm18667_vm8 = vmmov %vm18647_vm0 }
 0x3c1   : > { %12322 = vmatprep.subr.bf16.mxu1 %v12713_v29  ;;  %v6762_v38 = vpop.f32.mrf.mxu1  ;;  %v9295_v19 = vshll.u32 %v16772_v7, 16  ;;  %vm18669_vm5 = vmmov %vm18654_vm1 }
 0x3c2   : > { %v17023_v60 = vadd.f32 %v16921_v6, %v6762_v38  ;;  %v9279_v6 = vrot.slane %v9277_v61, 3 }
 0x3c3   : > { %12235 = vmatmul.mubr.bf16.gmra.mxu1 %v8846_v59  ;;  %v11937_v0 = vpop.f32.mrf.mxu1  ;;  %v9263_v59 = vsel %vm18649_vm10, %v9253_v16, %v9262_v53  ;;  %v18652_v16 = vld [vmem:[#allocation54_spill] sm:$0xff]  ;;  %vm18668_vm10 = vmmov %vm18654_vm1 }
 0x3c4   : > { %12238 = vmatprep.mubr.bf16.mxu1 %v8848_v21  ;;  %12323 = vmatpush3.bf16.msra.mxu1 %v12713_v29  ;;  %v9267_v29 = vrot.slane %v9265_v40, 2  ;;  %v17029_v31 = vadd.f32 %v16928_v3, %v11937_v0  ;;  %v9276_v21 = vrot.slane %v9274_v9, 2  ;;  %v8852_v3 = vsel %vm18651_vm13, %v8849_v42, %v8851_v12  ;;  %v12725_v42 = vld [vmem:[#allocation3 + $0x208] sm:$0xff]   ;;  %vm18670_vm13 = vmmov %vm18647_vm0 }
 0x3c5   : > { %12324 = vmatprep.subr.bf16.mxu1 %v12716_v11  ;;  %v6765_v38 = vpop.f32.mrf.mxu1  ;;  %v9283_v0 = vshrl.u32 %v18652_v16, 16  ;;  %v9286_v9 = vshll.u32 %v18652_v16, 16 }
 0x3c6   : > { %v17035_v25 = vadd.f32 %v16943_v44, %v6765_v38  ;;  %v9271_v8 = vor.u32 %v9270_v50, %v9267_v29  ;;  %v9280_v61 = vor.u32 %v9279_v6, %v9276_v21  ;;  %v9292_v44 = vshrl.u32 %v16772_v7, 16 }
 0x3c7   : > { %12295 = vmatmul.mubr.bf16.gmra.mxu0 %v9254_v30  ;;  %v11940_v40 = vpop.f32.mrf.mxu1  ;;  %v17044_v30 = vpop.f32.mrf.mxu0  ;;  %v8853_v50 = vrot.slane %v16755_v18, 2  ;;  %v9285_v6 = vrot.slane %v9283_v0, 2  ;;  %v12727_v18 = vld [vmem:[#allocation3 + $0x200] sm:$0xff]  }
 0x3c8   : > { %12325 = vmatpush3.bf16.msra.mxu1 %v12716_v11  ;;  %12298 = vmatprep.mubr.bf16.mxu0 %v9263_v59  ;;  %v17042_v11 = vadd.f32 %v16952_v39, %v11940_v40  ;;  %v8855_v39 = vrot.slane %v16759_v27, 2  ;;  %v9272_v21 = vsel %vm18653_vm12, %v9262_v53, %v9271_v8  ;;  %v9294_v43 = vrot.slane %v9292_v44, 2  ;;  %vm18671_vm12 = vmmov %vm18647_vm0 }
 0x3c9   : > { %12326 = vmatprep.subr.bf16.mxu1 %v12719_v49  ;;  %v6778_v59 = vpop.f32.mrf.mxu1  ;;  %v8854_v53 = vsel %vm18655_vm2, %v8851_v12, %v8853_v50  ;;  %v9304_v44 = vshll.u32 %v16774_v10, 16  ;;  %vm18673_vm2 = vmmov %vm18647_vm0 }
 0x3ca   : > { %v17049_v29 = vadd.f32 %v16960_v23, %v6778_v59  ;;  %v9297_v23 = vrot.slane %v9295_v19, 3 }
 0x3cb   : > { %12239 = vmatmul.mubr.bf16.gmra.mxu1 %v8850_v2  ;;  %v11941_v38 = vpop.f32.mrf.mxu1  ;;  %v9288_v2 = vrot.slane %v9286_v9, 3 }
 0x3cc   : > { %12242 = vmatprep.mubr.bf16.mxu1 %v8852_v3  ;;  %12327 = vmatpush3.bf16.msra.mxu1 %v12719_v49  ;;  %v17055_v40 = vadd.f32 %v16967_v14, %v11941_v38  ;;  %v9281_v49 = vsel %vm18654_vm1, %v9271_v8, %v9280_v61  ;;  %v17058_v3 = vpop.f32.mrf.mxu0  ;;  %v8856_v14 = vsel %vm18656_vm7, %v8853_v50, %v8855_v39  ;;  %v9301_v8 = vshrl.u32 %v16774_v10, 16  ;;  %vm18674_vm7 = vmmov %vm18647_vm0 }
 0x3cd   : > { %12328 = vmatprep.subr.bf16.mxu1 %v12722_v33  ;;  %v6781_v59 = vpop.f32.mrf.mxu1  ;;  %v9289_v9 = vor.u32 %v9288_v2, %v9285_v6  ;;  %v9298_v38 = vor.u32 %v9297_v23, %v9294_v43  ;;  %v8857_v6 = vrot.slane %v16761_v32, 2 }
 0x3ce   : > { %v17061_v27 = vadd.f32 %v16977_v55, %v6781_v59  ;;  %v7056_v19 = vpop.f32.mrf.mxu0  ;;  %v8859_v59 = vrot.slane %v16764_v51, 2 }
 0x3cf   : > { %12299 = vmatmul.mubr.bf16.gmra.mxu0 %v9272_v21  ;;  %v11944_v0 = vpop.f32.mrf.mxu1  ;;  %v18658_v21 = vld [vmem:[#allocation45_spill] sm:$0xff]  ;;  %v8858_v51 = vsel %vm18661_vm9, %v8855_v39, %v8857_v6  ;;  %vm10008_vm9 = vcmask 64512  }
 0x3d0   : > { %12329 = vmatpush3.bf16.msra.mxu1 %v12722_v33  ;;  %12302 = vmatprep.mubr.bf16.mxu0 %v9281_v49  ;;  %v17068_v33 = vadd.f32 %v16989_v35, %v11944_v0  ;;  %v9310_v55 = vshrl.u32 %v18658_v21, 16  ;;  %v9313_v49 = vshll.u32 %v18658_v21, 16  ;;  %v9290_v35 = vsel %vm18659_vm11, %v9280_v61, %v9289_v9  ;;  %vm18676_vm11 = vmmov %vm18647_vm0 }
 0x3d1   : > { %12330 = vmatprep.subr.bf16.mxu1 %v12725_v42  ;;  %v6794_v12 = vpop.f32.mrf.mxu1  ;;  %v9306_v0 = vrot.slane %v9304_v44, 3 }
 0x3d2   : > { %18657 = vst [vmem:[#allocation19_spill] sm:$0xff] %v17068_v33  ;;  %v17073_v50 = vadd.f32 %v17001_v57, %v6794_v12  ;;  %v9315_v33 = vrot.slane %v9313_v49, 3  ;;  %v9319_v12 = vshrl.u32 %v16790_v4, 16 }
 0x3d3   : > { %12243 = vmatmul.mubr.bf16.gmra.mxu1 %v8854_v53  ;;  %v11945_v2 = vpop.f32.mrf.mxu1  ;;  %v9303_v53 = vrot.slane %v9301_v8, 2  ;;  %v12004_v23 = vpop.f32.mrf.mxu0 }
 0x3d4   : > { %12246 = vmatprep.mubr.bf16.mxu1 %v8856_v14  ;;  %12331 = vmatpush3.bf16.msra.mxu1 %v12725_v42  ;;  %v17079_v43 = vadd.f32 %v17009_v48, %v11945_v2  ;;  %v9299_v42 = vsel %vm18660_vm4, %v9289_v9, %v9298_v38  ;;  %v9312_v14 = vrot.slane %v9310_v55, 2  ;;  %v8860_v48 = vsel %vm18662_vm15, %v8857_v6, %v8859_v59 }
 0x3d5   : > { %12332 = vmatprep.subr.bf16.mxu1 %v12727_v18  ;;  %v6797_v57 = vpop.f32.mrf.mxu1  ;;  %v7069_v61 = vpop.f32.mrf.mxu0  ;;  %v9307_v44 = vor.u32 %v9306_v0, %v9303_v53  ;;  %v9322_v9 = vshll.u32 %v16790_v4, 16  ;;  %v9328_v6 = vshrl.u32 %v16799_v22, 16  ;;  %v9331_v53 = vshll.u32 %v16799_v22, 16 }
 0x3d6   : > { %v17083_v32 = vadd.f32 %v17018_v58, %v6797_v57  ;;  %v9316_v49 = vor.u32 %v9315_v33, %v9312_v14  ;;  %v9321_v57 = vrot.slane %v9319_v12, 2  ;;  %vm10026_vm4 = vcmask 64514  }
 0x3d7   : > { %12303 = vmatmul.mubr.bf16.gmra.mxu0 %v9290_v35  ;;  %v11948_v8 = vpop.f32.mrf.mxu1  ;;  %v8861_v35 = vrot.slane %v18652_v16, 2  ;;  %vm10065_vm15 = vcmask 64518  }
 0x3d8   : > { %12333 = vmatpush3.bf16.msra.mxu1 %v12727_v18  ;;  %12306 = vmatprep.mubr.bf16.mxu0 %v9299_v42  ;;  %v17090_v55 = vadd.f32 %v17032_v37, %v11948_v8  ;;  %v12005_v18 = vpop.f32.mrf.mxu0  ;;  %v8863_v42 = vrot.slane %v16772_v7, 2  ;;  %v9308_v37 = vsel %vm18665_vm3, %v9298_v38, %v9307_v44  ;;  %v9333_v7 = vrot.slane %v9331_v53, 3 }
 0x3d9   : > { %v6810_v58 = vpop.f32.mrf.mxu1  ;;  %vm10035_vm3 = vcmask 1043456  }
 0x3da   : > { %18663 = vst [vmem:[#allocation71_spill] sm:$0xff] %v17090_v55  ;;  %v17093_v2 = vadd.f32 %v17044_v30, %v6810_v58  ;;  %v7072_v39 = vpop.f32.mrf.mxu0  ;;  %v9317_v30 = vsel %vm18666_vm6, %v9307_v44, %v9316_v49  ;;  %v8864_v38 = vsel %vm18667_vm8, %v8861_v35, %v8863_v42  ;;  %vm10046_vm6 = vcmask 64516  }
 0x3db   : > { %12247 = vmatmul.mubr.bf16.gmra.mxu1 %v8858_v51  ;;  %v11949_v0 = vpop.f32.mrf.mxu1  ;;  %v9324_v51 = vrot.slane %v9322_v9, 3  ;;  %v9340_v9 = vshll.u32 %v16811_v15, 16  ;;  %vm18704_vm8 = vcmask 60416  }
 0x3dc   : > { %12250 = vmatprep.mubr.bf16.mxu1 %v8860_v48  ;;  %18664 = vst [vmem:[#allocation61_spill] sm:$0xff] %v17093_v2  ;;  %v17101_v33 = vadd.f32 %v17058_v3, %v11949_v0  ;;  %v12076_v14 = vpop.f32.mrf.mxu0  ;;  %v8862_v48 = vsel %vm18647_vm0, %v8859_v59, %v8861_v35  ;;  %v9330_v2 = vrot.slane %v9328_v6, 2  ;;  %v9337_v3 = vshrl.u32 %v16811_v15, 16 }
 0x3dd   : > { %v6813_v8 = vpop.f32.mrf.mxu1  ;;  %v9325_v12 = vor.u32 %v9324_v51, %v9321_v57  ;;  %v8865_v6 = vrot.slane %v16774_v10, 2  ;;  %v9342_v51 = vrot.slane %v9340_v9, 3 }
 0x3de   : > { %v17104_v16 = vadd.f32 %v7056_v19, %v6813_v8  ;;  %v7705_v58 = vpop.f32.mrf.mxu0  ;;  %v9334_v53 = vor.u32 %v9333_v7, %v9330_v2  ;;  %v8867_v8 = vrot.slane %v18658_v21, 2  ;;  %v9339_v57 = vrot.slane %v9337_v3, 2 }
 0x3df   : > { %12307 = vmatmul.mubr.bf16.gmra.mxu0 %v9308_v37  ;;  %v11952_v55 = vpop.f32.mrf.mxu1  ;;  %v9326_v35 = vsel %vm18668_vm10, %v9316_v49, %v9325_v12  ;;  %v8866_v10 = vsel %vm18670_vm13, %v8863_v42, %v8865_v6  ;;  %vm18705_vm10 = vcmask 58368   ;;  %vm18706_vm13 = vmmov %vm18704_vm8 }
 0x3e0   : > { %12310 = vmatprep.mubr.bf16.mxu0 %v9317_v30  ;;  %v17110_v0 = vadd.f32 %v12004_v23, %v11952_v55  ;;  %v12077_v44 = vpop.f32.mrf.mxu0  ;;  %v9335_v23 = vsel %vm18669_vm5, %v9325_v12, %v9334_v53  ;;  %v8868_v21 = vsel %vm18671_vm12, %v8865_v6, %v8867_v8  ;;  %v9343_v49 = vor.u32 %v9342_v51, %v9339_v57  ;;  %vm18707_vm12 = vmmov %vm18647_vm0 }
 0x3e1   : > { %v6826_v19 = vpop.f32.mrf.mxu1  ;;  %vm10068_vm5 = vcmask 62464  }
 0x3e2   : > { %v17112_v37 = vadd.f32 %v7069_v61, %v6826_v19  ;;  %v7708_v59 = vpop.f32.mrf.mxu0  ;;  %v8869_v19 = vrot.slane %v16790_v4, 2  ;;  %v9344_v42 = vsel %vm18654_vm1, %v9334_v53, %v9343_v49  ;;  %vm18708_vm1 = vmmov %vm18705_vm10 }
 0x3e3   : > { %12251 = vmatmul.mubr.bf16.gmra.mxu1 %v8862_v48  ;;  %v11953_v30 = vpop.f32.mrf.mxu1 }
 0x3e4   : > { %12254 = vmatprep.mubr.bf16.mxu1 %v8864_v38  ;;  %v17117_v48 = vadd.f32 %v12005_v18, %v11953_v30  ;;  %v12080_v15 = vpop.f32.mrf.mxu0  ;;  %v8870_v4 = vsel %vm18673_vm2, %v8867_v8, %v8869_v19  ;;  %vm18709_vm2 = vmmov %vm18708_vm1 }
 0x3e5   : > { %v6829_v55 = vpop.f32.mrf.mxu1 }
 0x3e6   : > { %v17120_v61 = vadd.f32 %v7072_v39, %v6829_v55  ;;  %v7721_v2 = vpop.f32.mrf.mxu0 }
 0x3e7   : > { %12311 = vmatmul.mubr.bf16.gmra.mxu0 %v9326_v35  ;;  %v12024_v7 = vpop.f32.mrf.mxu1  ;;  %v18672_v35 = vld [vmem:[#allocation53_spill] sm:$0xff] }
 0x3e8   : > { %12314 = vmatprep.mubr.bf16.mxu0 %v9335_v23  ;;  %v7387_v38 = vadd.f32 %v12024_v7, %v16864_v45  ;;  %v12081_v18 = vpop.f32.mrf.mxu0  ;;  %v6945_v23 = vadd.f32 %v18672_v35, %v16884_v63 }
 0x3e9   : > { %v7242_v3 = vpop.f32.mrf.mxu1 }
 0x3ea   : > { %v7385_v9 = vadd.f32 %v7242_v3, %v16867_v56  ;;  %v7724_v12 = vpop.f32.mrf.mxu0  ;;  %v17127_v39 = vadd.f32 %v12076_v14, %v7387_v38  ;;  %v8871_v56 = vrot.slane %v16799_v22, 2 }
 0x3eb   : > { %12255 = vmatmul.mubr.bf16.gmra.mxu1 %v8866_v10  ;;  %v12025_v30 = vpop.f32.mrf.mxu1  ;;  %v12728_v10 = vld [vmem:[#allocation2 + $0xa0] ss:$0 sps:$4 sm:$0x33]  }
 0x3ec   : > { %12258 = vmatprep.mubr.bf16.mxu1 %v8868_v21  ;;  %v7388_v6 = vadd.f32 %v12025_v30, %v16874_v36  ;;  %v12084_v57 = vpop.f32.mrf.mxu0  ;;  %v17133_v45 = vadd.f32 %v7705_v58, %v7385_v9  ;;  %v8872_v63 = vsel %vm18674_vm7, %v8869_v19, %v8871_v56  ;;  %v8873_v3 = vrot.slane %v12728_v10, 2  ;;  %vm18710_vm7 = vmmov %vm18647_vm0 }
 0x3ed   : > { %v7245_v51 = vpop.f32.mrf.mxu1 }
 0x3ee   : > { %v7386_v55 = vadd.f32 %v7245_v51, %v6945_v23  ;;  %v7737_v14 = vpop.f32.mrf.mxu0  ;;  %v17137_v7 = vadd.f32 %v12077_v44, %v7388_v6  ;;  %v18675_v44 = vld [vmem:[#allocation46_spill] sm:$0xff] }
 0x3ef   : > { %12315 = vmatmul.mubr.bf16.gmra.mxu0 %v9344_v42  ;;  %v12028_v53 = vpop.f32.mrf.mxu1  ;;  %v6961_v30 = vadd.f32 %v18675_v44, %v16923_v24  ;;  %v18678_v44 = vld [vmem:[#allocation55_spill] sm:$0xff] }
 0x3f0   : > { %v7391_v36 = vadd.f32 %v12028_v53, %v16893_v52  ;;  %v12085_v21 = vpop.f32.mrf.mxu0  ;;  %v17141_v58 = vadd.f32 %v7708_v59, %v7386_v55  ;;  %v8874_v59 = vsel %vm18676_vm11, %v8871_v56, %v8873_v3  ;;  %v18677_v55 = vld [vmem:[#allocation10_spill] sm:$0xff]  ;;  %vm18711_vm11 = vmmov %vm18704_vm8 }
 0x3f1   : > { %v7258_v49 = vpop.f32.mrf.mxu1 }
 0x3f2   : > { %v7389_v22 = vadd.f32 %v7258_v49, %v16897_v13  ;;  %v7740_v38 = vpop.f32.mrf.mxu0  ;;  %v17144_v8 = vadd.f32 %v12080_v15, %v7391_v36 }
 0x3f3   : > { %12259 = vmatmul.mubr.bf16.gmra.mxu1 %v8870_v4  ;;  %v12029_v9 = vpop.f32.mrf.mxu1 }
 0x3f4   : > { %12262 = vmatprep.mubr.bf16.mxu1 %v8872_v63  ;;  %v7392_v42 = vadd.f32 %v12029_v9, %v16904_v47  ;;  %v12088_v19 = vpop.f32.mrf.mxu0  ;;  %v17149_v35 = vadd.f32 %v7721_v2, %v7389_v22 }
 0x3f5   : > { %v7261_v52 = vpop.f32.mrf.mxu1 }
 0x3f6   : > { %v7390_v23 = vadd.f32 %v7261_v52, %v6961_v30  ;;  %v7753_v6 = vpop.f32.mrf.mxu0  ;;  %v17152_v51 = vadd.f32 %v12081_v18, %v7392_v42  ;;  %v6977_v18 = vadd.f32 %v16878_v62, %v16965_v26 }
 0x3f7   : > { %v12032_v13 = vpop.f32.mrf.mxu1 }
 0x3f8   : > { %v7395_v15 = vadd.f32 %v12032_v13, %v16932_v41  ;;  %v12089_v4 = vpop.f32.mrf.mxu0  ;;  %v17156_v24 = vadd.f32 %v7724_v12, %v7390_v23 }
 0x3f9   : > { %v7274_v47 = vpop.f32.mrf.mxu1 }
 0x3fa   : > { %v7393_v2 = vadd.f32 %v7274_v47, %v16939_v17  ;;  %v7756_v10 = vpop.f32.mrf.mxu0  ;;  %v17159_v53 = vadd.f32 %v12084_v57, %v7395_v15  ;;  %v18679_v57 = vld [vmem:[#allocation6_spill] sm:$0xff] }
 0x3fb   : > { %12263 = vmatmul.mubr.bf16.gmra.mxu1 %v8874_v59  ;;  %v12033_v63 = vpop.f32.mrf.mxu1 }
 0x3fc   : > { %12334 = vmatprep.mubr.bf16.mxu1 %v18677_v55  ;;  %v7396_v56 = vadd.f32 %v12033_v63, %v16946_v5  ;;  %v12092_v36 = vpop.f32.mrf.mxu0  ;;  %v17164_v49 = vadd.f32 %v7737_v14, %v7393_v2  ;;  %v18680_v2 = vld [vmem:[#allocation57_spill] sm:$0xff] }
 0x3fd   : > { %v7277_v41 = vpop.f32.mrf.mxu1 }
 0x3fe   : > { %v7394_v22 = vadd.f32 %v7277_v41, %v6977_v18  ;;  %v7769_v3 = vpop.f32.mrf.mxu0  ;;  %v17166_v12 = vadd.f32 %v12085_v21, %v7396_v56  ;;  %v6993_v21 = vadd.f32 %v16908_v1, %v17004_v20 }
 0x3ff   : > { %v12036_v9 = vpop.f32.mrf.mxu1 }
 0x400   : > { %v7399_v17 = vadd.f32 %v12036_v9, %v16980_v54  ;;  %v12093_v30 = vpop.f32.mrf.mxu0  ;;  %v17171_v42 = vadd.f32 %v7740_v38, %v7394_v22 }
 0x401   : > { %v7290_v62 = vpop.f32.mrf.mxu1 }
 0x402   : > { %v7397_v5 = vadd.f32 %v7290_v62, %v16986_v34  ;;  %v7772_v26 = vpop.f32.mrf.mxu0  ;;  %v17174_v14 = vadd.f32 %v12088_v19, %v7399_v17  ;;  %v18681_v19 = vld [vmem:[#allocation56_spill] sm:$0xff]  ;;  %v18683_v62 = vld [vmem:[#allocation18_spill] sm:$0xff] }
 0x403   : > { %12335 = vmatmul.mubr.bf16.vlgmr.msra.gmra.mxu1 %v18678_v44  ;;  %v12037_v52 = vpop.f32.mrf.mxu1 }
 0x404   : > { %12338 = vmatprep.mubr.bf16.mxu1 %v18679_v57  ;;  %v7400_v23 = vadd.f32 %v12037_v52, %v16992_v28  ;;  %v17179_v13 = vadd.f32 %v7753_v6, %v7397_v5  ;;  %v18682_v57 = vld [vmem:[#allocation49_spill] sm:$0xff] }
 0x405   : > { %v7293_v54 = vpop.f32.mrf.mxu1 }
 0x406   : > { %v7398_v15 = vadd.f32 %v7293_v54, %v6993_v21  ;;  %v17181_v38 = vadd.f32 %v12089_v4, %v7400_v23 }
 0x407   : > { %v12096_v59 = vpop.f32.mrf.mxu0 }
 0x408   : > { %v17186_v18 = vadd.f32 %v7756_v10, %v7398_v15 }
 0x409   : > { %v7785_v55 = vpop.f32.mrf.mxu0 }
 0x40b   : > { %v12040_v47 = vpop.f32.mrf.mxu1  ;;  %12339 = vmatmul.mubr.bf16.gmra.mxu1 %v18680_v2  ;;  %v12097_v63 = vpop.f32.mrf.mxu0 }
 0x40c   : > { %v7403_v34 = vadd.f32 %v12040_v47, %v17016_v46  ;;  %12342 = vmatprep.mubr.bf16.mxu1 %v18681_v19  ;;  %v18685_v19 = vld [vmem:[#allocation19_spill] sm:$0xff] }
 0x40d   : > { %v7306_v1 = vpop.f32.mrf.mxu1  ;;  %v7788_v20 = vpop.f32.mrf.mxu0 }
 0x40e   : > { %v7401_v28 = vadd.f32 %v7306_v1, %v17023_v60  ;;  %v17189_v6 = vadd.f32 %v12092_v36, %v7403_v34  ;;  %v18684_v34 = vld [vmem:[#allocation13_spill] sm:$0xff]  ;;  %v18686_v1 = vld [vmem:[#allocation58_spill] sm:$0xff] }
 0x40f   : > { %v12041_v56 = vpop.f32.mrf.mxu1  ;;  %v12100_v41 = vpop.f32.mrf.mxu0 }
 0x410   : > { %v7404_v4 = vadd.f32 %v12041_v56, %v17029_v31  ;;  %v17192_v22 = vadd.f32 %v7769_v3, %v7401_v28 }
 0x411   : > { %v7309_v9 = vpop.f32.mrf.mxu1  ;;  %v7801_v44 = vpop.f32.mrf.mxu0 }
 0x412   : > { %v7402_v46 = vadd.f32 %v7309_v9, %v17035_v25  ;;  %v17195_v17 = vadd.f32 %v12093_v30, %v7404_v4 }
 0x413   : > { %v12044_v10 = vpop.f32.mrf.mxu1  ;;  %12343 = vmatmul.mubr.bf16.gmra.mxu1 %v18682_v57  ;;  %v12101_v36 = vpop.f32.mrf.mxu0 }
 0x414   : > { %v7407_v60 = vadd.f32 %v12044_v10, %v17042_v11  ;;  %12346 = vmatprep.mubr.bf16.mxu1 %v18683_v62  ;;  %v17200_v5 = vadd.f32 %v7772_v26, %v7402_v46 }
 0x415   : > { %v7322_v31 = vpop.f32.mrf.mxu1  ;;  %v7804_v52 = vpop.f32.mrf.mxu0 }
 0x416   : > { %v7405_v3 = vadd.f32 %v7322_v31, %v17049_v29  ;;  %v17203_v21 = vadd.f32 %v12096_v59, %v7407_v60  ;;  %v18687_v31 = vld [vmem:[#allocation67_spill] sm:$0xff] }
 0x417   : > { %v12045_v25 = vpop.f32.mrf.mxu1  ;;  %v12104_v23 = vpop.f32.mrf.mxu0 }
 0x418   : > { %v7408_v30 = vadd.f32 %v12045_v25, %v17055_v40  ;;  %v17206_v54 = vadd.f32 %v7785_v55, %v7405_v3  ;;  %v18688_v3 = vld [vmem:[#allocation71_spill] sm:$0xff]  ;;  %v18689_v25 = vld [vmem:[#allocation60_spill] sm:$0xff] }
 0x419   : > { %v7325_v15 = vpop.f32.mrf.mxu1  ;;  %v7817_v47 = vpop.f32.mrf.mxu0 }
 0x41a   : > { %v7406_v11 = vadd.f32 %v7325_v15, %v17061_v27  ;;  %v17209_v2 = vadd.f32 %v12097_v63, %v7408_v30  ;;  %v18690_v15 = vld [vmem:[#allocation61_spill] sm:$0xff] }
 0x41b   : > { %v12048_v26 = vpop.f32.mrf.mxu1  ;;  %12347 = vmatmul.mubr.bf16.gmra.mxu1 %v18684_v34  ;;  %v12105_v59 = vpop.f32.mrf.mxu0 }
 0x41c   : > { %v7411_v29 = vadd.f32 %v12048_v26, %v18685_v19  ;;  %12350 = vmatprep.mubr.bf16.mxu1 %v18686_v1  ;;  %v17214_v28 = vadd.f32 %v7788_v20, %v7406_v11 }
 0x41d   : > { %v7338_v40 = vpop.f32.mrf.mxu1  ;;  %v7820_v56 = vpop.f32.mrf.mxu0 }
 0x41e   : > { %v7409_v55 = vadd.f32 %v7338_v40, %v17073_v50  ;;  %v17217_v4 = vadd.f32 %v12100_v41, %v7411_v29 }
 0x41f   : > { %v12049_v27 = vpop.f32.mrf.mxu1  ;;  %v12108_v9 = vpop.f32.mrf.mxu0 }
 0x420   : > { %v7412_v63 = vadd.f32 %v12049_v27, %v17079_v43  ;;  %v17220_v46 = vadd.f32 %v7801_v44, %v7409_v55  ;;  %v18691_v27 = vld [vmem:[#allocation29_spill] sm:$0xff] }
 0x421   : > { %v7341_v10 = vpop.f32.mrf.mxu1  ;;  %v7833_v60 = vpop.f32.mrf.mxu0 }
 0x422   : > { %v7410_v57 = vadd.f32 %v7341_v10, %v17083_v32  ;;  %v17223_v62 = vadd.f32 %v12101_v36, %v7412_v63  ;;  %v18692_v10 = vld [vmem:[#allocation9_spill] sm:$0xff] }
 0x423   : > { %v12052_v20 = vpop.f32.mrf.mxu1  ;;  %12351 = vmatmul.mubr.bf16.gmra.mxu1 %v18687_v31  ;;  %v12109_v41 = vpop.f32.mrf.mxu0 }
 0x424   : > { %v7415_v50 = vadd.f32 %v12052_v20, %v18688_v3  ;;  %12354 = vmatprep.mubr.bf16.mxu1 %v18689_v25  ;;  %v17228_v30 = vadd.f32 %v7804_v52, %v7410_v57 }
 0x425   : > { %v7354_v43 = vpop.f32.mrf.mxu1  ;;  %v7836_v11 = vpop.f32.mrf.mxu0 }
 0x426   : > { %v7413_v44 = vadd.f32 %v7354_v43, %v18690_v15  ;;  %v17231_v26 = vadd.f32 %v12104_v23, %v7415_v50 }
 0x427   : > { %v12053_v32 = vpop.f32.mrf.mxu1  ;;  %v12180_v34 = vpop.f32.mrf.mxu0 }
 0x428   : > { %v7416_v36 = vadd.f32 %v12053_v32, %v17101_v33  ;;  %v17234_v19 = vadd.f32 %v7817_v47, %v7413_v44  ;;  %v18693_v44 = vld [vmem:[#allocation16_spill] sm:$0xff]  ;;  %v18694_v32 = vld [vmem:[#allocation59_spill] sm:$0xff] }
 0x429   : > { %v7357_v29 = vpop.f32.mrf.mxu1  ;;  %v8512_v40 = vpop.f32.mrf.mxu0 }
 0x42a   : > { %v7414_v1 = vadd.f32 %v7357_v29, %v17104_v16  ;;  %v17237_v55 = vadd.f32 %v12105_v59, %v7416_v36 }
 0x42b   : > { %v12056_v52 = vpop.f32.mrf.mxu1  ;;  %12355 = vmatmul.mubr.bf16.gmra.mxu1 %v18691_v27  ;;  %v12181_v23 = vpop.f32.mrf.mxu0 }
 0x42c   : > { %v7419_v63 = vadd.f32 %v12056_v52, %v17110_v0  ;;  %12358 = vmatprep.mubr.bf16.mxu1 %v18692_v10  ;;  %v17242_v57 = vadd.f32 %v7820_v56, %v7414_v1 }
 0x42d   : > { %v7370_v33 = vpop.f32.mrf.mxu1  ;;  %v8515_v20 = vpop.f32.mrf.mxu0 }
 0x42e   : > { %v7417_v47 = vadd.f32 %v7370_v33, %v17112_v37  ;;  %v17245_v31 = vadd.f32 %v12108_v9, %v7419_v63 }
 0x42f   : > { %v12057_v16 = vpop.f32.mrf.mxu1  ;;  %v12184_v3 = vpop.f32.mrf.mxu0 }
 0x430   : > { %v7420_v59 = vadd.f32 %v12057_v16, %v17117_v48  ;;  %v17248_v50 = vadd.f32 %v7833_v60, %v7417_v47  ;;  %v18695_v47 = vld [vmem:[#allocation70_spill] sm:$0xff]  ;;  %v18696_v16 = vld [vmem:[#allocation64_spill] sm:$0xff] }
 0x431   : > { %v7373_v25 = vpop.f32.mrf.mxu1  ;;  %v8528_v43 = vpop.f32.mrf.mxu0 }
 0x432   : > { %v7418_v0 = vadd.f32 %v7373_v25, %v17120_v61  ;;  %v17251_v15 = vadd.f32 %v12109_v41, %v7420_v59 }
 0x433   : > { %v12128_v56 = vpop.f32.mrf.mxu1  ;;  %12359 = vmatmul.mubr.bf16.gmra.mxu1 %v18693_v44  ;;  %v12185_v9 = vpop.f32.mrf.mxu0 }
 0x434   : > { %v8320_v37 = vadd.f32 %v12128_v56, %v17127_v39  ;;  %12362 = vmatprep.mubr.bf16.mxu1 %v18694_v32  ;;  %v17256_v36 = vadd.f32 %v7836_v11, %v7418_v0 }
 0x435   : > { %v8175_v48 = vpop.f32.mrf.mxu1  ;;  %v8531_v29 = vpop.f32.mrf.mxu0 }
 0x436   : > { %v8318_v60 = vadd.f32 %v8175_v48, %v17133_v45  ;;  %v17259_v1 = vadd.f32 %v12180_v34, %v8320_v37 }
 0x437   : > { %v12129_v61 = vpop.f32.mrf.mxu1  ;;  %v12188_v52 = vpop.f32.mrf.mxu0 }
 0x438   : > { %v8321_v41 = vadd.f32 %v12129_v61, %v17137_v7  ;;  %v17262_v27 = vadd.f32 %v8512_v40, %v8318_v60  ;;  %v18697_v60 = vld [vmem:[#allocation15_spill] sm:$0xff] }
 0x439   : > { %v8178_v63 = vpop.f32.mrf.mxu1  ;;  %v8544_v10 = vpop.f32.mrf.mxu0 }
 0x43a   : > { %v8319_v39 = vadd.f32 %v8178_v63, %v17141_v58  ;;  %v17265_v33 = vadd.f32 %v12181_v23, %v8321_v41 }
 0x43b   : > { %v12132_v11 = vpop.f32.mrf.mxu1  ;;  %12363 = vmatmul.mubr.bf16.gmra.mxu1 %v18695_v47  ;;  %v12189_v34 = vpop.f32.mrf.mxu0 }
 0x43c   : > { %v8324_v45 = vadd.f32 %v12132_v11, %v17144_v8  ;;  %12366 = vmatprep.mubr.bf16.mxu1 %v18696_v16  ;;  %v17270_v59 = vadd.f32 %v8515_v20, %v8319_v39 }
 0x43d   : > { %v8191_v7 = vpop.f32.mrf.mxu1  ;;  %v8547_v25 = vpop.f32.mrf.mxu0 }
 0x43e   : > { %v8322_v40 = vadd.f32 %v8191_v7, %v17149_v35  ;;  %v17273_v0 = vadd.f32 %v12184_v3, %v8324_v45 }
 0x43f   : > { %v12133_v58 = vpop.f32.mrf.mxu1  ;;  %v12192_v56 = vpop.f32.mrf.mxu0 }
 0x440   : > { %v8325_v23 = vadd.f32 %v12133_v58, %v17152_v51  ;;  %v17276_v44 = vadd.f32 %v8528_v43, %v8322_v40 }
 0x441   : > { %v8194_v37 = vpop.f32.mrf.mxu1  ;;  %v8560_v32 = vpop.f32.mrf.mxu0 }
 0x442   : > { %v8323_v8 = vadd.f32 %v8194_v37, %v17156_v24  ;;  %v17279_v48 = vadd.f32 %v12185_v9, %v8325_v23 }
 0x443   : > { %v12136_v20 = vpop.f32.mrf.mxu1  ;;  %12367 = vmatmul.mubr.bf16.gmra.mxu1 %v18697_v60  ;;  %v12193_v61 = vpop.f32.mrf.mxu0 }
 0x444   : > { %v8328_v35 = vadd.f32 %v12136_v20, %v17159_v53  ;;  %v17283_v3 = vadd.f32 %v8531_v29, %v8323_v8 }
 0x445   : > { %v8207_v41 = vpop.f32.mrf.mxu1  ;;  %v8563_v63 = vpop.f32.mrf.mxu0 }
 0x446   : > { %v8326_v51 = vadd.f32 %v8207_v41, %v17164_v49  ;;  %v17286_v43 = vadd.f32 %v12188_v52, %v8328_v35 }
 0x447   : > { %v12137_v39 = vpop.f32.mrf.mxu1  ;;  %v12196_v11 = vpop.f32.mrf.mxu0 }
 0x448   : > { %v8329_v24 = vadd.f32 %v12137_v39, %v17166_v12  ;;  %v17289_v9 = vadd.f32 %v8544_v10, %v8326_v51 }
 0x449   : > { %v8210_v47 = vpop.f32.mrf.mxu1  ;;  %v8576_v16 = vpop.f32.mrf.mxu0 }
 0x44a   : > { %v8327_v45 = vadd.f32 %v8210_v47, %v17171_v42  ;;  %v17292_v53 = vadd.f32 %v12189_v34, %v8329_v24 }
 0x44b   : > { %v12140_v29 = vpop.f32.mrf.mxu1  ;;  %v12197_v40 = vpop.f32.mrf.mxu0 }
 0x44c   : > { %v8332_v7 = vadd.f32 %v12140_v29, %v17174_v14  ;;  %v17295_v49 = vadd.f32 %v8547_v25, %v8327_v45 }
 0x44d   : > { %v8223_v52 = vpop.f32.mrf.mxu1  ;;  %v8579_v23 = vpop.f32.mrf.mxu0 }
 0x44e   : > { %v8330_v58 = vadd.f32 %v8223_v52, %v17179_v13  ;;  %v17298_v12 = vadd.f32 %v12192_v56, %v8332_v7 }
 0x44f   : > { %v12141_v10 = vpop.f32.mrf.mxu1  ;;  %v12200_v8 = vpop.f32.mrf.mxu0 }
 0x450   : > { %v8333_v37 = vadd.f32 %v12141_v10, %v17181_v38  ;;  %v17301_v42 = vadd.f32 %v8560_v32, %v8330_v58 }
 0x451   : > { %v8226_v34 = vpop.f32.mrf.mxu1  ;;  %v8592_v60 = vpop.f32.mrf.mxu0 }
 0x452   : > { %v8331_v20 = vadd.f32 %v8226_v34, %v17186_v18  ;;  %v17304_v14 = vadd.f32 %v12193_v61, %v8333_v37 }
 0x453   : > { %v12144_v25 = vpop.f32.mrf.mxu1  ;;  %v12201_v41 = vpop.f32.mrf.mxu0 }
 0x454   : > { %v8336_v35 = vadd.f32 %v12144_v25, %v17189_v6  ;;  %v17307_v13 = vadd.f32 %v8563_v63, %v8331_v20 }
 0x455   : > { %v8239_v56 = vpop.f32.mrf.mxu1  ;;  %v8595_v39 = vpop.f32.mrf.mxu0 }
 0x456   : > { %v8334_v51 = vadd.f32 %v8239_v56, %v17192_v22  ;;  %v17310_v38 = vadd.f32 %v12196_v11, %v8336_v35 }
 0x457   : > { %v12145_v32 = vpop.f32.mrf.mxu1  ;;  %v12204_v47 = vpop.f32.mrf.mxu0 }
 0x458   : > { %v8337_v24 = vadd.f32 %v12145_v32, %v17195_v17  ;;  %v17313_v18 = vadd.f32 %v8576_v16, %v8334_v51 }
 0x459   : > { %v8242_v61 = vpop.f32.mrf.mxu1  ;;  %v8608_v29 = vpop.f32.mrf.mxu0 }
 0x45a   : > { %v8335_v45 = vadd.f32 %v8242_v61, %v17200_v5  ;;  %v17316_v6 = vadd.f32 %v12197_v40, %v8337_v24 }
 0x45b   : > { %v12148_v63 = vpop.f32.mrf.mxu1  ;;  %v12205_v52 = vpop.f32.mrf.mxu0 }
 0x45c   : > { %v8340_v7 = vadd.f32 %v12148_v63, %v17203_v21  ;;  %v17319_v22 = vadd.f32 %v8579_v23, %v8335_v45 }
 0x45d   : > { %v8255_v11 = vpop.f32.mrf.mxu1  ;;  %v8611_v10 = vpop.f32.mrf.mxu0 }
 0x45e   : > { %v8338_v58 = vadd.f32 %v8255_v11, %v17206_v54  ;;  %v17322_v17 = vadd.f32 %v12200_v8, %v8340_v7 }
 0x45f   : > { %v12149_v16 = vpop.f32.mrf.mxu1  ;;  %v12208_v34 = vpop.f32.mrf.mxu0 }
 0x460   : > { %v8341_v37 = vadd.f32 %v12149_v16, %v17209_v2  ;;  %v17325_v5 = vadd.f32 %v8592_v60, %v8338_v58 }
 0x461   : > { %v8258_v40 = vpop.f32.mrf.mxu1  ;;  %v8624_v25 = vpop.f32.mrf.mxu0 }
 0x462   : > { %v8339_v20 = vadd.f32 %v8258_v40, %v17214_v28  ;;  %v17328_v21 = vadd.f32 %v12201_v41, %v8341_v37 }
 0x463   : > { %v12152_v23 = vpop.f32.mrf.mxu1  ;;  %v12209_v56 = vpop.f32.mrf.mxu0 }
 0x464   : > { %v8344_v35 = vadd.f32 %v12152_v23, %v17217_v4  ;;  %v17331_v54 = vadd.f32 %v8595_v39, %v8339_v20 }
 0x465   : > { %v8271_v8 = vpop.f32.mrf.mxu1  ;;  %v8627_v60 = vpop.f32.mrf.mxu0 }
 0x466   : > { %v8342_v51 = vadd.f32 %v8271_v8, %v17220_v46  ;;  %v17334_v32 = vadd.f32 %v12204_v47, %v8344_v35 }
 0x467   : > { %v12153_v2 = vpop.f32.mrf.mxu1  ;;  %v12212_v63 = vpop.f32.mrf.mxu0 }
 0x468   : > { %v8345_v24 = vadd.f32 %v12153_v2, %v17223_v62  ;;  %v17337_v61 = vadd.f32 %v8608_v29, %v8342_v51 }
 0x469   : > { %v8274_v28 = vpop.f32.mrf.mxu1  ;;  %v8640_v58 = vpop.f32.mrf.mxu0 }
 0x46a   : > { %v8343_v41 = vadd.f32 %v8274_v28, %v17228_v30  ;;  %v17340_v45 = vadd.f32 %v12205_v52, %v8345_v24 }
 0x46b   : > { %v12156_v4 = vpop.f32.mrf.mxu1  ;;  %v12213_v40 = vpop.f32.mrf.mxu0 }
 0x46c   : > { %v8348_v39 = vadd.f32 %v12156_v4, %v17231_v26  ;;  %v17343_v7 = vadd.f32 %v8611_v10, %v8343_v41 }
 0x46d   : > { %v8287_v46 = vpop.f32.mrf.mxu1  ;;  %v8643_v35 = vpop.f32.mrf.mxu0 }
 0x46e   : > { %v8346_v47 = vadd.f32 %v8287_v46, %v17234_v19  ;;  %v17346_v11 = vadd.f32 %v12208_v34, %v8348_v39 }
 0x46f   : > { %v12157_v62 = vpop.f32.mrf.mxu1  ;;  %v17366_v2 = vpop.f32.mrf.mxu0 }
 0x470   : > { %v8349_v29 = vadd.f32 %v12157_v62, %v17237_v55  ;;  %v17349_v16 = vadd.f32 %v8624_v25, %v8346_v47 }
 0x471   : > { %v8290_v30 = vpop.f32.mrf.mxu1 }
 0x472   : > { %v8347_v52 = vadd.f32 %v8290_v30, %v17242_v57  ;;  %v17352_v37 = vadd.f32 %v12209_v56, %v8349_v29 }
 0x473   : > { %v12160_v26 = vpop.f32.mrf.mxu1 }
 0x474   : > { %v8352_v10 = vadd.f32 %v12160_v26, %v17245_v31  ;;  %v17355_v20 = vadd.f32 %v8627_v60, %v8347_v52 }
 0x475   : > { %v8303_v19 = vpop.f32.mrf.mxu1 }
 0x476   : > { %v8350_v34 = vadd.f32 %v8303_v19, %v17248_v50  ;;  %v17358_v23 = vadd.f32 %v12212_v63, %v8352_v10 }
 0x477   : > { %v12161_v55 = vpop.f32.mrf.mxu1 }
 0x478   : > { %v8353_v25 = vadd.f32 %v12161_v55, %v17251_v15  ;;  %v17361_v8 = vadd.f32 %v8640_v58, %v8350_v34  ;;  %v17376_v15 = vpop.f32.mrf.mxu0 }
 0x479   : > { %v8306_v57 = vpop.f32.mrf.mxu1 }
 0x47a   : > { %v8351_v56 = vadd.f32 %v8306_v57, %v17256_v36  ;;  %v17364_v51 = vadd.f32 %v12213_v40, %v8353_v25  ;;  %v17384_v39 = vpop.f32.mrf.mxu0 }
 0x47b   : > { %v12232_v31 = vpop.f32.mrf.mxu1 }
 0x47c   : > { %v17369_v60 = vadd.f32 %v12232_v31, %v17259_v1  ;;  %v17371_v50 = vadd.f32 %v8643_v35, %v8351_v56  ;;  %v17392_v58 = vpop.f32.mrf.mxu0 }
 0x47d   : > { %v8975_v24 = vpop.f32.mrf.mxu1 }
 0x47e   : > { %v17374_v28 = vadd.f32 %v8975_v24, %v17262_v27  ;;  %v17400_v30 = vpop.f32.mrf.mxu0 }
 0x47f   : > { %v12233_v41 = vpop.f32.mrf.mxu1 }
 0x480   : > { %v17379_v4 = vadd.f32 %v12233_v41, %v17265_v33  ;;  %v17408_v26 = vpop.f32.mrf.mxu0 }
 0x481   : > { %v8978_v36 = vpop.f32.mrf.mxu1 }
 0x482   : > { %v17382_v63 = vadd.f32 %v8978_v36, %v17270_v59  ;;  %v17416_v34 = vpop.f32.mrf.mxu0 }
 0x483   : > { %v12236_v1 = vpop.f32.mrf.mxu1 }
 0x484   : > { %v17387_v46 = vadd.f32 %v12236_v1, %v17273_v0  ;;  %v17424_v25 = vpop.f32.mrf.mxu0 }
 0x485   : > { %v8991_v47 = vpop.f32.mrf.mxu1 }
 0x486   : > { %v17390_v27 = vadd.f32 %v8991_v47, %v17276_v44  ;;  %v17432_v31 = vpop.f32.mrf.mxu0 }
 0x487   : > { %v12237_v62 = vpop.f32.mrf.mxu1 }
 0x488   : > { %v17395_v33 = vadd.f32 %v12237_v62, %v17279_v48  ;;  %v17440_v36 = vpop.f32.mrf.mxu0 }
 0x489   : > { %v8994_v29 = vpop.f32.mrf.mxu1 }
 0x48a   : > { %v17398_v59 = vadd.f32 %v8994_v29, %v17283_v3  ;;  %v17448_v62 = vpop.f32.mrf.mxu0 }
 0x48b   : > { %v12240_v52 = vpop.f32.mrf.mxu1 }
 0x48c   : > { %v17403_v0 = vadd.f32 %v12240_v52, %v17286_v43 }
 0x48d   : > { %v9007_v40 = vpop.f32.mrf.mxu1 }
 0x48e   : > { %v17406_v44 = vadd.f32 %v9007_v40, %v17289_v9  ;;  %v17456_v40 = vpop.f32.mrf.mxu0 }
 0x48f   : > { %v12241_v10 = vpop.f32.mrf.mxu1 }
 0x490   : > { %v17411_v48 = vadd.f32 %v12241_v10, %v17292_v53 }
 0x491   : > { %v9010_v19 = vpop.f32.mrf.mxu1 }
 0x492   : > { %v17414_v3 = vadd.f32 %v9010_v19, %v17295_v49 }
 0x493   : > { %v12244_v35 = vpop.f32.mrf.mxu1 }
 0x494   : > { %v17419_v43 = vadd.f32 %v12244_v35, %v17298_v12  ;;  %v17464_v35 = vpop.f32.mrf.mxu0 }
 0x495   : > { %v9023_v55 = vpop.f32.mrf.mxu1 }
 0x496   : > { %v17422_v9 = vadd.f32 %v9023_v55, %v17301_v42 }
 0x497   : > { %v12245_v57 = vpop.f32.mrf.mxu1 }
 0x498   : > { %v17427_v53 = vadd.f32 %v12245_v57, %v17304_v14 }
 0x499   : > { %v9026_v56 = vpop.f32.mrf.mxu1 }
 0x49a   : > { %v17430_v49 = vadd.f32 %v9026_v56, %v17307_v13  ;;  %v17472_v56 = vpop.f32.mrf.mxu0 }
 0x49b   : > { %v12248_v24 = vpop.f32.mrf.mxu1 }
 0x49c   : > { %v17435_v12 = vadd.f32 %v12248_v24, %v17310_v38 }
 0x49d   : > { %v9039_v41 = vpop.f32.mrf.mxu1 }
 0x49e   : > { %v17438_v42 = vadd.f32 %v9039_v41, %v17313_v18 }
 0x49f   : > { %v12249_v1 = vpop.f32.mrf.mxu1 }
 0x4a0   : > { %v17443_v14 = vadd.f32 %v12249_v1, %v17316_v6  ;;  %v17480_v1 = vpop.f32.mrf.mxu0 }
 0x4a1   : > { %v9042_v47 = vpop.f32.mrf.mxu1 }
 0x4a2   : > { %v17446_v13 = vadd.f32 %v9042_v47, %v17319_v22 }
 0x4a3   : > { %v12252_v29 = vpop.f32.mrf.mxu1 }
 0x4a4   : > { %v17451_v38 = vadd.f32 %v12252_v29, %v17322_v17 }
 0x4a5   : > { %v9055_v52 = vpop.f32.mrf.mxu1 }
 0x4a6   : > { %v17454_v18 = vadd.f32 %v9055_v52, %v17325_v5  ;;  %v17488_v52 = vpop.f32.mrf.mxu0 }
 0x4a7   : > { %v12253_v10 = vpop.f32.mrf.mxu1 }
 0x4a8   : > { %v17459_v6 = vadd.f32 %v12253_v10, %v17328_v21 }
 0x4a9   : > { %v9058_v19 = vpop.f32.mrf.mxu1 }
 0x4aa   : > { %v17462_v22 = vadd.f32 %v9058_v19, %v17331_v54 }
 0x4ab   : > { %v12256_v55 = vpop.f32.mrf.mxu1 }
 0x4ac   : > { %v17467_v17 = vadd.f32 %v12256_v55, %v17334_v32  ;;  %v17496_v55 = vpop.f32.mrf.mxu0 }
 0x4ad   : > { %v9071_v57 = vpop.f32.mrf.mxu1 }
 0x4ae   : > { %v17470_v5 = vadd.f32 %v9071_v57, %v17337_v61 }
 0x4af   : > { %v12257_v24 = vpop.f32.mrf.mxu1 }
 0x4b0   : > { %v17475_v21 = vadd.f32 %v12257_v24, %v17340_v45 }
 0x4b1   : > { %v9074_v41 = vpop.f32.mrf.mxu1 }
 0x4b2   : > { %v17478_v54 = vadd.f32 %v9074_v41, %v17343_v7  ;;  %v17504_v41 = vpop.f32.mrf.mxu0 }
 0x4b3   : > { %v12260_v47 = vpop.f32.mrf.mxu1 }
 0x4b4   : > { %v17483_v32 = vadd.f32 %v12260_v47, %v17346_v11 }
 0x4b5   : > { %v9087_v29 = vpop.f32.mrf.mxu1 }
 0x4b6   : > { %v17486_v61 = vadd.f32 %v9087_v29, %v17349_v16 }
 0x4b7   : > { %v12261_v10 = vpop.f32.mrf.mxu1 }
 0x4b8   : > { %v17491_v45 = vadd.f32 %v12261_v10, %v17352_v37  ;;  %v10822_v10 = vld [vmem:[%s12917_s23 + $0x10] sm:$0xff] }
 0x4b9   : > { %v9090_v7 = vpop.f32.mrf.mxu1 }
 0x4ba   : > { %18698 = vst [vmem:[#allocation74_spill] sm:$0xff] %v17491_v45  ;;  %v17494_v19 = vadd.f32 %v9090_v7, %v17355_v20  ;;  %v17516_v7 = vld [vmem:[%s12917_s23 + $0x18] sm:$0xff] }
 0x4bb   : > { %v12264_v11 = vpop.f32.mrf.mxu1 }
 0x4bc   : > { %18699 = vst [vmem:[#allocation72_spill] sm:$0xff] %v17494_v19  ;;  %v17499_v57 = vadd.f32 %v12264_v11, %v17358_v23  ;;  %v9590_v23 = vadd.f32 %v17366_v2, %v17369_v60  ;;  %v10017_v2 = vrot.slane %v17516_v7, 6 }
 0x4bd   : > { %v9103_v24 = vpop.f32.mrf.mxu1 }
 0x4be   : > { %18700 = vst [vmem:[#allocation62_spill] sm:$0xff] %v17499_v57  ;;  %v17502_v16 = vadd.f32 %v9103_v24, %v17361_v8  ;;  %v17518_v8 = vpop.f32.mrf.mxu0 }
 0x4bf   : > { %v12265_v47 = vpop.f32.mrf.mxu1 }
 0x4c0   : > { %18701 = vst [vmem:[#allocation76_spill] sm:$0xff] %v17502_v16  ;;  %v17507_v37 = vadd.f32 %v12265_v47, %v17364_v51  ;;  %v17523_v51 = vld [vmem:[%s17802_s8] ss:$0 sm:$0xff]  ;;  %v10016_v47 = vrot.slane %v10822_v10, 6  ;;  %v17531_v16 = vpop.f32.mrf.mxu0 }
 0x4c1   : > { %v9106_v29 = vpop.f32.mrf.mxu1 }
 0x4c2   : > { %18702 = vst [vmem:[#allocation75_spill] sm:$0xff] %v17507_v37  ;;  %v17511_v20 = vadd.f32 %v9106_v29, %v17371_v50  ;;  %v9588_v50 = vadd.f32 %v17376_v15, %v17374_v28  ;;  %v9591_v37 = vadd.f32 %v17384_v39, %v17379_v4  ;;  %v10004_v28 = vld [vmem:[%s12917_s23] sm:$0xff]  ;;  %v9589_v4 = vadd.f32 %v17392_v58, %v17382_v63  ;;  %v10828_v39 = vld [vmem:[%s12917_s23 + $0x28] sm:$0xff]  ;;  %v17556_v63 = vpop.f32.mrf.mxu0 }
 0x4c3   : > { %v12336_v11 = vpop.f32.mrf.mxu1  ;;  %v10005_v58 = vld [vmem:[%s12917_s23 + $0x8] sm:$0xff]  ;;  %v10037_v45 = vrot.slane %v10828_v39, 4 }
 0x4c4   : > { %18703 = vst [vmem:[#allocation65_spill] sm:$0xff] %v17511_v20  ;;  %v9927_v24 = vadd.f32 %v12336_v11, %v9590_v23  ;;  %v10832_v11 = vld [vmem:[%s12917_s23 + $0x30] sm:$0xff] }
 0x4c5   : > { %v9782_v29 = vpop.f32.mrf.mxu1 }
 0x4c6   : > { %v9970_v60 = vadd.f32 %v17523_v51, %v9927_v24  ;;  %v9925_v20 = vadd.f32 %v9782_v29, %v9588_v50  ;;  %v10018_v24 = vsel %vm6282_vm14, %v10016_v47, %v10017_v2 }
 0x4c7   : > { %v12337_v15 = vpop.f32.mrf.mxu1 }
 0x4c8   : > { %v10022_v10 = vadd.f32 %v10016_v47, %v9970_v60  ;;  %v9968_v23 = vadd.f32 %v17523_v51, %v9925_v20  ;;  %v9928_v7 = vadd.f32 %v12337_v15, %v9591_v37  ;;  %v9594_v20 = vadd.f32 %v17400_v30, %v17387_v46  ;;  %v10827_v37 = vld [vmem:[%s12917_s23 + $0x20] sm:$0xff]  ;;  %v17554_v15 = vld [vmem:[%s12917_s23 + $0x38] sm:$0xff] }
 0x4c9   : > { %v9785_v50 = vpop.f32.mrf.mxu1  ;;  %v10055_v47 = vrot.slane %v10832_v11, 2  ;;  %v9592_v46 = vadd.f32 %v17408_v26, %v17390_v27  ;;  %v9593_v27 = vadd.f32 %v17424_v25, %v17398_v59 }
 0x4ca   : > { %10824 = vst.msk [vmem:[%s17538_s18 + $0xe] sm:$0xfc] %vm10026_vm4, %v10022_v10  ;;  %v10006_v29 = vadd.f32 %v10004_v28, %v9968_v23  ;;  %v9971_v57 = vadd.f32 %v17523_v51, %v9928_v7  ;;  %v9926_v60 = vadd.f32 %v9785_v50, %v9589_v4  ;;  %v10036_v7 = vrot.slane %v10827_v37, 4 }
 0x4cb   : > { %v12340_v19 = vpop.f32.mrf.mxu1  ;;  %v10056_v4 = vrot.slane %v17554_v15, 2  ;;  %v9598_v37 = vadd.f32 %v17432_v31, %v17403_v0 }
 0x4cc   : > { %10009 = vst.msk [vmem:[%s17538_s18] sm:$0xff] %vm10008_vm9, %v10006_v29  ;;  %v10023_v10 = vadd.f32 %v10018_v24, %v9971_v57  ;;  %v9969_v28 = vadd.f32 %v17523_v51, %v9926_v60  ;;  %v9931_v23 = vadd.f32 %v12340_v19, %v9594_v20  ;;  %v9595_v57 = vadd.f32 %v17416_v34, %v17395_v33  ;;  %v17570_v24 = vpop.f32.mrf.mxu0 }
 0x4cd   : > { %v9798_v30 = vpop.f32.mrf.mxu1  ;;  %v10057_v33 = vsel %vm18647_vm0, %v10055_v47, %v10056_v4 }
 0x4ce   : > { %10825 = vst.msk [vmem:[%s17538_s18 + $0x16] sm:$0xff] %vm10008_vm9, %v10023_v10  ;;  %v10007_v50 = vadd.f32 %v10005_v58, %v9969_v28  ;;  %v9974_v39 = vadd.f32 %v17523_v51, %v9931_v23  ;;  %v9929_v11 = vadd.f32 %v9798_v30, %v9592_v46  ;;  %v17585_v10 = vpop.f32.mrf.mxu0  ;;  %v9596_v23 = vadd.f32 %v17440_v36, %v17406_v44  ;;  %v10841_v46 = vld [vmem:[%s12917_s23 + $0x50] sm:$0xff]  ;;  %v10838_v30 = vld [vmem:[%s12917_s23 + $0x48] sm:$0xff] }
 0x4cf   : > { %v12341_v19 = vpop.f32.mrf.mxu1  ;;  %v10081_v36 = vrot.slane %v10841_v46, 6 }
 0x4d0   : > { %10010 = vst.msk [vmem:[%s17538_s18 + $0x8] sm:$0xff] %vm10008_vm9, %v10007_v50  ;;  %v10044_v26 = vadd.f32 %v10037_v45, %v9974_v39  ;;  %v10061_v29 = vadd.f32 %v10055_v47, %v9974_v39  ;;  %v9972_v60 = vadd.f32 %v17523_v51, %v9929_v11  ;;  %v9932_v20 = vadd.f32 %v12341_v19, %v9595_v57  ;;  %v17603_v57 = vld [vmem:[%s12917_s23 + $0x60] sm:$0xff]  ;;  %v10847_v19 = vld [vmem:[%s12917_s23 + $0x68] sm:$0xff] }
 0x4d1   : > { %v9801_v34 = vpop.f32.mrf.mxu1  ;;  %v10038_v47 = vsel %vm10035_vm3, %v10036_v7, %v10037_v45  ;;  %v9599_v11 = vadd.f32 %v17448_v62, %v17411_v48  ;;  %v10842_v48 = vld [vmem:[%s12917_s23 + $0x58] sm:$0xff] }
 0x4d2   : > { %10831 = vst.msk [vmem:[%s17538_s18 + $0x2c] sm:$0xf] %vm18704_vm8, %v10044_v26  ;;  %v10024_v59 = vadd.f32 %v10017_v2, %v9972_v60  ;;  %v10042_v25 = vadd.f32 %v10036_v7, %v9972_v60  ;;  %v9975_v15 = vadd.f32 %v17523_v51, %v9932_v20  ;;  %v9930_v58 = vadd.f32 %v9801_v34, %v9593_v27  ;;  %v17606_v27 = vpop.f32.mrf.mxu0 }
 0x4d3   : > { %10834 = vst.msk [vmem:[%s17538_s18 + $0x2a] sm:$0xc0] %vm10065_vm15, %v10061_v29  ;;  %v12344_v28 = vpop.f32.mrf.mxu1  ;;  %v9597_v20 = vadd.f32 %v17456_v40, %v17414_v3  ;;  %v10099_v34 = vrot.slane %v10847_v19, 4  ;;  %v10837_v3 = vld [vmem:[%s12917_s23 + $0x40] sm:$0xff]  ;;  %v9601_v19 = vadd.f32 %v17488_v52, %v17430_v49  ;;  %v9604_v49 = vadd.f32 %v17504_v41, %v17438_v42 }
 0x4d4   : > { %10826 = vst.msk [vmem:[%s17538_s18 + $0x1e] sm:$0x3] %vm18705_vm10, %v10024_v59  ;;  %v10062_v0 = vadd.f32 %v10057_v33, %v9975_v15  ;;  %v9973_v31 = vadd.f32 %v17523_v51, %v9930_v58  ;;  %v9935_v2 = vadd.f32 %v12344_v28, %v9598_v37  ;;  %v10098_v33 = vrot.slane %v17603_v57, 4  ;;  %v17620_v58 = vpop.f32.mrf.mxu0 }
 0x4d5   : > { %10829 = vst.msk [vmem:[%s17538_s18 + $0x1c] sm:$0xf0] %vm10046_vm6, %v10042_v25  ;;  %v9814_v50 = vpop.f32.mrf.mxu1  ;;  %v9602_v15 = vadd.f32 %v17464_v35, %v17419_v43 }
 0x4d6   : > { %10835 = vst.msk [vmem:[%s17538_s18 + $0x32] sm:$0xff] %vm10008_vm9, %v10062_v0  ;;  %v10043_v45 = vadd.f32 %v10038_v47, %v9973_v31  ;;  %v9978_v7 = vadd.f32 %v17523_v51, %v9935_v2  ;;  %v9933_v39 = vadd.f32 %v9814_v50, %v9596_v23  ;;  %v10082_v47 = vrot.slane %v10842_v48, 6  ;;  %v10851_v2 = vld [vmem:[%s12917_s23 + $0x70] sm:$0xff] }
 0x4d7   : > { %v12345_v44 = vpop.f32.mrf.mxu1  ;;  %v10100_v23 = vsel %vm10035_vm3, %v10098_v33, %v10099_v34  ;;  %v9603_v50 = vadd.f32 %v17480_v1, %v17427_v53 }
 0x4d8   : > { %10830 = vst.msk [vmem:[%s17538_s18 + $0x24] sm:$0xff] %vm10008_vm9, %v10043_v45  ;;  %v10073_v26 = vadd.f32 %v10838_v30, %v9978_v7  ;;  %v9976_v29 = vadd.f32 %v17523_v51, %v9933_v39  ;;  %v9936_v60 = vadd.f32 %v12345_v44, %v9599_v11  ;;  %v17635_v45 = vpop.f32.mrf.mxu0  ;;  %v10083_v7 = vsel %vm6282_vm14, %v10081_v36, %v10082_v47  ;;  %v10852_v44 = vld [vmem:[%s12917_s23 + $0x78] sm:$0xff] }
 0x4d9   : > { %v9817_v62 = vpop.f32.mrf.mxu1  ;;  %v10116_v52 = vrot.slane %v10852_v44, 2 }
 0x4da   : > { %10840 = vst.msk [vmem:[%s17538_s18 + $0x48] sm:$0xff] %vm10008_vm9, %v10073_v26  ;;  %v10063_v37 = vadd.f32 %v10056_v4, %v9976_v29  ;;  %v9979_v59 = vadd.f32 %v17523_v51, %v9936_v60  ;;  %v9934_v25 = vadd.f32 %v9817_v62, %v9597_v20  ;;  %v9600_v4 = vadd.f32 %v17472_v56, %v17422_v9  ;;  %v17649_v60 = vpop.f32.mrf.mxu0 }
 0x4db   : > { %v12348_v40 = vpop.f32.mrf.mxu1  ;;  %v10115_v56 = vrot.slane %v10851_v2, 2  ;;  %v9606_v29 = vadd.f32 %v17496_v55, %v17435_v12  ;;  %v9607_v12 = vadd.f32 %v17518_v8, %v17443_v14 }
 0x4dc   : > { %10836 = vst.msk [vmem:[%s17538_s18 + $0x3a] sm:$0x3f] %vm10068_vm5, %v10063_v37  ;;  %v10087_v28 = vadd.f32 %v10081_v36, %v9979_v59  ;;  %v9977_v0 = vadd.f32 %v17523_v51, %v9934_v25  ;;  %v9939_v31 = vadd.f32 %v12348_v40, %v9602_v15  ;;  %v10856_v25 = vld [vmem:[%s12917_s23 + $0x80] sm:$0xff] }
 0x4dd   : > { %v9830_v43 = vpop.f32.mrf.mxu1  ;;  %v10117_v40 = vsel %vm18707_vm12, %v10115_v56, %v10116_v52 }
 0x4de   : > { %10843 = vst.msk [vmem:[%s17538_s18 + $0x4e] sm:$0xfc] %vm10026_vm4, %v10087_v28  ;;  %v10072_v35 = vadd.f32 %v10837_v3, %v9977_v0  ;;  %v9982_v46 = vadd.f32 %v17523_v51, %v9939_v31  ;;  %v9937_v30 = vadd.f32 %v9830_v43, %v9600_v4  ;;  %v17664_v3 = vpop.f32.mrf.mxu0  ;;  %v10861_v0 = vld [vmem:[%s12917_s23 + $0x98] sm:$0xff]  ;;  %v10865_v31 = vld [vmem:[%s12917_s23 + $0xa0] sm:$0xff]  ;;  %v10857_v4 = vld [vmem:[%s12917_s23 + $0x88] sm:$0xff] }
 0x4df   : > { %v12349_v9 = vpop.f32.mrf.mxu1 }
 0x4e0   : > { %10839 = vst.msk [vmem:[%s17538_s18 + $0x40] sm:$0xff] %vm10008_vm9, %v10072_v35  ;;  %v10105_v39 = vadd.f32 %v10100_v23, %v9982_v46  ;;  %v9980_v11 = vadd.f32 %v17523_v51, %v9937_v30  ;;  %v9940_v57 = vadd.f32 %v12349_v9, %v9603_v50  ;;  %v9610_v46 = vadd.f32 %v17556_v63, %v17451_v38  ;;  %v10860_v30 = vld [vmem:[%s12917_s23 + $0x90] sm:$0xff]  ;;  %v17684_v50 = vld [vmem:[%s12917_s23 + $0xa8] sm:$0xff] }
 0x4e1   : > { %v9833_v26 = vpop.f32.mrf.mxu1  ;;  %v10156_v9 = vrot.slane %v10865_v31, 4  ;;  %v10139_v38 = vrot.slane %v10860_v30, 6  ;;  %v10157_v63 = vrot.slane %v17684_v50, 4 }
 0x4e2   : > { %10849 = vst.msk [vmem:[%s17538_s18 + $0x64] sm:$0xff] %vm10008_vm9, %v10105_v39  ;;  %v10088_v53 = vadd.f32 %v10083_v7, %v9980_v11  ;;  %v9983_v1 = vadd.f32 %v17523_v51, %v9940_v57  ;;  %v9938_v36 = vadd.f32 %v9833_v26, %v9601_v19  ;;  %v12312_v7 = vpop.f32.mrf.mxu0  ;;  %v9608_v57 = vadd.f32 %v17570_v24, %v17454_v18 }
 0x4e3   : > { %v12352_v20 = vpop.f32.mrf.mxu1  ;;  %v9609_v18 = vadd.f32 %v17606_v27, %v17462_v22  ;;  %v9614_v27 = vadd.f32 %v17620_v58, %v17467_v17 }
 0x4e4   : > { %10844 = vst.msk [vmem:[%s17538_s18 + $0x56] sm:$0xff] %vm10008_vm9, %v10088_v53  ;;  %v10106_v48 = vadd.f32 %v10099_v34, %v9983_v1  ;;  %v10121_v62 = vadd.f32 %v10115_v56, %v9983_v1  ;;  %v9981_v37 = vadd.f32 %v17523_v51, %v9938_v36  ;;  %v9943_v59 = vadd.f32 %v12352_v20, %v9606_v29  ;;  %v9557_v36 = vpop.f32.mrf.mxu0 }
 0x4e5   : > { %v9846_v15 = vpop.f32.mrf.mxu1  ;;  %v9611_v1 = vadd.f32 %v17585_v10, %v17459_v6 }
 0x4e6   : > { %10850 = vst.msk [vmem:[%s17538_s18 + $0x6c] sm:$0xf] %vm18706_vm13, %v10106_v48  ;;  %v10089_v42 = vadd.f32 %v10082_v47, %v9981_v37  ;;  %v10104_v55 = vadd.f32 %v10098_v33, %v9981_v37  ;;  %v9986_v41 = vadd.f32 %v17523_v51, %v9943_v59  ;;  %v9941_v34 = vadd.f32 %v9846_v15, %v9604_v49  ;;  %v10871_v48 = vld [vmem:[%s12917_s23 + $0xb8] sm:$0xff]  ;;  %v10870_v59 = vld [vmem:[%s12917_s23 + $0xb0] sm:$0xff] }
 0x4e7   : > { %10853 = vst.msk [vmem:[%s17538_s18 + $0x6a] sm:$0xc0] %vm10065_vm15, %v10121_v62  ;;  %v12353_v28 = vpop.f32.mrf.mxu1  ;;  %v9605_v33 = vadd.f32 %v17531_v16, %v17446_v13  ;;  %v10140_v16 = vrot.slane %v10861_v0, 6  ;;  %v10158_v62 = vsel %vm10035_vm3, %v10156_v9, %v10157_v63  ;;  %v10173_v17 = vrot.slane %v10870_v59, 2  ;;  %v10880_v0 = vld [vmem:[%s12917_s23 + $0xd8] sm:$0xff] }
 0x4e8   : > { %10845 = vst.msk [vmem:[%s17538_s18 + $0x5e] sm:$0x3] %vm18708_vm1, %v10089_v42  ;;  %v10130_v14 = vadd.f32 %v10856_v25, %v9986_v41  ;;  %v9984_v8 = vadd.f32 %v17523_v51, %v9941_v34  ;;  %v9944_v47 = vadd.f32 %v12353_v28, %v9607_v12  ;;  %v12313_v25 = vpop.f32.mrf.mxu0  ;;  %v10174_v42 = vrot.slane %v10871_v48, 2  ;;  %v18713_v48 = vld [vmem:[#allocation72_spill] sm:$0xff] }
 0x4e9   : > { %10848 = vst.msk [vmem:[%s17538_s18 + $0x5c] sm:$0xf0] %vm10046_vm6, %v10104_v55  ;;  %v9849_v2 = vpop.f32.mrf.mxu1  ;;  %v10141_v15 = vsel %vm6282_vm14, %v10139_v38, %v10140_v16 }
 0x4ea   : > { %10858 = vst.msk [vmem:[%s17538_s18 + $0x80] sm:$0xff] %vm10008_vm9, %v10130_v14  ;;  %v10122_v23 = vadd.f32 %v10117_v40, %v9984_v8  ;;  %v9987_v43 = vadd.f32 %v17523_v51, %v9944_v47  ;;  %v9942_v35 = vadd.f32 %v9849_v2, %v9605_v33  ;;  %v9612_v40 = vadd.f32 %v17635_v45, %v17470_v5  ;;  %v17724_v33 = vld [vmem:[%s12917_s23 + $0xd0] sm:$0xff]  ;;  %v9560_v31 = vpop.f32.mrf.mxu0 }
 0x4eb   : > { %v12356_v13 = vpop.f32.mrf.mxu1  ;;  %v9615_v47 = vadd.f32 %v17649_v60, %v17475_v21  ;;  %v9618_v21 = vadd.f32 %v12312_v7, %v17483_v32  ;;  %v10197_v60 = vrot.slane %v17724_v33, 6 }
 0x4ec   : > { %10854 = vst.msk [vmem:[%s17538_s18 + $0x72] sm:$0xff] %vm10008_vm9, %v10122_v23  ;;  %v10131_v56 = vadd.f32 %v10857_v4, %v9987_v43  ;;  %v9985_v39 = vadd.f32 %v17523_v51, %v9942_v35  ;;  %v9947_v11 = vadd.f32 %v12356_v13, %v9610_v46  ;;  %v9613_v23 = vadd.f32 %v17664_v3, %v17478_v54  ;;  %v10875_v43 = vld [vmem:[%s12917_s23 + $0xc0] sm:$0xff] }
 0x4ed   : > { %v9862_v19 = vpop.f32.mrf.mxu1  ;;  %v10198_v46 = vrot.slane %v10880_v0, 6 }
 0x4ee   : > { %10859 = vst.msk [vmem:[%s17538_s18 + $0x88] sm:$0xff] %vm10008_vm9, %v10131_v56  ;;  %v10123_v44 = vadd.f32 %v10116_v52, %v9985_v39  ;;  %v9990_v26 = vadd.f32 %v17523_v51, %v9947_v11  ;;  %v9945_v53 = vadd.f32 %v9862_v19, %v9608_v57  ;;  %v10175_v56 = vsel %vm18710_vm7, %v10173_v17, %v10174_v42  ;;  %v10884_v11 = vld [vmem:[%s12917_s23 + $0xe0] sm:$0xff] }
 0x4ef   : > { %v12357_v29 = vpop.f32.mrf.mxu1  ;;  %v9616_v39 = vadd.f32 %v9557_v36, %v17486_v61  ;;  %v10199_v57 = vsel %vm6282_vm14, %v10197_v60, %v10198_v46  ;;  %v10214_v61 = vrot.slane %v10884_v11, 4  ;;  %vm18716_vm14 = vmmov %vm18647_vm0 }
 0x4f0   : > { %10855 = vst.msk [vmem:[%s17538_s18 + $0x7a] sm:$0x3f] %vm10068_vm5, %v10123_v44  ;;  %v10147_v24 = vadd.f32 %v10140_v16, %v9990_v26  ;;  %v10162_v20 = vadd.f32 %v10156_v9, %v9990_v26  ;;  %v9988_v49 = vadd.f32 %v17523_v51, %v9945_v53  ;;  %v9948_v52 = vadd.f32 %v12357_v29, %v9611_v1  ;;  %v12316_v9 = vpop.f32.mrf.mxu0  ;;  %v18712_v26 = vld [vmem:[#allocation74_spill] sm:$0xff]  ;;  %v10890_v29 = vld [vmem:[%s12917_s23 + $0xf8] sm:$0xff]  ;;  %vm18717_vm0 = vmmov %vm18708_vm1 }
 0x4f1   : > { %v9865_v37 = vpop.f32.mrf.mxu1  ;;  %v9619_v53 = vadd.f32 %v12313_v25, %v18712_v26  ;;  %v10889_v1 = vld [vmem:[%s12917_s23 + $0xf0] sm:$0xff] }
 0x4f2   : > { %10864 = vst.msk [vmem:[%s17538_s18 + $0x9e] sm:$0x3] %vm18709_vm2, %v10147_v24  ;;  %v10145_v6 = vadd.f32 %v10139_v38, %v9988_v49  ;;  %v9991_v22 = vadd.f32 %v17523_v51, %v9948_v52  ;;  %v9946_v10 = vadd.f32 %v9865_v37, %v9609_v18  ;;  %v9573_v18 = vpop.f32.mrf.mxu0  ;;  %v10876_v24 = vld [vmem:[%s12917_s23 + $0xc8] sm:$0xff] }
 0x4f3   : > { %10867 = vst.msk [vmem:[%s17538_s18 + $0x9c] sm:$0xf0] %vm10046_vm6, %v10162_v20  ;;  %v12360_v12 = vpop.f32.mrf.mxu1  ;;  %v10885_v37 = vld [vmem:[%s12917_s23 + $0xe8] sm:$0xff] }
 0x4f4   : > { %10862 = vst.msk [vmem:[%s17538_s18 + $0x8e] sm:$0xfc] %vm10026_vm4, %v10145_v6  ;;  %v10163_v55 = vadd.f32 %v10158_v62, %v9991_v22  ;;  %v9989_v41 = vadd.f32 %v17523_v51, %v9946_v10  ;;  %v9951_v34 = vadd.f32 %v12360_v12, %v9614_v27  ;;  %v9617_v62 = vadd.f32 %v9560_v31, %v18713_v48 }
 0x4f5   : > { %v9878_v28 = vpop.f32.mrf.mxu1  ;;  %v10231_v22 = vrot.slane %v10889_v1, 2  ;;  %v10232_v10 = vrot.slane %v10890_v29, 2 }
 0x4f6   : > { %10868 = vst.msk [vmem:[%s17538_s18 + $0xa4] sm:$0xff] %vm10008_vm9, %v10163_v55  ;;  %v10146_v58 = vadd.f32 %v10141_v15, %v9989_v41  ;;  %v9994_v14 = vadd.f32 %v17523_v51, %v9951_v34  ;;  %v9949_v8 = vadd.f32 %v9878_v28, %v9612_v40  ;;  %v18714_v15 = vld [vmem:[#allocation62_spill] sm:$0xff]  ;;  %v18715_v41 = vld [vmem:[#allocation76_spill] sm:$0xff]  ;;  %v10215_v40 = vrot.slane %v10885_v37, 4 }
 0x4f7   : > { %v12361_v4 = vpop.f32.mrf.mxu1  ;;  %v9622_v12 = vadd.f32 %v12316_v9, %v18714_v15  ;;  %v9620_v34 = vadd.f32 %v9573_v18, %v18715_v41 }
 0x4f8   : > { %10863 = vst.msk [vmem:[%s17538_s18 + $0x96] sm:$0xff] %vm10008_vm9, %v10146_v58  ;;  %v10181_v5 = vadd.f32 %v10174_v42, %v9994_v14  ;;  %v9992_v45 = vadd.f32 %v17523_v51, %v9949_v8  ;;  %v9952_v2 = vadd.f32 %v12361_v4, %v9615_v47  ;;  %v12317_v42 = vpop.f32.mrf.mxu0  ;;  %v10233_v8 = vsel %vm18716_vm14, %v10231_v22, %v10232_v10  ;;  %v18718_v4 = vld [vmem:[#allocation75_spill] sm:$0xff] }
 0x4f9   : > { %v9881_v35 = vpop.f32.mrf.mxu1 }
 0x4fa   : > { %10874 = vst.msk [vmem:[%s17538_s18 + $0xba] sm:$0x3f] %vm10068_vm5, %v10181_v5  ;;  %v10164_v30 = vadd.f32 %v10157_v63, %v9992_v45  ;;  %v10179_v50 = vadd.f32 %v10173_v17, %v9992_v45  ;;  %v9995_v13 = vadd.f32 %v17523_v51, %v9952_v2  ;;  %v9950_v16 = vadd.f32 %v9881_v35, %v9613_v23  ;;  %v9576_v45 = vpop.f32.mrf.mxu0 }
 0x4fb   : > { %v12364_v54 = vpop.f32.mrf.mxu1  ;;  %v9623_v5 = vadd.f32 %v12317_v42, %v18718_v4  ;;  %v10216_v2 = vsel %vm10035_vm3, %v10214_v61, %v10215_v40 }
 0x4fc   : > { %10869 = vst.msk [vmem:[%s17538_s18 + $0xac] sm:$0xf] %vm18711_vm11, %v10164_v30  ;;  %v10188_v32 = vadd.f32 %v10875_v43, %v9995_v13  ;;  %v9993_v3 = vadd.f32 %v17523_v51, %v9950_v16  ;;  %v9955_v7 = vadd.f32 %v12364_v54, %v9618_v21 }
 0x4fd   : > { %10872 = vst.msk [vmem:[%s17538_s18 + $0xaa] sm:$0xc0] %vm10065_vm15, %v10179_v50  ;;  %v9894_v19 = vpop.f32.mrf.mxu1 }
 0x4fe   : > { %10877 = vst.msk [vmem:[%s17538_s18 + $0xc0] sm:$0xff] %vm10008_vm9, %v10188_v32  ;;  %v10180_v38 = vadd.f32 %v10175_v56, %v9993_v3  ;;  %v9998_v63 = vadd.f32 %v17523_v51, %v9955_v7  ;;  %v9953_v44 = vadd.f32 %v9894_v19, %v9616_v39 }
 0x4ff   : > { %v12365_v20 = vpop.f32.mrf.mxu1 }
 0x500   : > { %10873 = vst.msk [vmem:[%s17538_s18 + $0xb2] sm:$0xff] %vm10008_vm9, %v10180_v38  ;;  %v10204_v36 = vadd.f32 %v10199_v57, %v9998_v63  ;;  %v9996_v49 = vadd.f32 %v17523_v51, %v9953_v44  ;;  %v9956_v52 = vadd.f32 %v12365_v20, %v9619_v53 }
 0x501   : > { %v9897_v6 = vpop.f32.mrf.mxu1 }
 0x502   : > { %10882 = vst.msk [vmem:[%s17538_s18 + $0xd6] sm:$0xff] %vm10008_vm9, %v10204_v36  ;;  %v10189_v27 = vadd.f32 %v10876_v24, %v9996_v49  ;;  %v9999_v59 = vadd.f32 %v17523_v51, %v9956_v52  ;;  %v9954_v25 = vadd.f32 %v9897_v6, %v9617_v62 }
 0x503   : > { %v12368_v55 = vpop.f32.mrf.mxu1 }
 0x504   : > { %10878 = vst.msk [vmem:[%s17538_s18 + $0xc8] sm:$0xff] %vm10008_vm9, %v10189_v27  ;;  %v10205_v28 = vadd.f32 %v10198_v46, %v9999_v59  ;;  %v10220_v17 = vadd.f32 %v10214_v61, %v9999_v59  ;;  %v9997_v58 = vadd.f32 %v17523_v51, %v9954_v25  ;;  %v9959_v14 = vadd.f32 %v12368_v55, %v9622_v12 }
 0x505   : > { %v9910_v47 = vpop.f32.mrf.mxu1 }
 0x506   : > { %10883 = vst.msk [vmem:[%s17538_s18 + $0xde] sm:$0x3] %vm18717_vm0, %v10205_v28  ;;  %v10203_v33 = vadd.f32 %v10197_v60, %v9997_v58  ;;  %v10002_v0 = vadd.f32 %v17523_v51, %v9959_v14  ;;  %v9957_v31 = vadd.f32 %v9910_v47, %v9620_v34  ;;  %v18719_v60 = vld [vmem:[#allocation65_spill] sm:$0xff] }
 0x507   : > { %10886 = vst.msk [vmem:[%s17538_s18 + $0xdc] sm:$0xf0] %vm10046_vm6, %v10220_v17  ;;  %v12369_v23 = vpop.f32.mrf.mxu1  ;;  %v9621_v46 = vadd.f32 %v9576_v45, %v18719_v60 }
 0x508   : > { %10881 = vst.msk [vmem:[%s17538_s18 + $0xce] sm:$0xfc] %vm10026_vm4, %v10203_v33  ;;  %v10238_v43 = vadd.f32 %v10233_v8, %v10002_v0  ;;  %v10000_v35 = vadd.f32 %v17523_v51, %v9957_v31  ;;  %v9960_v21 = vadd.f32 %v12369_v23, %v9623_v5  ;;  %vm18720_vm4 = vmmov %vm18704_vm8 }
 0x509   : > { %v9913_v30 = vpop.f32.mrf.mxu1 }
 0x50a   : > { %10892 = vst.msk [vmem:[%s17538_s18 + $0xf2] sm:$0xff] %vm10008_vm9, %v10238_v43  ;;  %v10221_v50 = vadd.f32 %v10216_v2, %v10000_v35  ;;  %v10003_v13 = vadd.f32 %v17523_v51, %v9960_v21  ;;  %v9958_v16 = vadd.f32 %v9913_v30, %v9621_v46 }
 0x50c   : > { %10887 = vst.msk [vmem:[%s17538_s18 + $0xe4] sm:$0xff] %vm10008_vm9, %v10221_v50  ;;  %v10239_v9 = vadd.f32 %v10232_v10, %v10003_v13  ;;  %v10001_v56 = vadd.f32 %v17523_v51, %v9958_v16 }
 0x50e   : > { %10893 = vst.msk [vmem:[%s17538_s18 + $0xfa] sm:$0x3f] %vm10068_vm5, %v10239_v9  ;;  %v10222_v54 = vadd.f32 %v10215_v40, %v10001_v56  ;;  %v10237_v32 = vadd.f32 %v10231_v22, %v10001_v56 }
 0x510   : > { %10888 = vst.msk [vmem:[%s17538_s18 + $0xec] sm:$0xf] %vm18720_vm4, %v10222_v54 }
 0x511   : > { %10891 = vst.msk [vmem:[%s17538_s18 + $0xea] sm:$0xc0] %vm10065_vm15, %v10237_v32 }
 0x512 PF: > { %s20_s30 = sadd.s32 1, %s12793_s30  }
 0x513   : > { %p17_p1 = scmp.ge.s32.totalorder %s20_s30, 4  }
 0x515   :  { %19 = sbr.rel (!%p17_p1) target bundleno = 1 (0x1), region = 137 }
 0x51a   :  { %10265 = vsyncpa [#allocation4], 1 }
 0x51b   :  { %10267 = vsyncpa [#allocation4 + $0x1], 1 }

</bundles_post_ra>
